<compile_context>
chip_gen: v7x
topology: tpu7x:2x2x1
jax: 0.10.0
libtpu: 0.0.40
codegen_flags: <defaults>
</compile_context>

<pallas_src>
import jax
import jax.numpy as jnp
from jax.experimental import pallas as pl
from jax.experimental.pallas import tpu as pltpu

IN_FEATURES = 3 * 96 * 96          # 27648
H1, H2, H3, OUT = 1024, 512, 256, 10
TK = 3456                          # 27648 / 3456 = 8 reduction steps


def _fused_mlp_kernel(x_ref, w1_ref, b1_ref, w2_ref, b2_ref,
                      w3_ref, b3_ref, w4_ref, b4_ref, o_ref, acc_ref):
    """Grid axis 0 walks the fc1 reduction (K) dimension.

    Every step:   acc += x_tile(bf16) @ w1_tile(bf16)   (f32 accumulation)
    Last step:    bias+ReLU, then fc2/fc3/fc4 (+ReLUs) on the VMEM-resident
                  small weights, write the (B, 10) logits.
    """
    k = pl.program_id(0)

    @pl.when(k == 0)
    def _():
        acc_ref[...] = jnp.zeros_like(acc_ref)

    acc_ref[...] += jnp.dot(
        x_ref[...].astype(jnp.bfloat16), w1_ref[...],
        preferred_element_type=jnp.float32)

    @pl.when(k == pl.num_programs(0) - 1)
    def _():
        # fc1 bias + ReLU
        h = jnp.maximum(acc_ref[...] + b1_ref[...], 0.0)            # (B, 1024)
        # fc2 + ReLU
        h = jnp.dot(h.astype(jnp.bfloat16), w2_ref[...],
                    preferred_element_type=jnp.float32) + b2_ref[...]
        h = jnp.maximum(h, 0.0)                                      # (B, 512)
        # fc3 + ReLU
        h = jnp.dot(h.astype(jnp.bfloat16), w3_ref[...],
                    preferred_element_type=jnp.float32) + b3_ref[...]
        h = jnp.maximum(h, 0.0)                                      # (B, 256)
        # fc4 (no ReLU)
        y = jnp.dot(h.astype(jnp.bfloat16), w4_ref[...],
                    preferred_element_type=jnp.float32) + b4_ref[...]
        o_ref[...] = y.astype(o_ref.dtype)                           # (B, 10)


def mlp_forward(x_nchw, params):
    """Forward pass of the 4-layer MLP with a single fused pallas_call."""
    B = x_nchw.shape[0]
    x = x_nchw.reshape(B, -1)                     # torch.flatten(x, 1)
    (w1, b1), (w2, b2), (w3, b3), (w4, b4) = params
    K = x.shape[1]
    assert K == IN_FEATURES and K % TK == 0
    grid = (K // TK,)

    # Advisory cost estimate: this call is memory-heavy (weight stream).
    flops = 2 * B * (IN_FEATURES * H1 + H1 * H2 + H2 * H3 + H3 * OUT)
    bytes_accessed = (
        B * IN_FEATURES * 4                                   # x (f32)
        + sum(int(w.size) * w.dtype.itemsize
              + int(b.size) * b.dtype.itemsize
              for (w, b) in params)                           # weights/biases
        + B * OUT * 4)                                        # output
    cost = pl.CostEstimate(flops=flops, transcendentals=0,
                           bytes_accessed=bytes_accessed)

    return pl.pallas_call(
        _fused_mlp_kernel,
        out_shape=jax.ShapeDtypeStruct((B, OUT), jnp.float32),
        grid_spec=pltpu.PrefetchScalarGridSpec(
            num_scalar_prefetch=0,
            grid=grid,
            in_specs=[
                pl.BlockSpec((B, TK), lambda k: (0, k)),      # activations
                pl.BlockSpec((TK, H1), lambda k: (k, 0)),     # fc1 weight (streamed)
                pl.BlockSpec((1, H1), lambda k: (0, 0)),      # fc1 bias   (resident)
                pl.BlockSpec((H1, H2), lambda k: (0, 0)),     # fc2 weight (resident)
                pl.BlockSpec((1, H2), lambda k: (0, 0)),      # fc2 bias
                pl.BlockSpec((H2, H3), lambda k: (0, 0)),     # fc3 weight (resident)
                pl.BlockSpec((1, H3), lambda k: (0, 0)),      # fc3 bias
                pl.BlockSpec((H3, OUT), lambda k: (0, 0)),    # fc4 weight (resident)
                pl.BlockSpec((1, OUT), lambda k: (0, 0)),     # fc4 bias
            ],
            out_specs=pl.BlockSpec((B, OUT), lambda k: (0, 0)),
            scratch_shapes=[pltpu.VMEM((B, H1), jnp.float32)],  # fc1 accumulator
        ),
        compiler_params=pltpu.CompilerParams(
            dimension_semantics=("arbitrary",),               # reduction axis
            vmem_limit_bytes=32 * 1024 * 1024,
        ),
        cost_estimate=cost,
    )(x, w1, b1, w2, b2, w3, b3, w4, b4)


def init_params(key):
    """Deterministic params matching nn.Linear shapes (stored as (in, out)).

    Weights are stored in bfloat16 (bandwidth-bound network); biases stay f32.
    """
    dims = [(IN_FEATURES, H1), (H1, H2), (H2, H3), (H3, OUT)]
    params = []
    for i, (fan_in, fan_out) in enumerate(dims):
        kw, kb = jax.random.split(jax.random.fold_in(key, i))
        bound = 1.0 / jnp.sqrt(fan_in)
        w = jax.random.uniform(kw, (fan_in, fan_out), jnp.float32, -bound, bound)
        b = jax.random.uniform(kb, (1, fan_out), jnp.float32, -bound, bound)
        params.append((w.astype(jnp.bfloat16), b))
    return params


def mlp_reference(x_nchw, params):
    """Plain-JAX reference using the same (bf16-stored) weights."""
    B = x_nchw.shape[0]
    x = x_nchw.reshape(B, -1)
    for i, (w, b) in enumerate(params):
        x = x @ w.astype(jnp.float32) + b
        if i < 3:
            x = jnp.maximum(x, 0.0)
    return x


if __name__ == "__main__":
    key = jax.random.PRNGKey(0)
    params = init_params(jax.random.fold_in(key, 100))

    # Small batch; feature dims are fixed by the module (3 x 96 x 96 input).
    x = jax.random.normal(jax.random.fold_in(key, 200), (2, 3, 96, 96),
                          jnp.float32)

    fwd = jax.jit(mlp_forward)
    out = fwd(x, params)
    out = jax.block_until_ready(out)

    ref = mlp_reference(x, params)
    assert out.shape == (2, 10)
    # bf16 weight streaming + bf16 MXU inputs (f32 accumulation): loose-ish
    # tolerance vs the f32 reference built from the same bf16 weight values.
    assert jnp.allclose(out, ref, atol=3e-2, rtol=3e-2), (
        float(jnp.max(jnp.abs(out - ref))))

    print("KERNEL_OK")
</pallas_src>

<mosaic_0001>
module attributes {stable_mosaic.version = 11 : i64} {
  func.func @_fused_mlp_kernel(%arg0: i32, %arg1: memref<2x3456xf32, #tpu.memory_space<vmem>>, %arg2: memref<3456x1024xbf16, #tpu.memory_space<vmem>>, %arg3: memref<1x1024xf32, #tpu.memory_space<vmem>>, %arg4: memref<1024x512xbf16, #tpu.memory_space<vmem>>, %arg5: memref<1x512xf32, #tpu.memory_space<vmem>>, %arg6: memref<512x256xbf16, #tpu.memory_space<vmem>>, %arg7: memref<1x256xf32, #tpu.memory_space<vmem>>, %arg8: memref<256x10xbf16, #tpu.memory_space<vmem>>, %arg9: memref<1x10xf32, #tpu.memory_space<vmem>>, %arg10: memref<2x10xf32, #tpu.memory_space<vmem>>, %arg11: memref<2x1024xf32, #tpu.memory_space<vmem>>) attributes {dimension_semantics = [#tpu.dimension_semantics<arbitrary>], iteration_bounds = array<i64: 8>, scalar_prefetch = 0 : i64, scratch_operands = 1 : i64, tpu.core_type = #tpu.core_type<tc>, window_params = [{transform_indices = @transform_0, window_bounds = array<i64: 2, 3456>}, {transform_indices = @transform_1, window_bounds = array<i64: 3456, 1024>}, {pipeline_mode = #tpu.pipeline_mode<synchronous>, transform_indices = @transform_2, window_bounds = array<i64: 1, 1024>}, {pipeline_mode = #tpu.pipeline_mode<synchronous>, transform_indices = @transform_3, window_bounds = array<i64: 1024, 512>}, {pipeline_mode = #tpu.pipeline_mode<synchronous>, transform_indices = @transform_4, window_bounds = array<i64: 1, 512>}, {pipeline_mode = #tpu.pipeline_mode<synchronous>, transform_indices = @transform_5, window_bounds = array<i64: 512, 256>}, {pipeline_mode = #tpu.pipeline_mode<synchronous>, transform_indices = @transform_6, window_bounds = array<i64: 1, 256>}, {pipeline_mode = #tpu.pipeline_mode<synchronous>, transform_indices = @transform_7, window_bounds = array<i64: 256, 10>}, {pipeline_mode = #tpu.pipeline_mode<synchronous>, transform_indices = @transform_8, window_bounds = array<i64: 1, 10>}, {pipeline_mode = #tpu.pipeline_mode<synchronous>, transform_indices = @transform_9, window_bounds = array<i64: 2, 10>}]} {
    %c0_i32 = arith.constant 0 : i32
    %0 = arith.cmpi eq, %arg0, %c0_i32 : i32
    %1 = arith.extui %0 : i1 to i32
    %c0_i32_0 = arith.constant 0 : i32
    %2 = arith.cmpi ne, %1, %c0_i32_0 : i32
    scf.if %2 {
      %cst_9 = arith.constant 0.000000e+00 : f32
      %13 = vector.broadcast %cst_9 : f32 to vector<2x1024xf32>
      %c0_10 = arith.constant 0 : index
      %c0_11 = arith.constant 0 : index
      %14 = vector.load %arg11[%c0_10, %c0_11] : memref<2x1024xf32, #tpu.memory_space<vmem>>, vector<2x1024xf32>
      tpu.vector_store %arg11[%c0_10, %c0_11], %13 {strides = array<i32>} : memref<2x1024xf32, #tpu.memory_space<vmem>>, vector<2x1024xf32>,
    } else {
    }
    %c0 = arith.constant 0 : index
    %c0_1 = arith.constant 0 : index
    %3 = vector.load %arg11[%c0, %c0_1] : memref<2x1024xf32, #tpu.memory_space<vmem>>, vector<2x1024xf32>
    %c0_2 = arith.constant 0 : index
    %c0_3 = arith.constant 0 : index
    %4 = vector.load %arg1[%c0_2, %c0_3] : memref<2x3456xf32, #tpu.memory_space<vmem>>, vector<2x3456xf32>
    %5 = arith.truncf %4 : vector<2x3456xf32> to vector<2x3456xbf16>
    %c0_4 = arith.constant 0 : index
    %c0_5 = arith.constant 0 : index
    %6 = vector.load %arg2[%c0_4, %c0_5] : memref<3456x1024xbf16, #tpu.memory_space<vmem>>, vector<3456x1024xbf16>
    %cst = arith.constant dense<0.000000e+00> : vector<2x1024xf32>
    %7 = tpu.matmul %5, %6, %cst {dimension_numbers = #tpu.dot_dimension_numbers<[1], [0], [0], [1], [0, 0, 1, 1], [], []>} : vector<2x3456xbf16>, vector<3456x1024xbf16>, vector<2x1024xf32> -> vector<2x1024xf32>
    %8 = arith.addf %3, %7 : vector<2x1024xf32>
    %c0_6 = arith.constant 0 : index
    %c0_7 = arith.constant 0 : index
    %9 = vector.load %arg11[%c0_6, %c0_7] : memref<2x1024xf32, #tpu.memory_space<vmem>>, vector<2x1024xf32>
    tpu.vector_store %arg11[%c0_6, %c0_7], %8 {strides = array<i32>} : memref<2x1024xf32, #tpu.memory_space<vmem>>, vector<2x1024xf32>,
    %c7_i32 = arith.constant 7 : i32
    %10 = arith.cmpi eq, %arg0, %c7_i32 : i32
    %11 = arith.extui %10 : i1 to i32
    %c0_i32_8 = arith.constant 0 : i32
    %12 = arith.cmpi ne, %11, %c0_i32_8 : i32
    scf.if %12 {
      %c0_9 = arith.constant 0 : index
      %c0_10 = arith.constant 0 : index
      %13 = vector.load %arg11[%c0_9, %c0_10] : memref<2x1024xf32, #tpu.memory_space<vmem>>, vector<2x1024xf32>
      %c0_11 = arith.constant 0 : index
      %c0_12 = arith.constant 0 : index
      %14 = vector.load %arg3[%c0_11, %c0_12] : memref<1x1024xf32, #tpu.memory_space<vmem>>, vector<1x1024xf32>
      %15 = vector.broadcast %14 : vector<1x1024xf32> to vector<2x1024xf32>
      %16 = arith.addf %13, %15 : vector<2x1024xf32>
      %cst_13 = arith.constant 0.000000e+00 : f32
      %17 = vector.broadcast %cst_13 : f32 to vector<2x1024xf32>
      %18 = arith.maximumf %16, %17 : vector<2x1024xf32>
      %19 = arith.truncf %18 : vector<2x1024xf32> to vector<2x1024xbf16>
      %c0_14 = arith.constant 0 : index
      %c0_15 = arith.constant 0 : index
      %20 = vector.load %arg4[%c0_14, %c0_15] : memref<1024x512xbf16, #tpu.memory_space<vmem>>, vector<1024x512xbf16>
      %cst_16 = arith.constant dense<0.000000e+00> : vector<2x512xf32>
      %21 = tpu.matmul %19, %20, %cst_16 {dimension_numbers = #tpu.dot_dimension_numbers<[1], [0], [0], [1], [0, 0, 1, 1], [], []>} : vector<2x1024xbf16>, vector<1024x512xbf16>, vector<2x512xf32> -> vector<2x512xf32>
      %c0_17 = arith.constant 0 : index
      %c0_18 = arith.constant 0 : index
      %22 = vector.load %arg5[%c0_17, %c0_18] : memref<1x512xf32, #tpu.memory_space<vmem>>, vector<1x512xf32>
      %23 = vector.broadcast %22 : vector<1x512xf32> to vector<2x512xf32>
      %24 = arith.addf %21, %23 : vector<2x512xf32>
      %cst_19 = arith.constant 0.000000e+00 : f32
      %25 = vector.broadcast %cst_19 : f32 to vector<2x512xf32>
      %26 = arith.maximumf %24, %25 : vector<2x512xf32>
      %27 = arith.truncf %26 : vector<2x512xf32> to vector<2x512xbf16>
      %c0_20 = arith.constant 0 : index
      %c0_21 = arith.constant 0 : index
      %28 = vector.load %arg6[%c0_20, %c0_21] : memref<512x256xbf16, #tpu.memory_space<vmem>>, vector<512x256xbf16>
      %cst_22 = arith.constant dense<0.000000e+00> : vector<2x256xf32>
      %29 = tpu.matmul %27, %28, %cst_22 {dimension_numbers = #tpu.dot_dimension_numbers<[1], [0], [0], [1], [0, 0, 1, 1], [], []>} : vector<2x512xbf16>, vector<512x256xbf16>, vector<2x256xf32> -> vector<2x256xf32>
      %c0_23 = arith.constant 0 : index
      %c0_24 = arith.constant 0 : index
      %30 = vector.load %arg7[%c0_23, %c0_24] : memref<1x256xf32, #tpu.memory_space<vmem>>, vector<1x256xf32>
      %31 = vector.broadcast %30 : vector<1x256xf32> to vector<2x256xf32>
      %32 = arith.addf %29, %31 : vector<2x256xf32>
      %cst_25 = arith.constant 0.000000e+00 : f32
      %33 = vector.broadcast %cst_25 : f32 to vector<2x256xf32>
      %34 = arith.maximumf %32, %33 : vector<2x256xf32>
      %35 = arith.truncf %34 : vector<2x256xf32> to vector<2x256xbf16>
      %c0_26 = arith.constant 0 : index
      %c0_27 = arith.constant 0 : index
      %36 = vector.load %arg8[%c0_26, %c0_27] : memref<256x10xbf16, #tpu.memory_space<vmem>>, vector<256x10xbf16>
      %cst_28 = arith.constant dense<0.000000e+00> : vector<2x10xf32>
      %37 = tpu.matmul %35, %36, %cst_28 {dimension_numbers = #tpu.dot_dimension_numbers<[1], [0], [0], [1], [0, 0, 1, 1], [], []>} : vector<2x256xbf16>, vector<256x10xbf16>, vector<2x10xf32> -> vector<2x10xf32>
      %c0_29 = arith.constant 0 : index
      %c0_30 = arith.constant 0 : index
      %38 = vector.load %arg9[%c0_29, %c0_30] : memref<1x10xf32, #tpu.memory_space<vmem>>, vector<1x10xf32>
      %39 = vector.broadcast %38 : vector<1x10xf32> to vector<2x10xf32>
      %40 = arith.addf %37, %39 : vector<2x10xf32>
      %c0_31 = arith.constant 0 : index
      %c0_32 = arith.constant 0 : index
      %41 = vector.load %arg10[%c0_31, %c0_32] : memref<2x10xf32, #tpu.memory_space<vmem>>, vector<2x10xf32>
      tpu.vector_store %arg10[%c0_31, %c0_32], %40 {strides = array<i32>} : memref<2x10xf32, #tpu.memory_space<vmem>>, vector<2x10xf32>,
    } else {
    }
    return
  }
  func.func @transform_0(%arg0: i32) -> (i32, i32) {
    %c0_i32 = arith.constant 0 : i32
    %c0_i32_0 = arith.constant 0 : i32
    return %c0_i32, %arg0 : i32, i32
  }
  func.func @transform_1(%arg0: i32) -> (i32, i32) {
    %c0_i32 = arith.constant 0 : i32
    %c0_i32_0 = arith.constant 0 : i32
    return %arg0, %c0_i32 : i32, i32
  }
  func.func @transform_2(%arg0: i32) -> (i32, i32) {
    %c0_i32 = arith.constant 0 : i32
    %c0_i32_0 = arith.constant 0 : i32
    %c0_i32_1 = arith.constant 0 : i32
    return %c0_i32, %c0_i32_0 : i32, i32
  }
  func.func @transform_3(%arg0: i32) -> (i32, i32) {
    %c0_i32 = arith.constant 0 : i32
    %c0_i32_0 = arith.constant 0 : i32
    %c0_i32_1 = arith.constant 0 : i32
    return %c0_i32, %c0_i32_0 : i32, i32
  }
  func.func @transform_4(%arg0: i32) -> (i32, i32) {
    %c0_i32 = arith.constant 0 : i32
    %c0_i32_0 = arith.constant 0 : i32
    %c0_i32_1 = arith.constant 0 : i32
    return %c0_i32, %c0_i32_0 : i32, i32
  }
  func.func @transform_5(%arg0: i32) -> (i32, i32) {
    %c0_i32 = arith.constant 0 : i32
    %c0_i32_0 = arith.constant 0 : i32
    %c0_i32_1 = arith.constant 0 : i32
    return %c0_i32, %c0_i32_0 : i32, i32
  }
  func.func @transform_6(%arg0: i32) -> (i32, i32) {
    %c0_i32 = arith.constant 0 : i32
    %c0_i32_0 = arith.constant 0 : i32
    %c0_i32_1 = arith.constant 0 : i32
    return %c0_i32, %c0_i32_0 : i32, i32
  }
  func.func @transform_7(%arg0: i32) -> (i32, i32) {
    %c0_i32 = arith.constant 0 : i32
    %c0_i32_0 = arith.constant 0 : i32
    %c0_i32_1 = arith.constant 0 : i32
    return %c0_i32, %c0_i32_0 : i32, i32
  }
  func.func @transform_8(%arg0: i32) -> (i32, i32) {
    %c0_i32 = arith.constant 0 : i32
    %c0_i32_0 = arith.constant 0 : i32
    %c0_i32_1 = arith.constant 0 : i32
    return %c0_i32, %c0_i32_0 : i32, i32
  }
  func.func @transform_9(%arg0: i32) -> (i32, i32) {
    %c0_i32 = arith.constant 0 : i32
    %c0_i32_0 = arith.constant 0 : i32
    %c0_i32_1 = arith.constant 0 : i32
    return %c0_i32, %c0_i32_0 : i32, i32
  }
}

</mosaic_0001>

<bundles_post_ra>
// kernel: mlp_forward.1
= control target key start
LH: loop header
LB: loop body
LE: loop exit
PB: predicated region body
PF: predicated region fallthrough
CT: control target
= control target key end

     0   :  { %s21964_s0 = inlined_call_operand.vmem [shape: f32[2,27648], index: 0, kind: input, shape index: {}]   ;;  %s21965_s1 = inlined_call_operand.hbm [shape: bf16[27648,1024], index: 1, kind: input, shape index: {}]   ;;  %s21966_s2 = inlined_call_operand.hbm [shape: f32[1,1024], index: 2, kind: input, shape index: {}]   ;;  %s21967_s3 = inlined_call_operand.hbm [shape: bf16[1024,512], index: 3, kind: input, shape index: {}]   ;;  %s21968_s4 = inlined_call_operand.hbm [shape: f32[1,512], index: 4, kind: input, shape index: {}]   ;;  %s21969_s5 = inlined_call_operand.hbm [shape: bf16[512,256], index: 5, kind: input, shape index: {}]   ;;  %s21970_s6 = inlined_call_operand.hbm [shape: f32[1,256], index: 6, kind: input, shape index: {}]   ;;  %s21971_s7 = inlined_call_operand.vmem [shape: bf16[256,10], index: 7, kind: input, shape index: {}]   ;;  %s21972_s8 = inlined_call_operand.hbm [shape: f32[1,10], index: 8, kind: input, shape index: {}]   ;;  %s21973_s9 = inlined_call_operand.hbm [shape: f32[2,10], index: 9, kind: output, shape index: {}]  }
   0x1   :  { %21976 = sst [smem:[#allocation21_spill]] %s21966_s2 }
   0x2   :  { %14 = vsyncpa [#allocation4], 0 }
   0x3   :  { %16 = vsyncpa [#allocation4 + $0x1], 0 }
   0x4   :  { %17 = vsyncpa [#allocation7], 0 }
   0x5   :  { %18 = vsyncpa [#allocation10], 0 }
   0x6   :  { %19 = vsyncpa [#allocation13], 0 }
   0x7   :  { %20 = vsyncpa [#allocation5], 0  ;;  %s19479_s30 = smov 0   ;;  %s19481_s10 = smov 0  }
   0x8   :  { %s19483_s11 = smov 0   ;;  %s19485_s12 = smov 0  }
   0x9 LB: > { %s19412_s13 = smov [#allocation6]   ;;  %s19500_s15 = sadd.s32 4294967295, %s19410_s12   ;;  %s19410_s12 = sphi %s19485_s12, %s21995_s12   ;;  %s19406_s11 = sphi %s19483_s11, %s21994_s11   ;;  %s19402_s10 = sphi %s19481_s10, %s21993_s10   ;;  %s19398_s30 = sphi %s19479_s30, %s21992_s30  }
   0xa   : > { %s264_s14 = sshll.u32 %s19412_s13, 4  ;;  %p16161_p0 = scmp.ge.s32.totalorder %s19410_s12, 1  ;;  %s19506_s14 = int_to_ptr.vmem [resolvable:$true] %s264_s14 }
   0xb   : > { %p21974_p1 = scmp.eq.s32.totalorder %s19500_s15, 0  ;;  %p251_p2 = scmp.lt.s32.totalorder %s19410_s12, 9 }
   0xc   : > { %s19413_s17 = smov [#allocation9]   ;;  %s19414_s19 = smov [#allocation12]  }
   0xd   : > { %p19508_p4 = pnand %p16161_p0, %p251_p2  ;;  %s288_s18 = sshll.u32 %s19413_s17, 4  ;;  %s19514_s18 = int_to_ptr.vmem [resolvable:$true] %s288_s18 }
   0xe   : > { %s312_s20 = sshll.u32 %s19414_s19, 4  ;;  %s19415_s22 = smov [#allocation8]   ;;  %s19522_s20 = int_to_ptr.vmem [resolvable:$true] %s312_s20 }
   0xf   : > { %s21977_s16 = scalar_select %p19508_p4, 1, 0 }
  0x10   : > { %p18547_p5 = pneg %p19508_p4  ;;  %s19524_s23 = sshll.u32 %s19415_s22, 4  ;;  %s275_s23 = int_to_ptr.vmem [resolvable:$true] %s19524_s23 }
  0x11   : > { %s21979_s2 = sld [smem:[#allocation21_spill]] }
  0x12   : > { %p19518_p6 = pnand %p18547_p5, %p21974_p1 }
  0x14   : > { %p19534_p8 = pneg %p19518_p6 }
  0x17   : > { %s19136_s26 = scalar_lea.hbm %s21979_s2, 128 }
  0x18   : > { %p19137_p7 = scmp.ne.s32.totalorder %s21979_s2, %s19136_s26  ;;  %p19143_p11 = scmp.lt.u32.totalorder %s19136_s26, %s21979_s2 }
  0x1a   : > { %p19139_p9 = pnand %p19534_p8, %p19137_p7 }
  0x1c   : > { %p19140_p10 = pneg %p19139_p9 }
  0x1e   : > { %p19145_p12 = pnand %p19143_p11, %p19140_p10 }
  0x20   : > { %19148 = shalt.err (!%p19145_p12)
}
  0x21   : > { %s19149_s19 = scalar_lea.vmem %s19506_s14, 128  ;;  %p19157_p5 = scmp.lt.s32.totalorder %s19506_s14, %s19506_s14 }
  0x22   : > { %p19150_p13 = scmp.ne.s32.totalorder %s19506_s14, %s19149_s19  ;;  %p19158_p3 = scmp.lt.s32.totalorder %s19149_s19, %s19149_s19 }
  0x24   : > { %p19152_p0 = pnand %p19150_p13, %p19534_p8  ;;  %p19159_p7 = por %p19158_p3, %p19157_p5 }
  0x26   : > { %p19153_p2 = pneg %p19152_p0 }
  0x28   : > { %p19160_p9 = pnand %p19159_p7, %p19153_p2 }
  0x2a   : > { %19163 = shalt.err (!%p19160_p9)
}
  0x2b   : > { %18550 = dma.hbm_to_vmem [thread:$0]  (!%p19518_p6), %s21979_s2, 128, %s19506_s14, [#allocation7]  }
  0x2c   : > { %s19164_s27 = scalar_lea.hbm %s21968_s4, 64 }
  0x2d   : > { %p19165_p10 = scmp.ne.s32.totalorder %s21968_s4, %s19164_s27  ;;  %p19171_p12 = scmp.lt.u32.totalorder %s19164_s27, %s21968_s4 }
  0x2f   : > { %p19167_p3 = pnand %p19165_p10, %p19534_p8 }
  0x31   : > { %p19168_p11 = pneg %p19167_p3 }
  0x33   : > { %p19173_p13 = pnand %p19171_p12, %p19168_p11 }
  0x35   : > { %19176 = shalt.err (!%p19173_p13)
}
  0x36   : > { %s19177_s14 = scalar_lea.vmem %s19514_s18, 64  ;;  %p19185_p7 = scmp.lt.s32.totalorder %s19514_s18, %s19514_s18 }
  0x37   : > { %p19178_p0 = scmp.ne.s32.totalorder %s19514_s18, %s19177_s14  ;;  %p19186_p9 = scmp.lt.s32.totalorder %s19177_s14, %s19177_s14 }
  0x39   : > { %p19180_p2 = pnand %p19178_p0, %p19534_p8  ;;  %p19187_p10 = por %p19186_p9, %p19185_p7 }
  0x3b   : > { %p19181_p5 = pneg %p19180_p2 }
  0x3d   : > { %p19188_p3 = pnand %p19187_p10, %p19181_p5 }
  0x3f   : > { %19191 = shalt.err (!%p19188_p3)
}
  0x40   : > { %18556 = dma.hbm_to_vmem [thread:$0]  (!%p19518_p6), %s21968_s4, 64, %s19514_s18, [#allocation10]  }
  0x41   : > { %s19192_s27 = scalar_lea.hbm %s21970_s6, 32 }
  0x42   : > { %p19193_p11 = scmp.ne.s32.totalorder %s21970_s6, %s19192_s27  ;;  %p19199_p0 = scmp.lt.u32.totalorder %s19192_s27, %s21970_s6 }
  0x44   : > { %p19195_p12 = pnand %p19193_p11, %p19534_p8 }
  0x46   : > { %p19196_p13 = pneg %p19195_p12 }
  0x48   : > { %p19201_p2 = pnand %p19199_p0, %p19196_p13 }
  0x4a   : > { %19204 = shalt.err (!%p19201_p2)
}
  0x4b   : > { %s19205_s18 = scalar_lea.vmem %s19522_s20, 32  ;;  %p19213_p10 = scmp.lt.s32.totalorder %s19522_s20, %s19522_s20 }
  0x4c   : > { %p19206_p5 = scmp.ne.s32.totalorder %s19522_s20, %s19205_s18  ;;  %p19214_p3 = scmp.lt.s32.totalorder %s19205_s18, %s19205_s18 }
  0x4e   : > { %p19208_p7 = pnand %p19206_p5, %p19534_p8  ;;  %p19215_p11 = por %p19214_p3, %p19213_p10 }
  0x50   : > { %p19209_p9 = pneg %p19208_p7 }
  0x52   : > { %p19216_p12 = pnand %p19215_p11, %p19209_p9 }
  0x54   : > { %19219 = shalt.err (!%p19216_p12)
}
  0x55   : > { %18562 = dma.hbm_to_vmem [thread:$0]  (!%p19518_p6), %s21970_s6, 32, %s19522_s20, [#allocation13]  }
  0x56   : > { %s19220_s26 = scalar_lea.hbm %s21967_s3, 32768 }
  0x57   : > { %p19221_p13 = scmp.ne.s32.totalorder %s21967_s3, %s19220_s26  ;;  %p19227_p5 = scmp.lt.u32.totalorder %s19220_s26, %s21967_s3 }
  0x59   : > { %p19223_p0 = pnand %p19221_p13, %p19534_p8 }
  0x5b   : > { %p19224_p2 = pneg %p19223_p0 }
  0x5d   : > { %p19229_p7 = pnand %p19227_p5, %p19224_p2 }
  0x5f   : > { %19232 = shalt.err (!%p19229_p7)
}
  0x60   : > { %s19233_s19 = scalar_lea.vmem %s275_s23, 32768  ;;  %p19241_p11 = scmp.lt.s32.totalorder %s275_s23, %s275_s23 }
  0x61   : > { %p19234_p9 = scmp.ne.s32.totalorder %s275_s23, %s19233_s19  ;;  %p19242_p12 = scmp.lt.s32.totalorder %s19233_s19, %s19233_s19 }
  0x63   : > { %p19236_p10 = pnand %p19234_p9, %p19534_p8  ;;  %p19243_p1 = por %p19242_p12, %p19241_p11 }
  0x65   : > { %p19237_p3 = pneg %p19236_p10 }
  0x67   : > { %p19244_p4 = pnand %p19243_p1, %p19237_p3 }
  0x69   : > { %19247 = shalt.err (!%p19244_p4)
}
  0x6a   : > { %s19416_s20 = smov 256   ;;  %s19417_s18 = smov 16  }
  0x6b   : > { %18553 = dma.hbm_to_vmem [thread:$0]  (!%p19518_p6), %s21967_s3, 32768, %s275_s23, [#allocation7], %s19416_s20, %s19416_s20, %s19417_s18  }
  0x6c   : > { %s19418_s24 = smov [#allocation11]   ;;  %s19248_s28 = scalar_lea.hbm %s21969_s5, 8192 }
  0x6d   : > { %s298_s25 = sshll.u32 %s19418_s24, 4  ;;  %p19249_p1 = scmp.ne.s32.totalorder %s21969_s5, %s19248_s28  ;;  %s299_s25 = int_to_ptr.vmem [resolvable:$true] %s298_s25 }
  0x6e   : > { %p19255_p0 = scmp.lt.u32.totalorder %s19248_s28, %s21969_s5 }
  0x6f   : > { %p19251_p4 = pnand %p19249_p1, %p19534_p8 }
  0x71   : > { %p19252_p13 = pneg %p19251_p4 }
  0x73   : > { %p19257_p2 = pnand %p19255_p0, %p19252_p13 }
  0x75   : > { %19260 = shalt.err (!%p19257_p2)
}
  0x76   : > { %s19261_s23 = scalar_lea.vmem %s299_s25, 8192  ;;  %p19269_p10 = scmp.lt.s32.totalorder %s299_s25, %s299_s25 }
  0x77   : > { %p19262_p5 = scmp.ne.s32.totalorder %s299_s25, %s19261_s23  ;;  %p19270_p3 = scmp.lt.s32.totalorder %s19261_s23, %s19261_s23 }
  0x79   : > { %p19264_p7 = pnand %p19262_p5, %p19534_p8  ;;  %p19271_p11 = por %p19270_p3, %p19269_p10 }
  0x7b   : > { %p19265_p9 = pneg %p19264_p7 }
  0x7d   : > { %p19272_p12 = pnand %p19271_p11, %p19265_p9 }
  0x7f   : > { %19275 = shalt.err (!%p19272_p12)
}
  0x80   : > { %s19419_s20 = smov 128   ;;  %s19420_s18 = smov 8  }
  0x81   : > { %18559 = dma.hbm_to_vmem [thread:$0]  (!%p19518_p6), %s21969_s5, 8192, %s299_s25, [#allocation10], %s19419_s20, %s19419_s20, %s19420_s18  }
  0x82   : > { %s19421_s22 = smov [#allocation14]   ;;  %s19276_s28 = scalar_lea.hbm %s21972_s8, 16 }
  0x83   : > { %s326_s24 = sshll.u32 %s19421_s22, 4  ;;  %p19277_p1 = scmp.ne.s32.totalorder %s21972_s8, %s19276_s28  ;;  %s327_s24 = int_to_ptr.vmem [resolvable:$true] %s326_s24 }
  0x84   : > { %p19283_p0 = scmp.lt.u32.totalorder %s19276_s28, %s21972_s8 }
  0x85   : > { %p19279_p4 = pnand %p19277_p1, %p19534_p8 }
  0x87   : > { %p19280_p13 = pneg %p19279_p4 }
  0x89   : > { %p19285_p2 = pnand %p19283_p0, %p19280_p13 }
  0x8b   : > { %19288 = shalt.err (!%p19285_p2)
}
  0x8c   : > { %s19289_s25 = scalar_lea.vmem %s327_s24, 16  ;;  %s19296_s20 = scalar_lea.vmem %s327_s24, 32 }
  0x8d   : > { %p19290_p5 = scmp.ne.s32.totalorder %s327_s24, %s19289_s25  ;;  %p19297_p10 = scmp.lt.s32.totalorder %s327_s24, %s327_s24 }
  0x8e   : > { %p19298_p3 = scmp.lt.s32.totalorder %s19296_s20, %s19289_s25 }
  0x8f   : > { %p19292_p7 = pnand %p19290_p5, %p19534_p8 }
  0x90   : > { %p19299_p11 = por %p19298_p3, %p19297_p10 }
  0x91   : > { %p19293_p9 = pneg %p19292_p7 }
  0x93   : > { %p19300_p12 = pnand %p19299_p11, %p19293_p9 }
  0x95   : > { %19303 = shalt.err (!%p19300_p12)
}
  0x96   : > { %18565 = dma.hbm_to_vmem [thread:$0]  (!%p19518_p6), %s21972_s8, 16, %s327_s24, [#allocation13]  }
  0x97   : > { %s19657_s29 = sadd.s32 1, %s19410_s12   ;;  %s59_s21 = sadd.s32 1, %s19406_s11 }
  0x98   : > { %s56_s14 = ssub.s32 %s19410_s12, %s19657_s29  ;;  %p66_p8 = scmp.ne.s32.totalorder %s19406_s11, %s19402_s10 }
  0x99   : > { %p57_p1 = scmp.eq.s32.totalorder %s56_s14, 0  ;;  %p67_p4 = scmp.eq.s32.totalorder %s19410_s12, 0 }
  0x9a   : > { %p72_p13 = scmp.ne.s32.totalorder %s19402_s10, %s19398_s30  ;;  %p18576_p0 = scmp.lt.s32.totalorder %s19410_s12, 8 }
  0x9b   : > { %s19669_s22 = scalar_select %p57_p1, %s19406_s11, %s59_s21  }
  0x9c   : > { %p68_p2 = por %p67_p4, %p66_p8  ;;  %p21981_p5 = scmp.eq.s32.totalorder %s19500_s15, 0 }
  0x9d   : > { %s346_s27 = sand.u32 1, %s19406_s11   ;;  %s18252_s24 = smul.u32 221184, %s19410_s12 }
  0x9e   : > { %p19673_p7 = por %p21981_p5, %p72_p13  ;;  %s18515_s28 = smul.u32 13824, %s346_s27 }
  0x9f   : > { %s19682_s19 = scalar_lea.hbm %s21965_s1, %s18252_s24  ;;  %p19684_p6 = pnand %p18576_p0, %p68_p2 }
  0xa0   : > { %s350_s23 = scalar_lea.vmem [#allocation3], %s18515_s28  ;;  %s19690_s12 = scalar_lea.sflag [#allocation4], %s346_s27 }
  0xa1   : > { %s358_s25 = sshll.u32 %s350_s23, 4  ;;  %s19304_s20 = scalar_lea.hbm %s19682_s19, 221184  ;;  %s19688_s25 = int_to_ptr.vmem [resolvable:$true] %s358_s25 }
  0xa2   : > { %p19305_p9 = scmp.ne.s32.totalorder %s19682_s19, %s19304_s20  ;;  %p19306_p10 = pneg %p19684_p6 }
  0xa3   : > { %s19309_s21 = scalar_lea.hbm %s21965_s1, 1769472  ;;  %p19310_p12 = scmp.lt.u32.totalorder %s19682_s19, %s21965_s1 }
  0xa4   : > { %p19307_p3 = pnand %p19306_p10, %p19305_p9  ;;  %p19311_p8 = scmp.lt.u32.totalorder %s19309_s21, %s19304_s20 }
  0xa5   : > { %p19313_p4 = scmp.lt.u32.totalorder %s19304_s20, %s19682_s19 }
  0xa6   : > { %p19308_p11 = pneg %p19307_p3  ;;  %p19312_p1 = por %p19311_p8, %p19310_p12 }
  0xa8   : > { %p19314_p13 = por %p19313_p4, %p19312_p1 }
  0xaa   : > { %p19315_p0 = pnand %p19314_p13, %p19308_p11 }
  0xac   : > { %19318 = shalt.err (!%p19315_p0)
}
  0xad   : > { %s19319_s27 = scalar_lea.vmem %s19688_s25, 221184  ;;  %s19422_s28 = smov [#allocation3]  }
  0xae   : > { %p19320_p2 = scmp.ne.s32.totalorder %s19688_s25, %s19319_s27  ;;  %s19324_s13 = sshll.u32 %s19422_s28, 4  ;;  %s19325_s13 = int_to_ptr.vmem [resolvable:$false] %s19324_s13 }
  0xaf   : > { %s19326_s17 = scalar_lea.vmem %s19325_s13, 442368  ;;  %p19327_p3 = scmp.lt.s32.totalorder %s19688_s25, %s19325_s13 }
  0xb0   : > { %p19322_p5 = pnand %p19320_p2, %p19306_p10  ;;  %p19328_p12 = scmp.lt.s32.totalorder %s19326_s17, %s19319_s27 }
  0xb2   : > { %p19323_p9 = pneg %p19322_p5  ;;  %p19329_p8 = por %p19328_p12, %p19327_p3 }
  0xb4   : > { %p19330_p1 = pnand %p19329_p8, %p19323_p9 }
  0xb6   : > { %19333 = shalt.err (!%p19330_p1)
}
  0xb7   : > { %s19423_s23 = smov 512   ;;  %s19424_s20 = smov 32  }
  0xb8   : > { %18569 = dma.hbm_to_vmem [thread:$0]  (!%p19684_p6), %s19682_s19, 221184, %s19688_s25, %s19690_s12, %s19423_s23, %s19423_s23, %s19424_s20  }
  0xb9   : > { %p21984_p10 = scmp.ne.s32.totalorder %s21977_s16, 0 }
  0xba   : > { %s372_s18 = sand.u32 (!%p21984_p10), 1, %s19402_s10  }
  0xbb   : > { %370 = sbr.rel (%p21984_p10) target bundleno = 3122 (0xc32), region = 56  ;;  %s373_s21 = scalar_lea.sflag (!%p21984_p10), [#allocation4], %s372_s18 }
  0xbc   : > { %s18516_s2 = smul.u32 (!%p21984_p10), 13824, %s372_s18 }
  0xbe   : > { %s19721_s14 = scalar_lea.vmem (!%p21984_p10), [#allocation3], %s18516_s2 }
  0xc2   : > { %19377 = dma.done.wait (%p19673_p7), %s373_s21, 221184  }
  0xc3   : > { %19379 = vsyncadd (%p19673_p7), %s373_s21, 4294746112  ;;  %p21985_p11 = scmp.eq.s32.totalorder %s19500_s15, 0 }
  0xc5   : > { %19381 = dma.done.wait (%p21985_p11), [#allocation7], 32896   ;;  %p21986_p6 = pmov %p21985_p11 }
  0xc7   : > { %19383 = vsyncadd (%p21986_p6), [#allocation7], 4294934400  ;;  %p21987_p4 = pmov %p21986_p6 }
  0xc9   : > { %19385 = dma.done.wait (%p21987_p4), [#allocation10], 8256   ;;  %p21988_p13 = pmov %p21987_p4 }
  0xca   : > { %p21989_p0 = pmov %p21987_p4 }
  0xcb   : > { %19387 = vsyncadd (%p21988_p13), [#allocation10], 4294959040 }
  0xcc   : > { %19389 = dma.done.wait (%p21989_p0), [#allocation13], 48   ;;  %p21990_p2 = pmov %p21989_p0 }
  0xcd   : > { %s435_s16 = smul.u32 27, %s19500_s15  ;;  %p21991_p5 = scmp.ne.s32.totalorder %s19500_s15, 0 }
  0xce   : > { %19391 = vsyncadd (%p21990_p2), [#allocation13], 4294967248  ;;  %v19425_v0 = vmov (!%p21991_p5), 0.0  }
  0xcf   : > { %p436_p7 = scmp.lt.s32.totalorder %s435_s16, 215  ;;  %446 = sbr.rel (%p21991_p5) target bundleno = 214 (0xd6), region = 88  ;;  %447 = vst [vmem:[#allocation2] sm:$0xff] (!%p21991_p5), %v19425_v0  ;;  %448 = vst [vmem:[#allocation2 + $0x8] sm:$0xff] (!%p21991_p5), %v19425_v0 }
  0xd1   : > { %s21997_s16 = smov (!%p436_p7, %s435_s16), 215 }
  0xd2   : > { %s16178_s26 = sshll.u32 %s21997_s16, 1 }
  0xd3   : > { %s19743_s25 = scalar_lea.vmem %s21964_s0, %s16178_s26 }
  0xd6 PF: > { %v637_v1 = vld [vmem:[%s19721_s14] sm:$0xff]  ;;  %v638_v3 = vld [vmem:[%s19721_s14 + $0x8] sm:$0xff]  ;;  %v19426_v33 = vmov 1983009808   ;;  %v469_v35 = vlaneseq  ;;  %v19781_v60 = vld [vmem:[%s19743_s25] sm:$0xff]  ;;  %p17908_p9 = scmp.ne.s32.totalorder %s19500_s15, 7 }
  0xd7   : > { %v641_v2 = vld [vmem:[%s19721_s14 + $0x20] sm:$0xff]  ;;  %v642_v5 = vld [vmem:[%s19721_s14 + $0x28] sm:$0xff]  ;;  %v467_v34 = vunpack.c.l.s4 %v19426_v33  ;;  %vm16032_vm0 = vcmask (!%p17908_p9), 74752  }
  0xd8   : > { %v16181_v4 = vcombine.high %v637_v1, %v641_v2  ;;  %v16180_v6 = vcombine.low %v637_v1, %v641_v2  ;;  %v645_v7 = vld [vmem:[%s19721_s14 + $0x40] sm:$0xff]  ;;  %v16183_v9 = vcombine.high %v638_v3, %v642_v5  ;;  %v16182_v10 = vcombine.low %v638_v3, %v642_v5  ;;  %v646_v12 = vld [vmem:[%s19721_s14 + $0x48] sm:$0xff] }
  0xd9   : > { %v649_v8 = vld [vmem:[%s19721_s14 + $0x60] sm:$0xff]  ;;  %v650_v13 = vld [vmem:[%s19721_s14 + $0x68] sm:$0xff]  ;;  %v468_v44 = vunpack.c.0.s8 %v467_v34  ;;  %v19769_v45 = vshrl.u32 %v469_v35, 7 }
  0xda   : > { %v16189_v11 = vcombine.high %v645_v7, %v649_v8  ;;  %v653_v14 = vld [vmem:[%s19721_s14 + $0x80] sm:$0xff]  ;;  %11005 = vmatprep.subr.bf16.mxu0 %v16181_v4  ;;  %v16191_v15 = vcombine.high %v646_v12, %v650_v13  ;;  %v654_v17 = vld [vmem:[%s19721_s14 + $0x88] sm:$0xff]  ;;  %11579 = vmatprep.subr.bf16.mxu1 %v16183_v9  ;;  %v16188_v19 = vcombine.low %v645_v7, %v649_v8 }
  0xdb   : > { %v657_v16 = vld [vmem:[%s19721_s14 + $0xa0] sm:$0xff]  ;;  %v658_v18 = vld [vmem:[%s19721_s14 + $0xa8] sm:$0xff]  ;;  %11006 = vmatpush1.bf16.msra.mxu0 %v16180_v6  ;;  %11580 = vmatpush1.bf16.msra.mxu1 %v16182_v10  ;;  %v16190_v20 = vcombine.low %v646_v12, %v650_v13  ;;  %v19776_v54 = vsub.s32 %v468_v44, %v19769_v45 }
  0xdc   : > { %11007 = vmatprep.subr.bf16.mxu0 %v16189_v11  ;;  %v16197_v21 = vcombine.high %v653_v14, %v657_v16  ;;  %11581 = vmatprep.subr.bf16.mxu1 %v16191_v15  ;;  %v16199_v22 = vcombine.high %v654_v17, %v658_v18  ;;  %v661_v23 = vld [vmem:[%s19721_s14 + $0xc0] sm:$0xff]  ;;  %v662_v25 = vld [vmem:[%s19721_s14 + $0xc8] sm:$0xff]  ;;  %v16196_v27 = vcombine.low %v653_v14, %v657_v16 }
  0xdd   : > { %v665_v24 = vld [vmem:[%s19721_s14 + $0xe0] sm:$0xff]  ;;  %v666_v26 = vld [vmem:[%s19721_s14 + $0xe8] sm:$0xff]  ;;  %v16198_v28 = vcombine.low %v654_v17, %v658_v18  ;;  %v19787_v0 = vrot.slane %v19781_v60, %v19776_v54 }
  0xde   : > { %v16205_v29 = vcombine.high %v661_v23, %v665_v24  ;;  %v16207_v30 = vcombine.high %v662_v25, %v666_v26  ;;  %v669_v31 = vld [vmem:[%s19721_s14 + $0x100] sm:$0xff]  ;;  %v670_v36 = vld [vmem:[%s19721_s14 + $0x108] sm:$0xff]  ;;  %v16204_v38 = vcombine.low %v661_v23, %v665_v24  ;;  %v16206_v39 = vcombine.low %v662_v25, %v666_v26 }
  0xdf   : > { %11008 = vmatpush1.bf16.msra.mxu0 %v16188_v19  ;;  %11582 = vmatpush1.bf16.msra.mxu1 %v16190_v20  ;;  %v673_v32 = vld [vmem:[%s19721_s14 + $0x120] sm:$0xff]  ;;  %v674_v37 = vld [vmem:[%s19721_s14 + $0x128] sm:$0xff]  ;;  %v480_v4 = vcombine.high %v19787_v0, %v19787_v0 }
  0xe0   : > { %11009 = vmatprep.subr.bf16.mxu0 %v16197_v21  ;;  %11583 = vmatprep.subr.bf16.mxu1 %v16199_v22  ;;  %v16213_v40 = vcombine.high %v669_v31, %v673_v32  ;;  %v16215_v41 = vcombine.high %v670_v36, %v674_v37  ;;  %v677_v42 = vld [vmem:[%s19721_s14 + $0x140] sm:$0xff]  ;;  %v678_v46 = vld [vmem:[%s19721_s14 + $0x148] sm:$0xff]  ;;  %v16212_v48 = vcombine.low %v669_v31, %v673_v32 }
  0xe1   : > { %v681_v43 = vld [vmem:[%s19721_s14 + $0x160] sm:$0xff]  ;;  %v682_v47 = vld [vmem:[%s19721_s14 + $0x168] sm:$0xff]  ;;  %v16214_v49 = vcombine.low %v670_v36, %v674_v37  ;;  %v19795_v10 = vpack.c.bf16 %v480_v4, %v480_v4 }
  0xe2   : > { %v16221_v50 = vcombine.high %v677_v42, %v681_v43  ;;  %v16223_v51 = vcombine.high %v678_v46, %v682_v47  ;;  %v685_v52 = vld [vmem:[%s19721_s14 + $0x180] sm:$0xff]  ;;  %v686_v55 = vld [vmem:[%s19721_s14 + $0x188] sm:$0xff]  ;;  %v16220_v57 = vcombine.low %v677_v42, %v681_v43  ;;  %v16222_v58 = vcombine.low %v678_v46, %v682_v47 }
  0xe3   : > { %11010 = vmatpush1.bf16.msra.mxu0 %v16196_v27  ;;  %11584 = vmatpush1.bf16.msra.mxu1 %v16198_v28  ;;  %v689_v53 = vld [vmem:[%s19721_s14 + $0x1a0] sm:$0xff]  ;;  %v690_v56 = vld [vmem:[%s19721_s14 + $0x1a8] sm:$0xff] }
  0xe4   : > { %11011 = vmatprep.subr.bf16.mxu0 %v16205_v29  ;;  %11585 = vmatprep.subr.bf16.mxu1 %v16207_v30  ;;  %v16229_v59 = vcombine.high %v685_v52, %v689_v53  ;;  %v16231_v61 = vcombine.high %v686_v55, %v690_v56  ;;  %v693_v62 = vld [vmem:[%s19721_s14 + $0x1c0] sm:$0xff]  ;;  %v694_v1 = vld [vmem:[%s19721_s14 + $0x1c8] sm:$0xff]  ;;  %v16228_v3 = vcombine.low %v685_v52, %v689_v53 }
  0xe5   : > { %v697_v63 = vld [vmem:[%s19721_s14 + $0x1e0] sm:$0xff]  ;;  %v698_v2 = vld [vmem:[%s19721_s14 + $0x1e8] sm:$0xff]  ;;  %v16230_v5 = vcombine.low %v686_v55, %v690_v56  ;;  %11037 = vmatprep.mubr.bf16.mxu0 %v19795_v10  ;;  %11611 = vmatprep.mubr.bf16.mxu1 %v19795_v10 }
  0xe6   : > { %v16237_v6 = vcombine.high %v693_v62, %v697_v63  ;;  %v16239_v7 = vcombine.high %v694_v1, %v698_v2  ;;  %v701_v8 = vld [vmem:[%s19721_s14 + $0x200] sm:$0xff]  ;;  %v702_v11 = vld [vmem:[%s19721_s14 + $0x208] sm:$0xff]  ;;  %v16236_v13 = vcombine.low %v693_v62, %v697_v63  ;;  %v16238_v14 = vcombine.low %v694_v1, %v698_v2 }
  0xe7   : > { %11012 = vmatpush1.bf16.msra.mxu0 %v16204_v38  ;;  %11586 = vmatpush1.bf16.msra.mxu1 %v16206_v39  ;;  %v705_v9 = vld [vmem:[%s19721_s14 + $0x220] sm:$0xff]  ;;  %v706_v12 = vld [vmem:[%s19721_s14 + $0x228] sm:$0xff] }
  0xe8   : > { %11013 = vmatprep.subr.bf16.mxu0 %v16213_v40  ;;  %11587 = vmatprep.subr.bf16.mxu1 %v16215_v41  ;;  %v16245_v15 = vcombine.high %v701_v8, %v705_v9  ;;  %v16247_v16 = vcombine.high %v702_v11, %v706_v12  ;;  %v709_v17 = vld [vmem:[%s19721_s14 + $0x240] sm:$0xff]  ;;  %v710_v19 = vld [vmem:[%s19721_s14 + $0x248] sm:$0xff]  ;;  %v16244_v21 = vcombine.low %v701_v8, %v705_v9 }
  0xe9   : > { %v713_v18 = vld [vmem:[%s19721_s14 + $0x260] sm:$0xff]  ;;  %v714_v20 = vld [vmem:[%s19721_s14 + $0x268] sm:$0xff]  ;;  %v16246_v22 = vcombine.low %v702_v11, %v706_v12 }
  0xea   : > { %v16253_v23 = vcombine.high %v709_v17, %v713_v18  ;;  %v16255_v24 = vcombine.high %v710_v19, %v714_v20  ;;  %v717_v25 = vld [vmem:[%s19721_s14 + $0x280] sm:$0xff]  ;;  %v718_v27 = vld [vmem:[%s19721_s14 + $0x288] sm:$0xff]  ;;  %v16252_v29 = vcombine.low %v709_v17, %v713_v18  ;;  %v16254_v30 = vcombine.low %v710_v19, %v714_v20 }
  0xeb   : > { %11014 = vmatpush1.bf16.msra.mxu0 %v16212_v48  ;;  %11588 = vmatpush1.bf16.msra.mxu1 %v16214_v49  ;;  %v721_v26 = vld [vmem:[%s19721_s14 + $0x2a0] sm:$0xff]  ;;  %v722_v28 = vld [vmem:[%s19721_s14 + $0x2a8] sm:$0xff] }
  0xec   : > { %11015 = vmatprep.subr.bf16.mxu0 %v16221_v50  ;;  %11589 = vmatprep.subr.bf16.mxu1 %v16223_v51  ;;  %v16261_v31 = vcombine.high %v717_v25, %v721_v26  ;;  %v16263_v32 = vcombine.high %v718_v27, %v722_v28  ;;  %v725_v33 = vld [vmem:[%s19721_s14 + $0x2c0] sm:$0xff]  ;;  %v726_v35 = vld [vmem:[%s19721_s14 + $0x2c8] sm:$0xff]  ;;  %v16260_v37 = vcombine.low %v717_v25, %v721_v26 }
  0xed   : > { %v729_v34 = vld [vmem:[%s19721_s14 + $0x2e0] sm:$0xff]  ;;  %v730_v36 = vld [vmem:[%s19721_s14 + $0x2e8] sm:$0xff]  ;;  %v16262_v38 = vcombine.low %v718_v27, %v722_v28  ;;  %v19844_v26 = vpack.c.bf16 %v19787_v0, %v19787_v0 }
  0xee   : > { %v16269_v39 = vcombine.high %v725_v33, %v729_v34  ;;  %v16271_v40 = vcombine.high %v726_v35, %v730_v36  ;;  %v733_v41 = vld [vmem:[%s19721_s14 + $0x300] sm:$0xff]  ;;  %v734_v43 = vld [vmem:[%s19721_s14 + $0x308] sm:$0xff]  ;;  %v16268_v46 = vcombine.low %v725_v33, %v729_v34  ;;  %v16270_v47 = vcombine.low %v726_v35, %v730_v36 }
  0xef   : > { %11016 = vmatpush1.bf16.msra.mxu0 %v16220_v57  ;;  %11590 = vmatpush1.bf16.msra.mxu1 %v16222_v58  ;;  %v737_v42 = vld [vmem:[%s19721_s14 + $0x320] sm:$0xff]  ;;  %v738_v44 = vld [vmem:[%s19721_s14 + $0x328] sm:$0xff] }
  0xf0   : > { %11017 = vmatprep.subr.bf16.mxu0 %v16229_v59  ;;  %11591 = vmatprep.subr.bf16.mxu1 %v16231_v61  ;;  %v16277_v48 = vcombine.high %v733_v41, %v737_v42  ;;  %v16279_v49 = vcombine.high %v734_v43, %v738_v44  ;;  %v741_v50 = vld [vmem:[%s19721_s14 + $0x340] sm:$0xff]  ;;  %v742_v52 = vld [vmem:[%s19721_s14 + $0x348] sm:$0xff]  ;;  %v16276_v55 = vcombine.low %v733_v41, %v737_v42 }
  0xf1   : > { %v745_v51 = vld [vmem:[%s19721_s14 + $0x360] sm:$0xff]  ;;  %v746_v53 = vld [vmem:[%s19721_s14 + $0x368] sm:$0xff]  ;;  %v16278_v56 = vcombine.low %v734_v43, %v738_v44 }
  0xf2   : > { %v16285_v57 = vcombine.high %v741_v50, %v745_v51  ;;  %v16287_v58 = vcombine.high %v742_v52, %v746_v53  ;;  %v749_v59 = vld [vmem:[%s19721_s14 + $0x380] sm:$0xff]  ;;  %v750_v62 = vld [vmem:[%s19721_s14 + $0x388] sm:$0xff]  ;;  %v16284_v1 = vcombine.low %v741_v50, %v745_v51  ;;  %v16286_v2 = vcombine.low %v742_v52, %v746_v53 }
  0xf3   : > { %11018 = vmatpush1.bf16.msra.mxu0 %v16228_v3  ;;  %11592 = vmatpush1.bf16.msra.mxu1 %v16230_v5  ;;  %v753_v61 = vld [vmem:[%s19721_s14 + $0x3a0] sm:$0xff]  ;;  %v754_v63 = vld [vmem:[%s19721_s14 + $0x3a8] sm:$0xff] }
  0xf4   : > { %11019 = vmatprep.subr.bf16.mxu0 %v16237_v6  ;;  %11593 = vmatprep.subr.bf16.mxu1 %v16239_v7  ;;  %v16293_v3 = vcombine.high %v749_v59, %v753_v61  ;;  %v16295_v4 = vcombine.high %v750_v62, %v754_v63  ;;  %v757_v5 = vld [vmem:[%s19721_s14 + $0x3c0] sm:$0xff]  ;;  %v465_v7 = vcombine.high %v19781_v60, %v19781_v60  ;;  %v758_v8 = vld [vmem:[%s19721_s14 + $0x3c8] sm:$0xff] }
  0xf5   : > { %v761_v6 = vld [vmem:[%s19721_s14 + $0x3e0] sm:$0xff]  ;;  %v762_v9 = vld [vmem:[%s19721_s14 + $0x3e8] sm:$0xff]  ;;  %v16292_v11 = vcombine.low %v749_v59, %v753_v61  ;;  %v16294_v12 = vcombine.low %v750_v62, %v754_v63 }
  0xf6   : > { %v19834_v17 = vrot.slane %v465_v7, %v19776_v54  ;;  %v766_v60 = vld [vmem:[%s19721_s14 + $0x408] sm:$0xff]  ;;  %v16300_v19 = vcombine.low %v757_v5, %v761_v6  ;;  %v16302_v20 = vcombine.low %v758_v8, %v762_v9  ;;  %v781_v33 = vld [vmem:[%s19721_s14 + $0x480] sm:$0xff] }
  0xf7   : > { %11020 = vmatpush1.bf16.msra.mxu0 %v16236_v13  ;;  %11594 = vmatpush1.bf16.msra.mxu1 %v16238_v14  ;;  %v16301_v13 = vcombine.high %v757_v5, %v761_v6  ;;  %v16303_v14 = vcombine.high %v758_v8, %v762_v9  ;;  %v770_v18 = vld [vmem:[%s19721_s14 + $0x428] sm:$0xff]  ;;  %v785_v34 = vld [vmem:[%s19721_s14 + $0x4a0] sm:$0xff] }
  0xf8   : > { %11021 = vmatprep.subr.bf16.mxu0 %v16245_v15  ;;  %11595 = vmatprep.subr.bf16.mxu1 %v16247_v16  ;;  %v765_v15 = vld [vmem:[%s19721_s14 + $0x400] sm:$0xff]  ;;  %v481_v25 = vcombine.high %v19834_v17, %v19834_v17  ;;  %v774_v27 = vld [vmem:[%s19721_s14 + $0x448] sm:$0xff] }
  0xf9   : > { %v769_v16 = vld [vmem:[%s19721_s14 + $0x420] sm:$0xff]  ;;  %v778_v28 = vld [vmem:[%s19721_s14 + $0x468] sm:$0xff] }
  0xfa   : > { %v19850_v35 = vpack.c.bf16 %v481_v25, %v481_v25  ;;  %v782_v0 = vld [vmem:[%s19721_s14 + $0x488] sm:$0xff]  ;;  %v789_v41 = vld [vmem:[%s19721_s14 + $0x4c0] sm:$0xff] }
  0xfb   : > { %11022 = vmatpush1.bf16.msra.mxu0 %v16244_v21  ;;  %11596 = vmatpush1.bf16.msra.mxu1 %v16246_v22  ;;  %v16309_v21 = vcombine.high %v765_v15, %v769_v16  ;;  %v16311_v22 = vcombine.high %v766_v60, %v770_v18  ;;  %v786_v36 = vld [vmem:[%s19721_s14 + $0x4a8] sm:$0xff]  ;;  %v793_v42 = vld [vmem:[%s19721_s14 + $0x4e0] sm:$0xff] }
  0xfc   : > { %11023 = vmatprep.subr.bf16.mxu0 %v16253_v23  ;;  %11597 = vmatprep.subr.bf16.mxu1 %v16255_v24  ;;  %v773_v23 = vld [vmem:[%s19721_s14 + $0x440] sm:$0xff]  ;;  %v790_v43 = vld [vmem:[%s19721_s14 + $0x4c8] sm:$0xff] }
  0xfd   : > { %v777_v24 = vld [vmem:[%s19721_s14 + $0x460] sm:$0xff]  ;;  %v794_v44 = vld [vmem:[%s19721_s14 + $0x4e8] sm:$0xff] }
  0xfe   : > { %v797_v50 = vld [vmem:[%s19721_s14 + $0x500] sm:$0xff]  ;;  %v798_v52 = vld [vmem:[%s19721_s14 + $0x508] sm:$0xff] }
  0xff   : > { %11024 = vmatpush1.bf16.msra.mxu0 %v16252_v29  ;;  %11598 = vmatpush1.bf16.msra.mxu1 %v16254_v30  ;;  %v16308_v29 = vcombine.low %v765_v15, %v769_v16  ;;  %v16310_v30 = vcombine.low %v766_v60, %v770_v18  ;;  %v801_v51 = vld [vmem:[%s19721_s14 + $0x520] sm:$0xff]  ;;  %v802_v53 = vld [vmem:[%s19721_s14 + $0x528] sm:$0xff] }
 0x100   : > { %11025 = vmatprep.subr.bf16.mxu0 %v16261_v31  ;;  %11599 = vmatprep.subr.bf16.mxu1 %v16263_v32  ;;  %v16317_v31 = vcombine.high %v773_v23, %v777_v24  ;;  %v16319_v32 = vcombine.high %v774_v27, %v778_v28  ;;  %v805_v59 = vld [vmem:[%s19721_s14 + $0x540] sm:$0xff]  ;;  %v806_v62 = vld [vmem:[%s19721_s14 + $0x548] sm:$0xff] }
 0x101   : > { %v809_v61 = vld [vmem:[%s19721_s14 + $0x560] sm:$0xff]  ;;  %v810_v63 = vld [vmem:[%s19721_s14 + $0x568] sm:$0xff] }
 0x102   : > { %v813_v5 = vld [vmem:[%s19721_s14 + $0x580] sm:$0xff]  ;;  %v814_v7 = vld [vmem:[%s19721_s14 + $0x588] sm:$0xff]  ;;  %v16348_v9 = vcombine.low %v805_v59, %v809_v61 }
 0x103   : > { %11026 = vmatpush1.bf16.msra.mxu0 %v16260_v37  ;;  %11600 = vmatpush1.bf16.msra.mxu1 %v16262_v38  ;;  %v16316_v37 = vcombine.low %v773_v23, %v777_v24  ;;  %v16318_v38 = vcombine.low %v774_v27, %v778_v28  ;;  %v817_v6 = vld [vmem:[%s19721_s14 + $0x5a0] sm:$0xff]  ;;  %v818_v8 = vld [vmem:[%s19721_s14 + $0x5a8] sm:$0xff] }
 0x104   : > { %11027 = vmatprep.subr.bf16.mxu0 %v16269_v39  ;;  %11601 = vmatprep.subr.bf16.mxu1 %v16271_v40  ;;  %v16325_v39 = vcombine.high %v781_v33, %v785_v34  ;;  %v16327_v40 = vcombine.high %v782_v0, %v786_v36  ;;  %v825_v15 = vld [vmem:[%s19721_s14 + $0x5e0] sm:$0xff]  ;;  %v822_v16 = vld [vmem:[%s19721_s14 + $0x5c8] sm:$0xff]  ;;  %v16356_v18 = vcombine.low %v813_v5, %v817_v6 }
 0x105   : > { %v826_v60 = vld [vmem:[%s19721_s14 + $0x5e8] sm:$0xff]  ;;  %v833_v23 = vld [vmem:[%s19721_s14 + $0x620] sm:$0xff] }
 0x106   : > { %v830_v24 = vld [vmem:[%s19721_s14 + $0x608] sm:$0xff]  ;;  %v16366_v28 = vcombine.low %v822_v16, %v826_v60 }
 0x107   : > { %11028 = vmatpush1.bf16.msra.mxu0 %v16268_v46  ;;  %11602 = vmatpush1.bf16.msra.mxu1 %v16270_v47  ;;  %v16324_v46 = vcombine.low %v781_v33, %v785_v34  ;;  %v16326_v47 = vcombine.low %v782_v0, %v786_v36  ;;  %v834_v25 = vld [vmem:[%s19721_s14 + $0x628] sm:$0xff] }
 0x108   : > { %11029 = vmatprep.subr.bf16.mxu0 %v16277_v48  ;;  %11603 = vmatprep.subr.bf16.mxu1 %v16279_v49  ;;  %v16333_v48 = vcombine.high %v789_v41, %v793_v42  ;;  %v16335_v49 = vcombine.high %v790_v43, %v794_v44  ;;  %v838_v33 = vld [vmem:[%s19721_s14 + $0x648] sm:$0xff]  ;;  %v16374_v36 = vcombine.low %v830_v24, %v834_v25 }
 0x109   : > { %v842_v34 = vld [vmem:[%s19721_s14 + $0x668] sm:$0xff] }
 0x10b   : > { %11030 = vmatpush1.bf16.msra.mxu0 %v16276_v55  ;;  %11604 = vmatpush1.bf16.msra.mxu1 %v16278_v56  ;;  %v16332_v55 = vcombine.low %v789_v41, %v793_v42  ;;  %v16334_v56 = vcombine.low %v790_v43, %v794_v44  ;;  %v846_v41 = vld [vmem:[%s19721_s14 + $0x688] sm:$0xff]  ;;  %v16382_v44 = vcombine.low %v838_v33, %v842_v34 }
 0x10c   : > { %11031 = vmatprep.subr.bf16.mxu0 %v16285_v57  ;;  %11605 = vmatprep.subr.bf16.mxu1 %v16287_v58  ;;  %v16341_v57 = vcombine.high %v797_v50, %v801_v51  ;;  %v16343_v58 = vcombine.high %v798_v52, %v802_v53  ;;  %v850_v42 = vld [vmem:[%s19721_s14 + $0x6a8] sm:$0xff] }
 0x10f   : > { %11032 = vmatpush1.bf16.msra.mxu0 %v16284_v1  ;;  %11606 = vmatpush1.bf16.msra.mxu1 %v16286_v2  ;;  %v16340_v1 = vcombine.low %v797_v50, %v801_v51  ;;  %v16342_v2 = vcombine.low %v798_v52, %v802_v53  ;;  %v854_v50 = vld [vmem:[%s19721_s14 + $0x6c8] sm:$0xff]  ;;  %v16390_v53 = vcombine.low %v846_v41, %v850_v42 }
 0x110   : > { %11033 = vmatprep.subr.bf16.mxu0 %v16293_v3  ;;  %11607 = vmatprep.subr.bf16.mxu1 %v16295_v4  ;;  %v16349_v3 = vcombine.high %v805_v59, %v809_v61  ;;  %v16351_v4 = vcombine.high %v806_v62, %v810_v63  ;;  %v858_v51 = vld [vmem:[%s19721_s14 + $0x6e8] sm:$0xff] }
 0x111   : > { %v862_v59 = vld [vmem:[%s19721_s14 + $0x708] sm:$0xff] }
 0x112   : > { %v866_v61 = vld [vmem:[%s19721_s14 + $0x728] sm:$0xff] }
 0x113   : > { %11034 = vmatpush1.bf16.msra.mxu0 %v16292_v11  ;;  %11608 = vmatpush1.bf16.msra.mxu1 %v16294_v12  ;;  %v16350_v11 = vcombine.low %v806_v62, %v810_v63  ;;  %v16357_v12 = vcombine.high %v813_v5, %v817_v6  ;;  %v16398_v63 = vcombine.low %v854_v50, %v858_v51  ;;  %v870_v5 = vld [vmem:[%s19721_s14 + $0x748] sm:$0xff] }
 0x114   : > { %11035 = vmatprep.subr.bf16.mxu0 %v16301_v13  ;;  %11609 = vmatprep.subr.bf16.mxu1 %v16303_v14  ;;  %v16359_v13 = vcombine.high %v814_v7, %v818_v8  ;;  %v821_v14 = vld [vmem:[%s19721_s14 + $0x5c0] sm:$0xff]  ;;  %v874_v6 = vld [vmem:[%s19721_s14 + $0x768] sm:$0xff] }
 0x115   : > { %v16364_v27 = vcombine.low %v821_v14, %v825_v15 }
 0x117   : > { %11036 = vmatpush1.bf16.msra.mxu0 %v16300_v19  ;;  %11610 = vmatpush1.bf16.msra.mxu1 %v16302_v20  ;;  %v16358_v19 = vcombine.low %v814_v7, %v818_v8  ;;  %v16365_v20 = vcombine.high %v821_v14, %v825_v15  ;;  %v16406_v8 = vcombine.low %v862_v59, %v866_v61  ;;  %v878_v14 = vld [vmem:[%s19721_s14 + $0x788] sm:$0xff] }
 0x118   : > { %11046 = vmatprep.subr.bf16.mxu0 %v16309_v21  ;;  %11620 = vmatprep.subr.bf16.mxu1 %v16311_v22  ;;  %v16367_v21 = vcombine.high %v822_v16, %v826_v60  ;;  %v829_v22 = vld [vmem:[%s19721_s14 + $0x600] sm:$0xff]  ;;  %v882_v15 = vld [vmem:[%s19721_s14 + $0x7a8] sm:$0xff]  ;;  %v16414_v60 = vcombine.low %v870_v5, %v874_v6 }
 0x119   : > { %v16372_v0 = vcombine.low %v829_v22, %v833_v23 }
 0x11a   : > { %11038 = vmatmul.mubr.bf16.vlgmr.msra.gmra.mrb[0].mxu0 %v19844_v26  ;;  %11612 = vmatmul.mubr.bf16.vlgmr.msra.gmra.mrb[0].mxu1 %v19844_v26 }
 0x11b   : > { %11047 = vmatpush1.bf16.msra.mxu0 %v16308_v29  ;;  %11621 = vmatpush1.bf16.msra.mxu1 %v16310_v30  ;;  %v16373_v29 = vcombine.high %v829_v22, %v833_v23  ;;  %v16375_v30 = vcombine.high %v830_v24, %v834_v25  ;;  %v886_v22 = vld [vmem:[%s19721_s14 + $0x7c8] sm:$0xff]  ;;  %v19911_v24 = vld [vmem:[%s19743_s25 + $0x8] sm:$0xff] }
 0x11c   : > { %11048 = vmatprep.subr.bf16.mxu0 %v16317_v31  ;;  %11622 = vmatprep.subr.bf16.mxu1 %v16319_v32  ;;  %v837_v31 = vld [vmem:[%s19721_s14 + $0x640] sm:$0xff]  ;;  %v890_v23 = vld [vmem:[%s19721_s14 + $0x7e8] sm:$0xff] }
 0x11d   : > { %11078 = vmatprep.mubr.bf16.mxu0 %v19850_v35  ;;  %11652 = vmatprep.mubr.bf16.mxu1 %v19850_v35  ;;  %v841_v32 = vld [vmem:[%s19721_s14 + $0x660] sm:$0xff] }
 0x11e   : > { %v16380_v43 = vcombine.low %v837_v31, %v841_v32 }
 0x11f   : > { %11049 = vmatpush1.bf16.msra.mxu0 %v16316_v37  ;;  %11623 = vmatpush1.bf16.msra.mxu1 %v16318_v38  ;;  %v16381_v37 = vcombine.high %v837_v31, %v841_v32  ;;  %v16383_v38 = vcombine.high %v838_v33, %v842_v34  ;;  %v897_v31 = vld [vmem:[%s19721_s14 + $0x820] sm:$0xff]  ;;  %v19917_v32 = vrot.slane %v19911_v24, %v19776_v54  ;;  %v894_v33 = vld [vmem:[%s19721_s14 + $0x808] sm:$0xff] }
 0x120   : > { %11050 = vmatprep.subr.bf16.mxu0 %v16325_v39  ;;  %11624 = vmatprep.subr.bf16.mxu1 %v16327_v40  ;;  %v845_v39 = vld [vmem:[%s19721_s14 + $0x680] sm:$0xff]  ;;  %v898_v34 = vld [vmem:[%s19721_s14 + $0x828] sm:$0xff] }
 0x121   : > { %v849_v40 = vld [vmem:[%s19721_s14 + $0x6a0] sm:$0xff] }
 0x122   : > { %v16388_v52 = vcombine.low %v845_v39, %v849_v40 }
 0x123   : > { %11051 = vmatpush1.bf16.msra.mxu0 %v16324_v46  ;;  %11625 = vmatpush1.bf16.msra.mxu1 %v16326_v47  ;;  %v16389_v46 = vcombine.high %v845_v39, %v849_v40  ;;  %v16391_v47 = vcombine.high %v846_v41, %v850_v42  ;;  %v901_v39 = vld [vmem:[%s19721_s14 + $0x840] sm:$0xff]  ;;  %v497_v41 = vcombine.high %v19917_v32, %v19917_v32 }
 0x124   : > { %11052 = vmatprep.subr.bf16.mxu0 %v16333_v48  ;;  %11626 = vmatprep.subr.bf16.mxu1 %v16335_v49  ;;  %v853_v48 = vld [vmem:[%s19721_s14 + $0x6c0] sm:$0xff]  ;;  %v19927_v42 = vpack.c.bf16 %v19834_v17, %v19834_v17  ;;  %v910_v17 = vld [vmem:[%s19721_s14 + $0x888] sm:$0xff] }
 0x125   : > { %v857_v49 = vld [vmem:[%s19721_s14 + $0x6e0] sm:$0xff] }
 0x126   : > { %v16396_v62 = vcombine.low %v853_v48, %v857_v49  ;;  %v905_v40 = vld [vmem:[%s19721_s14 + $0x860] sm:$0xff] }
 0x127   : > { %11053 = vmatpush1.bf16.msra.mxu0 %v16332_v55  ;;  %11627 = vmatpush1.bf16.msra.mxu1 %v16334_v56  ;;  %v16397_v55 = vcombine.high %v853_v48, %v857_v49  ;;  %v16399_v56 = vcombine.high %v854_v50, %v858_v51  ;;  %v16445_v48 = vcombine.high %v901_v39, %v905_v40  ;;  %v909_v50 = vld [vmem:[%s19721_s14 + $0x880] sm:$0xff] }
 0x128   : > { %11054 = vmatprep.subr.bf16.mxu0 %v16341_v57  ;;  %11628 = vmatprep.subr.bf16.mxu1 %v16343_v58  ;;  %v861_v57 = vld [vmem:[%s19721_s14 + $0x700] sm:$0xff] }
 0x129   : > { %v865_v58 = vld [vmem:[%s19721_s14 + $0x720] sm:$0xff] }
 0x12a   : > { %v16404_v7 = vcombine.low %v861_v57, %v865_v58  ;;  %v913_v51 = vld [vmem:[%s19721_s14 + $0x8a0] sm:$0xff] }
 0x12b   : > { %11055 = vmatpush1.bf16.msra.mxu0 %v16340_v1  ;;  %11629 = vmatpush1.bf16.msra.mxu1 %v16342_v2  ;;  %v16405_v1 = vcombine.high %v861_v57, %v865_v58  ;;  %v16407_v2 = vcombine.high %v862_v59, %v866_v61  ;;  %v16453_v57 = vcombine.high %v909_v50, %v913_v51  ;;  %v917_v59 = vld [vmem:[%s19721_s14 + $0x8c0] sm:$0xff] }
 0x12c   : > { %11056 = vmatprep.subr.bf16.mxu0 %v16349_v3  ;;  %11630 = vmatprep.subr.bf16.mxu1 %v16351_v4  ;;  %v869_v3 = vld [vmem:[%s19721_s14 + $0x740] sm:$0xff] }
 0x12d   : > { %v873_v4 = vld [vmem:[%s19721_s14 + $0x760] sm:$0xff] }
 0x12e   : > { %v16412_v16 = vcombine.low %v869_v3, %v873_v4  ;;  %v921_v61 = vld [vmem:[%s19721_s14 + $0x8e0] sm:$0xff] }
 0x12f   : > { %11057 = vmatpush1.bf16.msra.mxu0 %v16348_v9  ;;  %11631 = vmatpush1.bf16.msra.mxu1 %v16350_v11  ;;  %v16413_v9 = vcombine.high %v869_v3, %v873_v4  ;;  %v16415_v11 = vcombine.high %v870_v5, %v874_v6  ;;  %v16461_v3 = vcombine.high %v917_v59, %v921_v61  ;;  %v925_v5 = vld [vmem:[%s19721_s14 + $0x900] sm:$0xff] }
 0x130   : > { %11058 = vmatprep.subr.bf16.mxu0 %v16357_v12  ;;  %11632 = vmatprep.subr.bf16.mxu1 %v16359_v13  ;;  %v877_v12 = vld [vmem:[%s19721_s14 + $0x780] sm:$0xff] }
 0x131   : > { %v881_v13 = vld [vmem:[%s19721_s14 + $0x7a0] sm:$0xff] }
 0x132   : > { %v16420_v25 = vcombine.low %v877_v12, %v881_v13  ;;  %v929_v6 = vld [vmem:[%s19721_s14 + $0x920] sm:$0xff] }
 0x133   : > { %11059 = vmatpush1.bf16.msra.mxu0 %v16356_v18  ;;  %11633 = vmatpush1.bf16.msra.mxu1 %v16358_v19  ;;  %v16421_v18 = vcombine.high %v877_v12, %v881_v13  ;;  %v16423_v19 = vcombine.high %v878_v14, %v882_v15  ;;  %v16469_v12 = vcombine.high %v925_v5, %v929_v6 }
 0x134   : > { %11060 = vmatprep.subr.bf16.mxu0 %v16365_v20  ;;  %11634 = vmatprep.subr.bf16.mxu1 %v16367_v21  ;;  %v885_v20 = vld [vmem:[%s19721_s14 + $0x7c0] sm:$0xff] }
 0x135   : > { %v889_v21 = vld [vmem:[%s19721_s14 + $0x7e0] sm:$0xff] }
 0x137   : > { %11061 = vmatpush1.bf16.msra.mxu0 %v16364_v27  ;;  %11635 = vmatpush1.bf16.msra.mxu1 %v16366_v28  ;;  %v16422_v27 = vcombine.low %v878_v14, %v882_v15  ;;  %v16429_v28 = vcombine.high %v885_v20, %v889_v21  ;;  %v933_v14 = vld [vmem:[%s19721_s14 + $0x940] sm:$0xff] }
 0x138   : > { %11062 = vmatprep.subr.bf16.mxu0 %v16373_v29  ;;  %11636 = vmatprep.subr.bf16.mxu1 %v16375_v30  ;;  %v16431_v29 = vcombine.high %v886_v22, %v890_v23  ;;  %v893_v30 = vld [vmem:[%s19721_s14 + $0x800] sm:$0xff] }
 0x139   : > { %v937_v15 = vld [vmem:[%s19721_s14 + $0x960] sm:$0xff] }
 0x13b   : > { %11063 = vmatpush1.bf16.msra.mxu0 %v16372_v0  ;;  %11637 = vmatpush1.bf16.msra.mxu1 %v16374_v36  ;;  %v16428_v0 = vcombine.low %v885_v20, %v889_v21  ;;  %v16430_v36 = vcombine.low %v886_v22, %v890_v23  ;;  %v16477_v20 = vcombine.high %v933_v14, %v937_v15  ;;  %v941_v22 = vld [vmem:[%s19721_s14 + $0x980] sm:$0xff] }
 0x13c   : > { %11064 = vmatprep.subr.bf16.mxu0 %v16381_v37  ;;  %11638 = vmatprep.subr.bf16.mxu1 %v16383_v38  ;;  %v16437_v37 = vcombine.high %v893_v30, %v897_v31  ;;  %v16439_v38 = vcombine.high %v894_v33, %v898_v34  ;;  %v945_v23 = vld [vmem:[%s19721_s14 + $0x9a0] sm:$0xff] }
 0x13f   : > { %11065 = vmatpush1.bf16.msra.mxu0 %v16380_v43  ;;  %11639 = vmatpush1.bf16.msra.mxu1 %v16382_v44  ;;  %v902_v43 = vld [vmem:[%s19721_s14 + $0x848] sm:$0xff] }
 0x140   : > { %11066 = vmatprep.subr.bf16.mxu0 %v16389_v46  ;;  %11640 = vmatprep.subr.bf16.mxu1 %v16391_v47  ;;  %v906_v44 = vld [vmem:[%s19721_s14 + $0x868] sm:$0xff]  ;;  %v16436_v46 = vcombine.low %v893_v30, %v897_v31  ;;  %v16438_v47 = vcombine.low %v894_v33, %v898_v34  ;;  %v16485_v30 = vcombine.high %v941_v22, %v945_v23  ;;  %v949_v33 = vld [vmem:[%s19721_s14 + $0x9c0] sm:$0xff] }
 0x141   : > { %v16447_v49 = vcombine.high %v902_v43, %v906_v44  ;;  %v953_v34 = vld [vmem:[%s19721_s14 + $0x9e0] sm:$0xff] }
 0x143   : > { %11067 = vmatpush1.bf16.msra.mxu0 %v16388_v52  ;;  %11641 = vmatpush1.bf16.msra.mxu1 %v16390_v53  ;;  %v19933_v52 = vpack.c.bf16 %v497_v41, %v497_v41  ;;  %v914_v53 = vld [vmem:[%s19721_s14 + $0x8a8] sm:$0xff]  ;;  %v957_v41 = vld [vmem:[%s19721_s14 + $0xa00] sm:$0xff] }
 0x144   : > { %11068 = vmatprep.subr.bf16.mxu0 %v16397_v55  ;;  %11642 = vmatprep.subr.bf16.mxu1 %v16399_v56  ;;  %v16444_v55 = vcombine.low %v901_v39, %v905_v40  ;;  %v16446_v56 = vcombine.low %v902_v43, %v906_v44  ;;  %v16455_v58 = vcombine.high %v910_v17, %v914_v53  ;;  %v961_v43 = vld [vmem:[%s19721_s14 + $0xa20] sm:$0xff]  ;;  %v958_v44 = vld [vmem:[%s19721_s14 + $0xa08] sm:$0xff] }
 0x145   : > { %v16493_v39 = vcombine.high %v949_v33, %v953_v34 }
 0x147   : > { %11069 = vmatpush1.bf16.msra.mxu0 %v16396_v62  ;;  %11643 = vmatpush1.bf16.msra.mxu1 %v16398_v63  ;;  %v918_v62 = vld [vmem:[%s19721_s14 + $0x8c8] sm:$0xff] }
 0x148   : > { %11070 = vmatprep.subr.bf16.mxu0 %v16405_v1  ;;  %11644 = vmatprep.subr.bf16.mxu1 %v16407_v2  ;;  %v922_v63 = vld [vmem:[%s19721_s14 + $0x8e8] sm:$0xff]  ;;  %v16452_v1 = vcombine.low %v909_v50, %v913_v51  ;;  %v16454_v2 = vcombine.low %v910_v17, %v914_v53  ;;  %v965_v51 = vld [vmem:[%s19721_s14 + $0xa40] sm:$0xff] }
 0x149   : > { %v16463_v4 = vcombine.high %v918_v62, %v922_v63  ;;  %v969_v17 = vld [vmem:[%s19721_s14 + $0xa60] sm:$0xff]  ;;  %v966_v53 = vld [vmem:[%s19721_s14 + $0xa48] sm:$0xff] }
 0x14b   : > { %11071 = vmatpush1.bf16.msra.mxu0 %v16404_v7  ;;  %11645 = vmatpush1.bf16.msra.mxu1 %v16406_v8  ;;  %v926_v7 = vld [vmem:[%s19721_s14 + $0x908] sm:$0xff] }
 0x14c   : > { %11072 = vmatprep.subr.bf16.mxu0 %v16413_v9  ;;  %11646 = vmatprep.subr.bf16.mxu1 %v16415_v11  ;;  %v930_v8 = vld [vmem:[%s19721_s14 + $0x928] sm:$0xff]  ;;  %v16460_v9 = vcombine.low %v917_v59, %v921_v61  ;;  %v16462_v11 = vcombine.low %v918_v62, %v922_v63  ;;  %v973_v61 = vld [vmem:[%s19721_s14 + $0xa80] sm:$0xff] }
 0x14d   : > { %v16471_v13 = vcombine.high %v926_v7, %v930_v8  ;;  %v977_v62 = vld [vmem:[%s19721_s14 + $0xaa0] sm:$0xff]  ;;  %v974_v63 = vld [vmem:[%s19721_s14 + $0xa88] sm:$0xff] }
 0x14f   : > { %11073 = vmatpush1.bf16.msra.mxu0 %v16412_v16  ;;  %11647 = vmatpush1.bf16.msra.mxu1 %v16414_v60  ;;  %v934_v16 = vld [vmem:[%s19721_s14 + $0x948] sm:$0xff] }
 0x150   : > { %11074 = vmatprep.subr.bf16.mxu0 %v16421_v18  ;;  %11648 = vmatprep.subr.bf16.mxu1 %v16423_v19  ;;  %v938_v60 = vld [vmem:[%s19721_s14 + $0x968] sm:$0xff]  ;;  %v16468_v18 = vcombine.low %v925_v5, %v929_v6  ;;  %v16470_v19 = vcombine.low %v926_v7, %v930_v8  ;;  %v981_v6 = vld [vmem:[%s19721_s14 + $0xac0] sm:$0xff] }
 0x151   : > { %v16479_v21 = vcombine.high %v934_v16, %v938_v60  ;;  %v985_v7 = vld [vmem:[%s19721_s14 + $0xae0] sm:$0xff]  ;;  %v982_v8 = vld [vmem:[%s19721_s14 + $0xac8] sm:$0xff] }
 0x153   : > { %11075 = vmatpush1.bf16.msra.mxu0 %v16420_v25  ;;  %11649 = vmatpush1.bf16.msra.mxu1 %v16422_v27  ;;  %v942_v25 = vld [vmem:[%s19721_s14 + $0x988] sm:$0xff] }
 0x154   : > { %11076 = vmatprep.subr.bf16.mxu0 %v16429_v28  ;;  %11650 = vmatprep.subr.bf16.mxu1 %v16431_v29  ;;  %v946_v27 = vld [vmem:[%s19721_s14 + $0x9a8] sm:$0xff]  ;;  %v16476_v28 = vcombine.low %v933_v14, %v937_v15  ;;  %v16478_v29 = vcombine.low %v934_v16, %v938_v60  ;;  %v989_v15 = vld [vmem:[%s19721_s14 + $0xb00] sm:$0xff] }
 0x155   : > { %v16487_v31 = vcombine.high %v942_v25, %v946_v27  ;;  %v993_v16 = vld [vmem:[%s19721_s14 + $0xb20] sm:$0xff]  ;;  %v990_v60 = vld [vmem:[%s19721_s14 + $0xb08] sm:$0xff] }
 0x157   : > { %11077 = vmatpush1.bf16.msra.mxu0 %v16428_v0  ;;  %11651 = vmatpush1.bf16.msra.mxu1 %v16430_v36  ;;  %v950_v0 = vld [vmem:[%s19721_s14 + $0x9c8] sm:$0xff] }
 0x158   : > { %11087 = vmatprep.subr.bf16.mxu0 %v16437_v37  ;;  %11661 = vmatprep.subr.bf16.mxu1 %v16439_v38  ;;  %v954_v36 = vld [vmem:[%s19721_s14 + $0x9e8] sm:$0xff]  ;;  %v16484_v37 = vcombine.low %v941_v22, %v945_v23  ;;  %v16486_v38 = vcombine.low %v942_v25, %v946_v27  ;;  %v997_v23 = vld [vmem:[%s19721_s14 + $0xb40] sm:$0xff] }
 0x159   : > { %v16495_v40 = vcombine.high %v950_v0, %v954_v36  ;;  %v1001_v25 = vld [vmem:[%s19721_s14 + $0xb60] sm:$0xff]  ;;  %v998_v27 = vld [vmem:[%s19721_s14 + $0xb48] sm:$0xff] }
 0x15a   : > { %11079 = vmatmul.mubr.bf16.vlgmr.msra.gmra.mrb[0].mxu0 %v19927_v42  ;;  %11653 = vmatmul.mubr.bf16.vlgmr.msra.gmra.mrb[0].mxu1 %v19927_v42 }
 0x15b   : > { %11088 = vmatpush1.bf16.msra.mxu0 %v16436_v46  ;;  %11662 = vmatpush1.bf16.msra.mxu1 %v16438_v47  ;;  %v962_v46 = vld [vmem:[%s19721_s14 + $0xa28] sm:$0xff]  ;;  %v16492_v47 = vcombine.low %v949_v33, %v953_v34  ;;  %v1005_v34 = vld [vmem:[%s19721_s14 + $0xb80] sm:$0xff] }
 0x15c   : > { %11089 = vmatprep.subr.bf16.mxu0 %v16445_v48  ;;  %11663 = vmatprep.subr.bf16.mxu1 %v16447_v49  ;;  %v16494_v48 = vcombine.low %v950_v0, %v954_v36  ;;  %v16501_v49 = vcombine.high %v957_v41, %v961_v43  ;;  %v16503_v50 = vcombine.high %v958_v44, %v962_v46  ;;  %v1009_v0 = vld [vmem:[%s19721_s14 + $0xba0] sm:$0xff]  ;;  %v1006_v36 = vld [vmem:[%s19721_s14 + $0xb88] sm:$0xff] }
 0x15d   : > { %11119 = vmatprep.mubr.bf16.mxu0 %v19933_v52  ;;  %11693 = vmatprep.mubr.bf16.mxu1 %v19933_v52 }
 0x15f   : > { %11090 = vmatpush1.bf16.msra.mxu0 %v16444_v55  ;;  %11664 = vmatpush1.bf16.msra.mxu1 %v16446_v56  ;;  %v970_v55 = vld [vmem:[%s19721_s14 + $0xa68] sm:$0xff]  ;;  %v16500_v56 = vcombine.low %v957_v41, %v961_v43  ;;  %v1013_v43 = vld [vmem:[%s19721_s14 + $0xbc0] sm:$0xff] }
 0x160   : > { %11091 = vmatprep.subr.bf16.mxu0 %v16453_v57  ;;  %11665 = vmatprep.subr.bf16.mxu1 %v16455_v58  ;;  %v16502_v57 = vcombine.low %v958_v44, %v962_v46  ;;  %v16509_v58 = vcombine.high %v965_v51, %v969_v17  ;;  %v16511_v59 = vcombine.high %v966_v53, %v970_v55  ;;  %v1017_v44 = vld [vmem:[%s19721_s14 + $0xbe0] sm:$0xff] }
 0x161   : > { %v482_v46 = vcombine.high %v19911_v24, %v19911_v24  ;;  %v1022_v24 = vld [vmem:[%s19721_s14 + $0xc08] sm:$0xff] }
 0x163   : > { %11092 = vmatpush1.bf16.msra.mxu0 %v16452_v1  ;;  %11666 = vmatpush1.bf16.msra.mxu1 %v16454_v2  ;;  %v978_v1 = vld [vmem:[%s19721_s14 + $0xaa8] sm:$0xff]  ;;  %v16508_v2 = vcombine.low %v965_v51, %v969_v17  ;;  %v16557_v51 = vcombine.high %v1013_v43, %v1017_v44 }
 0x164   : > { %11093 = vmatprep.subr.bf16.mxu0 %v16461_v3  ;;  %11667 = vmatprep.subr.bf16.mxu1 %v16463_v4  ;;  %v16510_v3 = vcombine.low %v966_v53, %v970_v55  ;;  %v16517_v4 = vcombine.high %v973_v61, %v977_v62  ;;  %v16519_v5 = vcombine.high %v974_v63, %v978_v1  ;;  %v1021_v53 = vld [vmem:[%s19721_s14 + $0xc00] sm:$0xff] }
 0x165   : > { %v1025_v55 = vld [vmem:[%s19721_s14 + $0xc20] sm:$0xff] }
 0x167   : > { %11094 = vmatpush1.bf16.msra.mxu0 %v16460_v9  ;;  %11668 = vmatpush1.bf16.msra.mxu1 %v16462_v11  ;;  %v986_v9 = vld [vmem:[%s19721_s14 + $0xae8] sm:$0xff]  ;;  %v16516_v11 = vcombine.low %v973_v61, %v977_v62  ;;  %v16565_v61 = vcombine.high %v1021_v53, %v1025_v55 }
 0x168   : > { %11095 = vmatprep.subr.bf16.mxu0 %v16469_v12  ;;  %11669 = vmatprep.subr.bf16.mxu1 %v16471_v13  ;;  %v16518_v12 = vcombine.low %v974_v63, %v978_v1  ;;  %v16525_v13 = vcombine.high %v981_v6, %v985_v7  ;;  %v16527_v14 = vcombine.high %v982_v8, %v986_v9  ;;  %v1029_v63 = vld [vmem:[%s19721_s14 + $0xc40] sm:$0xff] }
 0x169   : > { %v1033_v1 = vld [vmem:[%s19721_s14 + $0xc60] sm:$0xff] }
 0x16b   : > { %11096 = vmatpush1.bf16.msra.mxu0 %v16468_v18  ;;  %11670 = vmatpush1.bf16.msra.mxu1 %v16470_v19  ;;  %v994_v18 = vld [vmem:[%s19721_s14 + $0xb28] sm:$0xff]  ;;  %v16524_v19 = vcombine.low %v981_v6, %v985_v7  ;;  %v16564_v6 = vcombine.low %v1021_v53, %v1025_v55 }
 0x16c   : > { %11097 = vmatprep.subr.bf16.mxu0 %v16477_v20  ;;  %11671 = vmatprep.subr.bf16.mxu1 %v16479_v21  ;;  %v16526_v20 = vcombine.low %v982_v8, %v986_v9  ;;  %v16533_v21 = vcombine.high %v989_v15, %v993_v16  ;;  %v16535_v22 = vcombine.high %v990_v60, %v994_v18 }
 0x16d   : > { %v16573_v8 = vcombine.high %v1029_v63, %v1033_v1 }
 0x16f   : > { %11098 = vmatpush1.bf16.msra.mxu0 %v16476_v28  ;;  %11672 = vmatpush1.bf16.msra.mxu1 %v16478_v29  ;;  %v1002_v28 = vld [vmem:[%s19721_s14 + $0xb68] sm:$0xff]  ;;  %v16532_v29 = vcombine.low %v989_v15, %v993_v16  ;;  %v16572_v15 = vcombine.low %v1029_v63, %v1033_v1 }
 0x170   : > { %11099 = vmatprep.subr.bf16.mxu0 %v16485_v30  ;;  %11673 = vmatprep.subr.bf16.mxu1 %v16487_v31  ;;  %v16534_v30 = vcombine.low %v990_v60, %v994_v18  ;;  %v16541_v31 = vcombine.high %v997_v23, %v1001_v25  ;;  %v16543_v33 = vcombine.high %v998_v27, %v1002_v28 }
 0x173   : > { %11100 = vmatpush1.bf16.msra.mxu0 %v16484_v37  ;;  %11674 = vmatpush1.bf16.msra.mxu1 %v16486_v38  ;;  %v1010_v37 = vld [vmem:[%s19721_s14 + $0xba8] sm:$0xff]  ;;  %v16540_v38 = vcombine.low %v997_v23, %v1001_v25 }
 0x174   : > { %11101 = vmatprep.subr.bf16.mxu0 %v16493_v39  ;;  %11675 = vmatprep.subr.bf16.mxu1 %v16495_v40  ;;  %v16542_v39 = vcombine.low %v998_v27, %v1002_v28  ;;  %v16549_v40 = vcombine.high %v1005_v34, %v1009_v0  ;;  %v16551_v41 = vcombine.high %v1006_v36, %v1010_v37 }
 0x177   : > { %11102 = vmatpush1.bf16.msra.mxu0 %v16492_v47  ;;  %11676 = vmatpush1.bf16.msra.mxu1 %v16494_v48  ;;  %v1014_v47 = vld [vmem:[%s19721_s14 + $0xbc8] sm:$0xff] }
 0x178   : > { %11103 = vmatprep.subr.bf16.mxu0 %v16501_v49  ;;  %11677 = vmatprep.subr.bf16.mxu1 %v16503_v50  ;;  %v1018_v48 = vld [vmem:[%s19721_s14 + $0xbe8] sm:$0xff]  ;;  %v16548_v49 = vcombine.low %v1005_v34, %v1009_v0  ;;  %v16550_v50 = vcombine.low %v1006_v36, %v1010_v37 }
 0x179   : > { %v16559_v17 = vcombine.high %v1014_v47, %v1018_v48 }
 0x17b   : > { %11104 = vmatpush1.bf16.msra.mxu0 %v16500_v56  ;;  %11678 = vmatpush1.bf16.msra.mxu1 %v16502_v57  ;;  %v19998_v56 = vrot.slane %v482_v46, %v19776_v54  ;;  %v1026_v57 = vld [vmem:[%s19721_s14 + $0xc28] sm:$0xff] }
 0x17c   : > { %11105 = vmatprep.subr.bf16.mxu0 %v16509_v58  ;;  %11679 = vmatprep.subr.bf16.mxu1 %v16511_v59  ;;  %v16556_v58 = vcombine.low %v1013_v43, %v1017_v44  ;;  %v16558_v59 = vcombine.low %v1014_v47, %v1018_v48  ;;  %v16567_v62 = vcombine.high %v1022_v24, %v1026_v57  ;;  %v1069_v48 = vld [vmem:[%s19721_s14 + $0xd80] sm:$0xff] }
 0x17d   : > { %v16566_v7 = vcombine.low %v1022_v24, %v1026_v57  ;;  %v1077_v57 = vld [vmem:[%s19721_s14 + $0xdc0] sm:$0xff] }
 0x17f   : > { %11106 = vmatpush1.bf16.msra.mxu0 %v16508_v2  ;;  %11680 = vmatpush1.bf16.msra.mxu1 %v16510_v3  ;;  %v498_v2 = vcombine.high %v19998_v56, %v19998_v56  ;;  %v20008_v3 = vpack.c.bf16 %v19917_v32, %v19917_v32  ;;  %v1038_v32 = vld [vmem:[%s19721_s14 + $0xc88] sm:$0xff] }
 0x180   : > { %11107 = vmatprep.subr.bf16.mxu0 %v16517_v4  ;;  %11681 = vmatprep.subr.bf16.mxu1 %v16519_v5  ;;  %v1030_v4 = vld [vmem:[%s19721_s14 + $0xc48] sm:$0xff] }
 0x181   : > { %v1034_v5 = vld [vmem:[%s19721_s14 + $0xc68] sm:$0xff] }
 0x182   : > { %v16575_v9 = vcombine.high %v1030_v4, %v1034_v5  ;;  %v16574_v16 = vcombine.low %v1030_v4, %v1034_v5  ;;  %v1085_v4 = vld [vmem:[%s19721_s14 + $0xe00] sm:$0xff] }
 0x183   : > { %11108 = vmatpush1.bf16.msra.mxu0 %v16516_v11  ;;  %11682 = vmatpush1.bf16.msra.mxu1 %v16518_v12  ;;  %v1037_v11 = vld [vmem:[%s19721_s14 + $0xc80] sm:$0xff] }
 0x184   : > { %11109 = vmatprep.subr.bf16.mxu0 %v16525_v13  ;;  %11683 = vmatprep.subr.bf16.mxu1 %v16527_v14  ;;  %v1041_v12 = vld [vmem:[%s19721_s14 + $0xca0] sm:$0xff]  ;;  %v20014_v13 = vpack.c.bf16 %v498_v2, %v498_v2  ;;  %v1042_v14 = vld [vmem:[%s19721_s14 + $0xca8] sm:$0xff] }
 0x185   : > { %v16581_v60 = vcombine.high %v1037_v11, %v1041_v12  ;;  %v16583_v18 = vcombine.high %v1038_v32, %v1042_v14  ;;  %v16580_v23 = vcombine.low %v1037_v11, %v1041_v12  ;;  %v16582_v25 = vcombine.low %v1038_v32, %v1042_v14  ;;  %v1089_v5 = vld [vmem:[%s19721_s14 + $0xe20] sm:$0xff] }
 0x186   : > { %v16629_v11 = vcombine.high %v1085_v4, %v1089_v5  ;;  %v1093_v32 = vld [vmem:[%s19721_s14 + $0xe40] sm:$0xff] }
 0x187   : > { %11110 = vmatpush1.bf16.msra.mxu0 %v16524_v19  ;;  %11684 = vmatpush1.bf16.msra.mxu1 %v16526_v20  ;;  %v1045_v19 = vld [vmem:[%s19721_s14 + $0xcc0] sm:$0xff] }
 0x188   : > { %11111 = vmatprep.subr.bf16.mxu0 %v16533_v21  ;;  %11685 = vmatprep.subr.bf16.mxu1 %v16535_v22  ;;  %v1049_v20 = vld [vmem:[%s19721_s14 + $0xce0] sm:$0xff]  ;;  %v1046_v21 = vld [vmem:[%s19721_s14 + $0xcc8] sm:$0xff] }
 0x189   : > { %v1050_v22 = vld [vmem:[%s19721_s14 + $0xce8] sm:$0xff]  ;;  %v16589_v27 = vcombine.high %v1045_v19, %v1049_v20  ;;  %v16588_v34 = vcombine.low %v1045_v19, %v1049_v20  ;;  %v1097_v14 = vld [vmem:[%s19721_s14 + $0xe60] sm:$0xff] }
 0x18a   : > { %v16591_v28 = vcombine.high %v1046_v21, %v1050_v22  ;;  %v16590_v0 = vcombine.low %v1046_v21, %v1050_v22  ;;  %v16637_v19 = vcombine.high %v1093_v32, %v1097_v14  ;;  %v1101_v21 = vld [vmem:[%s19721_s14 + $0xe80] sm:$0xff] }
 0x18b   : > { %11112 = vmatpush1.bf16.msra.mxu0 %v16532_v29  ;;  %11686 = vmatpush1.bf16.msra.mxu1 %v16534_v30  ;;  %v1053_v29 = vld [vmem:[%s19721_s14 + $0xd00] sm:$0xff] }
 0x18c   : > { %11113 = vmatprep.subr.bf16.mxu0 %v16541_v31  ;;  %11687 = vmatprep.subr.bf16.mxu1 %v16543_v33  ;;  %v1057_v30 = vld [vmem:[%s19721_s14 + $0xd20] sm:$0xff]  ;;  %v1054_v31 = vld [vmem:[%s19721_s14 + $0xd08] sm:$0xff] }
 0x18d   : > { %v1058_v33 = vld [vmem:[%s19721_s14 + $0xd28] sm:$0xff]  ;;  %v16597_v36 = vcombine.high %v1053_v29, %v1057_v30  ;;  %v16596_v43 = vcombine.low %v1053_v29, %v1057_v30  ;;  %v1105_v22 = vld [vmem:[%s19721_s14 + $0xea0] sm:$0xff] }
 0x18e   : > { %v16599_v37 = vcombine.high %v1054_v31, %v1058_v33  ;;  %v16598_v44 = vcombine.low %v1054_v31, %v1058_v33  ;;  %v16645_v29 = vcombine.high %v1101_v21, %v1105_v22  ;;  %v1109_v31 = vld [vmem:[%s19721_s14 + $0xec0] sm:$0xff] }
 0x18f   : > { %11114 = vmatpush1.bf16.msra.mxu0 %v16540_v38  ;;  %11688 = vmatpush1.bf16.msra.mxu1 %v16542_v39  ;;  %v1061_v38 = vld [vmem:[%s19721_s14 + $0xd40] sm:$0xff] }
 0x190   : > { %11115 = vmatprep.subr.bf16.mxu0 %v16549_v40  ;;  %11689 = vmatprep.subr.bf16.mxu1 %v16551_v41  ;;  %v1065_v39 = vld [vmem:[%s19721_s14 + $0xd60] sm:$0xff]  ;;  %v1062_v40 = vld [vmem:[%s19721_s14 + $0xd48] sm:$0xff] }
 0x191   : > { %v1066_v41 = vld [vmem:[%s19721_s14 + $0xd68] sm:$0xff]  ;;  %v16605_v46 = vcombine.high %v1061_v38, %v1065_v39  ;;  %v1113_v33 = vld [vmem:[%s19721_s14 + $0xee0] sm:$0xff] }
 0x192   : > { %v16607_v47 = vcombine.high %v1062_v40, %v1066_v41  ;;  %v16606_v53 = vcombine.low %v1062_v40, %v1066_v41  ;;  %v1117_v40 = vld [vmem:[%s19721_s14 + $0xf00] sm:$0xff] }
 0x193   : > { %11116 = vmatpush1.bf16.msra.mxu0 %v16548_v49  ;;  %11690 = vmatpush1.bf16.msra.mxu1 %v16550_v50  ;;  %v1073_v49 = vld [vmem:[%s19721_s14 + $0xda0] sm:$0xff]  ;;  %v1070_v50 = vld [vmem:[%s19721_s14 + $0xd88] sm:$0xff] }
 0x194   : > { %11117 = vmatprep.subr.bf16.mxu0 %v16557_v51  ;;  %11691 = vmatprep.subr.bf16.mxu1 %v16559_v17  ;;  %v1074_v51 = vld [vmem:[%s19721_s14 + $0xda8] sm:$0xff]  ;;  %v16604_v17 = vcombine.low %v1061_v38, %v1065_v39  ;;  %v16613_v55 = vcombine.high %v1069_v48, %v1073_v49  ;;  %v16653_v38 = vcombine.high %v1109_v31, %v1113_v33  ;;  %v1121_v41 = vld [vmem:[%s19721_s14 + $0xf20] sm:$0xff] }
 0x195   : > { %v16615_v24 = vcombine.high %v1070_v50, %v1074_v51  ;;  %v16614_v63 = vcombine.low %v1070_v50, %v1074_v51  ;;  %v1125_v50 = vld [vmem:[%s19721_s14 + $0xf40] sm:$0xff] }
 0x196   : > { %v1129_v51 = vld [vmem:[%s19721_s14 + $0xf60] sm:$0xff] }
 0x197   : > { %11118 = vmatpush1.bf16.msra.mxu0 %v16556_v58  ;;  %11692 = vmatpush1.bf16.msra.mxu1 %v16558_v59  ;;  %v1081_v58 = vld [vmem:[%s19721_s14 + $0xde0] sm:$0xff]  ;;  %v1078_v59 = vld [vmem:[%s19721_s14 + $0xdc8] sm:$0xff] }
 0x198   : > { %11128 = vmatprep.subr.bf16.mxu0 %v16565_v61  ;;  %11702 = vmatprep.subr.bf16.mxu1 %v16567_v62  ;;  %v1082_v61 = vld [vmem:[%s19721_s14 + $0xde8] sm:$0xff]  ;;  %v16612_v62 = vcombine.low %v1069_v48, %v1073_v49  ;;  %v16621_v1 = vcombine.high %v1077_v57, %v1081_v58  ;;  %v16661_v48 = vcombine.high %v1117_v40, %v1121_v41 }
 0x199   : > { %v16623_v2 = vcombine.high %v1078_v59, %v1082_v61 }
 0x19a   : > { %11120 = vmatmul.mubr.bf16.vlgmr.msra.gmra.mrb[0].mxu0 %v20008_v3  ;;  %11694 = vmatmul.mubr.bf16.vlgmr.msra.gmra.mrb[0].mxu1 %v20008_v3 }
 0x19b   : > { %11129 = vmatpush1.bf16.msra.mxu0 %v16564_v6  ;;  %11703 = vmatpush1.bf16.msra.mxu1 %v16566_v7  ;;  %v1086_v6 = vld [vmem:[%s19721_s14 + $0xe08] sm:$0xff] }
 0x19c   : > { %11130 = vmatprep.subr.bf16.mxu0 %v16573_v8  ;;  %11704 = vmatprep.subr.bf16.mxu1 %v16575_v9  ;;  %v1090_v7 = vld [vmem:[%s19721_s14 + $0xe28] sm:$0xff]  ;;  %v16620_v8 = vcombine.low %v1077_v57, %v1081_v58  ;;  %v16622_v9 = vcombine.low %v1078_v59, %v1082_v61  ;;  %v16669_v57 = vcombine.high %v1125_v50, %v1129_v51  ;;  %v1133_v59 = vld [vmem:[%s19721_s14 + $0xf80] sm:$0xff] }
 0x19d   : > { %11160 = vmatprep.mubr.bf16.mxu0 %v20014_v13  ;;  %11734 = vmatprep.mubr.bf16.mxu1 %v20014_v13  ;;  %v16631_v12 = vcombine.high %v1086_v6, %v1090_v7  ;;  %v1137_v61 = vld [vmem:[%s19721_s14 + $0xfa0] sm:$0xff] }
 0x19f   : > { %11131 = vmatpush1.bf16.msra.mxu0 %v16572_v15  ;;  %11705 = vmatpush1.bf16.msra.mxu1 %v16574_v16  ;;  %v1094_v15 = vld [vmem:[%s19721_s14 + $0xe48] sm:$0xff] }
 0x1a0   : > { %11132 = vmatprep.subr.bf16.mxu0 %v16581_v60  ;;  %11706 = vmatprep.subr.bf16.mxu1 %v16583_v18  ;;  %v1098_v16 = vld [vmem:[%s19721_s14 + $0xe68] sm:$0xff]  ;;  %v16628_v60 = vcombine.low %v1085_v4, %v1089_v5  ;;  %v16630_v18 = vcombine.low %v1086_v6, %v1090_v7  ;;  %v16677_v4 = vcombine.high %v1133_v59, %v1137_v61  ;;  %v1141_v6 = vld [vmem:[%s19721_s14 + $0xfc0] sm:$0xff] }
 0x1a1   : > { %v16639_v20 = vcombine.high %v1094_v15, %v1098_v16  ;;  %v1145_v7 = vld [vmem:[%s19721_s14 + $0xfe0] sm:$0xff] }
 0x1a3   : > { %11133 = vmatpush1.bf16.msra.mxu0 %v16580_v23  ;;  %11707 = vmatpush1.bf16.msra.mxu1 %v16582_v25  ;;  %v1102_v23 = vld [vmem:[%s19721_s14 + $0xe88] sm:$0xff] }
 0x1a4   : > { %11134 = vmatprep.subr.bf16.mxu0 %v16589_v27  ;;  %11708 = vmatprep.subr.bf16.mxu1 %v16591_v28  ;;  %v1106_v25 = vld [vmem:[%s19721_s14 + $0xea8] sm:$0xff]  ;;  %v16636_v27 = vcombine.low %v1093_v32, %v1097_v14  ;;  %v16638_v28 = vcombine.low %v1094_v15, %v1098_v16  ;;  %v16685_v14 = vcombine.high %v1141_v6, %v1145_v7  ;;  %v1149_v16 = vld [vmem:[%s19721_s14 + $0x1000] sm:$0xff] }
 0x1a5   : > { %v16647_v30 = vcombine.high %v1102_v23, %v1106_v25 }
 0x1a7   : > { %11135 = vmatpush1.bf16.msra.mxu0 %v16588_v34  ;;  %11709 = vmatpush1.bf16.msra.mxu1 %v16590_v0  ;;  %v1110_v34 = vld [vmem:[%s19721_s14 + $0xec8] sm:$0xff] }
 0x1a8   : > { %11136 = vmatprep.subr.bf16.mxu0 %v16597_v36  ;;  %11710 = vmatprep.subr.bf16.mxu1 %v16599_v37  ;;  %v1114_v0 = vld [vmem:[%s19721_s14 + $0xee8] sm:$0xff]  ;;  %v16644_v36 = vcombine.low %v1101_v21, %v1105_v22  ;;  %v16646_v37 = vcombine.low %v1102_v23, %v1106_v25  ;;  %v16684_v21 = vcombine.low %v1141_v6, %v1145_v7 }
 0x1a9   : > { %v16655_v39 = vcombine.high %v1110_v34, %v1114_v0  ;;  %v1190_v6 = vld [vmem:[%s19721_s14 + $0x1148] sm:$0xff] }
 0x1aa   : > { %v1194_v7 = vld [vmem:[%s19721_s14 + $0x1168] sm:$0xff] }
 0x1ab   : > { %11137 = vmatpush1.bf16.msra.mxu0 %v16596_v43  ;;  %11711 = vmatpush1.bf16.msra.mxu1 %v16598_v44  ;;  %v1118_v43 = vld [vmem:[%s19721_s14 + $0xf08] sm:$0xff] }
 0x1ac   : > { %11138 = vmatprep.subr.bf16.mxu0 %v16605_v46  ;;  %11712 = vmatprep.subr.bf16.mxu1 %v16607_v47  ;;  %v1122_v44 = vld [vmem:[%s19721_s14 + $0xf28] sm:$0xff]  ;;  %v16652_v46 = vcombine.low %v1109_v31, %v1113_v33  ;;  %v16654_v47 = vcombine.low %v1110_v34, %v1114_v0 }
 0x1ad   : > { %v16663_v49 = vcombine.high %v1118_v43, %v1122_v44  ;;  %v1158_v31 = vld [vmem:[%s19721_s14 + $0x1048] sm:$0xff] }
 0x1ae   : > { %v1162_v33 = vld [vmem:[%s19721_s14 + $0x1068] sm:$0xff] }
 0x1af   : > { %11139 = vmatpush1.bf16.msra.mxu0 %v16604_v17  ;;  %11713 = vmatpush1.bf16.msra.mxu1 %v16606_v53  ;;  %v1126_v17 = vld [vmem:[%s19721_s14 + $0xf48] sm:$0xff] }
 0x1b0   : > { %11140 = vmatprep.subr.bf16.mxu0 %v16613_v55  ;;  %11714 = vmatprep.subr.bf16.mxu1 %v16615_v24  ;;  %v1130_v53 = vld [vmem:[%s19721_s14 + $0xf68] sm:$0xff]  ;;  %v16660_v55 = vcombine.low %v1117_v40, %v1121_v41  ;;  %v16662_v24 = vcombine.low %v1118_v43, %v1122_v44  ;;  %v16702_v44 = vcombine.low %v1158_v31, %v1162_v33 }
 0x1b1   : > { %v16671_v58 = vcombine.high %v1126_v17, %v1130_v53  ;;  %v1170_v41 = vld [vmem:[%s19721_s14 + $0x10a8] sm:$0xff] }
 0x1b3   : > { %11141 = vmatpush1.bf16.msra.mxu0 %v16612_v62  ;;  %11715 = vmatpush1.bf16.msra.mxu1 %v16614_v63  ;;  %v1134_v62 = vld [vmem:[%s19721_s14 + $0xf88] sm:$0xff] }
 0x1b4   : > { %11142 = vmatprep.subr.bf16.mxu0 %v16621_v1  ;;  %11716 = vmatprep.subr.bf16.mxu1 %v16623_v2  ;;  %v1138_v63 = vld [vmem:[%s19721_s14 + $0xfa8] sm:$0xff]  ;;  %v16668_v1 = vcombine.low %v1125_v50, %v1129_v51  ;;  %v16670_v2 = vcombine.low %v1126_v17, %v1130_v53 }
 0x1b5   : > { %v16679_v5 = vcombine.high %v1134_v62, %v1138_v63  ;;  %v16678_v32 = vcombine.low %v1134_v62, %v1138_v63  ;;  %v1174_v50 = vld [vmem:[%s19721_s14 + $0x10c8] sm:$0xff] }
 0x1b6   : > { %v1178_v51 = vld [vmem:[%s19721_s14 + $0x10e8] sm:$0xff] }
 0x1b7   : > { %11143 = vmatpush1.bf16.msra.mxu0 %v16620_v8  ;;  %11717 = vmatpush1.bf16.msra.mxu1 %v16622_v9  ;;  %v1142_v8 = vld [vmem:[%s19721_s14 + $0xfc8] sm:$0xff]  ;;  %v16718_v63 = vcombine.low %v1174_v50, %v1178_v51 }
 0x1b8   : > { %11144 = vmatprep.subr.bf16.mxu0 %v16629_v11  ;;  %11718 = vmatprep.subr.bf16.mxu1 %v16631_v12  ;;  %v1146_v9 = vld [vmem:[%s19721_s14 + $0xfe8] sm:$0xff]  ;;  %v20075_v11 = vld [vmem:[%s19743_s25 + $0x10] sm:$0xff]  ;;  %v16676_v12 = vcombine.low %v1133_v59, %v1137_v61 }
 0x1b9   : > { %v16687_v15 = vcombine.high %v1142_v8, %v1146_v9  ;;  %v16686_v22 = vcombine.low %v1142_v8, %v1146_v9  ;;  %v1182_v59 = vld [vmem:[%s19721_s14 + $0x1108] sm:$0xff] }
 0x1ba   : > { %v1186_v61 = vld [vmem:[%s19721_s14 + $0x1128] sm:$0xff] }
 0x1bb   : > { %11145 = vmatpush1.bf16.msra.mxu0 %v16628_v60  ;;  %11719 = vmatpush1.bf16.msra.mxu1 %v16630_v18  ;;  %v1153_v60 = vld [vmem:[%s19721_s14 + $0x1020] sm:$0xff]  ;;  %v20081_v18 = vrot.slane %v20075_v11, %v19776_v54  ;;  %v16726_v9 = vcombine.low %v1182_v59, %v1186_v61 }
 0x1bc   : > { %11146 = vmatprep.subr.bf16.mxu0 %v16637_v19  ;;  %11720 = vmatprep.subr.bf16.mxu1 %v16639_v20  ;;  %v1150_v19 = vld [vmem:[%s19721_s14 + $0x1008] sm:$0xff]  ;;  %v16693_v23 = vcombine.high %v1149_v16, %v1153_v60  ;;  %v16692_v34 = vcombine.low %v1149_v16, %v1153_v60 }
 0x1bd   : > { %v1154_v20 = vld [vmem:[%s19721_s14 + $0x1028] sm:$0xff] }
 0x1be   : > { %v16695_v25 = vcombine.high %v1150_v19, %v1154_v20  ;;  %v16694_v0 = vcombine.low %v1150_v19, %v1154_v20  ;;  %v1198_v16 = vld [vmem:[%s19721_s14 + $0x1188] sm:$0xff]  ;;  %v16734_v20 = vcombine.low %v1190_v6, %v1194_v7 }
 0x1bf   : > { %11147 = vmatpush1.bf16.msra.mxu0 %v16636_v27  ;;  %11721 = vmatpush1.bf16.msra.mxu1 %v16638_v28  ;;  %v1157_v27 = vld [vmem:[%s19721_s14 + $0x1040] sm:$0xff]  ;;  %v1202_v60 = vld [vmem:[%s19721_s14 + $0x11a8] sm:$0xff] }
 0x1c0   : > { %11148 = vmatprep.subr.bf16.mxu0 %v16645_v29  ;;  %11722 = vmatprep.subr.bf16.mxu1 %v16647_v30  ;;  %v1161_v28 = vld [vmem:[%s19721_s14 + $0x1060] sm:$0xff]  ;;  %v514_v29 = vcombine.high %v20081_v18, %v20081_v18  ;;  %v20091_v30 = vpack.c.bf16 %v19998_v56, %v19998_v56  ;;  %v1166_v56 = vld [vmem:[%s19721_s14 + $0x1088] sm:$0xff] }
 0x1c1   : > { %v16700_v43 = vcombine.low %v1157_v27, %v1161_v28  ;;  %v16710_v53 = vcombine.low %v1166_v56, %v1170_v41 }
 0x1c2   : > { %v20097_v40 = vpack.c.bf16 %v514_v29, %v514_v29 }
 0x1c3   : > { %11149 = vmatpush1.bf16.msra.mxu0 %v16644_v36  ;;  %11723 = vmatpush1.bf16.msra.mxu1 %v16646_v37  ;;  %v16701_v36 = vcombine.high %v1157_v27, %v1161_v28  ;;  %v16703_v37 = vcombine.high %v1158_v31, %v1162_v33  ;;  %v1206_v27 = vld [vmem:[%s19721_s14 + $0x11c8] sm:$0xff]  ;;  %v16742_v31 = vcombine.low %v1198_v16, %v1202_v60 }
 0x1c4   : > { %11150 = vmatprep.subr.bf16.mxu0 %v16653_v38  ;;  %11724 = vmatprep.subr.bf16.mxu1 %v16655_v39  ;;  %v1165_v38 = vld [vmem:[%s19721_s14 + $0x1080] sm:$0xff]  ;;  %v1210_v28 = vld [vmem:[%s19721_s14 + $0x11e8] sm:$0xff] }
 0x1c5   : > { %v1169_v39 = vld [vmem:[%s19721_s14 + $0x10a0] sm:$0xff] }
 0x1c6   : > { %v16708_v17 = vcombine.low %v1165_v38, %v1169_v39 }
 0x1c7   : > { %11151 = vmatpush1.bf16.msra.mxu0 %v16652_v46  ;;  %11725 = vmatpush1.bf16.msra.mxu1 %v16654_v47  ;;  %v16709_v46 = vcombine.high %v1165_v38, %v1169_v39  ;;  %v16711_v47 = vcombine.high %v1166_v56, %v1170_v41  ;;  %v1218_v38 = vld [vmem:[%s19721_s14 + $0x1228] sm:$0xff]  ;;  %v16750_v56 = vcombine.low %v1206_v27, %v1210_v28 }
 0x1c8   : > { %11152 = vmatprep.subr.bf16.mxu0 %v16661_v48  ;;  %11726 = vmatprep.subr.bf16.mxu1 %v16663_v49  ;;  %v1173_v48 = vld [vmem:[%s19721_s14 + $0x10c0] sm:$0xff] }
 0x1c9   : > { %v1177_v49 = vld [vmem:[%s19721_s14 + $0x10e0] sm:$0xff] }
 0x1ca   : > { %v16716_v62 = vcombine.low %v1173_v48, %v1177_v49 }
 0x1cb   : > { %11153 = vmatpush1.bf16.msra.mxu0 %v16660_v55  ;;  %11727 = vmatpush1.bf16.msra.mxu1 %v16662_v24  ;;  %v16717_v55 = vcombine.high %v1173_v48, %v1177_v49  ;;  %v16719_v24 = vcombine.high %v1174_v50, %v1178_v51  ;;  %v1226_v48 = vld [vmem:[%s19721_s14 + $0x1268] sm:$0xff] }
 0x1cc   : > { %11154 = vmatprep.subr.bf16.mxu0 %v16669_v57  ;;  %11728 = vmatprep.subr.bf16.mxu1 %v16671_v58  ;;  %v1181_v57 = vld [vmem:[%s19721_s14 + $0x1100] sm:$0xff] }
 0x1cd   : > { %v1185_v58 = vld [vmem:[%s19721_s14 + $0x1120] sm:$0xff] }
 0x1ce   : > { %v16724_v8 = vcombine.low %v1181_v57, %v1185_v58 }
 0x1cf   : > { %11155 = vmatpush1.bf16.msra.mxu0 %v16668_v1  ;;  %11729 = vmatpush1.bf16.msra.mxu1 %v16670_v2  ;;  %v16725_v1 = vcombine.high %v1181_v57, %v1185_v58  ;;  %v16727_v2 = vcombine.high %v1182_v59, %v1186_v61  ;;  %v1234_v57 = vld [vmem:[%s19721_s14 + $0x12a8] sm:$0xff] }
 0x1d0   : > { %11156 = vmatprep.subr.bf16.mxu0 %v16677_v4  ;;  %11730 = vmatprep.subr.bf16.mxu1 %v16679_v5  ;;  %v1189_v4 = vld [vmem:[%s19721_s14 + $0x1140] sm:$0xff] }
 0x1d1   : > { %v1193_v5 = vld [vmem:[%s19721_s14 + $0x1160] sm:$0xff] }
 0x1d2   : > { %v16732_v19 = vcombine.low %v1189_v4, %v1193_v5 }
 0x1d3   : > { %11157 = vmatpush1.bf16.msra.mxu0 %v16676_v12  ;;  %11731 = vmatpush1.bf16.msra.mxu1 %v16678_v32  ;;  %v16733_v12 = vcombine.high %v1189_v4, %v1193_v5  ;;  %v16735_v32 = vcombine.high %v1190_v6, %v1194_v7  ;;  %v1242_v4 = vld [vmem:[%s19721_s14 + $0x12e8] sm:$0xff] }
 0x1d4   : > { %11158 = vmatprep.subr.bf16.mxu0 %v16685_v14  ;;  %11732 = vmatprep.subr.bf16.mxu1 %v16687_v15  ;;  %v1197_v14 = vld [vmem:[%s19721_s14 + $0x1180] sm:$0xff] }
 0x1d5   : > { %v1201_v15 = vld [vmem:[%s19721_s14 + $0x11a0] sm:$0xff] }
 0x1d6   : > { %v16740_v29 = vcombine.low %v1197_v14, %v1201_v15 }
 0x1d7   : > { %11159 = vmatpush1.bf16.msra.mxu0 %v16684_v21  ;;  %11733 = vmatpush1.bf16.msra.mxu1 %v16686_v22  ;;  %v16741_v21 = vcombine.high %v1197_v14, %v1201_v15  ;;  %v16743_v22 = vcombine.high %v1198_v16, %v1202_v60  ;;  %v1250_v14 = vld [vmem:[%s19721_s14 + $0x1328] sm:$0xff] }
 0x1d8   : > { %11169 = vmatprep.subr.bf16.mxu0 %v16693_v23  ;;  %11743 = vmatprep.subr.bf16.mxu1 %v16695_v25  ;;  %v1205_v23 = vld [vmem:[%s19721_s14 + $0x11c0] sm:$0xff] }
 0x1d9   : > { %v1209_v25 = vld [vmem:[%s19721_s14 + $0x11e0] sm:$0xff] }
 0x1da   : > { %11161 = vmatmul.mubr.bf16.vlgmr.msra.gmra.mrb[0].mxu0 %v20091_v30  ;;  %11735 = vmatmul.mubr.bf16.vlgmr.msra.gmra.mrb[0].mxu1 %v20091_v30  ;;  %v16749_v33 = vcombine.high %v1205_v23, %v1209_v25  ;;  %v16748_v39 = vcombine.low %v1205_v23, %v1209_v25  ;;  %v1258_v23 = vld [vmem:[%s19721_s14 + $0x1368] sm:$0xff] }
 0x1db   : > { %11170 = vmatpush1.bf16.msra.mxu0 %v16692_v34  ;;  %11744 = vmatpush1.bf16.msra.mxu1 %v16694_v0  ;;  %v16751_v34 = vcombine.high %v1206_v27, %v1210_v28  ;;  %v1213_v0 = vld [vmem:[%s19721_s14 + $0x1200] sm:$0xff] }
 0x1dc   : > { %11171 = vmatprep.subr.bf16.mxu0 %v16701_v36  ;;  %11745 = vmatprep.subr.bf16.mxu1 %v16703_v37  ;;  %v1217_v36 = vld [vmem:[%s19721_s14 + $0x1220] sm:$0xff]  ;;  %v1214_v37 = vld [vmem:[%s19721_s14 + $0x1208] sm:$0xff] }
 0x1dd   : > { %11201 = vmatprep.mubr.bf16.mxu0 %v20097_v40  ;;  %11775 = vmatprep.mubr.bf16.mxu1 %v20097_v40  ;;  %v16757_v41 = vcombine.high %v1213_v0, %v1217_v36  ;;  %v16756_v49 = vcombine.low %v1213_v0, %v1217_v36  ;;  %v16758_v50 = vcombine.low %v1214_v37, %v1218_v38  ;;  %v1266_v0 = vld [vmem:[%s19721_s14 + $0x13a8] sm:$0xff] }
 0x1df   : > { %11172 = vmatpush1.bf16.msra.mxu0 %v16700_v43  ;;  %11746 = vmatpush1.bf16.msra.mxu1 %v16702_v44  ;;  %v16759_v43 = vcombine.high %v1214_v37, %v1218_v38  ;;  %v1221_v44 = vld [vmem:[%s19721_s14 + $0x1240] sm:$0xff] }
 0x1e0   : > { %11173 = vmatprep.subr.bf16.mxu0 %v16709_v46  ;;  %11747 = vmatprep.subr.bf16.mxu1 %v16711_v47  ;;  %v1225_v46 = vld [vmem:[%s19721_s14 + $0x1260] sm:$0xff]  ;;  %v1222_v47 = vld [vmem:[%s19721_s14 + $0x1248] sm:$0xff] }
 0x1e1   : > { %v16765_v51 = vcombine.high %v1221_v44, %v1225_v46  ;;  %v16764_v58 = vcombine.low %v1221_v44, %v1225_v46  ;;  %v16766_v59 = vcombine.low %v1222_v47, %v1226_v48  ;;  %v1270_v44 = vld [vmem:[%s19721_s14 + $0x13c8] sm:$0xff] }
 0x1e2   : > { %v1274_v46 = vld [vmem:[%s19721_s14 + $0x13e8] sm:$0xff] }
 0x1e3   : > { %11174 = vmatpush1.bf16.msra.mxu0 %v16708_v17  ;;  %11748 = vmatpush1.bf16.msra.mxu1 %v16710_v53  ;;  %v16767_v17 = vcombine.high %v1222_v47, %v1226_v48  ;;  %v1229_v53 = vld [vmem:[%s19721_s14 + $0x1280] sm:$0xff] }
 0x1e4   : > { %11175 = vmatprep.subr.bf16.mxu0 %v16717_v55  ;;  %11749 = vmatprep.subr.bf16.mxu1 %v16719_v24  ;;  %v1233_v55 = vld [vmem:[%s19721_s14 + $0x12a0] sm:$0xff]  ;;  %v1230_v24 = vld [vmem:[%s19721_s14 + $0x1288] sm:$0xff] }
 0x1e5   : > { %v16773_v61 = vcombine.high %v1229_v53, %v1233_v55  ;;  %v16772_v5 = vcombine.low %v1229_v53, %v1233_v55  ;;  %v16774_v6 = vcombine.low %v1230_v24, %v1234_v57  ;;  %v1282_v55 = vld [vmem:[%s19721_s14 + $0x1428] sm:$0xff] }
 0x1e7   : > { %11176 = vmatpush1.bf16.msra.mxu0 %v16716_v62  ;;  %11750 = vmatpush1.bf16.msra.mxu1 %v16718_v63  ;;  %v16775_v62 = vcombine.high %v1230_v24, %v1234_v57  ;;  %v1237_v63 = vld [vmem:[%s19721_s14 + $0x12c0] sm:$0xff]  ;;  %v16814_v57 = vcombine.low %v1270_v44, %v1274_v46 }
 0x1e8   : > { %11177 = vmatprep.subr.bf16.mxu0 %v16725_v1  ;;  %11751 = vmatprep.subr.bf16.mxu1 %v16727_v2  ;;  %v1241_v1 = vld [vmem:[%s19721_s14 + $0x12e0] sm:$0xff]  ;;  %v1238_v2 = vld [vmem:[%s19721_s14 + $0x12c8] sm:$0xff] }
 0x1e9   : > { %v16781_v7 = vcombine.high %v1237_v63, %v1241_v1  ;;  %v16780_v15 = vcombine.low %v1237_v63, %v1241_v1  ;;  %v16782_v16 = vcombine.low %v1238_v2, %v1242_v4  ;;  %v20172_v1 = vpack.c.bf16 %v20081_v18, %v20081_v18  ;;  %v1294_v18 = vld [vmem:[%s19721_s14 + $0x1488] sm:$0xff] }
 0x1eb   : > { %11178 = vmatpush1.bf16.msra.mxu0 %v16724_v8  ;;  %11752 = vmatpush1.bf16.msra.mxu1 %v16726_v9  ;;  %v16783_v8 = vcombine.high %v1238_v2, %v1242_v4  ;;  %v1245_v9 = vld [vmem:[%s19721_s14 + $0x1300] sm:$0xff]  ;;  %v1286_v2 = vld [vmem:[%s19721_s14 + $0x1448] sm:$0xff] }
 0x1ec   : > { %11179 = vmatprep.subr.bf16.mxu0 %v16733_v12  ;;  %11753 = vmatprep.subr.bf16.mxu1 %v16735_v32  ;;  %v1249_v12 = vld [vmem:[%s19721_s14 + $0x1320] sm:$0xff]  ;;  %v1246_v32 = vld [vmem:[%s19721_s14 + $0x1308] sm:$0xff] }
 0x1ed   : > { %v16789_v60 = vcombine.high %v1245_v9, %v1249_v12  ;;  %v16788_v25 = vcombine.low %v1245_v9, %v1249_v12  ;;  %v16790_v27 = vcombine.low %v1246_v32, %v1250_v14  ;;  %v1290_v4 = vld [vmem:[%s19721_s14 + $0x1468] sm:$0xff]  ;;  %v1293_v9 = vld [vmem:[%s19721_s14 + $0x1480] sm:$0xff] }
 0x1ee   : > { %v1297_v12 = vld [vmem:[%s19721_s14 + $0x14a0] sm:$0xff] }
 0x1ef   : > { %11180 = vmatpush1.bf16.msra.mxu0 %v16732_v19  ;;  %11754 = vmatpush1.bf16.msra.mxu1 %v16734_v20  ;;  %v16791_v19 = vcombine.high %v1246_v32, %v1250_v14  ;;  %v1253_v20 = vld [vmem:[%s19721_s14 + $0x1340] sm:$0xff]  ;;  %v1298_v14 = vld [vmem:[%s19721_s14 + $0x14a8] sm:$0xff] }
 0x1f0   : > { %11181 = vmatprep.subr.bf16.mxu0 %v16741_v21  ;;  %11755 = vmatprep.subr.bf16.mxu1 %v16743_v22  ;;  %v1257_v21 = vld [vmem:[%s19721_s14 + $0x1360] sm:$0xff]  ;;  %v1254_v22 = vld [vmem:[%s19721_s14 + $0x1348] sm:$0xff] }
 0x1f1   : > { %v16797_v28 = vcombine.high %v1253_v20, %v1257_v21  ;;  %v16796_v36 = vcombine.low %v1253_v20, %v1257_v21  ;;  %v16798_v37 = vcombine.low %v1254_v22, %v1258_v23  ;;  %v1301_v20 = vld [vmem:[%s19721_s14 + $0x14c0] sm:$0xff] }
 0x1f2   : > { %v1305_v21 = vld [vmem:[%s19721_s14 + $0x14e0] sm:$0xff] }
 0x1f3   : > { %11182 = vmatpush1.bf16.msra.mxu0 %v16740_v29  ;;  %11756 = vmatpush1.bf16.msra.mxu1 %v16742_v31  ;;  %v16799_v29 = vcombine.high %v1254_v22, %v1258_v23  ;;  %v1261_v31 = vld [vmem:[%s19721_s14 + $0x1380] sm:$0xff]  ;;  %v1302_v22 = vld [vmem:[%s19721_s14 + $0x14c8] sm:$0xff] }
 0x1f4   : > { %11183 = vmatprep.subr.bf16.mxu0 %v16749_v33  ;;  %11757 = vmatprep.subr.bf16.mxu1 %v16751_v34  ;;  %v1265_v33 = vld [vmem:[%s19721_s14 + $0x13a0] sm:$0xff]  ;;  %v1262_v34 = vld [vmem:[%s19721_s14 + $0x1388] sm:$0xff] }
 0x1f5   : > { %v16805_v38 = vcombine.high %v1261_v31, %v1265_v33  ;;  %v16804_v47 = vcombine.low %v1261_v31, %v1265_v33  ;;  %v16806_v48 = vcombine.low %v1262_v34, %v1266_v0  ;;  %v1306_v23 = vld [vmem:[%s19721_s14 + $0x14e8] sm:$0xff]  ;;  %v1309_v31 = vld [vmem:[%s19721_s14 + $0x1500] sm:$0xff] }
 0x1f6   : > { %v1313_v33 = vld [vmem:[%s19721_s14 + $0x1520] sm:$0xff] }
 0x1f7   : > { %11184 = vmatpush1.bf16.msra.mxu0 %v16748_v39  ;;  %11758 = vmatpush1.bf16.msra.mxu1 %v16750_v56  ;;  %v16807_v39 = vcombine.high %v1262_v34, %v1266_v0  ;;  %v1269_v56 = vld [vmem:[%s19721_s14 + $0x13c0] sm:$0xff]  ;;  %v1310_v34 = vld [vmem:[%s19721_s14 + $0x1508] sm:$0xff] }
 0x1f8   : > { %11185 = vmatprep.subr.bf16.mxu0 %v16757_v41  ;;  %11759 = vmatprep.subr.bf16.mxu1 %v16759_v43  ;;  %v1273_v41 = vld [vmem:[%s19721_s14 + $0x13e0] sm:$0xff]  ;;  %v499_v43 = vcombine.high %v20075_v11, %v20075_v11  ;;  %v1278_v11 = vld [vmem:[%s19721_s14 + $0x1408] sm:$0xff] }
 0x1f9   : > { %v16812_v24 = vcombine.low %v1269_v56, %v1273_v41  ;;  %v1314_v0 = vld [vmem:[%s19721_s14 + $0x1528] sm:$0xff] }
 0x1fa   : > { %v20162_v53 = vrot.slane %v499_v43, %v19776_v54  ;;  %v1318_v43 = vld [vmem:[%s19721_s14 + $0x1548] sm:$0xff] }
 0x1fb   : > { %11186 = vmatpush1.bf16.msra.mxu0 %v16756_v49  ;;  %11760 = vmatpush1.bf16.msra.mxu1 %v16758_v50  ;;  %v16813_v49 = vcombine.high %v1269_v56, %v1273_v41  ;;  %v16815_v50 = vcombine.high %v1270_v44, %v1274_v46  ;;  %v1317_v56 = vld [vmem:[%s19721_s14 + $0x1540] sm:$0xff]  ;;  %v1322_v44 = vld [vmem:[%s19721_s14 + $0x1568] sm:$0xff]  ;;  %v16852_v46 = vcombine.low %v1309_v31, %v1313_v33 }
 0x1fc   : > { %11187 = vmatprep.subr.bf16.mxu0 %v16765_v51  ;;  %11761 = vmatprep.subr.bf16.mxu1 %v16767_v17  ;;  %v1277_v51 = vld [vmem:[%s19721_s14 + $0x1400] sm:$0xff]  ;;  %v515_v63 = vcombine.high %v20162_v53, %v20162_v53 }
 0x1fd   : > { %v1281_v17 = vld [vmem:[%s19721_s14 + $0x1420] sm:$0xff] }
 0x1fe   : > { %v20178_v32 = vpack.c.bf16 %v515_v63, %v515_v63  ;;  %v1321_v41 = vld [vmem:[%s19721_s14 + $0x1560] sm:$0xff]  ;;  %v1338_v63 = vld [vmem:[%s19721_s14 + $0x15e8] sm:$0xff] }
 0x1ff   : > { %11188 = vmatpush1.bf16.msra.mxu0 %v16764_v58  ;;  %11762 = vmatpush1.bf16.msra.mxu1 %v16766_v59  ;;  %v16821_v58 = vcombine.high %v1277_v51, %v1281_v17  ;;  %v16823_v59 = vcombine.high %v1278_v11, %v1282_v55 }
 0x200   : > { %11189 = vmatprep.subr.bf16.mxu0 %v16773_v61  ;;  %11763 = vmatprep.subr.bf16.mxu1 %v16775_v62  ;;  %v1285_v61 = vld [vmem:[%s19721_s14 + $0x1440] sm:$0xff] }
 0x201   : > { %v1289_v62 = vld [vmem:[%s19721_s14 + $0x1460] sm:$0xff] }
 0x203   : > { %11190 = vmatpush1.bf16.msra.mxu0 %v16772_v5  ;;  %11764 = vmatpush1.bf16.msra.mxu1 %v16774_v6  ;;  %v16820_v5 = vcombine.low %v1277_v51, %v1281_v17  ;;  %v16822_v6 = vcombine.low %v1278_v11, %v1282_v55  ;;  %v1329_v51 = vld [vmem:[%s19721_s14 + $0x15a0] sm:$0xff]  ;;  %v1326_v17 = vld [vmem:[%s19721_s14 + $0x1588] sm:$0xff]  ;;  %v16860_v55 = vcombine.low %v1317_v56, %v1321_v41 }
 0x204   : > { %11191 = vmatprep.subr.bf16.mxu0 %v16781_v7  ;;  %11765 = vmatprep.subr.bf16.mxu1 %v16783_v8  ;;  %v16829_v7 = vcombine.high %v1285_v61, %v1289_v62  ;;  %v16831_v8 = vcombine.high %v1286_v2, %v1290_v4  ;;  %v1330_v11 = vld [vmem:[%s19721_s14 + $0x15a8] sm:$0xff] }
 0x207   : > { %11192 = vmatpush1.bf16.msra.mxu0 %v16780_v15  ;;  %11766 = vmatpush1.bf16.msra.mxu1 %v16782_v16  ;;  %v16828_v15 = vcombine.low %v1285_v61, %v1289_v62  ;;  %v16830_v16 = vcombine.low %v1286_v2, %v1290_v4  ;;  %v1337_v61 = vld [vmem:[%s19721_s14 + $0x15e0] sm:$0xff]  ;;  %v1334_v62 = vld [vmem:[%s19721_s14 + $0x15c8] sm:$0xff]  ;;  %v16870_v4 = vcombine.low %v1326_v17, %v1330_v11 }
 0x208   : > { %11193 = vmatprep.subr.bf16.mxu0 %v16789_v60  ;;  %11767 = vmatprep.subr.bf16.mxu1 %v16791_v19  ;;  %v16837_v60 = vcombine.high %v1293_v9, %v1297_v12  ;;  %v16839_v19 = vcombine.high %v1294_v18, %v1298_v14 }
 0x20b   : > { %11194 = vmatpush1.bf16.msra.mxu0 %v16788_v25  ;;  %11768 = vmatpush1.bf16.msra.mxu1 %v16790_v27  ;;  %v16836_v25 = vcombine.low %v1293_v9, %v1297_v12  ;;  %v16838_v27 = vcombine.low %v1294_v18, %v1298_v14  ;;  %v1342_v9 = vld [vmem:[%s19721_s14 + $0x1608] sm:$0xff]  ;;  %v16878_v14 = vcombine.low %v1334_v62, %v1338_v63 }
 0x20c   : > { %11195 = vmatprep.subr.bf16.mxu0 %v16797_v28  ;;  %11769 = vmatprep.subr.bf16.mxu1 %v16799_v29  ;;  %v16845_v28 = vcombine.high %v1301_v20, %v1305_v21  ;;  %v16847_v29 = vcombine.high %v1302_v22, %v1306_v23  ;;  %v1346_v12 = vld [vmem:[%s19721_s14 + $0x1628] sm:$0xff] }
 0x20f   : > { %11196 = vmatpush1.bf16.msra.mxu0 %v16796_v36  ;;  %11770 = vmatpush1.bf16.msra.mxu1 %v16798_v37  ;;  %v16844_v36 = vcombine.low %v1301_v20, %v1305_v21  ;;  %v16846_v37 = vcombine.low %v1302_v22, %v1306_v23  ;;  %v1350_v20 = vld [vmem:[%s19721_s14 + $0x1648] sm:$0xff]  ;;  %v16886_v23 = vcombine.low %v1342_v9, %v1346_v12 }
 0x210   : > { %11197 = vmatprep.subr.bf16.mxu0 %v16805_v38  ;;  %11771 = vmatprep.subr.bf16.mxu1 %v16807_v39  ;;  %v16853_v38 = vcombine.high %v1309_v31, %v1313_v33  ;;  %v16855_v39 = vcombine.high %v1310_v34, %v1314_v0  ;;  %v1354_v21 = vld [vmem:[%s19721_s14 + $0x1668] sm:$0xff] }
 0x211   : > { %v1358_v31 = vld [vmem:[%s19721_s14 + $0x1688] sm:$0xff] }
 0x212   : > { %v1362_v33 = vld [vmem:[%s19721_s14 + $0x16a8] sm:$0xff] }
 0x213   : > { %11198 = vmatpush1.bf16.msra.mxu0 %v16804_v47  ;;  %11772 = vmatpush1.bf16.msra.mxu1 %v16806_v48  ;;  %v16854_v47 = vcombine.low %v1310_v34, %v1314_v0  ;;  %v16861_v48 = vcombine.high %v1317_v56, %v1321_v41  ;;  %v16894_v0 = vcombine.low %v1350_v20, %v1354_v21  ;;  %v1366_v56 = vld [vmem:[%s19721_s14 + $0x16c8] sm:$0xff] }
 0x214   : > { %11199 = vmatprep.subr.bf16.mxu0 %v16813_v49  ;;  %11773 = vmatprep.subr.bf16.mxu1 %v16815_v50  ;;  %v16863_v49 = vcombine.high %v1318_v43, %v1322_v44  ;;  %v1325_v50 = vld [vmem:[%s19721_s14 + $0x1580] sm:$0xff]  ;;  %v1370_v41 = vld [vmem:[%s19721_s14 + $0x16e8] sm:$0xff] }
 0x215   : > { %v16868_v2 = vcombine.low %v1325_v50, %v1329_v51 }
 0x217   : > { %11200 = vmatpush1.bf16.msra.mxu0 %v16812_v24  ;;  %11774 = vmatpush1.bf16.msra.mxu1 %v16814_v57  ;;  %v16862_v24 = vcombine.low %v1318_v43, %v1322_v44  ;;  %v16869_v57 = vcombine.high %v1325_v50, %v1329_v51  ;;  %v16902_v44 = vcombine.low %v1358_v31, %v1362_v33  ;;  %v1374_v50 = vld [vmem:[%s19721_s14 + $0x1708] sm:$0xff] }
 0x218   : > { %11210 = vmatprep.subr.bf16.mxu0 %v16821_v58  ;;  %11784 = vmatprep.subr.bf16.mxu1 %v16823_v59  ;;  %v16871_v58 = vcombine.high %v1326_v17, %v1330_v11  ;;  %v1333_v59 = vld [vmem:[%s19721_s14 + $0x15c0] sm:$0xff]  ;;  %v1378_v51 = vld [vmem:[%s19721_s14 + $0x1728] sm:$0xff]  ;;  %v16910_v11 = vcombine.low %v1366_v56, %v1370_v41 }
 0x219   : > { %v16876_v18 = vcombine.low %v1333_v59, %v1337_v61 }
 0x21a   : > { %11202 = vmatmul.mubr.bf16.vlgmr.msra.gmra.mrb[0].mxu0 %v20172_v1  ;;  %11776 = vmatmul.mubr.bf16.vlgmr.msra.gmra.mrb[0].mxu1 %v20172_v1 }
 0x21b   : > { %11211 = vmatpush1.bf16.msra.mxu0 %v16820_v5  ;;  %11785 = vmatpush1.bf16.msra.mxu1 %v16822_v6  ;;  %v16877_v5 = vcombine.high %v1333_v59, %v1337_v61  ;;  %v16879_v6 = vcombine.high %v1334_v62, %v1338_v63  ;;  %v1382_v59 = vld [vmem:[%s19721_s14 + $0x1748] sm:$0xff]  ;;  %v16918_v63 = vcombine.low %v1374_v50, %v1378_v51 }
 0x21c   : > { %11212 = vmatprep.subr.bf16.mxu0 %v16829_v7  ;;  %11786 = vmatprep.subr.bf16.mxu1 %v16831_v8  ;;  %v1341_v7 = vld [vmem:[%s19721_s14 + $0x1600] sm:$0xff]  ;;  %v1386_v61 = vld [vmem:[%s19721_s14 + $0x1768] sm:$0xff] }
 0x21d   : > { %11242 = vmatprep.mubr.bf16.mxu0 %v20178_v32  ;;  %11816 = vmatprep.mubr.bf16.mxu1 %v20178_v32  ;;  %v1345_v8 = vld [vmem:[%s19721_s14 + $0x1620] sm:$0xff] }
 0x21e   : > { %v16884_v22 = vcombine.low %v1341_v7, %v1345_v8 }
 0x21f   : > { %11213 = vmatpush1.bf16.msra.mxu0 %v16828_v15  ;;  %11787 = vmatpush1.bf16.msra.mxu1 %v16830_v16  ;;  %v16885_v15 = vcombine.high %v1341_v7, %v1345_v8  ;;  %v16887_v16 = vcombine.high %v1342_v9, %v1346_v12  ;;  %v1390_v7 = vld [vmem:[%s19721_s14 + $0x1788] sm:$0xff]  ;;  %v16926_v12 = vcombine.low %v1382_v59, %v1386_v61 }
 0x220   : > { %11214 = vmatprep.subr.bf16.mxu0 %v16837_v60  ;;  %11788 = vmatprep.subr.bf16.mxu1 %v16839_v19  ;;  %v1349_v60 = vld [vmem:[%s19721_s14 + $0x1640] sm:$0xff]  ;;  %v1394_v8 = vld [vmem:[%s19721_s14 + $0x17a8] sm:$0xff] }
 0x221   : > { %v1353_v19 = vld [vmem:[%s19721_s14 + $0x1660] sm:$0xff] }
 0x222   : > { %v16892_v34 = vcombine.low %v1349_v60, %v1353_v19 }
 0x223   : > { %11215 = vmatpush1.bf16.msra.mxu0 %v16836_v25  ;;  %11789 = vmatpush1.bf16.msra.mxu1 %v16838_v27  ;;  %v16893_v25 = vcombine.high %v1349_v60, %v1353_v19  ;;  %v16895_v27 = vcombine.high %v1350_v20, %v1354_v21  ;;  %v1398_v60 = vld [vmem:[%s19721_s14 + $0x17c8] sm:$0xff] }
 0x224   : > { %11216 = vmatprep.subr.bf16.mxu0 %v16845_v28  ;;  %11790 = vmatprep.subr.bf16.mxu1 %v16847_v29  ;;  %v1357_v28 = vld [vmem:[%s19721_s14 + $0x1680] sm:$0xff]  ;;  %v1402_v19 = vld [vmem:[%s19721_s14 + $0x17e8] sm:$0xff] }
 0x225   : > { %v1361_v29 = vld [vmem:[%s19721_s14 + $0x16a0] sm:$0xff]  ;;  %v20239_v20 = vld [vmem:[%s19743_s25 + $0x18] sm:$0xff] }
 0x226   : > { %v16900_v43 = vcombine.low %v1357_v28, %v1361_v29 }
 0x227   : > { %11217 = vmatpush1.bf16.msra.mxu0 %v16844_v36  ;;  %11791 = vmatpush1.bf16.msra.mxu1 %v16846_v37  ;;  %v16901_v36 = vcombine.high %v1357_v28, %v1361_v29  ;;  %v16903_v37 = vcombine.high %v1358_v31, %v1362_v33  ;;  %v1409_v28 = vld [vmem:[%s19721_s14 + $0x1820] sm:$0xff]  ;;  %v20245_v29 = vrot.slane %v20239_v20, %v19776_v54  ;;  %v1406_v31 = vld [vmem:[%s19721_s14 + $0x1808] sm:$0xff] }
 0x228   : > { %11218 = vmatprep.subr.bf16.mxu0 %v16853_v38  ;;  %11792 = vmatprep.subr.bf16.mxu1 %v16855_v39  ;;  %v1365_v38 = vld [vmem:[%s19721_s14 + $0x16c0] sm:$0xff]  ;;  %v1410_v33 = vld [vmem:[%s19721_s14 + $0x1828] sm:$0xff] }
 0x229   : > { %v1369_v39 = vld [vmem:[%s19721_s14 + $0x16e0] sm:$0xff] }
 0x22a   : > { %v16908_v17 = vcombine.low %v1365_v38, %v1369_v39 }
 0x22b   : > { %11219 = vmatpush1.bf16.msra.mxu0 %v16852_v46  ;;  %11793 = vmatpush1.bf16.msra.mxu1 %v16854_v47  ;;  %v16909_v46 = vcombine.high %v1365_v38, %v1369_v39  ;;  %v16911_v47 = vcombine.high %v1366_v56, %v1370_v41  ;;  %v1413_v38 = vld [vmem:[%s19721_s14 + $0x1840] sm:$0xff]  ;;  %v531_v56 = vcombine.high %v20245_v29, %v20245_v29 }
 0x22c   : > { %11220 = vmatprep.subr.bf16.mxu0 %v16861_v48  ;;  %11794 = vmatprep.subr.bf16.mxu1 %v16863_v49  ;;  %v1373_v48 = vld [vmem:[%s19721_s14 + $0x1700] sm:$0xff]  ;;  %v20255_v41 = vpack.c.bf16 %v20162_v53, %v20162_v53  ;;  %v1422_v53 = vld [vmem:[%s19721_s14 + $0x1888] sm:$0xff] }
 0x22d   : > { %v1377_v49 = vld [vmem:[%s19721_s14 + $0x1720] sm:$0xff] }
 0x22e   : > { %v16916_v62 = vcombine.low %v1373_v48, %v1377_v49  ;;  %v1417_v39 = vld [vmem:[%s19721_s14 + $0x1860] sm:$0xff] }
 0x22f   : > { %11221 = vmatpush1.bf16.msra.mxu0 %v16860_v55  ;;  %11795 = vmatpush1.bf16.msra.mxu1 %v16862_v24  ;;  %v16917_v55 = vcombine.high %v1373_v48, %v1377_v49  ;;  %v16919_v24 = vcombine.high %v1374_v50, %v1378_v51  ;;  %v16957_v48 = vcombine.high %v1413_v38, %v1417_v39  ;;  %v1421_v50 = vld [vmem:[%s19721_s14 + $0x1880] sm:$0xff] }
 0x230   : > { %11222 = vmatprep.subr.bf16.mxu0 %v16869_v57  ;;  %11796 = vmatprep.subr.bf16.mxu1 %v16871_v58  ;;  %v1381_v57 = vld [vmem:[%s19721_s14 + $0x1740] sm:$0xff] }
 0x231   : > { %v1385_v58 = vld [vmem:[%s19721_s14 + $0x1760] sm:$0xff] }
 0x232   : > { %v16924_v9 = vcombine.low %v1381_v57, %v1385_v58  ;;  %v1425_v51 = vld [vmem:[%s19721_s14 + $0x18a0] sm:$0xff] }
 0x233   : > { %11223 = vmatpush1.bf16.msra.mxu0 %v16868_v2  ;;  %11797 = vmatpush1.bf16.msra.mxu1 %v16870_v4  ;;  %v16925_v2 = vcombine.high %v1381_v57, %v1385_v58  ;;  %v16927_v4 = vcombine.high %v1382_v59, %v1386_v61  ;;  %v16965_v57 = vcombine.high %v1421_v50, %v1425_v51  ;;  %v1429_v59 = vld [vmem:[%s19721_s14 + $0x18c0] sm:$0xff] }
 0x234   : > { %11224 = vmatprep.subr.bf16.mxu0 %v16877_v5  ;;  %11798 = vmatprep.subr.bf16.mxu1 %v16879_v6  ;;  %v1389_v5 = vld [vmem:[%s19721_s14 + $0x1780] sm:$0xff] }
 0x235   : > { %v1393_v6 = vld [vmem:[%s19721_s14 + $0x17a0] sm:$0xff] }
 0x236   : > { %v16932_v21 = vcombine.low %v1389_v5, %v1393_v6  ;;  %v1433_v61 = vld [vmem:[%s19721_s14 + $0x18e0] sm:$0xff] }
 0x237   : > { %11225 = vmatpush1.bf16.msra.mxu0 %v16876_v18  ;;  %11799 = vmatpush1.bf16.msra.mxu1 %v16878_v14  ;;  %v16933_v18 = vcombine.high %v1389_v5, %v1393_v6  ;;  %v16935_v14 = vcombine.high %v1390_v7, %v1394_v8  ;;  %v16973_v5 = vcombine.high %v1429_v59, %v1433_v61 }
 0x238   : > { %11226 = vmatprep.subr.bf16.mxu0 %v16885_v15  ;;  %11800 = vmatprep.subr.bf16.mxu1 %v16887_v16  ;;  %v1397_v15 = vld [vmem:[%s19721_s14 + $0x17c0] sm:$0xff] }
 0x239   : > { %v1401_v16 = vld [vmem:[%s19721_s14 + $0x17e0] sm:$0xff] }
 0x23b   : > { %11227 = vmatpush1.bf16.msra.mxu0 %v16884_v22  ;;  %11801 = vmatpush1.bf16.msra.mxu1 %v16886_v23  ;;  %v16934_v22 = vcombine.low %v1390_v7, %v1394_v8  ;;  %v16941_v23 = vcombine.high %v1397_v15, %v1401_v16  ;;  %v1437_v7 = vld [vmem:[%s19721_s14 + $0x1900] sm:$0xff] }
 0x23c   : > { %11228 = vmatprep.subr.bf16.mxu0 %v16893_v25  ;;  %11802 = vmatprep.subr.bf16.mxu1 %v16895_v27  ;;  %v16943_v25 = vcombine.high %v1398_v60, %v1402_v19  ;;  %v1405_v27 = vld [vmem:[%s19721_s14 + $0x1800] sm:$0xff] }
 0x23d   : > { %v1441_v8 = vld [vmem:[%s19721_s14 + $0x1920] sm:$0xff] }
 0x23f   : > { %11229 = vmatpush1.bf16.msra.mxu0 %v16892_v34  ;;  %11803 = vmatpush1.bf16.msra.mxu1 %v16894_v0  ;;  %v16940_v34 = vcombine.low %v1397_v15, %v1401_v16  ;;  %v16942_v0 = vcombine.low %v1398_v60, %v1402_v19  ;;  %v16981_v15 = vcombine.high %v1437_v7, %v1441_v8  ;;  %v1445_v60 = vld [vmem:[%s19721_s14 + $0x1940] sm:$0xff] }
 0x240   : > { %11230 = vmatprep.subr.bf16.mxu0 %v16901_v36  ;;  %11804 = vmatprep.subr.bf16.mxu1 %v16903_v37  ;;  %v16949_v36 = vcombine.high %v1405_v27, %v1409_v28  ;;  %v16951_v37 = vcombine.high %v1406_v31, %v1410_v33  ;;  %v1449_v19 = vld [vmem:[%s19721_s14 + $0x1960] sm:$0xff] }
 0x243   : > { %11231 = vmatpush1.bf16.msra.mxu0 %v16900_v43  ;;  %11805 = vmatpush1.bf16.msra.mxu1 %v16902_v44  ;;  %v1414_v43 = vld [vmem:[%s19721_s14 + $0x1848] sm:$0xff] }
 0x244   : > { %11232 = vmatprep.subr.bf16.mxu0 %v16909_v46  ;;  %11806 = vmatprep.subr.bf16.mxu1 %v16911_v47  ;;  %v1418_v44 = vld [vmem:[%s19721_s14 + $0x1868] sm:$0xff]  ;;  %v16948_v46 = vcombine.low %v1405_v27, %v1409_v28  ;;  %v16950_v47 = vcombine.low %v1406_v31, %v1410_v33  ;;  %v16989_v27 = vcombine.high %v1445_v60, %v1449_v19  ;;  %v1453_v31 = vld [vmem:[%s19721_s14 + $0x1980] sm:$0xff] }
 0x245   : > { %v16959_v49 = vcombine.high %v1414_v43, %v1418_v44  ;;  %v1457_v33 = vld [vmem:[%s19721_s14 + $0x19a0] sm:$0xff] }
 0x247   : > { %11233 = vmatpush1.bf16.msra.mxu0 %v16908_v17  ;;  %11807 = vmatpush1.bf16.msra.mxu1 %v16910_v11  ;;  %v20261_v17 = vpack.c.bf16 %v531_v56, %v531_v56  ;;  %v1426_v11 = vld [vmem:[%s19721_s14 + $0x18a8] sm:$0xff]  ;;  %v1461_v56 = vld [vmem:[%s19721_s14 + $0x19c0] sm:$0xff] }
 0x248   : > { %11234 = vmatprep.subr.bf16.mxu0 %v16917_v55  ;;  %11808 = vmatprep.subr.bf16.mxu1 %v16919_v24  ;;  %v16956_v55 = vcombine.low %v1413_v38, %v1417_v39  ;;  %v16958_v24 = vcombine.low %v1414_v43, %v1418_v44  ;;  %v16967_v58 = vcombine.high %v1422_v53, %v1426_v11  ;;  %v1465_v43 = vld [vmem:[%s19721_s14 + $0x19e0] sm:$0xff]  ;;  %v1462_v44 = vld [vmem:[%s19721_s14 + $0x19c8] sm:$0xff] }
 0x249   : > { %v16997_v38 = vcombine.high %v1453_v31, %v1457_v33 }
 0x24b   : > { %11235 = vmatpush1.bf16.msra.mxu0 %v16916_v62  ;;  %11809 = vmatpush1.bf16.msra.mxu1 %v16918_v63  ;;  %v1430_v62 = vld [vmem:[%s19721_s14 + $0x18c8] sm:$0xff] }
 0x24c   : > { %11236 = vmatprep.subr.bf16.mxu0 %v16925_v2  ;;  %11810 = vmatprep.subr.bf16.mxu1 %v16927_v4  ;;  %v1434_v63 = vld [vmem:[%s19721_s14 + $0x18e8] sm:$0xff]  ;;  %v16964_v2 = vcombine.low %v1421_v50, %v1425_v51  ;;  %v16966_v4 = vcombine.low %v1422_v53, %v1426_v11  ;;  %v1469_v51 = vld [vmem:[%s19721_s14 + $0x1a00] sm:$0xff] }
 0x24d   : > { %v16975_v6 = vcombine.high %v1430_v62, %v1434_v63  ;;  %v1473_v53 = vld [vmem:[%s19721_s14 + $0x1a20] sm:$0xff]  ;;  %v1470_v11 = vld [vmem:[%s19721_s14 + $0x1a08] sm:$0xff] }
 0x24f   : > { %11237 = vmatpush1.bf16.msra.mxu0 %v16924_v9  ;;  %11811 = vmatpush1.bf16.msra.mxu1 %v16926_v12  ;;  %v1438_v9 = vld [vmem:[%s19721_s14 + $0x1908] sm:$0xff] }
 0x250   : > { %11238 = vmatprep.subr.bf16.mxu0 %v16933_v18  ;;  %11812 = vmatprep.subr.bf16.mxu1 %v16935_v14  ;;  %v1442_v12 = vld [vmem:[%s19721_s14 + $0x1928] sm:$0xff]  ;;  %v16972_v18 = vcombine.low %v1429_v59, %v1433_v61  ;;  %v16974_v14 = vcombine.low %v1430_v62, %v1434_v63  ;;  %v1477_v61 = vld [vmem:[%s19721_s14 + $0x1a40] sm:$0xff] }
 0x251   : > { %v16983_v16 = vcombine.high %v1438_v9, %v1442_v12  ;;  %v1481_v62 = vld [vmem:[%s19721_s14 + $0x1a60] sm:$0xff]  ;;  %v1478_v63 = vld [vmem:[%s19721_s14 + $0x1a48] sm:$0xff] }
 0x253   : > { %11239 = vmatpush1.bf16.msra.mxu0 %v16932_v21  ;;  %11813 = vmatpush1.bf16.msra.mxu1 %v16934_v22  ;;  %v1446_v21 = vld [vmem:[%s19721_s14 + $0x1948] sm:$0xff] }
 0x254   : > { %11240 = vmatprep.subr.bf16.mxu0 %v16941_v23  ;;  %11814 = vmatprep.subr.bf16.mxu1 %v16943_v25  ;;  %v1450_v22 = vld [vmem:[%s19721_s14 + $0x1968] sm:$0xff]  ;;  %v16980_v23 = vcombine.low %v1437_v7, %v1441_v8  ;;  %v16982_v25 = vcombine.low %v1438_v9, %v1442_v12  ;;  %v1485_v8 = vld [vmem:[%s19721_s14 + $0x1a80] sm:$0xff] }
 0x255   : > { %v16991_v28 = vcombine.high %v1446_v21, %v1450_v22  ;;  %v1489_v9 = vld [vmem:[%s19721_s14 + $0x1aa0] sm:$0xff]  ;;  %v1486_v12 = vld [vmem:[%s19721_s14 + $0x1a88] sm:$0xff] }
 0x257   : > { %11241 = vmatpush1.bf16.msra.mxu0 %v16940_v34  ;;  %11815 = vmatpush1.bf16.msra.mxu1 %v16942_v0  ;;  %v1454_v34 = vld [vmem:[%s19721_s14 + $0x1988] sm:$0xff] }
 0x258   : > { %11251 = vmatprep.subr.bf16.mxu0 %v16949_v36  ;;  %11825 = vmatprep.subr.bf16.mxu1 %v16951_v37  ;;  %v1458_v0 = vld [vmem:[%s19721_s14 + $0x19a8] sm:$0xff]  ;;  %v16988_v36 = vcombine.low %v1445_v60, %v1449_v19  ;;  %v16990_v37 = vcombine.low %v1446_v21, %v1450_v22  ;;  %v1493_v19 = vld [vmem:[%s19721_s14 + $0x1ac0] sm:$0xff] }
 0x259   : > { %v16999_v39 = vcombine.high %v1454_v34, %v1458_v0  ;;  %v1497_v21 = vld [vmem:[%s19721_s14 + $0x1ae0] sm:$0xff]  ;;  %v1494_v22 = vld [vmem:[%s19721_s14 + $0x1ac8] sm:$0xff] }
 0x25a   : > { %11243 = vmatmul.mubr.bf16.vlgmr.msra.gmra.mrb[0].mxu0 %v20255_v41  ;;  %11817 = vmatmul.mubr.bf16.vlgmr.msra.gmra.mrb[0].mxu1 %v20255_v41 }
 0x25b   : > { %11252 = vmatpush1.bf16.msra.mxu0 %v16948_v46  ;;  %11826 = vmatpush1.bf16.msra.mxu1 %v16950_v47  ;;  %v1466_v46 = vld [vmem:[%s19721_s14 + $0x19e8] sm:$0xff]  ;;  %v16996_v47 = vcombine.low %v1453_v31, %v1457_v33  ;;  %v1501_v33 = vld [vmem:[%s19721_s14 + $0x1b00] sm:$0xff] }
 0x25c   : > { %11253 = vmatprep.subr.bf16.mxu0 %v16957_v48  ;;  %11827 = vmatprep.subr.bf16.mxu1 %v16959_v49  ;;  %v16998_v48 = vcombine.low %v1454_v34, %v1458_v0  ;;  %v17005_v49 = vcombine.high %v1461_v56, %v1465_v43  ;;  %v17007_v50 = vcombine.high %v1462_v44, %v1466_v46  ;;  %v1505_v34 = vld [vmem:[%s19721_s14 + $0x1b20] sm:$0xff]  ;;  %v1502_v0 = vld [vmem:[%s19721_s14 + $0x1b08] sm:$0xff] }
 0x25d   : > { %11283 = vmatprep.mubr.bf16.mxu0 %v20261_v17  ;;  %11857 = vmatprep.mubr.bf16.mxu1 %v20261_v17 }
 0x25f   : > { %11254 = vmatpush1.bf16.msra.mxu0 %v16956_v55  ;;  %11828 = vmatpush1.bf16.msra.mxu1 %v16958_v24  ;;  %v1474_v55 = vld [vmem:[%s19721_s14 + $0x1a28] sm:$0xff]  ;;  %v17004_v24 = vcombine.low %v1461_v56, %v1465_v43  ;;  %v1509_v43 = vld [vmem:[%s19721_s14 + $0x1b40] sm:$0xff] }
 0x260   : > { %11255 = vmatprep.subr.bf16.mxu0 %v16965_v57  ;;  %11829 = vmatprep.subr.bf16.mxu1 %v16967_v58  ;;  %v17006_v57 = vcombine.low %v1462_v44, %v1466_v46  ;;  %v17013_v58 = vcombine.high %v1469_v51, %v1473_v53  ;;  %v17015_v59 = vcombine.high %v1470_v11, %v1474_v55  ;;  %v1513_v44 = vld [vmem:[%s19721_s14 + $0x1b60] sm:$0xff]  ;;  %v1510_v46 = vld [vmem:[%s19721_s14 + $0x1b48] sm:$0xff] }
 0x263   : > { %11256 = vmatpush1.bf16.msra.mxu0 %v16964_v2  ;;  %11830 = vmatpush1.bf16.msra.mxu1 %v16966_v4  ;;  %v1482_v2 = vld [vmem:[%s19721_s14 + $0x1a68] sm:$0xff]  ;;  %v17012_v4 = vcombine.low %v1469_v51, %v1473_v53  ;;  %v1517_v53 = vld [vmem:[%s19721_s14 + $0x1b80] sm:$0xff] }
 0x264   : > { %11257 = vmatprep.subr.bf16.mxu0 %v16973_v5  ;;  %11831 = vmatprep.subr.bf16.mxu1 %v16975_v6  ;;  %v17014_v5 = vcombine.low %v1470_v11, %v1474_v55  ;;  %v17021_v6 = vcombine.high %v1477_v61, %v1481_v62  ;;  %v17023_v7 = vcombine.high %v1478_v63, %v1482_v2  ;;  %v1521_v11 = vld [vmem:[%s19721_s14 + $0x1ba0] sm:$0xff]  ;;  %v1518_v55 = vld [vmem:[%s19721_s14 + $0x1b88] sm:$0xff] }
 0x267   : > { %11258 = vmatpush1.bf16.msra.mxu0 %v16972_v18  ;;  %11832 = vmatpush1.bf16.msra.mxu1 %v16974_v14  ;;  %v1490_v18 = vld [vmem:[%s19721_s14 + $0x1aa8] sm:$0xff]  ;;  %v17020_v14 = vcombine.low %v1477_v61, %v1481_v62  ;;  %v1525_v62 = vld [vmem:[%s19721_s14 + $0x1bc0] sm:$0xff] }
 0x268   : > { %11259 = vmatprep.subr.bf16.mxu0 %v16981_v15  ;;  %11833 = vmatprep.subr.bf16.mxu1 %v16983_v16  ;;  %v17022_v15 = vcombine.low %v1478_v63, %v1482_v2  ;;  %v17029_v16 = vcombine.high %v1485_v8, %v1489_v9  ;;  %v17031_v60 = vcombine.high %v1486_v12, %v1490_v18  ;;  %v1529_v63 = vld [vmem:[%s19721_s14 + $0x1be0] sm:$0xff] }
 0x269   : > { %v516_v2 = vcombine.high %v20239_v20, %v20239_v20  ;;  %v1534_v20 = vld [vmem:[%s19721_s14 + $0x1c08] sm:$0xff] }
 0x26b   : > { %11260 = vmatpush1.bf16.msra.mxu0 %v16980_v23  ;;  %11834 = vmatpush1.bf16.msra.mxu1 %v16982_v25  ;;  %v1498_v23 = vld [vmem:[%s19721_s14 + $0x1ae8] sm:$0xff]  ;;  %v17028_v25 = vcombine.low %v1485_v8, %v1489_v9  ;;  %v17069_v8 = vcombine.high %v1525_v62, %v1529_v63 }
 0x26c   : > { %11261 = vmatprep.subr.bf16.mxu0 %v16989_v27  ;;  %11835 = vmatprep.subr.bf16.mxu1 %v16991_v28  ;;  %v17030_v27 = vcombine.low %v1486_v12, %v1490_v18  ;;  %v17037_v28 = vcombine.high %v1493_v19, %v1497_v21  ;;  %v17039_v31 = vcombine.high %v1494_v22, %v1498_v23  ;;  %v1533_v12 = vld [vmem:[%s19721_s14 + $0x1c00] sm:$0xff] }
 0x26d   : > { %v1537_v18 = vld [vmem:[%s19721_s14 + $0x1c20] sm:$0xff] }
 0x26f   : > { %11262 = vmatpush1.bf16.msra.mxu0 %v16988_v36  ;;  %11836 = vmatpush1.bf16.msra.mxu1 %v16990_v37  ;;  %v1506_v36 = vld [vmem:[%s19721_s14 + $0x1b28] sm:$0xff]  ;;  %v17036_v37 = vcombine.low %v1493_v19, %v1497_v21  ;;  %v17077_v19 = vcombine.high %v1533_v12, %v1537_v18 }
 0x270   : > { %11263 = vmatprep.subr.bf16.mxu0 %v16997_v38  ;;  %11837 = vmatprep.subr.bf16.mxu1 %v16999_v39  ;;  %v17038_v38 = vcombine.low %v1494_v22, %v1498_v23  ;;  %v17045_v39 = vcombine.high %v1501_v33, %v1505_v34  ;;  %v17047_v56 = vcombine.high %v1502_v0, %v1506_v36  ;;  %v1541_v22 = vld [vmem:[%s19721_s14 + $0x1c40] sm:$0xff] }
 0x271   : > { %v1545_v23 = vld [vmem:[%s19721_s14 + $0x1c60] sm:$0xff] }
 0x273   : > { %11264 = vmatpush1.bf16.msra.mxu0 %v16996_v47  ;;  %11838 = vmatpush1.bf16.msra.mxu1 %v16998_v48  ;;  %v1514_v47 = vld [vmem:[%s19721_s14 + $0x1b68] sm:$0xff]  ;;  %v17044_v48 = vcombine.low %v1501_v33, %v1505_v34  ;;  %v17076_v33 = vcombine.low %v1533_v12, %v1537_v18 }
 0x274   : > { %11265 = vmatprep.subr.bf16.mxu0 %v17005_v49  ;;  %11839 = vmatprep.subr.bf16.mxu1 %v17007_v50  ;;  %v17046_v49 = vcombine.low %v1502_v0, %v1506_v36  ;;  %v17053_v50 = vcombine.high %v1509_v43, %v1513_v44  ;;  %v17055_v51 = vcombine.high %v1510_v46, %v1514_v47 }
 0x275   : > { %v17085_v0 = vcombine.high %v1541_v22, %v1545_v23 }
 0x277   : > { %11266 = vmatpush1.bf16.msra.mxu0 %v17004_v24  ;;  %11840 = vmatpush1.bf16.msra.mxu1 %v17006_v57  ;;  %v1522_v24 = vld [vmem:[%s19721_s14 + $0x1ba8] sm:$0xff]  ;;  %v17052_v57 = vcombine.low %v1509_v43, %v1513_v44  ;;  %v17084_v43 = vcombine.low %v1541_v22, %v1545_v23 }
 0x278   : > { %11267 = vmatprep.subr.bf16.mxu0 %v17013_v58  ;;  %11841 = vmatprep.subr.bf16.mxu1 %v17015_v59  ;;  %v17054_v58 = vcombine.low %v1510_v46, %v1514_v47  ;;  %v17061_v59 = vcombine.high %v1517_v53, %v1521_v11  ;;  %v17063_v61 = vcombine.high %v1518_v55, %v1522_v24 }
 0x27b   : > { %11268 = vmatpush1.bf16.msra.mxu0 %v17012_v4  ;;  %11842 = vmatpush1.bf16.msra.mxu1 %v17014_v5  ;;  %v1526_v4 = vld [vmem:[%s19721_s14 + $0x1bc8] sm:$0xff] }
 0x27c   : > { %11269 = vmatprep.subr.bf16.mxu0 %v17021_v6  ;;  %11843 = vmatprep.subr.bf16.mxu1 %v17023_v7  ;;  %v1530_v5 = vld [vmem:[%s19721_s14 + $0x1be8] sm:$0xff]  ;;  %v17060_v6 = vcombine.low %v1517_v53, %v1521_v11  ;;  %v17062_v7 = vcombine.low %v1518_v55, %v1522_v24 }
 0x27d   : > { %v17071_v9 = vcombine.high %v1526_v4, %v1530_v5 }
 0x27f   : > { %11270 = vmatpush1.bf16.msra.mxu0 %v17020_v14  ;;  %11844 = vmatpush1.bf16.msra.mxu1 %v17022_v15  ;;  %v20326_v14 = vrot.slane %v516_v2, %v19776_v54  ;;  %v1538_v15 = vld [vmem:[%s19721_s14 + $0x1c28] sm:$0xff] }
 0x280   : > { %11271 = vmatprep.subr.bf16.mxu0 %v17029_v16  ;;  %11845 = vmatprep.subr.bf16.mxu1 %v17031_v60  ;;  %v17068_v16 = vcombine.low %v1525_v62, %v1529_v63  ;;  %v17070_v60 = vcombine.low %v1526_v4, %v1530_v5  ;;  %v17079_v21 = vcombine.high %v1534_v20, %v1538_v15  ;;  %v1573_v5 = vld [vmem:[%s19721_s14 + $0x1d40] sm:$0xff] }
 0x281   : > { %v17078_v34 = vcombine.low %v1534_v20, %v1538_v15  ;;  %v1581_v15 = vld [vmem:[%s19721_s14 + $0x1d80] sm:$0xff] }
 0x283   : > { %11272 = vmatpush1.bf16.msra.mxu0 %v17028_v25  ;;  %11846 = vmatpush1.bf16.msra.mxu1 %v17030_v27  ;;  %v532_v25 = vcombine.high %v20326_v14, %v20326_v14  ;;  %v20336_v27 = vpack.c.bf16 %v20245_v29, %v20245_v29  ;;  %v1550_v29 = vld [vmem:[%s19721_s14 + $0x1c88] sm:$0xff] }
 0x284   : > { %11273 = vmatprep.subr.bf16.mxu0 %v17037_v28  ;;  %11847 = vmatprep.subr.bf16.mxu1 %v17039_v31  ;;  %v1542_v28 = vld [vmem:[%s19721_s14 + $0x1c48] sm:$0xff] }
 0x285   : > { %v1546_v31 = vld [vmem:[%s19721_s14 + $0x1c68] sm:$0xff] }
 0x286   : > { %v17087_v36 = vcombine.high %v1542_v28, %v1546_v31  ;;  %v17086_v44 = vcombine.low %v1542_v28, %v1546_v31  ;;  %v1589_v28 = vld [vmem:[%s19721_s14 + $0x1dc0] sm:$0xff] }
 0x287   : > { %11274 = vmatpush1.bf16.msra.mxu0 %v17036_v37  ;;  %11848 = vmatpush1.bf16.msra.mxu1 %v17038_v38  ;;  %v1549_v37 = vld [vmem:[%s19721_s14 + $0x1c80] sm:$0xff] }
 0x288   : > { %11275 = vmatprep.subr.bf16.mxu0 %v17045_v39  ;;  %11849 = vmatprep.subr.bf16.mxu1 %v17047_v56  ;;  %v1553_v38 = vld [vmem:[%s19721_s14 + $0x1ca0] sm:$0xff]  ;;  %v20342_v39 = vpack.c.bf16 %v532_v25, %v532_v25  ;;  %v1554_v56 = vld [vmem:[%s19721_s14 + $0x1ca8] sm:$0xff] }
 0x289   : > { %v17093_v46 = vcombine.high %v1549_v37, %v1553_v38  ;;  %v17095_v47 = vcombine.high %v1550_v29, %v1554_v56  ;;  %v17092_v53 = vcombine.low %v1549_v37, %v1553_v38  ;;  %v17094_v11 = vcombine.low %v1550_v29, %v1554_v56  ;;  %v1593_v31 = vld [vmem:[%s19721_s14 + $0x1de0] sm:$0xff] }
 0x28a   : > { %v17133_v37 = vcombine.high %v1589_v28, %v1593_v31  ;;  %v1597_v29 = vld [vmem:[%s19721_s14 + $0x1e00] sm:$0xff] }
 0x28b   : > { %11276 = vmatpush1.bf16.msra.mxu0 %v17044_v48  ;;  %11850 = vmatpush1.bf16.msra.mxu1 %v17046_v49  ;;  %v1557_v48 = vld [vmem:[%s19721_s14 + $0x1cc0] sm:$0xff] }
 0x28c   : > { %11277 = vmatprep.subr.bf16.mxu0 %v17053_v50  ;;  %11851 = vmatprep.subr.bf16.mxu1 %v17055_v51  ;;  %v1561_v49 = vld [vmem:[%s19721_s14 + $0x1ce0] sm:$0xff]  ;;  %v1558_v50 = vld [vmem:[%s19721_s14 + $0x1cc8] sm:$0xff] }
 0x28d   : > { %v1562_v51 = vld [vmem:[%s19721_s14 + $0x1ce8] sm:$0xff]  ;;  %v17101_v55 = vcombine.high %v1557_v48, %v1561_v49  ;;  %v17100_v62 = vcombine.low %v1557_v48, %v1561_v49  ;;  %v1601_v56 = vld [vmem:[%s19721_s14 + $0x1e20] sm:$0xff] }
 0x28e   : > { %v17103_v24 = vcombine.high %v1558_v50, %v1562_v51  ;;  %v17102_v63 = vcombine.low %v1558_v50, %v1562_v51  ;;  %v17141_v48 = vcombine.high %v1597_v29, %v1601_v56  ;;  %v1605_v50 = vld [vmem:[%s19721_s14 + $0x1e40] sm:$0xff] }
 0x28f   : > { %11278 = vmatpush1.bf16.msra.mxu0 %v17052_v57  ;;  %11852 = vmatpush1.bf16.msra.mxu1 %v17054_v58  ;;  %v1565_v57 = vld [vmem:[%s19721_s14 + $0x1d00] sm:$0xff] }
 0x290   : > { %11279 = vmatprep.subr.bf16.mxu0 %v17061_v59  ;;  %11853 = vmatprep.subr.bf16.mxu1 %v17063_v61  ;;  %v1569_v58 = vld [vmem:[%s19721_s14 + $0x1d20] sm:$0xff]  ;;  %v1566_v59 = vld [vmem:[%s19721_s14 + $0x1d08] sm:$0xff] }
 0x291   : > { %v1570_v61 = vld [vmem:[%s19721_s14 + $0x1d28] sm:$0xff]  ;;  %v17109_v2 = vcombine.high %v1565_v57, %v1569_v58  ;;  %v1609_v51 = vld [vmem:[%s19721_s14 + $0x1e60] sm:$0xff] }
 0x292   : > { %v17111_v4 = vcombine.high %v1566_v59, %v1570_v61  ;;  %v17110_v12 = vcombine.low %v1566_v59, %v1570_v61  ;;  %v1613_v59 = vld [vmem:[%s19721_s14 + $0x1e80] sm:$0xff] }
 0x293   : > { %11280 = vmatpush1.bf16.msra.mxu0 %v17060_v6  ;;  %11854 = vmatpush1.bf16.msra.mxu1 %v17062_v7  ;;  %v1577_v6 = vld [vmem:[%s19721_s14 + $0x1d60] sm:$0xff]  ;;  %v1574_v7 = vld [vmem:[%s19721_s14 + $0x1d48] sm:$0xff] }
 0x294   : > { %11281 = vmatprep.subr.bf16.mxu0 %v17069_v8  ;;  %11855 = vmatprep.subr.bf16.mxu1 %v17071_v9  ;;  %v1578_v8 = vld [vmem:[%s19721_s14 + $0x1d68] sm:$0xff]  ;;  %v17108_v9 = vcombine.low %v1565_v57, %v1569_v58  ;;  %v17117_v18 = vcombine.high %v1573_v5, %v1577_v6  ;;  %v17149_v57 = vcombine.high %v1605_v50, %v1609_v51  ;;  %v1617_v61 = vld [vmem:[%s19721_s14 + $0x1ea0] sm:$0xff] }
 0x295   : > { %v17119_v20 = vcombine.high %v1574_v7, %v1578_v8  ;;  %v17118_v22 = vcombine.low %v1574_v7, %v1578_v8  ;;  %v1621_v7 = vld [vmem:[%s19721_s14 + $0x1ec0] sm:$0xff] }
 0x296   : > { %v1625_v8 = vld [vmem:[%s19721_s14 + $0x1ee0] sm:$0xff] }
 0x297   : > { %11282 = vmatpush1.bf16.msra.mxu0 %v17068_v16  ;;  %11856 = vmatpush1.bf16.msra.mxu1 %v17070_v60  ;;  %v1585_v16 = vld [vmem:[%s19721_s14 + $0x1da0] sm:$0xff]  ;;  %v1582_v60 = vld [vmem:[%s19721_s14 + $0x1d88] sm:$0xff] }
 0x298   : > { %11292 = vmatprep.subr.bf16.mxu0 %v17077_v19  ;;  %11866 = vmatprep.subr.bf16.mxu1 %v17079_v21  ;;  %v1586_v19 = vld [vmem:[%s19721_s14 + $0x1da8] sm:$0xff]  ;;  %v17116_v21 = vcombine.low %v1573_v5, %v1577_v6  ;;  %v17125_v23 = vcombine.high %v1581_v15, %v1585_v16  ;;  %v17157_v5 = vcombine.high %v1613_v59, %v1617_v61 }
 0x299   : > { %v17127_v25 = vcombine.high %v1582_v60, %v1586_v19 }
 0x29a   : > { %11284 = vmatmul.mubr.bf16.vlgmr.msra.gmra.mrb[0].mxu0 %v20336_v27  ;;  %11858 = vmatmul.mubr.bf16.vlgmr.msra.gmra.mrb[0].mxu1 %v20336_v27 }
 0x29b   : > { %11293 = vmatpush1.bf16.msra.mxu0 %v17076_v33  ;;  %11867 = vmatpush1.bf16.msra.mxu1 %v17078_v34  ;;  %v1590_v33 = vld [vmem:[%s19721_s14 + $0x1dc8] sm:$0xff] }
 0x29c   : > { %11294 = vmatprep.subr.bf16.mxu0 %v17085_v0  ;;  %11868 = vmatprep.subr.bf16.mxu1 %v17087_v36  ;;  %v1594_v34 = vld [vmem:[%s19721_s14 + $0x1de8] sm:$0xff]  ;;  %v17124_v0 = vcombine.low %v1581_v15, %v1585_v16  ;;  %v17126_v36 = vcombine.low %v1582_v60, %v1586_v19  ;;  %v17165_v15 = vcombine.high %v1621_v7, %v1625_v8  ;;  %v1629_v60 = vld [vmem:[%s19721_s14 + $0x1f00] sm:$0xff] }
 0x29d   : > { %11324 = vmatprep.mubr.bf16.mxu0 %v20342_v39  ;;  %11898 = vmatprep.mubr.bf16.mxu1 %v20342_v39  ;;  %v17135_v38 = vcombine.high %v1590_v33, %v1594_v34  ;;  %v1633_v19 = vld [vmem:[%s19721_s14 + $0x1f20] sm:$0xff] }
 0x29f   : > { %11295 = vmatpush1.bf16.msra.mxu0 %v17084_v43  ;;  %11869 = vmatpush1.bf16.msra.mxu1 %v17086_v44  ;;  %v1598_v43 = vld [vmem:[%s19721_s14 + $0x1e08] sm:$0xff] }
 0x2a0   : > { %11296 = vmatprep.subr.bf16.mxu0 %v17093_v46  ;;  %11870 = vmatprep.subr.bf16.mxu1 %v17095_v47  ;;  %v1602_v44 = vld [vmem:[%s19721_s14 + $0x1e28] sm:$0xff]  ;;  %v17132_v46 = vcombine.low %v1589_v28, %v1593_v31  ;;  %v17134_v47 = vcombine.low %v1590_v33, %v1594_v34  ;;  %v17173_v28 = vcombine.high %v1629_v60, %v1633_v19  ;;  %v1637_v33 = vld [vmem:[%s19721_s14 + $0x1f40] sm:$0xff] }
 0x2a1   : > { %v17143_v49 = vcombine.high %v1598_v43, %v1602_v44  ;;  %v1641_v34 = vld [vmem:[%s19721_s14 + $0x1f60] sm:$0xff] }
 0x2a3   : > { %11297 = vmatpush1.bf16.msra.mxu0 %v17092_v53  ;;  %11871 = vmatpush1.bf16.msra.mxu1 %v17094_v11  ;;  %v1606_v53 = vld [vmem:[%s19721_s14 + $0x1e48] sm:$0xff] }
 0x2a4   : > { %11298 = vmatprep.subr.bf16.mxu0 %v17101_v55  ;;  %11872 = vmatprep.subr.bf16.mxu1 %v17103_v24  ;;  %v1610_v11 = vld [vmem:[%s19721_s14 + $0x1e68] sm:$0xff]  ;;  %v17140_v55 = vcombine.low %v1597_v29, %v1601_v56  ;;  %v17142_v24 = vcombine.low %v1598_v43, %v1602_v44  ;;  %v17181_v29 = vcombine.high %v1637_v33, %v1641_v34  ;;  %v1645_v43 = vld [vmem:[%s19721_s14 + $0x1f80] sm:$0xff] }
 0x2a5   : > { %v17151_v58 = vcombine.high %v1606_v53, %v1610_v11  ;;  %v1649_v44 = vld [vmem:[%s19721_s14 + $0x1fa0] sm:$0xff] }
 0x2a7   : > { %11299 = vmatpush1.bf16.msra.mxu0 %v17100_v62  ;;  %11873 = vmatpush1.bf16.msra.mxu1 %v17102_v63  ;;  %v1614_v62 = vld [vmem:[%s19721_s14 + $0x1e88] sm:$0xff] }
 0x2a8   : > { %11300 = vmatprep.subr.bf16.mxu0 %v17109_v2  ;;  %11874 = vmatprep.subr.bf16.mxu1 %v17111_v4  ;;  %v1618_v63 = vld [vmem:[%s19721_s14 + $0x1ea8] sm:$0xff]  ;;  %v17148_v2 = vcombine.low %v1605_v50, %v1609_v51  ;;  %v17150_v4 = vcombine.low %v1606_v53, %v1610_v11  ;;  %v17189_v50 = vcombine.high %v1645_v43, %v1649_v44  ;;  %v1653_v53 = vld [vmem:[%s19721_s14 + $0x1fc0] sm:$0xff] }
 0x2a9   : > { %v17159_v6 = vcombine.high %v1614_v62, %v1618_v63  ;;  %v1657_v11 = vld [vmem:[%s19721_s14 + $0x1fe0] sm:$0xff] }
 0x2ab   : > { %11301 = vmatpush1.bf16.msra.mxu0 %v17108_v9  ;;  %11875 = vmatpush1.bf16.msra.mxu1 %v17110_v12  ;;  %v1622_v9 = vld [vmem:[%s19721_s14 + $0x1ec8] sm:$0xff] }
 0x2ac   : > { %11302 = vmatprep.subr.bf16.mxu0 %v17117_v18  ;;  %11876 = vmatprep.subr.bf16.mxu1 %v17119_v20  ;;  %v1626_v12 = vld [vmem:[%s19721_s14 + $0x1ee8] sm:$0xff]  ;;  %v17156_v18 = vcombine.low %v1613_v59, %v1617_v61  ;;  %v17158_v20 = vcombine.low %v1614_v62, %v1618_v63  ;;  %v17197_v61 = vcombine.high %v1653_v53, %v1657_v11  ;;  %v1661_v63 = vld [vmem:[%s19721_s14 + $0x2000] sm:$0xff] }
 0x2ad   : > { %v17167_v16 = vcombine.high %v1622_v9, %v1626_v12 }
 0x2af   : > { %11303 = vmatpush1.bf16.msra.mxu0 %v17116_v21  ;;  %11877 = vmatpush1.bf16.msra.mxu1 %v17118_v22  ;;  %v1630_v21 = vld [vmem:[%s19721_s14 + $0x1f08] sm:$0xff] }
 0x2b0   : > { %11304 = vmatprep.subr.bf16.mxu0 %v17125_v23  ;;  %11878 = vmatprep.subr.bf16.mxu1 %v17127_v25  ;;  %v1634_v22 = vld [vmem:[%s19721_s14 + $0x1f28] sm:$0xff]  ;;  %v17164_v23 = vcombine.low %v1621_v7, %v1625_v8  ;;  %v17166_v25 = vcombine.low %v1622_v9, %v1626_v12  ;;  %v17196_v7 = vcombine.low %v1653_v53, %v1657_v11 }
 0x2b1   : > { %v17175_v31 = vcombine.high %v1630_v21, %v1634_v22  ;;  %v1694_v53 = vld [vmem:[%s19721_s14 + $0x2108] sm:$0xff] }
 0x2b2   : > { %v1698_v11 = vld [vmem:[%s19721_s14 + $0x2128] sm:$0xff] }
 0x2b3   : > { %11305 = vmatpush1.bf16.msra.mxu0 %v17124_v0  ;;  %11879 = vmatpush1.bf16.msra.mxu1 %v17126_v36  ;;  %v1638_v0 = vld [vmem:[%s19721_s14 + $0x1f48] sm:$0xff] }
 0x2b4   : > { %11306 = vmatprep.subr.bf16.mxu0 %v17133_v37  ;;  %11880 = vmatprep.subr.bf16.mxu1 %v17135_v38  ;;  %v1642_v36 = vld [vmem:[%s19721_s14 + $0x1f68] sm:$0xff]  ;;  %v17172_v37 = vcombine.low %v1629_v60, %v1633_v19  ;;  %v17174_v38 = vcombine.low %v1630_v21, %v1634_v22 }
 0x2b5   : > { %v17183_v56 = vcombine.high %v1638_v0, %v1642_v36  ;;  %v1670_v60 = vld [vmem:[%s19721_s14 + $0x2048] sm:$0xff] }
 0x2b6   : > { %v1674_v19 = vld [vmem:[%s19721_s14 + $0x2068] sm:$0xff] }
 0x2b7   : > { %11307 = vmatpush1.bf16.msra.mxu0 %v17132_v46  ;;  %11881 = vmatpush1.bf16.msra.mxu1 %v17134_v47  ;;  %v1646_v46 = vld [vmem:[%s19721_s14 + $0x1f88] sm:$0xff] }
 0x2b8   : > { %11308 = vmatprep.subr.bf16.mxu0 %v17141_v48  ;;  %11882 = vmatprep.subr.bf16.mxu1 %v17143_v49  ;;  %v1650_v47 = vld [vmem:[%s19721_s14 + $0x1fa8] sm:$0xff]  ;;  %v17180_v48 = vcombine.low %v1637_v33, %v1641_v34  ;;  %v17182_v49 = vcombine.low %v1638_v0, %v1642_v36  ;;  %v17214_v36 = vcombine.low %v1670_v60, %v1674_v19 }
 0x2b9   : > { %v17191_v51 = vcombine.high %v1646_v46, %v1650_v47  ;;  %v17190_v59 = vcombine.low %v1646_v46, %v1650_v47  ;;  %v1682_v34 = vld [vmem:[%s19721_s14 + $0x20a8] sm:$0xff] }
 0x2bb   : > { %11309 = vmatpush1.bf16.msra.mxu0 %v17140_v55  ;;  %11883 = vmatpush1.bf16.msra.mxu1 %v17142_v24  ;;  %v1654_v55 = vld [vmem:[%s19721_s14 + $0x1fc8] sm:$0xff] }
 0x2bc   : > { %11310 = vmatprep.subr.bf16.mxu0 %v17149_v57  ;;  %11884 = vmatprep.subr.bf16.mxu1 %v17151_v58  ;;  %v1658_v24 = vld [vmem:[%s19721_s14 + $0x1fe8] sm:$0xff]  ;;  %v20403_v57 = vld [vmem:[%s19743_s25 + $0x20] sm:$0xff]  ;;  %v17188_v58 = vcombine.low %v1645_v43, %v1649_v44 }
 0x2bd   : > { %v17199_v62 = vcombine.high %v1654_v55, %v1658_v24  ;;  %v17198_v8 = vcombine.low %v1654_v55, %v1658_v24  ;;  %v1686_v43 = vld [vmem:[%s19721_s14 + $0x20c8] sm:$0xff] }
 0x2be   : > { %v1690_v44 = vld [vmem:[%s19721_s14 + $0x20e8] sm:$0xff] }
 0x2bf   : > { %11311 = vmatpush1.bf16.msra.mxu0 %v17148_v2  ;;  %11885 = vmatpush1.bf16.msra.mxu1 %v17150_v4  ;;  %v1665_v2 = vld [vmem:[%s19721_s14 + $0x2020] sm:$0xff]  ;;  %v20409_v4 = vrot.slane %v20403_v57, %v19776_v54  ;;  %v17230_v24 = vcombine.low %v1686_v43, %v1690_v44 }
 0x2c0   : > { %11312 = vmatprep.subr.bf16.mxu0 %v17157_v5  ;;  %11886 = vmatprep.subr.bf16.mxu1 %v17159_v6  ;;  %v1662_v5 = vld [vmem:[%s19721_s14 + $0x2008] sm:$0xff]  ;;  %v17205_v9 = vcombine.high %v1661_v63, %v1665_v2  ;;  %v17204_v21 = vcombine.low %v1661_v63, %v1665_v2 }
 0x2c1   : > { %v1666_v6 = vld [vmem:[%s19721_s14 + $0x2028] sm:$0xff] }
 0x2c2   : > { %v17207_v12 = vcombine.high %v1662_v5, %v1666_v6  ;;  %v17206_v22 = vcombine.low %v1662_v5, %v1666_v6  ;;  %v1702_v63 = vld [vmem:[%s19721_s14 + $0x2148] sm:$0xff]  ;;  %v17238_v6 = vcombine.low %v1694_v53, %v1698_v11 }
 0x2c3   : > { %11313 = vmatpush1.bf16.msra.mxu0 %v17156_v18  ;;  %11887 = vmatpush1.bf16.msra.mxu1 %v17158_v20  ;;  %v1669_v18 = vld [vmem:[%s19721_s14 + $0x2040] sm:$0xff]  ;;  %v1706_v2 = vld [vmem:[%s19721_s14 + $0x2168] sm:$0xff] }
 0x2c4   : > { %11314 = vmatprep.subr.bf16.mxu0 %v17165_v15  ;;  %11888 = vmatprep.subr.bf16.mxu1 %v17167_v16  ;;  %v1673_v20 = vld [vmem:[%s19721_s14 + $0x2060] sm:$0xff]  ;;  %v548_v15 = vcombine.high %v20409_v4, %v20409_v4  ;;  %v20419_v16 = vpack.c.bf16 %v20326_v14, %v20326_v14  ;;  %v1678_v14 = vld [vmem:[%s19721_s14 + $0x2088] sm:$0xff] }
 0x2c5   : > { %v17212_v0 = vcombine.low %v1669_v18, %v1673_v20  ;;  %v17222_v47 = vcombine.low %v1678_v14, %v1682_v34 }
 0x2c6   : > { %v20425_v33 = vpack.c.bf16 %v548_v15, %v548_v15 }
 0x2c7   : > { %11315 = vmatpush1.bf16.msra.mxu0 %v17164_v23  ;;  %11889 = vmatpush1.bf16.msra.mxu1 %v17166_v25  ;;  %v17213_v23 = vcombine.high %v1669_v18, %v1673_v20  ;;  %v17215_v25 = vcombine.high %v1670_v60, %v1674_v19  ;;  %v1710_v18 = vld [vmem:[%s19721_s14 + $0x2188] sm:$0xff]  ;;  %v17246_v60 = vcombine.low %v1702_v63, %v1706_v2 }
 0x2c8   : > { %11316 = vmatprep.subr.bf16.mxu0 %v17173_v28  ;;  %11890 = vmatprep.subr.bf16.mxu1 %v17175_v31  ;;  %v1677_v28 = vld [vmem:[%s19721_s14 + $0x2080] sm:$0xff]  ;;  %v1714_v20 = vld [vmem:[%s19721_s14 + $0x21a8] sm:$0xff] }
 0x2c9   : > { %v1681_v31 = vld [vmem:[%s19721_s14 + $0x20a0] sm:$0xff] }
 0x2ca   : > { %v17220_v46 = vcombine.low %v1677_v28, %v1681_v31 }
 0x2cb   : > { %11317 = vmatpush1.bf16.msra.mxu0 %v17172_v37  ;;  %11891 = vmatpush1.bf16.msra.mxu1 %v17174_v38  ;;  %v17221_v37 = vcombine.high %v1677_v28, %v1681_v31  ;;  %v17223_v38 = vcombine.high %v1678_v14, %v1682_v34  ;;  %v1722_v28 = vld [vmem:[%s19721_s14 + $0x21e8] sm:$0xff]  ;;  %v17254_v14 = vcombine.low %v1710_v18, %v1714_v20 }
 0x2cc   : > { %11318 = vmatprep.subr.bf16.mxu0 %v17181_v29  ;;  %11892 = vmatprep.subr.bf16.mxu1 %v17183_v56  ;;  %v1685_v29 = vld [vmem:[%s19721_s14 + $0x20c0] sm:$0xff] }
 0x2cd   : > { %v1689_v56 = vld [vmem:[%s19721_s14 + $0x20e0] sm:$0xff] }
 0x2ce   : > { %v17228_v55 = vcombine.low %v1685_v29, %v1689_v56 }
 0x2cf   : > { %11319 = vmatpush1.bf16.msra.mxu0 %v17180_v48  ;;  %11893 = vmatpush1.bf16.msra.mxu1 %v17182_v49  ;;  %v17229_v48 = vcombine.high %v1685_v29, %v1689_v56  ;;  %v17231_v49 = vcombine.high %v1686_v43, %v1690_v44  ;;  %v1730_v29 = vld [vmem:[%s19721_s14 + $0x2228] sm:$0xff] }
 0x2d0   : > { %11320 = vmatprep.subr.bf16.mxu0 %v17189_v50  ;;  %11894 = vmatprep.subr.bf16.mxu1 %v17191_v51  ;;  %v1693_v50 = vld [vmem:[%s19721_s14 + $0x2100] sm:$0xff] }
 0x2d1   : > { %v1697_v51 = vld [vmem:[%s19721_s14 + $0x2120] sm:$0xff] }
 0x2d2   : > { %v17236_v5 = vcombine.low %v1693_v50, %v1697_v51 }
 0x2d3   : > { %11321 = vmatpush1.bf16.msra.mxu0 %v17188_v58  ;;  %11895 = vmatpush1.bf16.msra.mxu1 %v17190_v59  ;;  %v17237_v58 = vcombine.high %v1693_v50, %v1697_v51  ;;  %v17239_v59 = vcombine.high %v1694_v53, %v1698_v11  ;;  %v1738_v50 = vld [vmem:[%s19721_s14 + $0x2268] sm:$0xff] }
 0x2d4   : > { %11322 = vmatprep.subr.bf16.mxu0 %v17197_v61  ;;  %11896 = vmatprep.subr.bf16.mxu1 %v17199_v62  ;;  %v1701_v61 = vld [vmem:[%s19721_s14 + $0x2140] sm:$0xff] }
 0x2d5   : > { %v1705_v62 = vld [vmem:[%s19721_s14 + $0x2160] sm:$0xff] }
 0x2d6   : > { %v17244_v15 = vcombine.low %v1701_v61, %v1705_v62 }
 0x2d7   : > { %11323 = vmatpush1.bf16.msra.mxu0 %v17196_v7  ;;  %11897 = vmatpush1.bf16.msra.mxu1 %v17198_v8  ;;  %v17245_v7 = vcombine.high %v1701_v61, %v1705_v62  ;;  %v17247_v8 = vcombine.high %v1702_v63, %v1706_v2  ;;  %v1746_v61 = vld [vmem:[%s19721_s14 + $0x22a8] sm:$0xff] }
 0x2d8   : > { %11333 = vmatprep.subr.bf16.mxu0 %v17205_v9  ;;  %11907 = vmatprep.subr.bf16.mxu1 %v17207_v12  ;;  %v1709_v9 = vld [vmem:[%s19721_s14 + $0x2180] sm:$0xff] }
 0x2d9   : > { %v1713_v12 = vld [vmem:[%s19721_s14 + $0x21a0] sm:$0xff] }
 0x2da   : > { %11325 = vmatmul.mubr.bf16.vlgmr.msra.gmra.mrb[0].mxu0 %v20419_v16  ;;  %11899 = vmatmul.mubr.bf16.vlgmr.msra.gmra.mrb[0].mxu1 %v20419_v16  ;;  %v17253_v19 = vcombine.high %v1709_v9, %v1713_v12  ;;  %v17252_v31 = vcombine.low %v1709_v9, %v1713_v12  ;;  %v1754_v9 = vld [vmem:[%s19721_s14 + $0x22e8] sm:$0xff] }
 0x2db   : > { %11334 = vmatpush1.bf16.msra.mxu0 %v17204_v21  ;;  %11908 = vmatpush1.bf16.msra.mxu1 %v17206_v22  ;;  %v17255_v21 = vcombine.high %v1710_v18, %v1714_v20  ;;  %v1717_v22 = vld [vmem:[%s19721_s14 + $0x21c0] sm:$0xff] }
 0x2dc   : > { %11335 = vmatprep.subr.bf16.mxu0 %v17213_v23  ;;  %11909 = vmatprep.subr.bf16.mxu1 %v17215_v25  ;;  %v1721_v23 = vld [vmem:[%s19721_s14 + $0x21e0] sm:$0xff]  ;;  %v1718_v25 = vld [vmem:[%s19721_s14 + $0x21c8] sm:$0xff] }
 0x2dd   : > { %11365 = vmatprep.mubr.bf16.mxu0 %v20425_v33  ;;  %11939 = vmatprep.mubr.bf16.mxu1 %v20425_v33  ;;  %v17261_v34 = vcombine.high %v1717_v22, %v1721_v23  ;;  %v17260_v56 = vcombine.low %v1717_v22, %v1721_v23  ;;  %v17262_v43 = vcombine.low %v1718_v25, %v1722_v28  ;;  %v1762_v22 = vld [vmem:[%s19721_s14 + $0x2328] sm:$0xff] }
 0x2df   : > { %11336 = vmatpush1.bf16.msra.mxu0 %v17212_v0  ;;  %11910 = vmatpush1.bf16.msra.mxu1 %v17214_v36  ;;  %v17263_v0 = vcombine.high %v1718_v25, %v1722_v28  ;;  %v1725_v36 = vld [vmem:[%s19721_s14 + $0x2200] sm:$0xff] }
 0x2e0   : > { %11337 = vmatprep.subr.bf16.mxu0 %v17221_v37  ;;  %11911 = vmatprep.subr.bf16.mxu1 %v17223_v38  ;;  %v1729_v37 = vld [vmem:[%s19721_s14 + $0x2220] sm:$0xff]  ;;  %v1726_v38 = vld [vmem:[%s19721_s14 + $0x2208] sm:$0xff] }
 0x2e1   : > { %v17269_v44 = vcombine.high %v1725_v36, %v1729_v37  ;;  %v17268_v51 = vcombine.low %v1725_v36, %v1729_v37  ;;  %v17270_v53 = vcombine.low %v1726_v38, %v1730_v29  ;;  %v1770_v36 = vld [vmem:[%s19721_s14 + $0x2368] sm:$0xff] }
 0x2e3   : > { %11338 = vmatpush1.bf16.msra.mxu0 %v17220_v46  ;;  %11912 = vmatpush1.bf16.msra.mxu1 %v17222_v47  ;;  %v17271_v46 = vcombine.high %v1726_v38, %v1730_v29  ;;  %v1733_v47 = vld [vmem:[%s19721_s14 + $0x2240] sm:$0xff] }
 0x2e4   : > { %11339 = vmatprep.subr.bf16.mxu0 %v17229_v48  ;;  %11913 = vmatprep.subr.bf16.mxu1 %v17231_v49  ;;  %v1737_v48 = vld [vmem:[%s19721_s14 + $0x2260] sm:$0xff]  ;;  %v1734_v49 = vld [vmem:[%s19721_s14 + $0x2248] sm:$0xff] }
 0x2e5   : > { %v17277_v11 = vcombine.high %v1733_v47, %v1737_v48  ;;  %v17276_v62 = vcombine.low %v1733_v47, %v1737_v48  ;;  %v17278_v63 = vcombine.low %v1734_v49, %v1738_v50  ;;  %v1778_v47 = vld [vmem:[%s19721_s14 + $0x23a8] sm:$0xff] }
 0x2e7   : > { %11340 = vmatpush1.bf16.msra.mxu0 %v17228_v55  ;;  %11914 = vmatpush1.bf16.msra.mxu1 %v17230_v24  ;;  %v17279_v55 = vcombine.high %v1734_v49, %v1738_v50  ;;  %v1741_v24 = vld [vmem:[%s19721_s14 + $0x2280] sm:$0xff] }
 0x2e8   : > { %11341 = vmatprep.subr.bf16.mxu0 %v17237_v58  ;;  %11915 = vmatprep.subr.bf16.mxu1 %v17239_v59  ;;  %v1745_v58 = vld [vmem:[%s19721_s14 + $0x22a0] sm:$0xff]  ;;  %v1742_v59 = vld [vmem:[%s19721_s14 + $0x2288] sm:$0xff] }
 0x2e9   : > { %v17285_v2 = vcombine.high %v1741_v24, %v1745_v58  ;;  %v17284_v12 = vcombine.low %v1741_v24, %v1745_v58  ;;  %v17286_v18 = vcombine.low %v1742_v59, %v1746_v61  ;;  %v1782_v24 = vld [vmem:[%s19721_s14 + $0x23c8] sm:$0xff] }
 0x2ea   : > { %v1786_v58 = vld [vmem:[%s19721_s14 + $0x23e8] sm:$0xff] }
 0x2eb   : > { %11342 = vmatpush1.bf16.msra.mxu0 %v17236_v5  ;;  %11916 = vmatpush1.bf16.msra.mxu1 %v17238_v6  ;;  %v17287_v5 = vcombine.high %v1742_v59, %v1746_v61  ;;  %v1749_v6 = vld [vmem:[%s19721_s14 + $0x22c0] sm:$0xff] }
 0x2ec   : > { %11343 = vmatprep.subr.bf16.mxu0 %v17245_v7  ;;  %11917 = vmatprep.subr.bf16.mxu1 %v17247_v8  ;;  %v1753_v7 = vld [vmem:[%s19721_s14 + $0x22e0] sm:$0xff]  ;;  %v1750_v8 = vld [vmem:[%s19721_s14 + $0x22c8] sm:$0xff] }
 0x2ed   : > { %v17293_v20 = vcombine.high %v1749_v6, %v1753_v7  ;;  %v17292_v23 = vcombine.low %v1749_v6, %v1753_v7  ;;  %v17294_v25 = vcombine.low %v1750_v8, %v1754_v9  ;;  %v1794_v7 = vld [vmem:[%s19721_s14 + $0x2428] sm:$0xff] }
 0x2ef   : > { %11344 = vmatpush1.bf16.msra.mxu0 %v17244_v15  ;;  %11918 = vmatpush1.bf16.msra.mxu1 %v17246_v60  ;;  %v17295_v15 = vcombine.high %v1750_v8, %v1754_v9  ;;  %v1757_v60 = vld [vmem:[%s19721_s14 + $0x2300] sm:$0xff]  ;;  %v17326_v9 = vcombine.low %v1782_v24, %v1786_v58 }
 0x2f0   : > { %11345 = vmatprep.subr.bf16.mxu0 %v17253_v19  ;;  %11919 = vmatprep.subr.bf16.mxu1 %v17255_v21  ;;  %v1761_v19 = vld [vmem:[%s19721_s14 + $0x2320] sm:$0xff]  ;;  %v1758_v21 = vld [vmem:[%s19721_s14 + $0x2308] sm:$0xff] }
 0x2f1   : > { %v17301_v28 = vcombine.high %v1757_v60, %v1761_v19  ;;  %v17300_v37 = vcombine.low %v1757_v60, %v1761_v19  ;;  %v17302_v38 = vcombine.low %v1758_v21, %v1762_v22  ;;  %v20500_v19 = vpack.c.bf16 %v20409_v4, %v20409_v4  ;;  %v1806_v4 = vld [vmem:[%s19721_s14 + $0x2488] sm:$0xff] }
 0x2f3   : > { %11346 = vmatpush1.bf16.msra.mxu0 %v17252_v31  ;;  %11920 = vmatpush1.bf16.msra.mxu1 %v17254_v14  ;;  %v17303_v31 = vcombine.high %v1758_v21, %v1762_v22  ;;  %v1765_v14 = vld [vmem:[%s19721_s14 + $0x2340] sm:$0xff]  ;;  %v1798_v21 = vld [vmem:[%s19721_s14 + $0x2448] sm:$0xff] }
 0x2f4   : > { %11347 = vmatprep.subr.bf16.mxu0 %v17261_v34  ;;  %11921 = vmatprep.subr.bf16.mxu1 %v17263_v0  ;;  %v1769_v34 = vld [vmem:[%s19721_s14 + $0x2360] sm:$0xff]  ;;  %v1766_v0 = vld [vmem:[%s19721_s14 + $0x2348] sm:$0xff] }
 0x2f5   : > { %v17309_v29 = vcombine.high %v1765_v14, %v1769_v34  ;;  %v17308_v48 = vcombine.low %v1765_v14, %v1769_v34  ;;  %v17310_v49 = vcombine.low %v1766_v0, %v1770_v36  ;;  %v1802_v22 = vld [vmem:[%s19721_s14 + $0x2468] sm:$0xff]  ;;  %v1805_v14 = vld [vmem:[%s19721_s14 + $0x2480] sm:$0xff] }
 0x2f6   : > { %v1809_v34 = vld [vmem:[%s19721_s14 + $0x24a0] sm:$0xff] }
 0x2f7   : > { %11348 = vmatpush1.bf16.msra.mxu0 %v17260_v56  ;;  %11922 = vmatpush1.bf16.msra.mxu1 %v17262_v43  ;;  %v17311_v56 = vcombine.high %v1766_v0, %v1770_v36  ;;  %v1773_v43 = vld [vmem:[%s19721_s14 + $0x2380] sm:$0xff]  ;;  %v1810_v36 = vld [vmem:[%s19721_s14 + $0x24a8] sm:$0xff] }
 0x2f8   : > { %11349 = vmatprep.subr.bf16.mxu0 %v17269_v44  ;;  %11923 = vmatprep.subr.bf16.mxu1 %v17271_v46  ;;  %v1777_v44 = vld [vmem:[%s19721_s14 + $0x23a0] sm:$0xff]  ;;  %v1774_v46 = vld [vmem:[%s19721_s14 + $0x2388] sm:$0xff] }
 0x2f9   : > { %v17317_v50 = vcombine.high %v1773_v43, %v1777_v44  ;;  %v17316_v59 = vcombine.low %v1773_v43, %v1777_v44  ;;  %v17318_v61 = vcombine.low %v1774_v46, %v1778_v47  ;;  %v1813_v43 = vld [vmem:[%s19721_s14 + $0x24c0] sm:$0xff] }
 0x2fa   : > { %v1817_v44 = vld [vmem:[%s19721_s14 + $0x24e0] sm:$0xff] }
 0x2fb   : > { %11350 = vmatpush1.bf16.msra.mxu0 %v17268_v51  ;;  %11924 = vmatpush1.bf16.msra.mxu1 %v17270_v53  ;;  %v17319_v51 = vcombine.high %v1774_v46, %v1778_v47  ;;  %v1781_v53 = vld [vmem:[%s19721_s14 + $0x23c0] sm:$0xff]  ;;  %v1814_v46 = vld [vmem:[%s19721_s14 + $0x24c8] sm:$0xff] }
 0x2fc   : > { %11351 = vmatprep.subr.bf16.mxu0 %v17277_v11  ;;  %11925 = vmatprep.subr.bf16.mxu1 %v17279_v55  ;;  %v1785_v11 = vld [vmem:[%s19721_s14 + $0x23e0] sm:$0xff]  ;;  %v533_v55 = vcombine.high %v20403_v57, %v20403_v57  ;;  %v1790_v57 = vld [vmem:[%s19721_s14 + $0x2408] sm:$0xff] }
 0x2fd   : > { %v17324_v8 = vcombine.low %v1781_v53, %v1785_v11  ;;  %v1818_v47 = vld [vmem:[%s19721_s14 + $0x24e8] sm:$0xff] }
 0x2fe   : > { %v20490_v6 = vrot.slane %v533_v55, %v19776_v54  ;;  %v1822_v55 = vld [vmem:[%s19721_s14 + $0x2508] sm:$0xff] }
 0x2ff   : > { %11352 = vmatpush1.bf16.msra.mxu0 %v17276_v62  ;;  %11926 = vmatpush1.bf16.msra.mxu1 %v17278_v63  ;;  %v17325_v62 = vcombine.high %v1781_v53, %v1785_v11  ;;  %v17327_v63 = vcombine.high %v1782_v24, %v1786_v58  ;;  %v1821_v53 = vld [vmem:[%s19721_s14 + $0x2500] sm:$0xff]  ;;  %v1826_v24 = vld [vmem:[%s19721_s14 + $0x2528] sm:$0xff]  ;;  %v17356_v58 = vcombine.low %v1813_v43, %v1817_v44 }
 0x300   : > { %11353 = vmatprep.subr.bf16.mxu0 %v17285_v2  ;;  %11927 = vmatprep.subr.bf16.mxu1 %v17287_v5  ;;  %v1789_v2 = vld [vmem:[%s19721_s14 + $0x2400] sm:$0xff]  ;;  %v549_v60 = vcombine.high %v20490_v6, %v20490_v6 }
 0x301   : > { %v1793_v5 = vld [vmem:[%s19721_s14 + $0x2420] sm:$0xff] }
 0x302   : > { %v20506_v0 = vpack.c.bf16 %v549_v60, %v549_v60  ;;  %v1825_v11 = vld [vmem:[%s19721_s14 + $0x2520] sm:$0xff]  ;;  %v1842_v60 = vld [vmem:[%s19721_s14 + $0x25a8] sm:$0xff] }
 0x303   : > { %11354 = vmatpush1.bf16.msra.mxu0 %v17284_v12  ;;  %11928 = vmatpush1.bf16.msra.mxu1 %v17286_v18  ;;  %v17333_v12 = vcombine.high %v1789_v2, %v1793_v5  ;;  %v17335_v18 = vcombine.high %v1790_v57, %v1794_v7 }
 0x304   : > { %11355 = vmatprep.subr.bf16.mxu0 %v17293_v20  ;;  %11929 = vmatprep.subr.bf16.mxu1 %v17295_v15  ;;  %v1797_v20 = vld [vmem:[%s19721_s14 + $0x2440] sm:$0xff] }
 0x305   : > { %v1801_v15 = vld [vmem:[%s19721_s14 + $0x2460] sm:$0xff] }
 0x307   : > { %11356 = vmatpush1.bf16.msra.mxu0 %v17292_v23  ;;  %11930 = vmatpush1.bf16.msra.mxu1 %v17294_v25  ;;  %v17332_v23 = vcombine.low %v1789_v2, %v1793_v5  ;;  %v17334_v25 = vcombine.low %v1790_v57, %v1794_v7  ;;  %v1833_v2 = vld [vmem:[%s19721_s14 + $0x2560] sm:$0xff]  ;;  %v1830_v5 = vld [vmem:[%s19721_s14 + $0x2548] sm:$0xff]  ;;  %v17364_v7 = vcombine.low %v1821_v53, %v1825_v11 }
 0x308   : > { %11357 = vmatprep.subr.bf16.mxu0 %v17301_v28  ;;  %11931 = vmatprep.subr.bf16.mxu1 %v17303_v31  ;;  %v17341_v28 = vcombine.high %v1797_v20, %v1801_v15  ;;  %v17343_v31 = vcombine.high %v1798_v21, %v1802_v22  ;;  %v1834_v57 = vld [vmem:[%s19721_s14 + $0x2568] sm:$0xff] }
 0x30b   : > { %11358 = vmatpush1.bf16.msra.mxu0 %v17300_v37  ;;  %11932 = vmatpush1.bf16.msra.mxu1 %v17302_v38  ;;  %v17340_v37 = vcombine.low %v1797_v20, %v1801_v15  ;;  %v17342_v38 = vcombine.low %v1798_v21, %v1802_v22  ;;  %v1841_v20 = vld [vmem:[%s19721_s14 + $0x25a0] sm:$0xff]  ;;  %v1838_v15 = vld [vmem:[%s19721_s14 + $0x2588] sm:$0xff]  ;;  %v17374_v22 = vcombine.low %v1830_v5, %v1834_v57 }
 0x30c   : > { %11359 = vmatprep.subr.bf16.mxu0 %v17309_v29  ;;  %11933 = vmatprep.subr.bf16.mxu1 %v17311_v56  ;;  %v17349_v29 = vcombine.high %v1805_v14, %v1809_v34  ;;  %v17351_v56 = vcombine.high %v1806_v4, %v1810_v36 }
 0x30f   : > { %11360 = vmatpush1.bf16.msra.mxu0 %v17308_v48  ;;  %11934 = vmatpush1.bf16.msra.mxu1 %v17310_v49  ;;  %v17348_v48 = vcombine.low %v1805_v14, %v1809_v34  ;;  %v17350_v49 = vcombine.low %v1806_v4, %v1810_v36  ;;  %v1846_v14 = vld [vmem:[%s19721_s14 + $0x25c8] sm:$0xff]  ;;  %v17382_v36 = vcombine.low %v1838_v15, %v1842_v60 }
 0x310   : > { %11361 = vmatprep.subr.bf16.mxu0 %v17317_v50  ;;  %11935 = vmatprep.subr.bf16.mxu1 %v17319_v51  ;;  %v17357_v50 = vcombine.high %v1813_v43, %v1817_v44  ;;  %v17359_v51 = vcombine.high %v1814_v46, %v1818_v47  ;;  %v1850_v34 = vld [vmem:[%s19721_s14 + $0x25e8] sm:$0xff] }
 0x311   : > { %v1854_v43 = vld [vmem:[%s19721_s14 + $0x2608] sm:$0xff] }
 0x312   : > { %v1858_v44 = vld [vmem:[%s19721_s14 + $0x2628] sm:$0xff] }
 0x313   : > { %11362 = vmatpush1.bf16.msra.mxu0 %v17316_v59  ;;  %11936 = vmatpush1.bf16.msra.mxu1 %v17318_v61  ;;  %v17358_v59 = vcombine.low %v1814_v46, %v1818_v47  ;;  %v17365_v61 = vcombine.high %v1821_v53, %v1825_v11  ;;  %v17390_v47 = vcombine.low %v1846_v14, %v1850_v34  ;;  %v1862_v53 = vld [vmem:[%s19721_s14 + $0x2648] sm:$0xff] }
 0x314   : > { %11363 = vmatprep.subr.bf16.mxu0 %v17325_v62  ;;  %11937 = vmatprep.subr.bf16.mxu1 %v17327_v63  ;;  %v17367_v62 = vcombine.high %v1822_v55, %v1826_v24  ;;  %v1829_v63 = vld [vmem:[%s19721_s14 + $0x2540] sm:$0xff]  ;;  %v1866_v11 = vld [vmem:[%s19721_s14 + $0x2668] sm:$0xff] }
 0x315   : > { %v17372_v21 = vcombine.low %v1829_v63, %v1833_v2 }
 0x317   : > { %11364 = vmatpush1.bf16.msra.mxu0 %v17324_v8  ;;  %11938 = vmatpush1.bf16.msra.mxu1 %v17326_v9  ;;  %v17366_v8 = vcombine.low %v1822_v55, %v1826_v24  ;;  %v17373_v9 = vcombine.high %v1829_v63, %v1833_v2  ;;  %v17398_v24 = vcombine.low %v1854_v43, %v1858_v44  ;;  %v1870_v63 = vld [vmem:[%s19721_s14 + $0x2688] sm:$0xff] }
 0x318   : > { %11374 = vmatprep.subr.bf16.mxu0 %v17333_v12  ;;  %11948 = vmatprep.subr.bf16.mxu1 %v17335_v18  ;;  %v17375_v12 = vcombine.high %v1830_v5, %v1834_v57  ;;  %v1837_v18 = vld [vmem:[%s19721_s14 + $0x2580] sm:$0xff]  ;;  %v1874_v2 = vld [vmem:[%s19721_s14 + $0x26a8] sm:$0xff]  ;;  %v17406_v57 = vcombine.low %v1862_v53, %v1866_v11 }
 0x319   : > { %v17380_v4 = vcombine.low %v1837_v18, %v1841_v20 }
 0x31a   : > { %11366 = vmatmul.mubr.bf16.vlgmr.msra.gmra.mrb[0].mxu0 %v20500_v19  ;;  %11940 = vmatmul.mubr.bf16.vlgmr.msra.gmra.mrb[0].mxu1 %v20500_v19 }
 0x31b   : > { %11375 = vmatpush1.bf16.msra.mxu0 %v17332_v23  ;;  %11949 = vmatpush1.bf16.msra.mxu1 %v17334_v25  ;;  %v17381_v23 = vcombine.high %v1837_v18, %v1841_v20  ;;  %v17383_v25 = vcombine.high %v1838_v15, %v1842_v60  ;;  %v1878_v18 = vld [vmem:[%s19721_s14 + $0x26c8] sm:$0xff]  ;;  %v17414_v60 = vcombine.low %v1870_v63, %v1874_v2 }
 0x31c   : > { %11376 = vmatprep.subr.bf16.mxu0 %v17341_v28  ;;  %11950 = vmatprep.subr.bf16.mxu1 %v17343_v31  ;;  %v1845_v28 = vld [vmem:[%s19721_s14 + $0x25c0] sm:$0xff]  ;;  %v1882_v20 = vld [vmem:[%s19721_s14 + $0x26e8] sm:$0xff] }
 0x31d   : > { %11406 = vmatprep.mubr.bf16.mxu0 %v20506_v0  ;;  %11980 = vmatprep.mubr.bf16.mxu1 %v20506_v0  ;;  %v1849_v31 = vld [vmem:[%s19721_s14 + $0x25e0] sm:$0xff] }
 0x31e   : > { %v17388_v46 = vcombine.low %v1845_v28, %v1849_v31 }
 0x31f   : > { %11377 = vmatpush1.bf16.msra.mxu0 %v17340_v37  ;;  %11951 = vmatpush1.bf16.msra.mxu1 %v17342_v38  ;;  %v17389_v37 = vcombine.high %v1845_v28, %v1849_v31  ;;  %v17391_v38 = vcombine.high %v1846_v14, %v1850_v34  ;;  %v1886_v28 = vld [vmem:[%s19721_s14 + $0x2708] sm:$0xff]  ;;  %v17422_v34 = vcombine.low %v1878_v18, %v1882_v20 }
 0x320   : > { %11378 = vmatprep.subr.bf16.mxu0 %v17349_v29  ;;  %11952 = vmatprep.subr.bf16.mxu1 %v17351_v56  ;;  %v1853_v29 = vld [vmem:[%s19721_s14 + $0x2600] sm:$0xff]  ;;  %v1890_v31 = vld [vmem:[%s19721_s14 + $0x2728] sm:$0xff] }
 0x321   : > { %v1857_v56 = vld [vmem:[%s19721_s14 + $0x2620] sm:$0xff] }
 0x322   : > { %v17396_v55 = vcombine.low %v1853_v29, %v1857_v56 }
 0x323   : > { %11379 = vmatpush1.bf16.msra.mxu0 %v17348_v48  ;;  %11953 = vmatpush1.bf16.msra.mxu1 %v17350_v49  ;;  %v17397_v48 = vcombine.high %v1853_v29, %v1857_v56  ;;  %v17399_v49 = vcombine.high %v1854_v43, %v1858_v44  ;;  %v1894_v29 = vld [vmem:[%s19721_s14 + $0x2748] sm:$0xff]  ;;  %v17430_v44 = vcombine.low %v1886_v28, %v1890_v31 }
 0x324   : > { %11380 = vmatprep.subr.bf16.mxu0 %v17357_v50  ;;  %11954 = vmatprep.subr.bf16.mxu1 %v17359_v51  ;;  %v1861_v50 = vld [vmem:[%s19721_s14 + $0x2640] sm:$0xff]  ;;  %v1898_v56 = vld [vmem:[%s19721_s14 + $0x2768] sm:$0xff] }
 0x325   : > { %v1865_v51 = vld [vmem:[%s19721_s14 + $0x2660] sm:$0xff] }
 0x326   : > { %v17404_v5 = vcombine.low %v1861_v50, %v1865_v51 }
 0x327   : > { %11381 = vmatpush1.bf16.msra.mxu0 %v17356_v58  ;;  %11955 = vmatpush1.bf16.msra.mxu1 %v17358_v59  ;;  %v17405_v58 = vcombine.high %v1861_v50, %v1865_v51  ;;  %v17407_v59 = vcombine.high %v1862_v53, %v1866_v11  ;;  %v1902_v50 = vld [vmem:[%s19721_s14 + $0x2788] sm:$0xff]  ;;  %v17438_v11 = vcombine.low %v1894_v29, %v1898_v56 }
 0x328   : > { %11382 = vmatprep.subr.bf16.mxu0 %v17365_v61  ;;  %11956 = vmatprep.subr.bf16.mxu1 %v17367_v62  ;;  %v1869_v61 = vld [vmem:[%s19721_s14 + $0x2680] sm:$0xff]  ;;  %v1906_v51 = vld [vmem:[%s19721_s14 + $0x27a8] sm:$0xff] }
 0x329   : > { %v1873_v62 = vld [vmem:[%s19721_s14 + $0x26a0] sm:$0xff] }
 0x32a   : > { %v17412_v15 = vcombine.low %v1869_v61, %v1873_v62 }
 0x32b   : > { %11383 = vmatpush1.bf16.msra.mxu0 %v17364_v7  ;;  %11957 = vmatpush1.bf16.msra.mxu1 %v17366_v8  ;;  %v17413_v7 = vcombine.high %v1869_v61, %v1873_v62  ;;  %v17415_v8 = vcombine.high %v1870_v63, %v1874_v2  ;;  %v1910_v61 = vld [vmem:[%s19721_s14 + $0x27c8] sm:$0xff]  ;;  %v20567_v63 = vld [vmem:[%s19743_s25 + $0x28] sm:$0xff] }
 0x32c   : > { %11384 = vmatprep.subr.bf16.mxu0 %v17373_v9  ;;  %11958 = vmatprep.subr.bf16.mxu1 %v17375_v12  ;;  %v1877_v9 = vld [vmem:[%s19721_s14 + $0x26c0] sm:$0xff]  ;;  %v1914_v62 = vld [vmem:[%s19721_s14 + $0x27e8] sm:$0xff] }
 0x32d   : > { %v1881_v12 = vld [vmem:[%s19721_s14 + $0x26e0] sm:$0xff] }
 0x32e   : > { %v17420_v14 = vcombine.low %v1877_v9, %v1881_v12 }
 0x32f   : > { %11385 = vmatpush1.bf16.msra.mxu0 %v17372_v21  ;;  %11959 = vmatpush1.bf16.msra.mxu1 %v17374_v22  ;;  %v17421_v21 = vcombine.high %v1877_v9, %v1881_v12  ;;  %v17423_v22 = vcombine.high %v1878_v18, %v1882_v20  ;;  %v1921_v9 = vld [vmem:[%s19721_s14 + $0x2820] sm:$0xff]  ;;  %v20573_v12 = vrot.slane %v20567_v63, %v19776_v54  ;;  %v1918_v18 = vld [vmem:[%s19721_s14 + $0x2808] sm:$0xff] }
 0x330   : > { %11386 = vmatprep.subr.bf16.mxu0 %v17381_v23  ;;  %11960 = vmatprep.subr.bf16.mxu1 %v17383_v25  ;;  %v1885_v23 = vld [vmem:[%s19721_s14 + $0x2700] sm:$0xff]  ;;  %v1922_v20 = vld [vmem:[%s19721_s14 + $0x2828] sm:$0xff] }
 0x331   : > { %v1889_v25 = vld [vmem:[%s19721_s14 + $0x2720] sm:$0xff] }
 0x332   : > { %v17428_v43 = vcombine.low %v1885_v23, %v1889_v25 }
 0x333   : > { %11387 = vmatpush1.bf16.msra.mxu0 %v17380_v4  ;;  %11961 = vmatpush1.bf16.msra.mxu1 %v17382_v36  ;;  %v17429_v4 = vcombine.high %v1885_v23, %v1889_v25  ;;  %v17431_v36 = vcombine.high %v1886_v28, %v1890_v31  ;;  %v1925_v23 = vld [vmem:[%s19721_s14 + $0x2840] sm:$0xff]  ;;  %v565_v28 = vcombine.high %v20573_v12, %v20573_v12 }
 0x334   : > { %11388 = vmatprep.subr.bf16.mxu0 %v17389_v37  ;;  %11962 = vmatprep.subr.bf16.mxu1 %v17391_v38  ;;  %v1893_v37 = vld [vmem:[%s19721_s14 + $0x2740] sm:$0xff]  ;;  %v20583_v31 = vpack.c.bf16 %v20490_v6, %v20490_v6  ;;  %v1934_v6 = vld [vmem:[%s19721_s14 + $0x2888] sm:$0xff] }
 0x335   : > { %v1897_v38 = vld [vmem:[%s19721_s14 + $0x2760] sm:$0xff] }
 0x336   : > { %v17436_v53 = vcombine.low %v1893_v37, %v1897_v38  ;;  %v1929_v25 = vld [vmem:[%s19721_s14 + $0x2860] sm:$0xff] }
 0x337   : > { %11389 = vmatpush1.bf16.msra.mxu0 %v17388_v46  ;;  %11963 = vmatpush1.bf16.msra.mxu1 %v17390_v47  ;;  %v17437_v46 = vcombine.high %v1893_v37, %v1897_v38  ;;  %v17439_v47 = vcombine.high %v1894_v29, %v1898_v56  ;;  %v17469_v37 = vcombine.high %v1925_v23, %v1929_v25  ;;  %v1933_v29 = vld [vmem:[%s19721_s14 + $0x2880] sm:$0xff] }
 0x338   : > { %11390 = vmatprep.subr.bf16.mxu0 %v17397_v48  ;;  %11964 = vmatprep.subr.bf16.mxu1 %v17399_v49  ;;  %v1901_v48 = vld [vmem:[%s19721_s14 + $0x2780] sm:$0xff] }
 0x339   : > { %v1905_v49 = vld [vmem:[%s19721_s14 + $0x27a0] sm:$0xff] }
 0x33a   : > { %v17444_v2 = vcombine.low %v1901_v48, %v1905_v49  ;;  %v1937_v56 = vld [vmem:[%s19721_s14 + $0x28a0] sm:$0xff] }
 0x33b   : > { %11391 = vmatpush1.bf16.msra.mxu0 %v17396_v55  ;;  %11965 = vmatpush1.bf16.msra.mxu1 %v17398_v24  ;;  %v17445_v55 = vcombine.high %v1901_v48, %v1905_v49  ;;  %v17447_v24 = vcombine.high %v1902_v50, %v1906_v51  ;;  %v17477_v48 = vcombine.high %v1933_v29, %v1937_v56 }
 0x33c   : > { %11392 = vmatprep.subr.bf16.mxu0 %v17405_v58  ;;  %11966 = vmatprep.subr.bf16.mxu1 %v17407_v59  ;;  %v1909_v58 = vld [vmem:[%s19721_s14 + $0x27c0] sm:$0xff] }
 0x33d   : > { %v1913_v59 = vld [vmem:[%s19721_s14 + $0x27e0] sm:$0xff] }
 0x33f   : > { %11393 = vmatpush1.bf16.msra.mxu0 %v17404_v5  ;;  %11967 = vmatpush1.bf16.msra.mxu1 %v17406_v57  ;;  %v17446_v5 = vcombine.low %v1902_v50, %v1906_v51  ;;  %v17453_v57 = vcombine.high %v1909_v58, %v1913_v59  ;;  %v1941_v50 = vld [vmem:[%s19721_s14 + $0x28c0] sm:$0xff] }
 0x340   : > { %11394 = vmatprep.subr.bf16.mxu0 %v17413_v7  ;;  %11968 = vmatprep.subr.bf16.mxu1 %v17415_v8  ;;  %v17455_v7 = vcombine.high %v1910_v61, %v1914_v62  ;;  %v1917_v8 = vld [vmem:[%s19721_s14 + $0x2800] sm:$0xff] }
 0x341   : > { %v1945_v51 = vld [vmem:[%s19721_s14 + $0x28e0] sm:$0xff] }
 0x343   : > { %11395 = vmatpush1.bf16.msra.mxu0 %v17412_v15  ;;  %11969 = vmatpush1.bf16.msra.mxu1 %v17414_v60  ;;  %v17452_v15 = vcombine.low %v1909_v58, %v1913_v59  ;;  %v17454_v60 = vcombine.low %v1910_v61, %v1914_v62  ;;  %v17485_v58 = vcombine.high %v1941_v50, %v1945_v51  ;;  %v1949_v61 = vld [vmem:[%s19721_s14 + $0x2900] sm:$0xff] }
 0x344   : > { %11396 = vmatprep.subr.bf16.mxu0 %v17421_v21  ;;  %11970 = vmatprep.subr.bf16.mxu1 %v17423_v22  ;;  %v17461_v21 = vcombine.high %v1917_v8, %v1921_v9  ;;  %v17463_v22 = vcombine.high %v1918_v18, %v1922_v20  ;;  %v1953_v62 = vld [vmem:[%s19721_s14 + $0x2920] sm:$0xff] }
 0x347   : > { %11397 = vmatpush1.bf16.msra.mxu0 %v17420_v14  ;;  %11971 = vmatpush1.bf16.msra.mxu1 %v17422_v34  ;;  %v1926_v14 = vld [vmem:[%s19721_s14 + $0x2848] sm:$0xff] }
 0x348   : > { %11398 = vmatprep.subr.bf16.mxu0 %v17429_v4  ;;  %11972 = vmatprep.subr.bf16.mxu1 %v17431_v36  ;;  %v1930_v34 = vld [vmem:[%s19721_s14 + $0x2868] sm:$0xff]  ;;  %v17460_v4 = vcombine.low %v1917_v8, %v1921_v9  ;;  %v17462_v36 = vcombine.low %v1918_v18, %v1922_v20  ;;  %v17493_v8 = vcombine.high %v1949_v61, %v1953_v62  ;;  %v1957_v18 = vld [vmem:[%s19721_s14 + $0x2940] sm:$0xff] }
 0x349   : > { %v17471_v38 = vcombine.high %v1926_v14, %v1930_v34  ;;  %v1961_v20 = vld [vmem:[%s19721_s14 + $0x2960] sm:$0xff] }
 0x34b   : > { %11399 = vmatpush1.bf16.msra.mxu0 %v17428_v43  ;;  %11973 = vmatpush1.bf16.msra.mxu1 %v17430_v44  ;;  %v20589_v43 = vpack.c.bf16 %v565_v28, %v565_v28  ;;  %v1938_v44 = vld [vmem:[%s19721_s14 + $0x28a8] sm:$0xff]  ;;  %v1965_v28 = vld [vmem:[%s19721_s14 + $0x2980] sm:$0xff] }
 0x34c   : > { %11400 = vmatprep.subr.bf16.mxu0 %v17437_v46  ;;  %11974 = vmatprep.subr.bf16.mxu1 %v17439_v47  ;;  %v17468_v46 = vcombine.low %v1925_v23, %v1929_v25  ;;  %v17470_v47 = vcombine.low %v1926_v14, %v1930_v34  ;;  %v17479_v49 = vcombine.high %v1934_v6, %v1938_v44  ;;  %v1969_v14 = vld [vmem:[%s19721_s14 + $0x29a0] sm:$0xff]  ;;  %v1966_v34 = vld [vmem:[%s19721_s14 + $0x2988] sm:$0xff] }
 0x34d   : > { %v17501_v23 = vcombine.high %v1957_v18, %v1961_v20 }
 0x34f   : > { %11401 = vmatpush1.bf16.msra.mxu0 %v17436_v53  ;;  %11975 = vmatpush1.bf16.msra.mxu1 %v17438_v11  ;;  %v1942_v53 = vld [vmem:[%s19721_s14 + $0x28c8] sm:$0xff] }
 0x350   : > { %11402 = vmatprep.subr.bf16.mxu0 %v17445_v55  ;;  %11976 = vmatprep.subr.bf16.mxu1 %v17447_v24  ;;  %v1946_v11 = vld [vmem:[%s19721_s14 + $0x28e8] sm:$0xff]  ;;  %v17476_v55 = vcombine.low %v1933_v29, %v1937_v56  ;;  %v17478_v24 = vcombine.low %v1934_v6, %v1938_v44  ;;  %v1973_v56 = vld [vmem:[%s19721_s14 + $0x29c0] sm:$0xff] }
 0x351   : > { %v17487_v59 = vcombine.high %v1942_v53, %v1946_v11  ;;  %v1977_v6 = vld [vmem:[%s19721_s14 + $0x29e0] sm:$0xff]  ;;  %v1974_v44 = vld [vmem:[%s19721_s14 + $0x29c8] sm:$0xff] }
 0x353   : > { %11403 = vmatpush1.bf16.msra.mxu0 %v17444_v2  ;;  %11977 = vmatpush1.bf16.msra.mxu1 %v17446_v5  ;;  %v1950_v2 = vld [vmem:[%s19721_s14 + $0x2908] sm:$0xff] }
 0x354   : > { %11404 = vmatprep.subr.bf16.mxu0 %v17453_v57  ;;  %11978 = vmatprep.subr.bf16.mxu1 %v17455_v7  ;;  %v1954_v5 = vld [vmem:[%s19721_s14 + $0x2928] sm:$0xff]  ;;  %v17484_v57 = vcombine.low %v1941_v50, %v1945_v51  ;;  %v17486_v7 = vcombine.low %v1942_v53, %v1946_v11  ;;  %v1981_v51 = vld [vmem:[%s19721_s14 + $0x2a00] sm:$0xff] }
 0x355   : > { %v17495_v9 = vcombine.high %v1950_v2, %v1954_v5  ;;  %v1985_v53 = vld [vmem:[%s19721_s14 + $0x2a20] sm:$0xff]  ;;  %v1982_v11 = vld [vmem:[%s19721_s14 + $0x2a08] sm:$0xff] }
 0x357   : > { %11405 = vmatpush1.bf16.msra.mxu0 %v17452_v15  ;;  %11979 = vmatpush1.bf16.msra.mxu1 %v17454_v60  ;;  %v1958_v15 = vld [vmem:[%s19721_s14 + $0x2948] sm:$0xff] }
 0x358   : > { %11415 = vmatprep.subr.bf16.mxu0 %v17461_v21  ;;  %11989 = vmatprep.subr.bf16.mxu1 %v17463_v22  ;;  %v1962_v60 = vld [vmem:[%s19721_s14 + $0x2968] sm:$0xff]  ;;  %v17492_v21 = vcombine.low %v1949_v61, %v1953_v62  ;;  %v17494_v22 = vcombine.low %v1950_v2, %v1954_v5  ;;  %v1989_v62 = vld [vmem:[%s19721_s14 + $0x2a40] sm:$0xff] }
 0x359   : > { %v17503_v25 = vcombine.high %v1958_v15, %v1962_v60  ;;  %v1993_v2 = vld [vmem:[%s19721_s14 + $0x2a60] sm:$0xff]  ;;  %v1990_v5 = vld [vmem:[%s19721_s14 + $0x2a48] sm:$0xff] }
 0x35a   : > { %11407 = vmatmul.mubr.bf16.vlgmr.msra.gmra.mrb[0].mxu0 %v20583_v31  ;;  %11981 = vmatmul.mubr.bf16.vlgmr.msra.gmra.mrb[0].mxu1 %v20583_v31 }
 0x35b   : > { %11416 = vmatpush1.bf16.msra.mxu0 %v17460_v4  ;;  %11990 = vmatpush1.bf16.msra.mxu1 %v17462_v36  ;;  %v1970_v4 = vld [vmem:[%s19721_s14 + $0x29a8] sm:$0xff]  ;;  %v17500_v36 = vcombine.low %v1957_v18, %v1961_v20  ;;  %v1997_v20 = vld [vmem:[%s19721_s14 + $0x2a80] sm:$0xff] }
 0x35c   : > { %11417 = vmatprep.subr.bf16.mxu0 %v17469_v37  ;;  %11991 = vmatprep.subr.bf16.mxu1 %v17471_v38  ;;  %v17502_v37 = vcombine.low %v1958_v15, %v1962_v60  ;;  %v17509_v38 = vcombine.high %v1965_v28, %v1969_v14  ;;  %v17511_v29 = vcombine.high %v1966_v34, %v1970_v4  ;;  %v2001_v15 = vld [vmem:[%s19721_s14 + $0x2aa0] sm:$0xff]  ;;  %v1998_v60 = vld [vmem:[%s19721_s14 + $0x2a88] sm:$0xff] }
 0x35d   : > { %11447 = vmatprep.mubr.bf16.mxu0 %v20589_v43  ;;  %12021 = vmatprep.mubr.bf16.mxu1 %v20589_v43 }
 0x35f   : > { %11418 = vmatpush1.bf16.msra.mxu0 %v17468_v46  ;;  %11992 = vmatpush1.bf16.msra.mxu1 %v17470_v47  ;;  %v1978_v46 = vld [vmem:[%s19721_s14 + $0x29e8] sm:$0xff]  ;;  %v17508_v47 = vcombine.low %v1965_v28, %v1969_v14  ;;  %v2005_v14 = vld [vmem:[%s19721_s14 + $0x2ac0] sm:$0xff] }
 0x360   : > { %11419 = vmatprep.subr.bf16.mxu0 %v17477_v48  ;;  %11993 = vmatprep.subr.bf16.mxu1 %v17479_v49  ;;  %v17510_v48 = vcombine.low %v1966_v34, %v1970_v4  ;;  %v17517_v49 = vcombine.high %v1973_v56, %v1977_v6  ;;  %v17519_v50 = vcombine.high %v1974_v44, %v1978_v46  ;;  %v2009_v34 = vld [vmem:[%s19721_s14 + $0x2ae0] sm:$0xff]  ;;  %v2006_v4 = vld [vmem:[%s19721_s14 + $0x2ac8] sm:$0xff] }
 0x363   : > { %11420 = vmatpush1.bf16.msra.mxu0 %v17476_v55  ;;  %11994 = vmatpush1.bf16.msra.mxu1 %v17478_v24  ;;  %v1986_v55 = vld [vmem:[%s19721_s14 + $0x2a28] sm:$0xff]  ;;  %v17516_v24 = vcombine.low %v1973_v56, %v1977_v6  ;;  %v2013_v6 = vld [vmem:[%s19721_s14 + $0x2b00] sm:$0xff] }
 0x364   : > { %11421 = vmatprep.subr.bf16.mxu0 %v17485_v58  ;;  %11995 = vmatprep.subr.bf16.mxu1 %v17487_v59  ;;  %v17518_v58 = vcombine.low %v1974_v44, %v1978_v46  ;;  %v17525_v59 = vcombine.high %v1981_v51, %v1985_v53  ;;  %v17527_v61 = vcombine.high %v1982_v11, %v1986_v55  ;;  %v2017_v44 = vld [vmem:[%s19721_s14 + $0x2b20] sm:$0xff]  ;;  %v2014_v46 = vld [vmem:[%s19721_s14 + $0x2b08] sm:$0xff] }
 0x367   : > { %11422 = vmatpush1.bf16.msra.mxu0 %v17484_v57  ;;  %11996 = vmatpush1.bf16.msra.mxu1 %v17486_v7  ;;  %v1994_v57 = vld [vmem:[%s19721_s14 + $0x2a68] sm:$0xff]  ;;  %v17524_v7 = vcombine.low %v1981_v51, %v1985_v53  ;;  %v2021_v53 = vld [vmem:[%s19721_s14 + $0x2b40] sm:$0xff] }
 0x368   : > { %11423 = vmatprep.subr.bf16.mxu0 %v17493_v8  ;;  %11997 = vmatprep.subr.bf16.mxu1 %v17495_v9  ;;  %v17526_v8 = vcombine.low %v1982_v11, %v1986_v55  ;;  %v17533_v9 = vcombine.high %v1989_v62, %v1993_v2  ;;  %v17535_v18 = vcombine.high %v1990_v5, %v1994_v57  ;;  %v2025_v11 = vld [vmem:[%s19721_s14 + $0x2b60] sm:$0xff]  ;;  %v2022_v55 = vld [vmem:[%s19721_s14 + $0x2b48] sm:$0xff] }
 0x36b   : > { %11424 = vmatpush1.bf16.msra.mxu0 %v17492_v21  ;;  %11998 = vmatpush1.bf16.msra.mxu1 %v17494_v22  ;;  %v2002_v21 = vld [vmem:[%s19721_s14 + $0x2aa8] sm:$0xff]  ;;  %v17532_v22 = vcombine.low %v1989_v62, %v1993_v2  ;;  %v2029_v2 = vld [vmem:[%s19721_s14 + $0x2b80] sm:$0xff] }
 0x36c   : > { %11425 = vmatprep.subr.bf16.mxu0 %v17501_v23  ;;  %11999 = vmatprep.subr.bf16.mxu1 %v17503_v25  ;;  %v17534_v23 = vcombine.low %v1990_v5, %v1994_v57  ;;  %v17541_v25 = vcombine.high %v1997_v20, %v2001_v15  ;;  %v17543_v28 = vcombine.high %v1998_v60, %v2002_v21  ;;  %v2033_v5 = vld [vmem:[%s19721_s14 + $0x2ba0] sm:$0xff]  ;;  %v2030_v57 = vld [vmem:[%s19721_s14 + $0x2b88] sm:$0xff] }
 0x36f   : > { %11426 = vmatpush1.bf16.msra.mxu0 %v17500_v36  ;;  %12000 = vmatpush1.bf16.msra.mxu1 %v17502_v37  ;;  %v2010_v36 = vld [vmem:[%s19721_s14 + $0x2ae8] sm:$0xff]  ;;  %v17540_v37 = vcombine.low %v1997_v20, %v2001_v15  ;;  %v2037_v15 = vld [vmem:[%s19721_s14 + $0x2bc0] sm:$0xff] }
 0x370   : > { %11427 = vmatprep.subr.bf16.mxu0 %v17509_v38  ;;  %12001 = vmatprep.subr.bf16.mxu1 %v17511_v29  ;;  %v17542_v38 = vcombine.low %v1998_v60, %v2002_v21  ;;  %v17549_v29 = vcombine.high %v2005_v14, %v2009_v34  ;;  %v17551_v56 = vcombine.high %v2006_v4, %v2010_v36  ;;  %v2041_v60 = vld [vmem:[%s19721_s14 + $0x2be0] sm:$0xff] }
 0x371   : > { %v550_v21 = vcombine.high %v20567_v63, %v20567_v63  ;;  %v2046_v63 = vld [vmem:[%s19721_s14 + $0x2c08] sm:$0xff] }
 0x373   : > { %11428 = vmatpush1.bf16.msra.mxu0 %v17508_v47  ;;  %12002 = vmatpush1.bf16.msra.mxu1 %v17510_v48  ;;  %v2018_v47 = vld [vmem:[%s19721_s14 + $0x2b28] sm:$0xff]  ;;  %v17548_v48 = vcombine.low %v2005_v14, %v2009_v34  ;;  %v17581_v14 = vcombine.high %v2037_v15, %v2041_v60 }
 0x374   : > { %11429 = vmatprep.subr.bf16.mxu0 %v17517_v49  ;;  %12003 = vmatprep.subr.bf16.mxu1 %v17519_v50  ;;  %v17550_v49 = vcombine.low %v2006_v4, %v2010_v36  ;;  %v17557_v50 = vcombine.high %v2013_v6, %v2017_v44  ;;  %v17559_v51 = vcombine.high %v2014_v46, %v2018_v47  ;;  %v2045_v4 = vld [vmem:[%s19721_s14 + $0x2c00] sm:$0xff] }
 0x375   : > { %v2049_v36 = vld [vmem:[%s19721_s14 + $0x2c20] sm:$0xff] }
 0x377   : > { %11430 = vmatpush1.bf16.msra.mxu0 %v17516_v24  ;;  %12004 = vmatpush1.bf16.msra.mxu1 %v17518_v58  ;;  %v2026_v24 = vld [vmem:[%s19721_s14 + $0x2b68] sm:$0xff]  ;;  %v17556_v58 = vcombine.low %v2013_v6, %v2017_v44  ;;  %v17589_v6 = vcombine.high %v2045_v4, %v2049_v36 }
 0x378   : > { %11431 = vmatprep.subr.bf16.mxu0 %v17525_v59  ;;  %12005 = vmatprep.subr.bf16.mxu1 %v17527_v61  ;;  %v17558_v59 = vcombine.low %v2014_v46, %v2018_v47  ;;  %v17565_v61 = vcombine.high %v2021_v53, %v2025_v11  ;;  %v17567_v62 = vcombine.high %v2022_v55, %v2026_v24  ;;  %v2053_v46 = vld [vmem:[%s19721_s14 + $0x2c40] sm:$0xff] }
 0x379   : > { %v2057_v47 = vld [vmem:[%s19721_s14 + $0x2c60] sm:$0xff] }
 0x37b   : > { %11432 = vmatpush1.bf16.msra.mxu0 %v17524_v7  ;;  %12006 = vmatpush1.bf16.msra.mxu1 %v17526_v8  ;;  %v2034_v7 = vld [vmem:[%s19721_s14 + $0x2ba8] sm:$0xff]  ;;  %v17564_v8 = vcombine.low %v2021_v53, %v2025_v11  ;;  %v17588_v53 = vcombine.low %v2045_v4, %v2049_v36 }
 0x37c   : > { %11433 = vmatprep.subr.bf16.mxu0 %v17533_v9  ;;  %12007 = vmatprep.subr.bf16.mxu1 %v17535_v18  ;;  %v17566_v9 = vcombine.low %v2022_v55, %v2026_v24  ;;  %v17573_v18 = vcombine.high %v2029_v2, %v2033_v5  ;;  %v17575_v20 = vcombine.high %v2030_v57, %v2034_v7 }
 0x37d   : > { %v17597_v55 = vcombine.high %v2053_v46, %v2057_v47 }
 0x37f   : > { %11434 = vmatpush1.bf16.msra.mxu0 %v17532_v22  ;;  %12008 = vmatpush1.bf16.msra.mxu1 %v17534_v23  ;;  %v2038_v22 = vld [vmem:[%s19721_s14 + $0x2bc8] sm:$0xff] }
 0x380   : > { %11435 = vmatprep.subr.bf16.mxu0 %v17541_v25  ;;  %12009 = vmatprep.subr.bf16.mxu1 %v17543_v28  ;;  %v2042_v23 = vld [vmem:[%s19721_s14 + $0x2be8] sm:$0xff]  ;;  %v17572_v25 = vcombine.low %v2029_v2, %v2033_v5  ;;  %v17574_v28 = vcombine.low %v2030_v57, %v2034_v7  ;;  %v17596_v2 = vcombine.low %v2053_v46, %v2057_v47 }
 0x381   : > { %v17583_v34 = vcombine.high %v2038_v22, %v2042_v23 }
 0x383   : > { %11436 = vmatpush1.bf16.msra.mxu0 %v17540_v37  ;;  %12010 = vmatpush1.bf16.msra.mxu1 %v17542_v38  ;;  %v20654_v37 = vrot.slane %v550_v21, %v19776_v54  ;;  %v2050_v38 = vld [vmem:[%s19721_s14 + $0x2c28] sm:$0xff] }
 0x384   : > { %11437 = vmatprep.subr.bf16.mxu0 %v17549_v29  ;;  %12011 = vmatprep.subr.bf16.mxu1 %v17551_v56  ;;  %v17580_v29 = vcombine.low %v2037_v15, %v2041_v60  ;;  %v17582_v56 = vcombine.low %v2038_v22, %v2042_v23  ;;  %v17591_v44 = vcombine.high %v2046_v63, %v2050_v38  ;;  %v2077_v23 = vld [vmem:[%s19721_s14 + $0x2d00] sm:$0xff] }
 0x385   : > { %v17590_v11 = vcombine.low %v2046_v63, %v2050_v38  ;;  %v2085_v38 = vld [vmem:[%s19721_s14 + $0x2d40] sm:$0xff] }
 0x387   : > { %11438 = vmatpush1.bf16.msra.mxu0 %v17548_v48  ;;  %12012 = vmatpush1.bf16.msra.mxu1 %v17550_v49  ;;  %v566_v48 = vcombine.high %v20654_v37, %v20654_v37  ;;  %v20664_v49 = vpack.c.bf16 %v20573_v12, %v20573_v12  ;;  %v2062_v12 = vld [vmem:[%s19721_s14 + $0x2c88] sm:$0xff] }
 0x388   : > { %11439 = vmatprep.subr.bf16.mxu0 %v17557_v50  ;;  %12013 = vmatprep.subr.bf16.mxu1 %v17559_v51  ;;  %v2054_v50 = vld [vmem:[%s19721_s14 + $0x2c48] sm:$0xff] }
 0x389   : > { %v2058_v51 = vld [vmem:[%s19721_s14 + $0x2c68] sm:$0xff] }
 0x38a   : > { %v17599_v24 = vcombine.high %v2054_v50, %v2058_v51  ;;  %v17598_v5 = vcombine.low %v2054_v50, %v2058_v51  ;;  %v2093_v50 = vld [vmem:[%s19721_s14 + $0x2d80] sm:$0xff] }
 0x38b   : > { %11440 = vmatpush1.bf16.msra.mxu0 %v17556_v58  ;;  %12014 = vmatpush1.bf16.msra.mxu1 %v17558_v59  ;;  %v2061_v58 = vld [vmem:[%s19721_s14 + $0x2c80] sm:$0xff] }
 0x38c   : > { %11441 = vmatprep.subr.bf16.mxu0 %v17565_v61  ;;  %12015 = vmatprep.subr.bf16.mxu1 %v17567_v62  ;;  %v2065_v59 = vld [vmem:[%s19721_s14 + $0x2ca0] sm:$0xff]  ;;  %v20670_v61 = vpack.c.bf16 %v566_v48, %v566_v48  ;;  %v2066_v62 = vld [vmem:[%s19721_s14 + $0x2ca8] sm:$0xff] }
 0x38d   : > { %v17605_v57 = vcombine.high %v2061_v58, %v2065_v59  ;;  %v17607_v7 = vcombine.high %v2062_v12, %v2066_v62  ;;  %v17604_v15 = vcombine.low %v2061_v58, %v2065_v59  ;;  %v17606_v60 = vcombine.low %v2062_v12, %v2066_v62  ;;  %v2097_v51 = vld [vmem:[%s19721_s14 + $0x2da0] sm:$0xff] }
 0x38e   : > { %v17637_v58 = vcombine.high %v2093_v50, %v2097_v51  ;;  %v2101_v12 = vld [vmem:[%s19721_s14 + $0x2dc0] sm:$0xff] }
 0x38f   : > { %11442 = vmatpush1.bf16.msra.mxu0 %v17564_v8  ;;  %12016 = vmatpush1.bf16.msra.mxu1 %v17566_v9  ;;  %v2069_v8 = vld [vmem:[%s19721_s14 + $0x2cc0] sm:$0xff] }
 0x390   : > { %11443 = vmatprep.subr.bf16.mxu0 %v17573_v18  ;;  %12017 = vmatprep.subr.bf16.mxu1 %v17575_v20  ;;  %v2073_v9 = vld [vmem:[%s19721_s14 + $0x2ce0] sm:$0xff]  ;;  %v2070_v18 = vld [vmem:[%s19721_s14 + $0x2cc8] sm:$0xff] }
 0x391   : > { %v2074_v20 = vld [vmem:[%s19721_s14 + $0x2ce8] sm:$0xff]  ;;  %v17613_v21 = vcombine.high %v2069_v8, %v2073_v9  ;;  %v2105_v62 = vld [vmem:[%s19721_s14 + $0x2de0] sm:$0xff] }
 0x392   : > { %v17615_v22 = vcombine.high %v2070_v18, %v2074_v20  ;;  %v17614_v4 = vcombine.low %v2070_v18, %v2074_v20  ;;  %v2109_v18 = vld [vmem:[%s19721_s14 + $0x2e00] sm:$0xff] }
 0x393   : > { %11444 = vmatpush1.bf16.msra.mxu0 %v17572_v25  ;;  %12018 = vmatpush1.bf16.msra.mxu1 %v17574_v28  ;;  %v2081_v25 = vld [vmem:[%s19721_s14 + $0x2d20] sm:$0xff]  ;;  %v2078_v28 = vld [vmem:[%s19721_s14 + $0x2d08] sm:$0xff] }
 0x394   : > { %11445 = vmatprep.subr.bf16.mxu0 %v17581_v14  ;;  %12019 = vmatprep.subr.bf16.mxu1 %v17583_v34  ;;  %v2082_v14 = vld [vmem:[%s19721_s14 + $0x2d28] sm:$0xff]  ;;  %v17612_v34 = vcombine.low %v2069_v8, %v2073_v9  ;;  %v17621_v36 = vcombine.high %v2077_v23, %v2081_v25  ;;  %v17645_v8 = vcombine.high %v2101_v12, %v2105_v62  ;;  %v2113_v20 = vld [vmem:[%s19721_s14 + $0x2e20] sm:$0xff] }
 0x395   : > { %v17623_v63 = vcombine.high %v2078_v28, %v2082_v14  ;;  %v17622_v46 = vcombine.low %v2078_v28, %v2082_v14  ;;  %v2117_v28 = vld [vmem:[%s19721_s14 + $0x2e40] sm:$0xff] }
 0x396   : > { %v2121_v14 = vld [vmem:[%s19721_s14 + $0x2e60] sm:$0xff] }
 0x397   : > { %11446 = vmatpush1.bf16.msra.mxu0 %v17580_v29  ;;  %12020 = vmatpush1.bf16.msra.mxu1 %v17582_v56  ;;  %v2089_v29 = vld [vmem:[%s19721_s14 + $0x2d60] sm:$0xff]  ;;  %v2086_v56 = vld [vmem:[%s19721_s14 + $0x2d48] sm:$0xff] }
 0x398   : > { %11456 = vmatprep.subr.bf16.mxu0 %v17589_v6  ;;  %12030 = vmatprep.subr.bf16.mxu1 %v17591_v44  ;;  %v2090_v6 = vld [vmem:[%s19721_s14 + $0x2d68] sm:$0xff]  ;;  %v17620_v44 = vcombine.low %v2077_v23, %v2081_v25  ;;  %v17629_v47 = vcombine.high %v2085_v38, %v2089_v29  ;;  %v17653_v23 = vcombine.high %v2109_v18, %v2113_v20 }
 0x399   : > { %v17631_v48 = vcombine.high %v2086_v56, %v2090_v6 }
 0x39a   : > { %11448 = vmatmul.mubr.bf16.vlgmr.msra.gmra.mrb[0].mxu0 %v20664_v49  ;;  %12022 = vmatmul.mubr.bf16.vlgmr.msra.gmra.mrb[0].mxu1 %v20664_v49 }
 0x39b   : > { %11457 = vmatpush1.bf16.msra.mxu0 %v17588_v53  ;;  %12031 = vmatpush1.bf16.msra.mxu1 %v17590_v11  ;;  %v2094_v53 = vld [vmem:[%s19721_s14 + $0x2d88] sm:$0xff] }
 0x39c   : > { %11458 = vmatprep.subr.bf16.mxu0 %v17597_v55  ;;  %12032 = vmatprep.subr.bf16.mxu1 %v17599_v24  ;;  %v2098_v11 = vld [vmem:[%s19721_s14 + $0x2da8] sm:$0xff]  ;;  %v17628_v55 = vcombine.low %v2085_v38, %v2089_v29  ;;  %v17630_v24 = vcombine.low %v2086_v56, %v2090_v6  ;;  %v17661_v38 = vcombine.high %v2117_v28, %v2121_v14  ;;  %v2125_v56 = vld [vmem:[%s19721_s14 + $0x2e80] sm:$0xff] }
 0x39d   : > { %11488 = vmatprep.mubr.bf16.mxu0 %v20670_v61  ;;  %12062 = vmatprep.mubr.bf16.mxu1 %v20670_v61  ;;  %v17639_v59 = vcombine.high %v2094_v53, %v2098_v11  ;;  %v2129_v6 = vld [vmem:[%s19721_s14 + $0x2ea0] sm:$0xff] }
 0x39f   : > { %11459 = vmatpush1.bf16.msra.mxu0 %v17596_v2  ;;  %12033 = vmatpush1.bf16.msra.mxu1 %v17598_v5  ;;  %v2102_v2 = vld [vmem:[%s19721_s14 + $0x2dc8] sm:$0xff] }
 0x3a0   : > { %11460 = vmatprep.subr.bf16.mxu0 %v17605_v57  ;;  %12034 = vmatprep.subr.bf16.mxu1 %v17607_v7  ;;  %v2106_v5 = vld [vmem:[%s19721_s14 + $0x2de8] sm:$0xff]  ;;  %v17636_v57 = vcombine.low %v2093_v50, %v2097_v51  ;;  %v17638_v7 = vcombine.low %v2094_v53, %v2098_v11  ;;  %v17669_v50 = vcombine.high %v2125_v56, %v2129_v6  ;;  %v2133_v53 = vld [vmem:[%s19721_s14 + $0x2ec0] sm:$0xff] }
 0x3a1   : > { %v17647_v9 = vcombine.high %v2102_v2, %v2106_v5  ;;  %v2137_v11 = vld [vmem:[%s19721_s14 + $0x2ee0] sm:$0xff] }
 0x3a3   : > { %11461 = vmatpush1.bf16.msra.mxu0 %v17604_v15  ;;  %12035 = vmatpush1.bf16.msra.mxu1 %v17606_v60  ;;  %v2110_v15 = vld [vmem:[%s19721_s14 + $0x2e08] sm:$0xff] }
 0x3a4   : > { %11462 = vmatprep.subr.bf16.mxu0 %v17613_v21  ;;  %12036 = vmatprep.subr.bf16.mxu1 %v17615_v22  ;;  %v2114_v60 = vld [vmem:[%s19721_s14 + $0x2e28] sm:$0xff]  ;;  %v17644_v21 = vcombine.low %v2101_v12, %v2105_v62  ;;  %v17646_v22 = vcombine.low %v2102_v2, %v2106_v5  ;;  %v17677_v12 = vcombine.high %v2133_v53, %v2137_v11  ;;  %v2141_v2 = vld [vmem:[%s19721_s14 + $0x2f00] sm:$0xff] }
 0x3a5   : > { %v17655_v25 = vcombine.high %v2110_v15, %v2114_v60  ;;  %v2145_v5 = vld [vmem:[%s19721_s14 + $0x2f20] sm:$0xff] }
 0x3a7   : > { %11463 = vmatpush1.bf16.msra.mxu0 %v17612_v34  ;;  %12037 = vmatpush1.bf16.msra.mxu1 %v17614_v4  ;;  %v2118_v34 = vld [vmem:[%s19721_s14 + $0x2e48] sm:$0xff] }
 0x3a8   : > { %11464 = vmatprep.subr.bf16.mxu0 %v17621_v36  ;;  %12038 = vmatprep.subr.bf16.mxu1 %v17623_v63  ;;  %v2122_v4 = vld [vmem:[%s19721_s14 + $0x2e68] sm:$0xff]  ;;  %v17652_v36 = vcombine.low %v2109_v18, %v2113_v20  ;;  %v17654_v63 = vcombine.low %v2110_v15, %v2114_v60  ;;  %v17685_v18 = vcombine.high %v2141_v2, %v2145_v5  ;;  %v2149_v15 = vld [vmem:[%s19721_s14 + $0x2f40] sm:$0xff] }
 0x3a9   : > { %v17663_v29 = vcombine.high %v2118_v34, %v2122_v4  ;;  %v2153_v60 = vld [vmem:[%s19721_s14 + $0x2f60] sm:$0xff] }
 0x3ab   : > { %11465 = vmatpush1.bf16.msra.mxu0 %v17620_v44  ;;  %12039 = vmatpush1.bf16.msra.mxu1 %v17622_v46  ;;  %v2126_v44 = vld [vmem:[%s19721_s14 + $0x2e88] sm:$0xff] }
 0x3ac   : > { %11466 = vmatprep.subr.bf16.mxu0 %v17629_v47  ;;  %12040 = vmatprep.subr.bf16.mxu1 %v17631_v48  ;;  %v2130_v46 = vld [vmem:[%s19721_s14 + $0x2ea8] sm:$0xff]  ;;  %v17660_v47 = vcombine.low %v2117_v28, %v2121_v14  ;;  %v17662_v48 = vcombine.low %v2118_v34, %v2122_v4  ;;  %v17693_v28 = vcombine.high %v2149_v15, %v2153_v60  ;;  %v2157_v34 = vld [vmem:[%s19721_s14 + $0x2f80] sm:$0xff] }
 0x3ad   : > { %v17671_v51 = vcombine.high %v2126_v44, %v2130_v46  ;;  %v2161_v4 = vld [vmem:[%s19721_s14 + $0x2fa0] sm:$0xff] }
 0x3af   : > { %11467 = vmatpush1.bf16.msra.mxu0 %v17628_v55  ;;  %12041 = vmatpush1.bf16.msra.mxu1 %v17630_v24  ;;  %v2134_v55 = vld [vmem:[%s19721_s14 + $0x2ec8] sm:$0xff] }
 0x3b0   : > { %11468 = vmatprep.subr.bf16.mxu0 %v17637_v58  ;;  %12042 = vmatprep.subr.bf16.mxu1 %v17639_v59  ;;  %v2138_v24 = vld [vmem:[%s19721_s14 + $0x2ee8] sm:$0xff]  ;;  %v17668_v58 = vcombine.low %v2125_v56, %v2129_v6  ;;  %v17670_v59 = vcombine.low %v2126_v44, %v2130_v46  ;;  %v17701_v56 = vcombine.high %v2157_v34, %v2161_v4  ;;  %v2165_v44 = vld [vmem:[%s19721_s14 + $0x2fc0] sm:$0xff] }
 0x3b1   : > { %v17679_v62 = vcombine.high %v2134_v55, %v2138_v24  ;;  %v2169_v46 = vld [vmem:[%s19721_s14 + $0x2fe0] sm:$0xff] }
 0x3b3   : > { %11469 = vmatpush1.bf16.msra.mxu0 %v17636_v57  ;;  %12043 = vmatpush1.bf16.msra.mxu1 %v17638_v7  ;;  %v2142_v57 = vld [vmem:[%s19721_s14 + $0x2f08] sm:$0xff] }
 0x3b4   : > { %11470 = vmatprep.subr.bf16.mxu0 %v17645_v8  ;;  %12044 = vmatprep.subr.bf16.mxu1 %v17647_v9  ;;  %v2146_v7 = vld [vmem:[%s19721_s14 + $0x2f28] sm:$0xff]  ;;  %v17676_v8 = vcombine.low %v2133_v53, %v2137_v11  ;;  %v17678_v9 = vcombine.low %v2134_v55, %v2138_v24  ;;  %v17709_v11 = vcombine.high %v2165_v44, %v2169_v46  ;;  %v2173_v24 = vld [vmem:[%s19721_s14 + $0x3000] sm:$0xff] }
 0x3b5   : > { %v17687_v20 = vcombine.high %v2142_v57, %v2146_v7 }
 0x3b7   : > { %11471 = vmatpush1.bf16.msra.mxu0 %v17644_v21  ;;  %12045 = vmatpush1.bf16.msra.mxu1 %v17646_v22  ;;  %v2150_v21 = vld [vmem:[%s19721_s14 + $0x2f48] sm:$0xff] }
 0x3b8   : > { %11472 = vmatprep.subr.bf16.mxu0 %v17653_v23  ;;  %12046 = vmatprep.subr.bf16.mxu1 %v17655_v25  ;;  %v2154_v22 = vld [vmem:[%s19721_s14 + $0x2f68] sm:$0xff]  ;;  %v17684_v23 = vcombine.low %v2141_v2, %v2145_v5  ;;  %v17686_v25 = vcombine.low %v2142_v57, %v2146_v7  ;;  %v17708_v2 = vcombine.low %v2165_v44, %v2169_v46 }
 0x3b9   : > { %v17695_v14 = vcombine.high %v2150_v21, %v2154_v22  ;;  %v2198_v44 = vld [vmem:[%s19721_s14 + $0x30c8] sm:$0xff] }
 0x3ba   : > { %v2202_v46 = vld [vmem:[%s19721_s14 + $0x30e8] sm:$0xff] }
 0x3bb   : > { %11473 = vmatpush1.bf16.msra.mxu0 %v17652_v36  ;;  %12047 = vmatpush1.bf16.msra.mxu1 %v17654_v63  ;;  %v2158_v36 = vld [vmem:[%s19721_s14 + $0x2f88] sm:$0xff] }
 0x3bc   : > { %11474 = vmatprep.subr.bf16.mxu0 %v17661_v38  ;;  %12048 = vmatprep.subr.bf16.mxu1 %v17663_v29  ;;  %v2162_v63 = vld [vmem:[%s19721_s14 + $0x2fa8] sm:$0xff]  ;;  %v17692_v38 = vcombine.low %v2149_v15, %v2153_v60  ;;  %v17694_v29 = vcombine.low %v2150_v21, %v2154_v22 }
 0x3bd   : > { %v17703_v6 = vcombine.high %v2158_v36, %v2162_v63  ;;  %v17702_v53 = vcombine.low %v2158_v36, %v2162_v63  ;;  %v2182_v15 = vld [vmem:[%s19721_s14 + $0x3048] sm:$0xff] }
 0x3be   : > { %v2186_v60 = vld [vmem:[%s19721_s14 + $0x3068] sm:$0xff] }
 0x3bf   : > { %11475 = vmatpush1.bf16.msra.mxu0 %v17660_v47  ;;  %12049 = vmatpush1.bf16.msra.mxu1 %v17662_v48  ;;  %v2166_v47 = vld [vmem:[%s19721_s14 + $0x2fc8] sm:$0xff]  ;;  %v17726_v63 = vcombine.low %v2182_v15, %v2186_v60 }
 0x3c0   : > { %11476 = vmatprep.subr.bf16.mxu0 %v17669_v50  ;;  %12050 = vmatprep.subr.bf16.mxu1 %v17671_v51  ;;  %v2170_v48 = vld [vmem:[%s19721_s14 + $0x2fe8] sm:$0xff]  ;;  %v20731_v50 = vld [vmem:[%s19743_s25 + $0x30] sm:$0x3f]  ;;  %v17700_v51 = vcombine.low %v2157_v34, %v2161_v4 }
 0x3c1   : > { %v17711_v55 = vcombine.high %v2166_v47, %v2170_v48  ;;  %v17710_v5 = vcombine.low %v2166_v47, %v2170_v48  ;;  %v2194_v4 = vld [vmem:[%s19721_s14 + $0x30a8] sm:$0xff] }
 0x3c3   : > { %11477 = vmatpush1.bf16.msra.mxu0 %v17668_v58  ;;  %12051 = vmatpush1.bf16.msra.mxu1 %v17670_v59  ;;  %v2177_v58 = vld [vmem:[%s19721_s14 + $0x3020] sm:$0xff]  ;;  %v20737_v59 = vrot.slane %v20731_v50, %v19776_v54 }
 0x3c4   : > { %11478 = vmatprep.subr.bf16.mxu0 %v17677_v12  ;;  %12052 = vmatprep.subr.bf16.mxu1 %v17679_v62  ;;  %v2174_v12 = vld [vmem:[%s19721_s14 + $0x3008] sm:$0xff]  ;;  %v17717_v57 = vcombine.high %v2173_v24, %v2177_v58  ;;  %v17716_v21 = vcombine.low %v2173_v24, %v2177_v58 }
 0x3c5   : > { %v2178_v62 = vld [vmem:[%s19721_s14 + $0x3028] sm:$0xff] }
 0x3c6   : > { %v17719_v7 = vcombine.high %v2174_v12, %v2178_v62  ;;  %v17718_v22 = vcombine.low %v2174_v12, %v2178_v62  ;;  %v2206_v24 = vld [vmem:[%s19721_s14 + $0x3108] sm:$0xff]  ;;  %v17742_v62 = vcombine.low %v2198_v44, %v2202_v46 }
 0x3c7   : > { %11479 = vmatpush1.bf16.msra.mxu0 %v17676_v8  ;;  %12053 = vmatpush1.bf16.msra.mxu1 %v17678_v9  ;;  %v2181_v8 = vld [vmem:[%s19721_s14 + $0x3040] sm:$0xff]  ;;  %v2210_v58 = vld [vmem:[%s19721_s14 + $0x3128] sm:$0xff] }
 0x3c8   : > { %11480 = vmatprep.subr.bf16.mxu0 %v17685_v18  ;;  %12054 = vmatprep.subr.bf16.mxu1 %v17687_v20  ;;  %v2185_v9 = vld [vmem:[%s19721_s14 + $0x3060] sm:$0xff]  ;;  %v582_v18 = vcombine.high %v20737_v59, %v20737_v59  ;;  %v20747_v20 = vpack.c.bf16 %v20654_v37, %v20654_v37  ;;  %v2190_v37 = vld [vmem:[%s19721_s14 + $0x3088] sm:$0xff] }
 0x3c9   : > { %v17724_v36 = vcombine.low %v2181_v8, %v2185_v9  ;;  %v17734_v48 = vcombine.low %v2190_v37, %v2194_v4 }
 0x3ca   : > { %v20753_v34 = vpack.c.bf16 %v582_v18, %v582_v18 }
 0x3cb   : > { %11481 = vmatpush1.bf16.msra.mxu0 %v17684_v23  ;;  %12055 = vmatpush1.bf16.msra.mxu1 %v17686_v25  ;;  %v17725_v23 = vcombine.high %v2181_v8, %v2185_v9  ;;  %v17727_v25 = vcombine.high %v2182_v15, %v2186_v60  ;;  %v2214_v8 = vld [vmem:[%s19721_s14 + $0x3148] sm:$0xff]  ;;  %v17750_v15 = vcombine.low %v2206_v24, %v2210_v58 }
 0x3cc   : > { %11482 = vmatprep.subr.bf16.mxu0 %v17693_v28  ;;  %12056 = vmatprep.subr.bf16.mxu1 %v17695_v14  ;;  %v2189_v28 = vld [vmem:[%s19721_s14 + $0x3080] sm:$0xff]  ;;  %v2218_v9 = vld [vmem:[%s19721_s14 + $0x3168] sm:$0xff] }
 0x3cd   : > { %v2193_v14 = vld [vmem:[%s19721_s14 + $0x30a0] sm:$0xff] }
 0x3ce   : > { %v17732_v47 = vcombine.low %v2189_v28, %v2193_v14 }
 0x3cf   : > { %11483 = vmatpush1.bf16.msra.mxu0 %v17692_v38  ;;  %12057 = vmatpush1.bf16.msra.mxu1 %v17694_v29  ;;  %v17733_v38 = vcombine.high %v2189_v28, %v2193_v14  ;;  %v17735_v29 = vcombine.high %v2190_v37, %v2194_v4  ;;  %v2226_v28 = vld [vmem:[%s19721_s14 + $0x31a8] sm:$0xff]  ;;  %v17758_v37 = vcombine.low %v2214_v8, %v2218_v9 }
 0x3d0   : > { %11484 = vmatprep.subr.bf16.mxu0 %v17701_v56  ;;  %12058 = vmatprep.subr.bf16.mxu1 %v17703_v6  ;;  %v2197_v56 = vld [vmem:[%s19721_s14 + $0x30c0] sm:$0xff] }
 0x3d1   : > { %v2201_v6 = vld [vmem:[%s19721_s14 + $0x30e0] sm:$0xff] }
 0x3d2   : > { %v17740_v12 = vcombine.low %v2197_v56, %v2201_v6 }
 0x3d3   : > { %11485 = vmatpush1.bf16.msra.mxu0 %v17700_v51  ;;  %12059 = vmatpush1.bf16.msra.mxu1 %v17702_v53  ;;  %v17741_v51 = vcombine.high %v2197_v56, %v2201_v6  ;;  %v17743_v53 = vcombine.high %v2198_v44, %v2202_v46  ;;  %v2234_v56 = vld [vmem:[%s19721_s14 + $0x31e8] sm:$0xff] }
 0x3d4   : > { %11486 = vmatprep.subr.bf16.mxu0 %v17709_v11  ;;  %12060 = vmatprep.subr.bf16.mxu1 %v17711_v55  ;;  %v2205_v11 = vld [vmem:[%s19721_s14 + $0x3100] sm:$0xff] }
 0x3d5   : > { %v2209_v55 = vld [vmem:[%s19721_s14 + $0x3120] sm:$0xff] }
 0x3d6   : > { %v17748_v18 = vcombine.low %v2205_v11, %v2209_v55 }
 0x3d7   : > { %11487 = vmatpush1.bf16.msra.mxu0 %v17708_v2  ;;  %12061 = vmatpush1.bf16.msra.mxu1 %v17710_v5  ;;  %v17749_v2 = vcombine.high %v2205_v11, %v2209_v55  ;;  %v17751_v5 = vcombine.high %v2206_v24, %v2210_v58  ;;  %v2242_v11 = vld [vmem:[%s19721_s14 + $0x3228] sm:$0xff] }
 0x3d8   : > { %11497 = vmatprep.subr.bf16.mxu0 %v17717_v57  ;;  %12071 = vmatprep.subr.bf16.mxu1 %v17719_v7  ;;  %v2213_v57 = vld [vmem:[%s19721_s14 + $0x3140] sm:$0xff] }
 0x3d9   : > { %v2217_v7 = vld [vmem:[%s19721_s14 + $0x3160] sm:$0xff] }
 0x3da   : > { %11489 = vmatmul.mubr.bf16.vlgmr.msra.gmra.mrb[0].mxu0 %v20747_v20  ;;  %12063 = vmatmul.mubr.bf16.vlgmr.msra.gmra.mrb[0].mxu1 %v20747_v20  ;;  %v17757_v60 = vcombine.high %v2213_v57, %v2217_v7  ;;  %v17756_v14 = vcombine.low %v2213_v57, %v2217_v7  ;;  %v2250_v57 = vld [vmem:[%s19721_s14 + $0x3268] sm:$0xff] }
 0x3db   : > { %11498 = vmatpush1.bf16.msra.mxu0 %v17716_v21  ;;  %12072 = vmatpush1.bf16.msra.mxu1 %v17718_v22  ;;  %v17759_v21 = vcombine.high %v2214_v8, %v2218_v9  ;;  %v2221_v22 = vld [vmem:[%s19721_s14 + $0x3180] sm:$0xff] }
 0x3dc   : > { %11499 = vmatprep.subr.bf16.mxu0 %v17725_v23  ;;  %12073 = vmatprep.subr.bf16.mxu1 %v17727_v25  ;;  %v2225_v23 = vld [vmem:[%s19721_s14 + $0x31a0] sm:$0xff]  ;;  %v2222_v25 = vld [vmem:[%s19721_s14 + $0x3188] sm:$0xff] }
 0x3dd   : > { %11529 = vmatprep.mubr.bf16.mxu0 %v20753_v34  ;;  %12103 = vmatprep.mubr.bf16.mxu1 %v20753_v34  ;;  %v17765_v4 = vcombine.high %v2221_v22, %v2225_v23  ;;  %v17764_v6 = vcombine.low %v2221_v22, %v2225_v23  ;;  %v17766_v44 = vcombine.low %v2222_v25, %v2226_v28  ;;  %v2258_v22 = vld [vmem:[%s19721_s14 + $0x32a8] sm:$0xff] }
 0x3df   : > { %11500 = vmatpush1.bf16.msra.mxu0 %v17724_v36  ;;  %12074 = vmatpush1.bf16.msra.mxu1 %v17726_v63  ;;  %v17767_v36 = vcombine.high %v2222_v25, %v2226_v28  ;;  %v2229_v63 = vld [vmem:[%s19721_s14 + $0x31c0] sm:$0xff] }
 0x3e0   : > { %11501 = vmatprep.subr.bf16.mxu0 %v17733_v38  ;;  %12075 = vmatprep.subr.bf16.mxu1 %v17735_v29  ;;  %v2233_v38 = vld [vmem:[%s19721_s14 + $0x31e0] sm:$0xff]  ;;  %v2230_v29 = vld [vmem:[%s19721_s14 + $0x31c8] sm:$0xff] }
 0x3e1   : > { %v17773_v46 = vcombine.high %v2229_v63, %v2233_v38  ;;  %v17772_v55 = vcombine.low %v2229_v63, %v2233_v38  ;;  %v17774_v24 = vcombine.low %v2230_v29, %v2234_v56  ;;  %v2266_v63 = vld [vmem:[%s19721_s14 + $0x32e8] sm:$0xff] }
 0x3e3   : > { %11502 = vmatpush1.bf16.msra.mxu0 %v17732_v47  ;;  %12076 = vmatpush1.bf16.msra.mxu1 %v17734_v48  ;;  %v17775_v47 = vcombine.high %v2230_v29, %v2234_v56  ;;  %v2237_v48 = vld [vmem:[%s19721_s14 + $0x3200] sm:$0xff] }
 0x3e4   : > { %11503 = vmatprep.subr.bf16.mxu0 %v17741_v51  ;;  %12077 = vmatprep.subr.bf16.mxu1 %v17743_v53  ;;  %v2241_v51 = vld [vmem:[%s19721_s14 + $0x3220] sm:$0xff]  ;;  %v2238_v53 = vld [vmem:[%s19721_s14 + $0x3208] sm:$0xff] }
 0x3e5   : > { %v17781_v58 = vcombine.high %v2237_v48, %v2241_v51  ;;  %v17780_v7 = vcombine.low %v2237_v48, %v2241_v51  ;;  %v17782_v8 = vcombine.low %v2238_v53, %v2242_v11  ;;  %v2274_v48 = vld [vmem:[%s19721_s14 + $0x3328] sm:$0xff] }
 0x3e7   : > { %11504 = vmatpush1.bf16.msra.mxu0 %v17740_v12  ;;  %12078 = vmatpush1.bf16.msra.mxu1 %v17742_v62  ;;  %v17783_v12 = vcombine.high %v2238_v53, %v2242_v11  ;;  %v2245_v62 = vld [vmem:[%s19721_s14 + $0x3240] sm:$0xff] }
 0x3e8   : > { %11505 = vmatprep.subr.bf16.mxu0 %v17749_v2  ;;  %12079 = vmatprep.subr.bf16.mxu1 %v17751_v5  ;;  %v2249_v2 = vld [vmem:[%s19721_s14 + $0x3260] sm:$0xff]  ;;  %v2246_v5 = vld [vmem:[%s19721_s14 + $0x3248] sm:$0xff] }
 0x3e9   : > { %v17789_v9 = vcombine.high %v2245_v62, %v2249_v2  ;;  %v17788_v23 = vcombine.low %v2245_v62, %v2249_v2  ;;  %v17790_v25 = vcombine.low %v2246_v5, %v2250_v57  ;;  %v2282_v62 = vld [vmem:[%s19721_s14 + $0x3368] sm:$0xff] }
 0x3eb   : > { %11506 = vmatpush1.bf16.msra.mxu0 %v17748_v18  ;;  %12080 = vmatpush1.bf16.msra.mxu1 %v17750_v15  ;;  %v17791_v18 = vcombine.high %v2246_v5, %v2250_v57  ;;  %v2253_v15 = vld [vmem:[%s19721_s14 + $0x3280] sm:$0xff] }
 0x3ec   : > { %11507 = vmatprep.subr.bf16.mxu0 %v17757_v60  ;;  %12081 = vmatprep.subr.bf16.mxu1 %v17759_v21  ;;  %v2257_v60 = vld [vmem:[%s19721_s14 + $0x32a0] sm:$0xff]  ;;  %v2254_v21 = vld [vmem:[%s19721_s14 + $0x3288] sm:$0xff] }
 0x3ed   : > { %v17797_v28 = vcombine.high %v2253_v15, %v2257_v60  ;;  %v17796_v38 = vcombine.low %v2253_v15, %v2257_v60  ;;  %v17798_v29 = vcombine.low %v2254_v21, %v2258_v22  ;;  %v2290_v15 = vld [vmem:[%s19721_s14 + $0x33a8] sm:$0xff] }
 0x3ef   : > { %11508 = vmatpush1.bf16.msra.mxu0 %v17756_v14  ;;  %12082 = vmatpush1.bf16.msra.mxu1 %v17758_v37  ;;  %v17799_v14 = vcombine.high %v2254_v21, %v2258_v22  ;;  %v2261_v37 = vld [vmem:[%s19721_s14 + $0x32c0] sm:$0xff] }
 0x3f0   : > { %11509 = vmatprep.subr.bf16.mxu0 %v17765_v4  ;;  %12083 = vmatprep.subr.bf16.mxu1 %v17767_v36  ;;  %v2265_v4 = vld [vmem:[%s19721_s14 + $0x32e0] sm:$0xff]  ;;  %v2262_v36 = vld [vmem:[%s19721_s14 + $0x32c8] sm:$0xff] }
 0x3f1   : > { %v17805_v56 = vcombine.high %v2261_v37, %v2265_v4  ;;  %v17804_v51 = vcombine.low %v2261_v37, %v2265_v4  ;;  %v17806_v53 = vcombine.low %v2262_v36, %v2266_v63  ;;  %v2298_v37 = vld [vmem:[%s19721_s14 + $0x33e8] sm:$0xff] }
 0x3f3   : > { %11510 = vmatpush1.bf16.msra.mxu0 %v17764_v6  ;;  %12084 = vmatpush1.bf16.msra.mxu1 %v17766_v44  ;;  %v17807_v6 = vcombine.high %v2262_v36, %v2266_v63  ;;  %v2269_v44 = vld [vmem:[%s19721_s14 + $0x3300] sm:$0xff] }
 0x3f4   : > { %11511 = vmatprep.subr.bf16.mxu0 %v17773_v46  ;;  %12085 = vmatprep.subr.bf16.mxu1 %v17775_v47  ;;  %v2273_v46 = vld [vmem:[%s19721_s14 + $0x3320] sm:$0xff]  ;;  %v2270_v47 = vld [vmem:[%s19721_s14 + $0x3308] sm:$0xff] }
 0x3f5   : > { %v17813_v11 = vcombine.high %v2269_v44, %v2273_v46  ;;  %v17812_v2 = vcombine.low %v2269_v44, %v2273_v46  ;;  %v17814_v5 = vcombine.low %v2270_v47, %v2274_v48  ;;  %v2306_v44 = vld [vmem:[%s19721_s14 + $0x3428] sm:$0xff] }
 0x3f7   : > { %11512 = vmatpush1.bf16.msra.mxu0 %v17772_v55  ;;  %12086 = vmatpush1.bf16.msra.mxu1 %v17774_v24  ;;  %v17815_v55 = vcombine.high %v2270_v47, %v2274_v48  ;;  %v2277_v24 = vld [vmem:[%s19721_s14 + $0x3340] sm:$0xff] }
 0x3f8   : > { %11513 = vmatprep.subr.bf16.mxu0 %v17781_v58  ;;  %12087 = vmatprep.subr.bf16.mxu1 %v17783_v12  ;;  %v2281_v58 = vld [vmem:[%s19721_s14 + $0x3360] sm:$0xff]  ;;  %v2278_v12 = vld [vmem:[%s19721_s14 + $0x3348] sm:$0xff] }
 0x3f9   : > { %v17821_v57 = vcombine.high %v2277_v24, %v2281_v58  ;;  %v17820_v60 = vcombine.low %v2277_v24, %v2281_v58  ;;  %v17822_v21 = vcombine.low %v2278_v12, %v2282_v62  ;;  %v2310_v24 = vld [vmem:[%s19721_s14 + $0x3448] sm:$0xff] }
 0x3fa   : > { %v2314_v58 = vld [vmem:[%s19721_s14 + $0x3468] sm:$0xff] }
 0x3fb   : > { %11514 = vmatpush1.bf16.msra.mxu0 %v17780_v7  ;;  %12088 = vmatpush1.bf16.msra.mxu1 %v17782_v8  ;;  %v17823_v7 = vcombine.high %v2278_v12, %v2282_v62  ;;  %v2285_v8 = vld [vmem:[%s19721_s14 + $0x3380] sm:$0xff] }
 0x3fc   : > { %11515 = vmatprep.subr.bf16.mxu0 %v17789_v9  ;;  %12089 = vmatprep.subr.bf16.mxu1 %v17791_v18  ;;  %v2289_v9 = vld [vmem:[%s19721_s14 + $0x33a0] sm:$0xff]  ;;  %v2286_v18 = vld [vmem:[%s19721_s14 + $0x3388] sm:$0xff] }
 0x3fd   : > { %v17829_v22 = vcombine.high %v2285_v8, %v2289_v9  ;;  %v17828_v4 = vcombine.low %v2285_v8, %v2289_v9  ;;  %v17830_v36 = vcombine.low %v2286_v18, %v2290_v15  ;;  %v2318_v8 = vld [vmem:[%s19721_s14 + $0x3488] sm:$0xff] }
 0x3ff   : > { %11516 = vmatpush1.bf16.msra.mxu0 %v17788_v23  ;;  %12090 = vmatpush1.bf16.msra.mxu1 %v17790_v25  ;;  %v17831_v23 = vcombine.high %v2286_v18, %v2290_v15  ;;  %v2293_v25 = vld [vmem:[%s19721_s14 + $0x33c0] sm:$0xff]  ;;  %v17854_v18 = vcombine.low %v2310_v24, %v2314_v58 }
 0x400   : > { %11517 = vmatprep.subr.bf16.mxu0 %v17797_v28  ;;  %12091 = vmatprep.subr.bf16.mxu1 %v17799_v14  ;;  %v2297_v28 = vld [vmem:[%s19721_s14 + $0x33e0] sm:$0xff]  ;;  %v2294_v14 = vld [vmem:[%s19721_s14 + $0x33c8] sm:$0xff] }
 0x401   : > { %v17837_v63 = vcombine.high %v2293_v25, %v2297_v28  ;;  %v17836_v46 = vcombine.low %v2293_v25, %v2297_v28  ;;  %v17838_v47 = vcombine.low %v2294_v14, %v2298_v37  ;;  %v2326_v25 = vld [vmem:[%s19721_s14 + $0x34c8] sm:$0xff] }
 0x402   : > { %v2330_v28 = vld [vmem:[%s19721_s14 + $0x34e8] sm:$0xff] }
 0x403   : > { %11518 = vmatpush1.bf16.msra.mxu0 %v17796_v38  ;;  %12092 = vmatpush1.bf16.msra.mxu1 %v17798_v29  ;;  %v17839_v38 = vcombine.high %v2294_v14, %v2298_v37  ;;  %v2301_v29 = vld [vmem:[%s19721_s14 + $0x3400] sm:$0xff] }
 0x404   : > { %11519 = vmatprep.subr.bf16.mxu0 %v17805_v56  ;;  %12093 = vmatprep.subr.bf16.mxu1 %v17807_v6  ;;  %v2305_v56 = vld [vmem:[%s19721_s14 + $0x3420] sm:$0xff]  ;;  %v2302_v6 = vld [vmem:[%s19721_s14 + $0x3408] sm:$0xff] }
 0x405   : > { %v17845_v48 = vcombine.high %v2301_v29, %v2305_v56  ;;  %v17844_v12 = vcombine.low %v2301_v29, %v2305_v56  ;;  %v17846_v62 = vcombine.low %v2302_v6, %v2306_v44  ;;  %v2334_v29 = vld [vmem:[%s19721_s14 + $0x3508] sm:$0xff] }
 0x406   : > { %v2338_v56 = vld [vmem:[%s19721_s14 + $0x3528] sm:$0xff] }
 0x407   : > { %11520 = vmatpush1.bf16.msra.mxu0 %v17804_v51  ;;  %12094 = vmatpush1.bf16.msra.mxu1 %v17806_v53  ;;  %v17847_v51 = vcombine.high %v2302_v6, %v2306_v44  ;;  %v2309_v53 = vld [vmem:[%s19721_s14 + $0x3440] sm:$0xff]  ;;  %v17870_v44 = vcombine.low %v2326_v25, %v2330_v28 }
 0x408   : > { %11521 = vmatprep.subr.bf16.mxu0 %v17813_v11  ;;  %12095 = vmatprep.subr.bf16.mxu1 %v17815_v55  ;;  %v2313_v11 = vld [vmem:[%s19721_s14 + $0x3460] sm:$0xff]  ;;  %v20821_v55 = vpack.c.bf16 %v20737_v59, %v20737_v59  ;;  %v2322_v59 = vld [vmem:[%s19721_s14 + $0x34a8] sm:$0xff] }
 0x409   : > { %v17852_v9 = vcombine.low %v2309_v53, %v2313_v11  ;;  %v17862_v37 = vcombine.low %v2318_v8, %v2322_v59 }
 0x40b   : > { %11522 = vmatpush1.bf16.msra.mxu0 %v17812_v2  ;;  %12096 = vmatpush1.bf16.msra.mxu1 %v17814_v5  ;;  %v17853_v2 = vcombine.high %v2309_v53, %v2313_v11  ;;  %v17855_v5 = vcombine.high %v2310_v24, %v2314_v58  ;;  %v2342_v53 = vld [vmem:[%s19721_s14 + $0x3548] sm:$0xff]  ;;  %v17878_v58 = vcombine.low %v2334_v29, %v2338_v56 }
 0x40c   : > { %11523 = vmatprep.subr.bf16.mxu0 %v17821_v57  ;;  %12097 = vmatprep.subr.bf16.mxu1 %v17823_v7  ;;  %v2317_v57 = vld [vmem:[%s19721_s14 + $0x3480] sm:$0xff]  ;;  %v2346_v11 = vld [vmem:[%s19721_s14 + $0x3568] sm:$0xff] }
 0x40d   : > { %v2321_v7 = vld [vmem:[%s19721_s14 + $0x34a0] sm:$0xff] }
 0x40e   : > { %v17861_v15 = vcombine.high %v2317_v57, %v2321_v7  ;;  %v17860_v14 = vcombine.low %v2317_v57, %v2321_v7  ;;  %v2350_v57 = vld [vmem:[%s19721_s14 + $0x3588] sm:$0xff] }
 0x40f   : > { %11524 = vmatpush1.bf16.msra.mxu0 %v17820_v60  ;;  %12098 = vmatpush1.bf16.msra.mxu1 %v17822_v21  ;;  %v17863_v60 = vcombine.high %v2318_v8, %v2322_v59  ;;  %v2325_v21 = vld [vmem:[%s19721_s14 + $0x34c0] sm:$0xff]  ;;  %v2354_v7 = vld [vmem:[%s19721_s14 + $0x35a8] sm:$0xff]  ;;  %v17886_v59 = vcombine.low %v2342_v53, %v2346_v11 }
 0x410   : > { %11525 = vmatprep.subr.bf16.mxu0 %v17829_v22  ;;  %12099 = vmatprep.subr.bf16.mxu1 %v17831_v23  ;;  %v2329_v22 = vld [vmem:[%s19721_s14 + $0x34e0] sm:$0xff]  ;;  %v19427_v23 = vmov 0  }
 0x411   : > { %v17868_v6 = vcombine.low %v2325_v21, %v2329_v22 }
 0x413   : > { %11526 = vmatpush1.bf16.msra.mxu0 %v17828_v4  ;;  %12100 = vmatpush1.bf16.msra.mxu1 %v17830_v36  ;;  %v17869_v4 = vcombine.high %v2325_v21, %v2329_v22  ;;  %v17871_v36 = vcombine.high %v2326_v25, %v2330_v28  ;;  %v2358_v21 = vld [vmem:[%s19721_s14 + $0x35c8] sm:$0xff]  ;;  %v567_v25 = vcombine.high %v20731_v50, %v20731_v50 }
 0x414   : > { %11527 = vmatprep.subr.bf16.mxu0 %v17837_v63  ;;  %12101 = vmatprep.subr.bf16.mxu1 %v17839_v38  ;;  %v2333_v63 = vld [vmem:[%s19721_s14 + $0x3500] sm:$0xff]  ;;  %v2362_v22 = vld [vmem:[%s19721_s14 + $0x35e8] sm:$0xff] }
 0x415   : > { %v2337_v38 = vld [vmem:[%s19721_s14 + $0x3520] sm:$0xff] }
 0x416   : > { %v17876_v24 = vcombine.low %v2333_v63, %v2337_v38 }
 0x417   : > { %11528 = vmatpush1.bf16.msra.mxu0 %v17836_v46  ;;  %12102 = vmatpush1.bf16.msra.mxu1 %v17838_v47  ;;  %v17877_v46 = vcombine.high %v2333_v63, %v2337_v38  ;;  %v17879_v47 = vcombine.high %v2334_v29, %v2338_v56  ;;  %v643_v63 = vld [vmem:[%s19721_s14 + $0x30] sm:$0xff]  ;;  %v581_v38 = vrot.slane %v567_v25, %v19776_v54  ;;  %v640_v29 = vld [vmem:[%s19721_s14 + $0x18] sm:$0xff] }
 0x418   : > { %11538 = vmatprep.subr.bf16.mxu0 %v17845_v48  ;;  %12112 = vmatprep.subr.bf16.mxu1 %v17847_v51  ;;  %v2341_v48 = vld [vmem:[%s19721_s14 + $0x3540] sm:$0xff]  ;;  %v644_v56 = vld [vmem:[%s19721_s14 + $0x38] sm:$0xff] }
 0x419   : > { %v2345_v51 = vld [vmem:[%s19721_s14 + $0x3560] sm:$0xff] }
 0x41a   : > { %11530 = vmatmul.mubr.bf16.vlgmr.msra.gmra.mrb[0].mxu0 %v20821_v55  ;;  %12104 = vmatmul.mubr.bf16.vlgmr.msra.gmra.mrb[0].mxu1 %v20821_v55  ;;  %v17884_v8 = vcombine.low %v2341_v48, %v2345_v51 }
 0x41b   : > { %11539 = vmatpush1.bf16.msra.mxu0 %v17844_v12  ;;  %12113 = vmatpush1.bf16.msra.mxu1 %v17846_v62  ;;  %v17885_v12 = vcombine.high %v2341_v48, %v2345_v51  ;;  %v17887_v62 = vcombine.high %v2342_v53, %v2346_v11  ;;  %v651_v48 = vld [vmem:[%s19721_s14 + $0x70] sm:$0xff]  ;;  %v20862_v51 = vpack.c.bf16 %v581_v38, %v581_v38  ;;  %v648_v53 = vld [vmem:[%s19721_s14 + $0x58] sm:$0xff] }
 0x41c   : > { %11540 = vmatprep.subr.bf16.mxu0 %v17853_v2  ;;  %12114 = vmatprep.subr.bf16.mxu1 %v17855_v5  ;;  %v2349_v2 = vld [vmem:[%s19721_s14 + $0x3580] sm:$0xff]  ;;  %v652_v11 = vld [vmem:[%s19721_s14 + $0x78] sm:$0xff] }
 0x41d   : > { %11570 = vmatprep.mubr.bf16.mxu0 %v19427_v23  ;;  %12144 = vmatprep.mubr.bf16.mxu1 %v19427_v23  ;;  %v2353_v5 = vld [vmem:[%s19721_s14 + $0x35a0] sm:$0xff]  ;;  %v676_v38 = vld [vmem:[%s19721_s14 + $0x138] sm:$0xff] }
 0x41e   : > { %v17892_v28 = vcombine.low %v2349_v2, %v2353_v5 }
 0x41f   : > { %11541 = vmatpush1.bf16.msra.mxu0 %v17852_v9  ;;  %12115 = vmatpush1.bf16.msra.mxu1 %v17854_v18  ;;  %v17893_v9 = vcombine.high %v2349_v2, %v2353_v5  ;;  %v17895_v18 = vcombine.high %v2350_v57, %v2354_v7  ;;  %v655_v2 = vld [vmem:[%s19721_s14 + $0x90] sm:$0xff] }
 0x420   : > { %11542 = vmatprep.subr.bf16.mxu0 %v17861_v15  ;;  %12116 = vmatprep.subr.bf16.mxu1 %v17863_v60  ;;  %v2357_v15 = vld [vmem:[%s19721_s14 + $0x35c0] sm:$0xff]  ;;  %v659_v5 = vld [vmem:[%s19721_s14 + $0xb0] sm:$0xff] }
 0x421   : > { %v2361_v60 = vld [vmem:[%s19721_s14 + $0x35e0] sm:$0xff]  ;;  %v16200_v25 = vcombine.low %v655_v2, %v659_v5 }
 0x422   : > { %v17900_v50 = vcombine.low %v2357_v15, %v2361_v60 }
 0x423   : > { %11543 = vmatpush1.bf16.msra.mxu0 %v17860_v14  ;;  %12117 = vmatpush1.bf16.msra.mxu1 %v17862_v37  ;;  %v17894_v14 = vcombine.low %v2350_v57, %v2354_v7  ;;  %v17901_v37 = vcombine.high %v2357_v15, %v2361_v60  ;;  %v656_v57 = vld [vmem:[%s19721_s14 + $0x98] sm:$0xff]  ;;  %v663_v15 = vld [vmem:[%s19721_s14 + $0xd0] sm:$0xff] }
 0x424   : > { %11544 = vmatprep.subr.bf16.mxu0 %v17869_v4  ;;  %12118 = vmatprep.subr.bf16.mxu1 %v17871_v36  ;;  %v17903_v4 = vcombine.high %v2358_v21, %v2362_v22  ;;  %v639_v36 = vld [vmem:[%s19721_s14 + $0x10] sm:$0xff]  ;;  %v660_v7 = vld [vmem:[%s19721_s14 + $0xb8] sm:$0xff] }
 0x425   : > { %v667_v60 = vld [vmem:[%s19721_s14 + $0xf0] sm:$0xff] }
 0x427   : > { %11545 = vmatpush1.bf16.msra.mxu0 %v17868_v6  ;;  %12119 = vmatpush1.bf16.msra.mxu1 %v17870_v44  ;;  %v17902_v6 = vcombine.low %v2358_v21, %v2362_v22  ;;  %v16185_v44 = vcombine.high %v639_v36, %v643_v63  ;;  %v664_v21 = vld [vmem:[%s19721_s14 + $0xd8] sm:$0xff] }
 0x428   : > { %11546 = vmatprep.subr.bf16.mxu0 %v17877_v46  ;;  %12120 = vmatprep.subr.bf16.mxu1 %v17879_v47  ;;  %v16187_v46 = vcombine.high %v640_v29, %v644_v56  ;;  %v647_v47 = vld [vmem:[%s19721_s14 + $0x50] sm:$0xff]  ;;  %v668_v22 = vld [vmem:[%s19721_s14 + $0xf8] sm:$0xff] }
 0x42b   : > { %11547 = vmatpush1.bf16.msra.mxu0 %v17876_v24  ;;  %12121 = vmatpush1.bf16.msra.mxu1 %v17878_v58  ;;  %v16184_v24 = vcombine.low %v639_v36, %v643_v63  ;;  %v16186_v58 = vcombine.low %v640_v29, %v644_v56  ;;  %v675_v36 = vld [vmem:[%s19721_s14 + $0x130] sm:$0xff]  ;;  %v672_v63 = vld [vmem:[%s19721_s14 + $0x118] sm:$0xff]  ;;  %v16208_v29 = vcombine.low %v663_v15, %v667_v60 }
 0x42c   : > { %11548 = vmatprep.subr.bf16.mxu0 %v17885_v12  ;;  %12122 = vmatprep.subr.bf16.mxu1 %v17887_v62  ;;  %v16193_v12 = vcombine.high %v647_v47, %v651_v48  ;;  %v16195_v62 = vcombine.high %v648_v53, %v652_v11 }
 0x42f   : > { %11549 = vmatpush1.bf16.msra.mxu0 %v17884_v8  ;;  %12123 = vmatpush1.bf16.msra.mxu1 %v17886_v59  ;;  %v16192_v8 = vcombine.low %v647_v47, %v651_v48  ;;  %v16194_v59 = vcombine.low %v648_v53, %v652_v11  ;;  %v684_v47 = vld [vmem:[%s19721_s14 + $0x178] sm:$0xff]  ;;  %v16218_v53 = vcombine.low %v672_v63, %v676_v38 }
 0x430   : > { %11550 = vmatprep.subr.bf16.mxu0 %v17893_v9  ;;  %12124 = vmatprep.subr.bf16.mxu1 %v17895_v18  ;;  %v16201_v9 = vcombine.high %v655_v2, %v659_v5  ;;  %v16203_v18 = vcombine.high %v656_v57, %v660_v7  ;;  %v692_v2 = vld [vmem:[%s19721_s14 + $0x1b8] sm:$0xff] }
 0x433   : > { %11551 = vmatpush1.bf16.msra.mxu0 %v17892_v28  ;;  %12125 = vmatpush1.bf16.msra.mxu1 %v17894_v14  ;;  %v16202_v28 = vcombine.low %v656_v57, %v660_v7  ;;  %v16209_v14 = vcombine.high %v663_v15, %v667_v60  ;;  %v700_v15 = vld [vmem:[%s19721_s14 + $0x1f8] sm:$0xff] }
 0x434   : > { %11552 = vmatprep.subr.bf16.mxu0 %v17901_v37  ;;  %12126 = vmatprep.subr.bf16.mxu1 %v17903_v4  ;;  %v16211_v37 = vcombine.high %v664_v21, %v668_v22  ;;  %v671_v4 = vld [vmem:[%s19721_s14 + $0x110] sm:$0xff] }
 0x435   : > { %v16217_v56 = vcombine.high %v671_v4, %v675_v36  ;;  %v16216_v48 = vcombine.low %v671_v4, %v675_v36  ;;  %v708_v4 = vld [vmem:[%s19721_s14 + $0x238] sm:$0xff] }
 0x437   : > { %11553 = vmatpush1.bf16.msra.mxu0 %v17900_v50  ;;  %12127 = vmatpush1.bf16.msra.mxu1 %v17902_v6  ;;  %v16219_v50 = vcombine.high %v672_v63, %v676_v38  ;;  %v679_v6 = vld [vmem:[%s19721_s14 + $0x150] sm:$0xff] }
 0x438   : > { %12153 = vmatprep.subr.bf16.mxu0 %v16185_v44  ;;  %12727 = vmatprep.subr.bf16.mxu1 %v16187_v46  ;;  %v683_v44 = vld [vmem:[%s19721_s14 + $0x170] sm:$0xff]  ;;  %v680_v46 = vld [vmem:[%s19721_s14 + $0x158] sm:$0xff] }
 0x439   : > { %v16225_v11 = vcombine.high %v679_v6, %v683_v44  ;;  %v16224_v5 = vcombine.low %v679_v6, %v683_v44  ;;  %v16226_v57 = vcombine.low %v680_v46, %v684_v47  ;;  %v716_v6 = vld [vmem:[%s19721_s14 + $0x278] sm:$0xff] }
 0x43a   : > { %11571 = vmatmul.mubr.bf16.vlgmr.msra.gmra.mrb[0].mxu0 %v20862_v51  ;;  %12145 = vmatmul.mubr.bf16.vlgmr.msra.gmra.mrb[0].mxu1 %v20862_v51 }
 0x43b   : > { %12154 = vmatpush1.bf16.msra.mxu0 %v16184_v24  ;;  %12728 = vmatpush1.bf16.msra.mxu1 %v16186_v58  ;;  %v16227_v24 = vcombine.high %v680_v46, %v684_v47  ;;  %v687_v58 = vld [vmem:[%s19721_s14 + $0x190] sm:$0xff] }
 0x43c   : > { %12155 = vmatprep.subr.bf16.mxu0 %v16193_v12  ;;  %12729 = vmatprep.subr.bf16.mxu1 %v16195_v62  ;;  %v691_v12 = vld [vmem:[%s19721_s14 + $0x1b0] sm:$0xff]  ;;  %v688_v62 = vld [vmem:[%s19721_s14 + $0x198] sm:$0xff] }
 0x43d   : > { %12185 = vmatprep.mubr.bf16.mxu0 %v19795_v10  ;;  %12759 = vmatprep.mubr.bf16.mxu1 %v19795_v10  ;;  %v16210_v10 = vcombine.low %v664_v21, %v668_v22  ;;  %v16233_v7 = vcombine.high %v687_v58, %v691_v12  ;;  %v16232_v60 = vcombine.low %v687_v58, %v691_v12  ;;  %v724_v58 = vld [vmem:[%s19721_s14 + $0x2b8] sm:$0xff] }
 0x43e   : > { %v16234_v21 = vcombine.low %v688_v62, %v692_v2 }
 0x43f   : > { %12156 = vmatpush1.bf16.msra.mxu0 %v16192_v8  ;;  %12730 = vmatpush1.bf16.msra.mxu1 %v16194_v59  ;;  %v16235_v8 = vcombine.high %v688_v62, %v692_v2  ;;  %v695_v59 = vld [vmem:[%s19721_s14 + $0x1d0] sm:$0xff] }
 0x440   : > { %12157 = vmatprep.subr.bf16.mxu0 %v16201_v9  ;;  %12731 = vmatprep.subr.bf16.mxu1 %v16203_v18  ;;  %v699_v9 = vld [vmem:[%s19721_s14 + $0x1f0] sm:$0xff]  ;;  %v696_v18 = vld [vmem:[%s19721_s14 + $0x1d8] sm:$0xff] }
 0x441   : > { %v16241_v22 = vcombine.high %v695_v59, %v699_v9  ;;  %v16240_v36 = vcombine.low %v695_v59, %v699_v9  ;;  %v16242_v63 = vcombine.low %v696_v18, %v700_v15  ;;  %v732_v59 = vld [vmem:[%s19721_s14 + $0x2f8] sm:$0xff] }
 0x443   : > { %12158 = vmatpush1.bf16.msra.mxu0 %v16200_v25  ;;  %12732 = vmatpush1.bf16.msra.mxu1 %v16202_v28  ;;  %v16243_v25 = vcombine.high %v696_v18, %v700_v15  ;;  %v703_v28 = vld [vmem:[%s19721_s14 + $0x210] sm:$0xff] }
 0x444   : > { %12159 = vmatprep.subr.bf16.mxu0 %v16209_v14  ;;  %12733 = vmatprep.subr.bf16.mxu1 %v16211_v37  ;;  %v707_v14 = vld [vmem:[%s19721_s14 + $0x230] sm:$0xff]  ;;  %v704_v37 = vld [vmem:[%s19721_s14 + $0x218] sm:$0xff] }
 0x445   : > { %v16249_v38 = vcombine.high %v703_v28, %v707_v14  ;;  %v16248_v44 = vcombine.low %v703_v28, %v707_v14  ;;  %v16250_v46 = vcombine.low %v704_v37, %v708_v4  ;;  %v740_v28 = vld [vmem:[%s19721_s14 + $0x338] sm:$0xff] }
 0x447   : > { %12160 = vmatpush1.bf16.msra.mxu0 %v16208_v29  ;;  %12734 = vmatpush1.bf16.msra.mxu1 %v16210_v10  ;;  %v16251_v29 = vcombine.high %v704_v37, %v708_v4  ;;  %v711_v10 = vld [vmem:[%s19721_s14 + $0x250] sm:$0xff] }
 0x448   : > { %12161 = vmatprep.subr.bf16.mxu0 %v16217_v56  ;;  %12735 = vmatprep.subr.bf16.mxu1 %v16219_v50  ;;  %v715_v56 = vld [vmem:[%s19721_s14 + $0x270] sm:$0xff]  ;;  %v712_v50 = vld [vmem:[%s19721_s14 + $0x258] sm:$0xff] }
 0x449   : > { %v16257_v47 = vcombine.high %v711_v10, %v715_v56  ;;  %v16256_v12 = vcombine.low %v711_v10, %v715_v56  ;;  %v16258_v62 = vcombine.low %v712_v50, %v716_v6  ;;  %v748_v10 = vld [vmem:[%s19721_s14 + $0x378] sm:$0xff] }
 0x44b   : > { %12162 = vmatpush1.bf16.msra.mxu0 %v16216_v48  ;;  %12736 = vmatpush1.bf16.msra.mxu1 %v16218_v53  ;;  %v16259_v48 = vcombine.high %v712_v50, %v716_v6  ;;  %v719_v53 = vld [vmem:[%s19721_s14 + $0x290] sm:$0xff] }
 0x44c   : > { %12163 = vmatprep.subr.bf16.mxu0 %v16225_v11  ;;  %12737 = vmatprep.subr.bf16.mxu1 %v16227_v24  ;;  %v723_v11 = vld [vmem:[%s19721_s14 + $0x2b0] sm:$0xff]  ;;  %v720_v24 = vld [vmem:[%s19721_s14 + $0x298] sm:$0xff] }
 0x44d   : > { %v16265_v2 = vcombine.high %v719_v53, %v723_v11  ;;  %v16264_v9 = vcombine.low %v719_v53, %v723_v11  ;;  %v16266_v18 = vcombine.low %v720_v24, %v724_v58  ;;  %v756_v53 = vld [vmem:[%s19721_s14 + $0x3b8] sm:$0xff] }
 0x44f   : > { %12164 = vmatpush1.bf16.msra.mxu0 %v16224_v5  ;;  %12738 = vmatpush1.bf16.msra.mxu1 %v16226_v57  ;;  %v16267_v5 = vcombine.high %v720_v24, %v724_v58  ;;  %v727_v57 = vld [vmem:[%s19721_s14 + $0x2d0] sm:$0xff] }
 0x450   : > { %12165 = vmatprep.subr.bf16.mxu0 %v16233_v7  ;;  %12739 = vmatprep.subr.bf16.mxu1 %v16235_v8  ;;  %v731_v7 = vld [vmem:[%s19721_s14 + $0x2f0] sm:$0xff]  ;;  %v728_v8 = vld [vmem:[%s19721_s14 + $0x2d8] sm:$0xff] }
 0x451   : > { %v16273_v15 = vcombine.high %v727_v57, %v731_v7  ;;  %v16272_v14 = vcombine.low %v727_v57, %v731_v7  ;;  %v16274_v37 = vcombine.low %v728_v8, %v732_v59  ;;  %v764_v57 = vld [vmem:[%s19721_s14 + $0x3f8] sm:$0xff] }
 0x453   : > { %12166 = vmatpush1.bf16.msra.mxu0 %v16232_v60  ;;  %12740 = vmatpush1.bf16.msra.mxu1 %v16234_v21  ;;  %v16275_v60 = vcombine.high %v728_v8, %v732_v59  ;;  %v735_v21 = vld [vmem:[%s19721_s14 + $0x310] sm:$0xff] }
 0x454   : > { %12167 = vmatprep.subr.bf16.mxu0 %v16241_v22  ;;  %12741 = vmatprep.subr.bf16.mxu1 %v16243_v25  ;;  %v739_v22 = vld [vmem:[%s19721_s14 + $0x330] sm:$0xff]  ;;  %v736_v25 = vld [vmem:[%s19721_s14 + $0x318] sm:$0xff] }
 0x455   : > { %v16281_v4 = vcombine.high %v735_v21, %v739_v22  ;;  %v16280_v56 = vcombine.low %v735_v21, %v739_v22  ;;  %v16282_v50 = vcombine.low %v736_v25, %v740_v28  ;;  %v772_v21 = vld [vmem:[%s19721_s14 + $0x438] sm:$0xff] }
 0x457   : > { %12168 = vmatpush1.bf16.msra.mxu0 %v16240_v36  ;;  %12742 = vmatpush1.bf16.msra.mxu1 %v16242_v63  ;;  %v16283_v36 = vcombine.high %v736_v25, %v740_v28  ;;  %v743_v63 = vld [vmem:[%s19721_s14 + $0x350] sm:$0xff] }
 0x458   : > { %12169 = vmatprep.subr.bf16.mxu0 %v16249_v38  ;;  %12743 = vmatprep.subr.bf16.mxu1 %v16251_v29  ;;  %v747_v38 = vld [vmem:[%s19721_s14 + $0x370] sm:$0xff]  ;;  %v744_v29 = vld [vmem:[%s19721_s14 + $0x358] sm:$0xff] }
 0x459   : > { %v16289_v6 = vcombine.high %v743_v63, %v747_v38  ;;  %v16288_v11 = vcombine.low %v743_v63, %v747_v38  ;;  %v16290_v24 = vcombine.low %v744_v29, %v748_v10  ;;  %v780_v63 = vld [vmem:[%s19721_s14 + $0x478] sm:$0xff] }
 0x45b   : > { %12170 = vmatpush1.bf16.msra.mxu0 %v16248_v44  ;;  %12744 = vmatpush1.bf16.msra.mxu1 %v16250_v46  ;;  %v16291_v44 = vcombine.high %v744_v29, %v748_v10  ;;  %v751_v46 = vld [vmem:[%s19721_s14 + $0x390] sm:$0xff] }
 0x45c   : > { %12171 = vmatprep.subr.bf16.mxu0 %v16257_v47  ;;  %12745 = vmatprep.subr.bf16.mxu1 %v16259_v48  ;;  %v755_v47 = vld [vmem:[%s19721_s14 + $0x3b0] sm:$0xff]  ;;  %v752_v48 = vld [vmem:[%s19721_s14 + $0x398] sm:$0xff] }
 0x45d   : > { %v16297_v58 = vcombine.high %v751_v46, %v755_v47  ;;  %v16296_v7 = vcombine.low %v751_v46, %v755_v47  ;;  %v16298_v8 = vcombine.low %v752_v48, %v756_v53  ;;  %v788_v46 = vld [vmem:[%s19721_s14 + $0x4b8] sm:$0xff] }
 0x45f   : > { %12172 = vmatpush1.bf16.msra.mxu0 %v16256_v12  ;;  %12746 = vmatpush1.bf16.msra.mxu1 %v16258_v62  ;;  %v16299_v12 = vcombine.high %v752_v48, %v756_v53  ;;  %v759_v62 = vld [vmem:[%s19721_s14 + $0x3d0] sm:$0xff] }
 0x460   : > { %12173 = vmatprep.subr.bf16.mxu0 %v16265_v2  ;;  %12747 = vmatprep.subr.bf16.mxu1 %v16267_v5  ;;  %v763_v2 = vld [vmem:[%s19721_s14 + $0x3f0] sm:$0xff]  ;;  %v760_v5 = vld [vmem:[%s19721_s14 + $0x3d8] sm:$0xff] }
 0x461   : > { %v16305_v59 = vcombine.high %v759_v62, %v763_v2  ;;  %v16304_v22 = vcombine.low %v759_v62, %v763_v2  ;;  %v16306_v25 = vcombine.low %v760_v5, %v764_v57  ;;  %v796_v62 = vld [vmem:[%s19721_s14 + $0x4f8] sm:$0xff] }
 0x463   : > { %12174 = vmatpush1.bf16.msra.mxu0 %v16264_v9  ;;  %12748 = vmatpush1.bf16.msra.mxu1 %v16266_v18  ;;  %v16307_v9 = vcombine.high %v760_v5, %v764_v57  ;;  %v767_v18 = vld [vmem:[%s19721_s14 + $0x410] sm:$0xff] }
 0x464   : > { %12175 = vmatprep.subr.bf16.mxu0 %v16273_v15  ;;  %12749 = vmatprep.subr.bf16.mxu1 %v16275_v60  ;;  %v771_v15 = vld [vmem:[%s19721_s14 + $0x430] sm:$0xff]  ;;  %v768_v60 = vld [vmem:[%s19721_s14 + $0x418] sm:$0xff] }
 0x465   : > { %v16313_v28 = vcombine.high %v767_v18, %v771_v15  ;;  %v16312_v38 = vcombine.low %v767_v18, %v771_v15  ;;  %v16314_v29 = vcombine.low %v768_v60, %v772_v21 }
 0x467   : > { %12176 = vmatpush1.bf16.msra.mxu0 %v16272_v14  ;;  %12750 = vmatpush1.bf16.msra.mxu1 %v16274_v37  ;;  %v16315_v14 = vcombine.high %v768_v60, %v772_v21  ;;  %v775_v37 = vld [vmem:[%s19721_s14 + $0x450] sm:$0xff] }
 0x468   : > { %12177 = vmatprep.subr.bf16.mxu0 %v16281_v4  ;;  %12751 = vmatprep.subr.bf16.mxu1 %v16283_v36  ;;  %v779_v4 = vld [vmem:[%s19721_s14 + $0x470] sm:$0xff]  ;;  %v776_v36 = vld [vmem:[%s19721_s14 + $0x458] sm:$0xff] }
 0x469   : > { %v16321_v10 = vcombine.high %v775_v37, %v779_v4  ;;  %v16320_v47 = vcombine.low %v775_v37, %v779_v4  ;;  %v16322_v48 = vcombine.low %v776_v36, %v780_v63  ;;  %v807_v21 = vld [vmem:[%s19721_s14 + $0x550] sm:$0xff] }
 0x46b   : > { %12178 = vmatpush1.bf16.msra.mxu0 %v16280_v56  ;;  %12752 = vmatpush1.bf16.msra.mxu1 %v16282_v50  ;;  %v16323_v56 = vcombine.high %v776_v36, %v780_v63  ;;  %v783_v50 = vld [vmem:[%s19721_s14 + $0x490] sm:$0xff] }
 0x46c   : > { %12179 = vmatprep.subr.bf16.mxu0 %v16289_v6  ;;  %12753 = vmatprep.subr.bf16.mxu1 %v16291_v44  ;;  %v787_v6 = vld [vmem:[%s19721_s14 + $0x4b0] sm:$0xff]  ;;  %v784_v44 = vld [vmem:[%s19721_s14 + $0x498] sm:$0xff] }
 0x46d   : > { %v16329_v53 = vcombine.high %v783_v50, %v787_v6  ;;  %v16330_v2 = vcombine.low %v784_v44, %v788_v46  ;;  %v815_v63 = vld [vmem:[%s19721_s14 + $0x590] sm:$0xff] }
 0x46f   : > { %12180 = vmatpush1.bf16.msra.mxu0 %v16288_v11  ;;  %12754 = vmatpush1.bf16.msra.mxu1 %v16290_v24  ;;  %v16331_v11 = vcombine.high %v784_v44, %v788_v46  ;;  %v791_v24 = vld [vmem:[%s19721_s14 + $0x4d0] sm:$0xff] }
 0x470   : > { %12181 = vmatprep.subr.bf16.mxu0 %v16297_v58  ;;  %12755 = vmatprep.subr.bf16.mxu1 %v16299_v12  ;;  %v795_v58 = vld [vmem:[%s19721_s14 + $0x4f0] sm:$0xff]  ;;  %v792_v12 = vld [vmem:[%s19721_s14 + $0x4d8] sm:$0xff] }
 0x471   : > { %v16337_v5 = vcombine.high %v791_v24, %v795_v58  ;;  %v16339_v57 = vcombine.high %v792_v12, %v796_v62  ;;  %v16336_v18 = vcombine.low %v791_v24, %v795_v58  ;;  %v823_v46 = vld [vmem:[%s19721_s14 + $0x5d0] sm:$0xff] }
 0x473   : > { %12182 = vmatpush1.bf16.msra.mxu0 %v16296_v7  ;;  %12756 = vmatpush1.bf16.msra.mxu1 %v16298_v8  ;;  %v799_v7 = vld [vmem:[%s19721_s14 + $0x510] sm:$0xff] }
 0x474   : > { %12183 = vmatprep.subr.bf16.mxu0 %v16305_v59  ;;  %12757 = vmatprep.subr.bf16.mxu1 %v16307_v9  ;;  %v803_v8 = vld [vmem:[%s19721_s14 + $0x530] sm:$0xff]  ;;  %v800_v59 = vld [vmem:[%s19721_s14 + $0x518] sm:$0xff] }
 0x475   : > { %v804_v9 = vld [vmem:[%s19721_s14 + $0x538] sm:$0xff]  ;;  %v16345_v15 = vcombine.high %v799_v7, %v803_v8 }
 0x476   : > { %v16347_v60 = vcombine.high %v800_v59, %v804_v9  ;;  %v16346_v37 = vcombine.low %v800_v59, %v804_v9  ;;  %v839_v9 = vld [vmem:[%s19721_s14 + $0x650] sm:$0xff] }
 0x477   : > { %12184 = vmatpush1.bf16.msra.mxu0 %v16304_v22  ;;  %12758 = vmatpush1.bf16.msra.mxu1 %v16306_v25  ;;  %v811_v22 = vld [vmem:[%s19721_s14 + $0x570] sm:$0xff]  ;;  %v808_v25 = vld [vmem:[%s19721_s14 + $0x558] sm:$0xff] }
 0x478   : > { %12194 = vmatprep.subr.bf16.mxu0 %v16313_v28  ;;  %12768 = vmatprep.subr.bf16.mxu1 %v16315_v14  ;;  %v812_v28 = vld [vmem:[%s19721_s14 + $0x578] sm:$0xff]  ;;  %v16344_v14 = vcombine.low %v799_v7, %v803_v8  ;;  %v16353_v4 = vcombine.high %v807_v21, %v811_v22 }
 0x479   : > { %v16355_v36 = vcombine.high %v808_v25, %v812_v28 }
 0x47a   : > { %12186 = vmatmul.mubr.bf16.vlgmr.msra.gmra.mrb[4].mxu0 %v19844_v26  ;;  %12760 = vmatmul.mubr.bf16.vlgmr.msra.gmra.mrb[4].mxu1 %v19844_v26  ;;  %v16328_v26 = vcombine.low %v783_v50, %v787_v6  ;;  %v16354_v50 = vcombine.low %v808_v25, %v812_v28  ;;  %v847_v28 = vld [vmem:[%s19721_s14 + $0x690] sm:$0xff] }
 0x47b   : > { %12195 = vmatpush1.bf16.msra.mxu0 %v16312_v38  ;;  %12769 = vmatpush1.bf16.msra.mxu1 %v16314_v29  ;;  %v819_v38 = vld [vmem:[%s19721_s14 + $0x5b0] sm:$0xff]  ;;  %v816_v29 = vld [vmem:[%s19721_s14 + $0x598] sm:$0xff] }
 0x47c   : > { %12196 = vmatprep.subr.bf16.mxu0 %v16321_v10  ;;  %12770 = vmatprep.subr.bf16.mxu1 %v16323_v56  ;;  %v820_v10 = vld [vmem:[%s19721_s14 + $0x5b8] sm:$0xff]  ;;  %v16352_v56 = vcombine.low %v807_v21, %v811_v22  ;;  %v16361_v6 = vcombine.high %v815_v63, %v819_v38 }
 0x47d   : > { %12226 = vmatprep.mubr.bf16.mxu0 %v19850_v35  ;;  %12800 = vmatprep.mubr.bf16.mxu1 %v19850_v35  ;;  %v16338_v35 = vcombine.low %v792_v12, %v796_v62  ;;  %v16363_v44 = vcombine.high %v816_v29, %v820_v10  ;;  %v16362_v24 = vcombine.low %v816_v29, %v820_v10  ;;  %v831_v62 = vld [vmem:[%s19721_s14 + $0x610] sm:$0xff] }
 0x47e   : > { %v855_v10 = vld [vmem:[%s19721_s14 + $0x6d0] sm:$0xff] }
 0x47f   : > { %12197 = vmatpush1.bf16.msra.mxu0 %v16320_v47  ;;  %12771 = vmatpush1.bf16.msra.mxu1 %v16322_v48  ;;  %v827_v47 = vld [vmem:[%s19721_s14 + $0x5f0] sm:$0xff]  ;;  %v824_v48 = vld [vmem:[%s19721_s14 + $0x5d8] sm:$0xff] }
 0x480   : > { %12198 = vmatprep.subr.bf16.mxu0 %v16329_v53  ;;  %12772 = vmatprep.subr.bf16.mxu1 %v16331_v11  ;;  %v828_v53 = vld [vmem:[%s19721_s14 + $0x5f8] sm:$0xff]  ;;  %v16360_v11 = vcombine.low %v815_v63, %v819_v38  ;;  %v16369_v58 = vcombine.high %v823_v46, %v827_v47 }
 0x481   : > { %v16371_v12 = vcombine.high %v824_v48, %v828_v53  ;;  %v16370_v7 = vcombine.low %v824_v48, %v828_v53  ;;  %v863_v53 = vld [vmem:[%s19721_s14 + $0x710] sm:$0xff] }
 0x483   : > { %12199 = vmatpush1.bf16.msra.mxu0 %v16328_v26  ;;  %12773 = vmatpush1.bf16.msra.mxu1 %v16330_v2  ;;  %v835_v26 = vld [vmem:[%s19721_s14 + $0x630] sm:$0xff]  ;;  %v832_v2 = vld [vmem:[%s19721_s14 + $0x618] sm:$0xff] }
 0x484   : > { %12200 = vmatprep.subr.bf16.mxu0 %v16337_v5  ;;  %12774 = vmatprep.subr.bf16.mxu1 %v16339_v57  ;;  %v836_v5 = vld [vmem:[%s19721_s14 + $0x638] sm:$0xff]  ;;  %v16368_v57 = vcombine.low %v823_v46, %v827_v47  ;;  %v16377_v8 = vcombine.high %v831_v62, %v835_v26 }
 0x485   : > { %v16379_v59 = vcombine.high %v832_v2, %v836_v5  ;;  %v16378_v21 = vcombine.low %v832_v2, %v836_v5  ;;  %v871_v5 = vld [vmem:[%s19721_s14 + $0x750] sm:$0xff] }
 0x487   : > { %12201 = vmatpush1.bf16.msra.mxu0 %v16336_v18  ;;  %12775 = vmatpush1.bf16.msra.mxu1 %v16338_v35  ;;  %v843_v18 = vld [vmem:[%s19721_s14 + $0x670] sm:$0xff]  ;;  %v840_v35 = vld [vmem:[%s19721_s14 + $0x658] sm:$0xff] }
 0x488   : > { %12202 = vmatprep.subr.bf16.mxu0 %v16345_v15  ;;  %12776 = vmatprep.subr.bf16.mxu1 %v16347_v60  ;;  %v844_v15 = vld [vmem:[%s19721_s14 + $0x678] sm:$0xff]  ;;  %v16376_v60 = vcombine.low %v831_v62, %v835_v26  ;;  %v16385_v22 = vcombine.high %v839_v9, %v843_v18 }
 0x489   : > { %v16387_v25 = vcombine.high %v840_v35, %v844_v15  ;;  %v16386_v63 = vcombine.low %v840_v35, %v844_v15  ;;  %v879_v15 = vld [vmem:[%s19721_s14 + $0x790] sm:$0xff] }
 0x48b   : > { %12203 = vmatpush1.bf16.msra.mxu0 %v16344_v14  ;;  %12777 = vmatpush1.bf16.msra.mxu1 %v16346_v37  ;;  %v851_v14 = vld [vmem:[%s19721_s14 + $0x6b0] sm:$0xff]  ;;  %v848_v37 = vld [vmem:[%s19721_s14 + $0x698] sm:$0xff] }
 0x48c   : > { %12204 = vmatprep.subr.bf16.mxu0 %v16353_v4  ;;  %12778 = vmatprep.subr.bf16.mxu1 %v16355_v36  ;;  %v852_v4 = vld [vmem:[%s19721_s14 + $0x6b8] sm:$0xff]  ;;  %v16384_v36 = vcombine.low %v839_v9, %v843_v18  ;;  %v16393_v38 = vcombine.high %v847_v28, %v851_v14 }
 0x48d   : > { %v16395_v29 = vcombine.high %v848_v37, %v852_v4  ;;  %v16394_v46 = vcombine.low %v848_v37, %v852_v4  ;;  %v887_v4 = vld [vmem:[%s19721_s14 + $0x7d0] sm:$0xff] }
 0x48f   : > { %12205 = vmatpush1.bf16.msra.mxu0 %v16352_v56  ;;  %12779 = vmatpush1.bf16.msra.mxu1 %v16354_v50  ;;  %v859_v56 = vld [vmem:[%s19721_s14 + $0x6f0] sm:$0xff]  ;;  %v856_v50 = vld [vmem:[%s19721_s14 + $0x6d8] sm:$0xff] }
 0x490   : > { %12206 = vmatprep.subr.bf16.mxu0 %v16361_v6  ;;  %12780 = vmatprep.subr.bf16.mxu1 %v16363_v44  ;;  %v860_v6 = vld [vmem:[%s19721_s14 + $0x6f8] sm:$0xff]  ;;  %v16392_v44 = vcombine.low %v847_v28, %v851_v14  ;;  %v16401_v47 = vcombine.high %v855_v10, %v859_v56 }
 0x491   : > { %v16403_v48 = vcombine.high %v856_v50, %v860_v6  ;;  %v16402_v62 = vcombine.low %v856_v50, %v860_v6  ;;  %v895_v6 = vld [vmem:[%s19721_s14 + $0x810] sm:$0xff] }
 0x493   : > { %12207 = vmatpush1.bf16.msra.mxu0 %v16360_v11  ;;  %12781 = vmatpush1.bf16.msra.mxu1 %v16362_v24  ;;  %v867_v11 = vld [vmem:[%s19721_s14 + $0x730] sm:$0xff]  ;;  %v864_v24 = vld [vmem:[%s19721_s14 + $0x718] sm:$0xff] }
 0x494   : > { %12208 = vmatprep.subr.bf16.mxu0 %v16369_v58  ;;  %12782 = vmatprep.subr.bf16.mxu1 %v16371_v12  ;;  %v868_v58 = vld [vmem:[%s19721_s14 + $0x738] sm:$0xff]  ;;  %v16400_v12 = vcombine.low %v855_v10, %v859_v56  ;;  %v16409_v26 = vcombine.high %v863_v53, %v867_v11 }
 0x495   : > { %v16411_v2 = vcombine.high %v864_v24, %v868_v58  ;;  %v16410_v9 = vcombine.low %v864_v24, %v868_v58  ;;  %v903_v58 = vld [vmem:[%s19721_s14 + $0x850] sm:$0xff] }
 0x497   : > { %12209 = vmatpush1.bf16.msra.mxu0 %v16368_v57  ;;  %12783 = vmatpush1.bf16.msra.mxu1 %v16370_v7  ;;  %v875_v57 = vld [vmem:[%s19721_s14 + $0x770] sm:$0xff]  ;;  %v872_v7 = vld [vmem:[%s19721_s14 + $0x758] sm:$0xff] }
 0x498   : > { %12210 = vmatprep.subr.bf16.mxu0 %v16377_v8  ;;  %12784 = vmatprep.subr.bf16.mxu1 %v16379_v59  ;;  %v876_v8 = vld [vmem:[%s19721_s14 + $0x778] sm:$0xff]  ;;  %v16408_v59 = vcombine.low %v863_v53, %v867_v11  ;;  %v16417_v18 = vcombine.high %v871_v5, %v875_v57 }
 0x499   : > { %v16419_v35 = vcombine.high %v872_v7, %v876_v8  ;;  %v16418_v28 = vcombine.low %v872_v7, %v876_v8  ;;  %v911_v8 = vld [vmem:[%s19721_s14 + $0x890] sm:$0xff] }
 0x49b   : > { %12211 = vmatpush1.bf16.msra.mxu0 %v16376_v60  ;;  %12785 = vmatpush1.bf16.msra.mxu1 %v16378_v21  ;;  %v883_v60 = vld [vmem:[%s19721_s14 + $0x7b0] sm:$0xff]  ;;  %v880_v21 = vld [vmem:[%s19721_s14 + $0x798] sm:$0xff] }
 0x49c   : > { %12212 = vmatprep.subr.bf16.mxu0 %v16385_v22  ;;  %12786 = vmatprep.subr.bf16.mxu1 %v16387_v25  ;;  %v884_v22 = vld [vmem:[%s19721_s14 + $0x7b8] sm:$0xff]  ;;  %v16416_v25 = vcombine.low %v871_v5, %v875_v57  ;;  %v16425_v14 = vcombine.high %v879_v15, %v883_v60 }
 0x49d   : > { %v16427_v37 = vcombine.high %v880_v21, %v884_v22  ;;  %v16426_v10 = vcombine.low %v880_v21, %v884_v22  ;;  %v919_v22 = vld [vmem:[%s19721_s14 + $0x8d0] sm:$0xff] }
 0x49f   : > { %12213 = vmatpush1.bf16.msra.mxu0 %v16384_v36  ;;  %12787 = vmatpush1.bf16.msra.mxu1 %v16386_v63  ;;  %v891_v36 = vld [vmem:[%s19721_s14 + $0x7f0] sm:$0xff]  ;;  %v888_v63 = vld [vmem:[%s19721_s14 + $0x7d8] sm:$0xff] }
 0x4a0   : > { %12214 = vmatprep.subr.bf16.mxu0 %v16393_v38  ;;  %12788 = vmatprep.subr.bf16.mxu1 %v16395_v29  ;;  %v892_v38 = vld [vmem:[%s19721_s14 + $0x7f8] sm:$0xff]  ;;  %v16424_v29 = vcombine.low %v879_v15, %v883_v60  ;;  %v16433_v56 = vcombine.high %v887_v4, %v891_v36 }
 0x4a1   : > { %v16435_v50 = vcombine.high %v888_v63, %v892_v38  ;;  %v16434_v53 = vcombine.low %v888_v63, %v892_v38  ;;  %v927_v63 = vld [vmem:[%s19721_s14 + $0x910] sm:$0xff] }
 0x4a2   : > { %v931_v38 = vld [vmem:[%s19721_s14 + $0x930] sm:$0xff] }
 0x4a3   : > { %12215 = vmatpush1.bf16.msra.mxu0 %v16392_v44  ;;  %12789 = vmatpush1.bf16.msra.mxu1 %v16394_v46  ;;  %v899_v44 = vld [vmem:[%s19721_s14 + $0x830] sm:$0xff]  ;;  %v896_v46 = vld [vmem:[%s19721_s14 + $0x818] sm:$0xff] }
 0x4a4   : > { %12216 = vmatprep.subr.bf16.mxu0 %v16401_v47  ;;  %12790 = vmatprep.subr.bf16.mxu1 %v16403_v48  ;;  %v900_v47 = vld [vmem:[%s19721_s14 + $0x838] sm:$0xff]  ;;  %v16432_v48 = vcombine.low %v887_v4, %v891_v36  ;;  %v16441_v11 = vcombine.high %v895_v6, %v899_v44 }
 0x4a5   : > { %v16443_v24 = vcombine.high %v896_v46, %v900_v47  ;;  %v16442_v5 = vcombine.low %v896_v46, %v900_v47  ;;  %v939_v46 = vld [vmem:[%s19721_s14 + $0x970] sm:$0xff]  ;;  %v936_v47 = vld [vmem:[%s19721_s14 + $0x958] sm:$0xff] }
 0x4a7   : > { %12217 = vmatpush1.bf16.msra.mxu0 %v16400_v12  ;;  %12791 = vmatpush1.bf16.msra.mxu1 %v16402_v62  ;;  %v907_v12 = vld [vmem:[%s19721_s14 + $0x870] sm:$0xff]  ;;  %v904_v62 = vld [vmem:[%s19721_s14 + $0x858] sm:$0xff] }
 0x4a8   : > { %12218 = vmatprep.subr.bf16.mxu0 %v16409_v26  ;;  %12792 = vmatprep.subr.bf16.mxu1 %v16411_v2  ;;  %v908_v26 = vld [vmem:[%s19721_s14 + $0x878] sm:$0xff]  ;;  %v16440_v2 = vcombine.low %v895_v6, %v899_v44  ;;  %v16449_v57 = vcombine.high %v903_v58, %v907_v12  ;;  %v935_v44 = vld [vmem:[%s19721_s14 + $0x950] sm:$0xff] }
 0x4a9   : > { %v16451_v7 = vcombine.high %v904_v62, %v908_v26  ;;  %v16450_v15 = vcombine.low %v904_v62, %v908_v26  ;;  %v947_v62 = vld [vmem:[%s19721_s14 + $0x9b0] sm:$0xff]  ;;  %v944_v26 = vld [vmem:[%s19721_s14 + $0x998] sm:$0xff] }
 0x4ab   : > { %12219 = vmatpush1.bf16.msra.mxu0 %v16408_v59  ;;  %12793 = vmatpush1.bf16.msra.mxu1 %v16410_v9  ;;  %v915_v59 = vld [vmem:[%s19721_s14 + $0x8b0] sm:$0xff]  ;;  %v912_v9 = vld [vmem:[%s19721_s14 + $0x898] sm:$0xff] }
 0x4ac   : > { %12220 = vmatprep.subr.bf16.mxu0 %v16417_v18  ;;  %12794 = vmatprep.subr.bf16.mxu1 %v16419_v35  ;;  %v916_v18 = vld [vmem:[%s19721_s14 + $0x8b8] sm:$0xff]  ;;  %v16448_v35 = vcombine.low %v903_v58, %v907_v12  ;;  %v16457_v60 = vcombine.high %v911_v8, %v915_v59  ;;  %v943_v12 = vld [vmem:[%s19721_s14 + $0x990] sm:$0xff] }
 0x4ad   : > { %v16459_v21 = vcombine.high %v912_v9, %v916_v18 }
 0x4af   : > { %12221 = vmatpush1.bf16.msra.mxu0 %v16416_v25  ;;  %12795 = vmatpush1.bf16.msra.mxu1 %v16418_v28  ;;  %v923_v25 = vld [vmem:[%s19721_s14 + $0x8f0] sm:$0xff]  ;;  %v920_v28 = vld [vmem:[%s19721_s14 + $0x8d8] sm:$0xff] }
 0x4b0   : > { %12222 = vmatprep.subr.bf16.mxu0 %v16425_v14  ;;  %12796 = vmatprep.subr.bf16.mxu1 %v16427_v37  ;;  %v924_v14 = vld [vmem:[%s19721_s14 + $0x8f8] sm:$0xff]  ;;  %v16458_v37 = vcombine.low %v912_v9, %v916_v18  ;;  %v16465_v4 = vcombine.high %v919_v22, %v923_v25  ;;  %v955_v9 = vld [vmem:[%s19721_s14 + $0x9f0] sm:$0xff] }
 0x4b1   : > { %v16467_v36 = vcombine.high %v920_v28, %v924_v14  ;;  %v952_v18 = vld [vmem:[%s19721_s14 + $0x9d8] sm:$0xff] }
 0x4b3   : > { %12223 = vmatpush1.bf16.msra.mxu0 %v16424_v29  ;;  %12797 = vmatpush1.bf16.msra.mxu1 %v16426_v10  ;;  %v928_v29 = vld [vmem:[%s19721_s14 + $0x918] sm:$0xff] }
 0x4b4   : > { %12224 = vmatprep.subr.bf16.mxu0 %v16433_v56  ;;  %12798 = vmatprep.subr.bf16.mxu1 %v16435_v50  ;;  %v932_v10 = vld [vmem:[%s19721_s14 + $0x938] sm:$0xff]  ;;  %v16464_v56 = vcombine.low %v919_v22, %v923_v25  ;;  %v16473_v50 = vcombine.high %v927_v63, %v931_v38  ;;  %v959_v25 = vld [vmem:[%s19721_s14 + $0xa10] sm:$0xff] }
 0x4b5   : > { %v16475_v6 = vcombine.high %v928_v29, %v932_v10 }
 0x4b7   : > { %12225 = vmatpush1.bf16.msra.mxu0 %v16432_v48  ;;  %12799 = vmatpush1.bf16.msra.mxu1 %v16434_v53  ;;  %v940_v48 = vld [vmem:[%s19721_s14 + $0x978] sm:$0xff]  ;;  %v16472_v53 = vcombine.low %v927_v63, %v931_v38  ;;  %v967_v38 = vld [vmem:[%s19721_s14 + $0xa50] sm:$0xff] }
 0x4b8   : > { %12235 = vmatprep.subr.bf16.mxu0 %v16441_v11  ;;  %12809 = vmatprep.subr.bf16.mxu1 %v16443_v24  ;;  %v16474_v11 = vcombine.low %v928_v29, %v932_v10  ;;  %v16481_v24 = vcombine.high %v935_v44, %v939_v46  ;;  %v16483_v58 = vcombine.high %v936_v47, %v940_v48  ;;  %v971_v29 = vld [vmem:[%s19721_s14 + $0xa70] sm:$0xff]  ;;  %v968_v10 = vld [vmem:[%s19721_s14 + $0xa58] sm:$0xff] }
 0x4ba   : > { %12227 = vmatmul.mubr.bf16.vlgmr.msra.gmra.mrb[4].mxu0 %v19927_v42  ;;  %12801 = vmatmul.mubr.bf16.vlgmr.msra.gmra.mrb[4].mxu1 %v19927_v42  ;;  %v16456_v42 = vcombine.low %v911_v8, %v915_v59  ;;  %v951_v59 = vld [vmem:[%s19721_s14 + $0x9d0] sm:$0xff] }
 0x4bb   : > { %12236 = vmatpush1.bf16.msra.mxu0 %v16440_v2  ;;  %12810 = vmatpush1.bf16.msra.mxu1 %v16442_v5  ;;  %v948_v2 = vld [vmem:[%s19721_s14 + $0x9b8] sm:$0xff]  ;;  %v16480_v5 = vcombine.low %v935_v44, %v939_v46  ;;  %v975_v46 = vld [vmem:[%s19721_s14 + $0xa90] sm:$0xff] }
 0x4bc   : > { %12237 = vmatprep.subr.bf16.mxu0 %v16449_v57  ;;  %12811 = vmatprep.subr.bf16.mxu1 %v16451_v7  ;;  %v16482_v57 = vcombine.low %v936_v47, %v940_v48  ;;  %v16489_v7 = vcombine.high %v943_v12, %v947_v62  ;;  %v16491_v8 = vcombine.high %v944_v26, %v948_v2  ;;  %v979_v47 = vld [vmem:[%s19721_s14 + $0xab0] sm:$0xff]  ;;  %v976_v48 = vld [vmem:[%s19721_s14 + $0xa98] sm:$0xff] }
 0x4bd   : > { %12267 = vmatprep.mubr.bf16.mxu0 %v19933_v52  ;;  %12841 = vmatprep.mubr.bf16.mxu1 %v19933_v52  ;;  %v16466_v52 = vcombine.low %v920_v28, %v924_v14  ;;  %v963_v28 = vld [vmem:[%s19721_s14 + $0xa30] sm:$0xff]  ;;  %v960_v14 = vld [vmem:[%s19721_s14 + $0xa18] sm:$0xff] }
 0x4bf   : > { %12238 = vmatpush1.bf16.msra.mxu0 %v16448_v35  ;;  %12812 = vmatpush1.bf16.msra.mxu1 %v16450_v15  ;;  %v956_v35 = vld [vmem:[%s19721_s14 + $0x9f8] sm:$0xff]  ;;  %v16488_v15 = vcombine.low %v943_v12, %v947_v62  ;;  %v983_v62 = vld [vmem:[%s19721_s14 + $0xad0] sm:$0xff] }
 0x4c0   : > { %12239 = vmatprep.subr.bf16.mxu0 %v16457_v60  ;;  %12813 = vmatprep.subr.bf16.mxu1 %v16459_v21  ;;  %v16490_v60 = vcombine.low %v944_v26, %v948_v2  ;;  %v16497_v21 = vcombine.high %v951_v59, %v955_v9  ;;  %v16499_v22 = vcombine.high %v952_v18, %v956_v35  ;;  %v987_v26 = vld [vmem:[%s19721_s14 + $0xaf0] sm:$0xff]  ;;  %v984_v2 = vld [vmem:[%s19721_s14 + $0xad8] sm:$0xff] }
 0x4c3   : > { %12240 = vmatpush1.bf16.msra.mxu0 %v16456_v42  ;;  %12814 = vmatpush1.bf16.msra.mxu1 %v16458_v37  ;;  %v964_v42 = vld [vmem:[%s19721_s14 + $0xa38] sm:$0xff]  ;;  %v16496_v37 = vcombine.low %v951_v59, %v955_v9  ;;  %v991_v9 = vld [vmem:[%s19721_s14 + $0xb10] sm:$0xff] }
 0x4c4   : > { %12241 = vmatprep.subr.bf16.mxu0 %v16465_v4  ;;  %12815 = vmatprep.subr.bf16.mxu1 %v16467_v36  ;;  %v16498_v4 = vcombine.low %v952_v18, %v956_v35  ;;  %v16505_v36 = vcombine.high %v959_v25, %v963_v28  ;;  %v16507_v63 = vcombine.high %v960_v14, %v964_v42  ;;  %v995_v18 = vld [vmem:[%s19721_s14 + $0xb30] sm:$0xff]  ;;  %v992_v35 = vld [vmem:[%s19721_s14 + $0xb18] sm:$0xff] }
 0x4c7   : > { %12242 = vmatpush1.bf16.msra.mxu0 %v16464_v56  ;;  %12816 = vmatpush1.bf16.msra.mxu1 %v16466_v52  ;;  %v972_v56 = vld [vmem:[%s19721_s14 + $0xa78] sm:$0xff]  ;;  %v16504_v52 = vcombine.low %v959_v25, %v963_v28  ;;  %v999_v28 = vld [vmem:[%s19721_s14 + $0xb50] sm:$0xff] }
 0x4c8   : > { %12243 = vmatprep.subr.bf16.mxu0 %v16473_v50  ;;  %12817 = vmatprep.subr.bf16.mxu1 %v16475_v6  ;;  %v16506_v50 = vcombine.low %v960_v14, %v964_v42  ;;  %v16513_v6 = vcombine.high %v967_v38, %v971_v29  ;;  %v16515_v44 = vcombine.high %v968_v10, %v972_v56  ;;  %v1003_v14 = vld [vmem:[%s19721_s14 + $0xb70] sm:$0xff]  ;;  %v1000_v42 = vld [vmem:[%s19721_s14 + $0xb58] sm:$0xff] }
 0x4cb   : > { %12244 = vmatpush1.bf16.msra.mxu0 %v16472_v53  ;;  %12818 = vmatpush1.bf16.msra.mxu1 %v16474_v11  ;;  %v980_v53 = vld [vmem:[%s19721_s14 + $0xab8] sm:$0xff]  ;;  %v16512_v11 = vcombine.low %v967_v38, %v971_v29  ;;  %v1007_v29 = vld [vmem:[%s19721_s14 + $0xb90] sm:$0xff] }
 0x4cc   : > { %12245 = vmatprep.subr.bf16.mxu0 %v16481_v24  ;;  %12819 = vmatprep.subr.bf16.mxu1 %v16483_v58  ;;  %v16514_v24 = vcombine.low %v968_v10, %v972_v56  ;;  %v16521_v58 = vcombine.high %v975_v46, %v979_v47  ;;  %v16523_v12 = vcombine.high %v976_v48, %v980_v53  ;;  %v1011_v10 = vld [vmem:[%s19721_s14 + $0xbb0] sm:$0xff]  ;;  %v1008_v56 = vld [vmem:[%s19721_s14 + $0xb98] sm:$0xff] }
 0x4cf   : > { %12246 = vmatpush1.bf16.msra.mxu0 %v16480_v5  ;;  %12820 = vmatpush1.bf16.msra.mxu1 %v16482_v57  ;;  %v988_v5 = vld [vmem:[%s19721_s14 + $0xaf8] sm:$0xff]  ;;  %v16520_v57 = vcombine.low %v975_v46, %v979_v47  ;;  %v1015_v47 = vld [vmem:[%s19721_s14 + $0xbd0] sm:$0xff] }
 0x4d0   : > { %12247 = vmatprep.subr.bf16.mxu0 %v16489_v7  ;;  %12821 = vmatprep.subr.bf16.mxu1 %v16491_v8  ;;  %v16522_v7 = vcombine.low %v976_v48, %v980_v53  ;;  %v16529_v8 = vcombine.high %v983_v62, %v987_v26  ;;  %v16531_v59 = vcombine.high %v984_v2, %v988_v5  ;;  %v1019_v48 = vld [vmem:[%s19721_s14 + $0xbf0] sm:$0xff]  ;;  %v1016_v53 = vld [vmem:[%s19721_s14 + $0xbd8] sm:$0xff] }
 0x4d3   : > { %12248 = vmatpush1.bf16.msra.mxu0 %v16488_v15  ;;  %12822 = vmatpush1.bf16.msra.mxu1 %v16490_v60  ;;  %v996_v15 = vld [vmem:[%s19721_s14 + $0xb38] sm:$0xff]  ;;  %v16528_v60 = vcombine.low %v983_v62, %v987_v26  ;;  %v1023_v26 = vld [vmem:[%s19721_s14 + $0xc10] sm:$0xff] }
 0x4d4   : > { %12249 = vmatprep.subr.bf16.mxu0 %v16497_v21  ;;  %12823 = vmatprep.subr.bf16.mxu1 %v16499_v22  ;;  %v16530_v21 = vcombine.low %v984_v2, %v988_v5  ;;  %v16537_v22 = vcombine.high %v991_v9, %v995_v18  ;;  %v16539_v25 = vcombine.high %v992_v35, %v996_v15  ;;  %v1027_v2 = vld [vmem:[%s19721_s14 + $0xc30] sm:$0xff]  ;;  %v1024_v5 = vld [vmem:[%s19721_s14 + $0xc18] sm:$0xff] }
 0x4d7   : > { %12250 = vmatpush1.bf16.msra.mxu0 %v16496_v37  ;;  %12824 = vmatpush1.bf16.msra.mxu1 %v16498_v4  ;;  %v1004_v37 = vld [vmem:[%s19721_s14 + $0xb78] sm:$0xff]  ;;  %v16536_v4 = vcombine.low %v991_v9, %v995_v18  ;;  %v1031_v18 = vld [vmem:[%s19721_s14 + $0xc50] sm:$0xff] }
 0x4d8   : > { %12251 = vmatprep.subr.bf16.mxu0 %v16505_v36  ;;  %12825 = vmatprep.subr.bf16.mxu1 %v16507_v63  ;;  %v16538_v36 = vcombine.low %v992_v35, %v996_v15  ;;  %v16545_v63 = vcombine.high %v999_v28, %v1003_v14  ;;  %v16547_v38 = vcombine.high %v1000_v42, %v1004_v37  ;;  %v1035_v35 = vld [vmem:[%s19721_s14 + $0xc70] sm:$0xff]  ;;  %v1032_v15 = vld [vmem:[%s19721_s14 + $0xc58] sm:$0xff] }
 0x4db   : > { %12252 = vmatpush1.bf16.msra.mxu0 %v16504_v52  ;;  %12826 = vmatpush1.bf16.msra.mxu1 %v16506_v50  ;;  %v1012_v52 = vld [vmem:[%s19721_s14 + $0xbb8] sm:$0xff]  ;;  %v16544_v50 = vcombine.low %v999_v28, %v1003_v14  ;;  %v1039_v14 = vld [vmem:[%s19721_s14 + $0xc90] sm:$0xff] }
 0x4dc   : > { %12253 = vmatprep.subr.bf16.mxu0 %v16513_v6  ;;  %12827 = vmatprep.subr.bf16.mxu1 %v16515_v44  ;;  %v16546_v6 = vcombine.low %v1000_v42, %v1004_v37  ;;  %v16553_v44 = vcombine.high %v1007_v29, %v1011_v10  ;;  %v16555_v46 = vcombine.high %v1008_v56, %v1012_v52  ;;  %v1043_v42 = vld [vmem:[%s19721_s14 + $0xcb0] sm:$0xff]  ;;  %v1040_v37 = vld [vmem:[%s19721_s14 + $0xc98] sm:$0xff] }
 0x4df   : > { %12254 = vmatpush1.bf16.msra.mxu0 %v16512_v11  ;;  %12828 = vmatpush1.bf16.msra.mxu1 %v16514_v24  ;;  %v1020_v11 = vld [vmem:[%s19721_s14 + $0xbf8] sm:$0xff]  ;;  %v16552_v24 = vcombine.low %v1007_v29, %v1011_v10  ;;  %v1047_v10 = vld [vmem:[%s19721_s14 + $0xcd0] sm:$0xff] }
 0x4e0   : > { %12255 = vmatprep.subr.bf16.mxu0 %v16521_v58  ;;  %12829 = vmatprep.subr.bf16.mxu1 %v16523_v12  ;;  %v16554_v58 = vcombine.low %v1008_v56, %v1012_v52  ;;  %v16561_v12 = vcombine.high %v1015_v47, %v1019_v48  ;;  %v16563_v62 = vcombine.high %v1016_v53, %v1020_v11  ;;  %v1051_v56 = vld [vmem:[%s19721_s14 + $0xcf0] sm:$0xff]  ;;  %v1048_v52 = vld [vmem:[%s19721_s14 + $0xcd8] sm:$0xff] }
 0x4e3   : > { %12256 = vmatpush1.bf16.msra.mxu0 %v16520_v57  ;;  %12830 = vmatpush1.bf16.msra.mxu1 %v16522_v7  ;;  %v1028_v57 = vld [vmem:[%s19721_s14 + $0xc38] sm:$0xff]  ;;  %v16560_v7 = vcombine.low %v1015_v47, %v1019_v48  ;;  %v1055_v47 = vld [vmem:[%s19721_s14 + $0xd10] sm:$0xff] }
 0x4e4   : > { %12257 = vmatprep.subr.bf16.mxu0 %v16529_v8  ;;  %12831 = vmatprep.subr.bf16.mxu1 %v16531_v59  ;;  %v16562_v8 = vcombine.low %v1016_v53, %v1020_v11  ;;  %v16569_v59 = vcombine.high %v1023_v26, %v1027_v2  ;;  %v16571_v9 = vcombine.high %v1024_v5, %v1028_v57  ;;  %v1059_v48 = vld [vmem:[%s19721_s14 + $0xd30] sm:$0xff]  ;;  %v1056_v53 = vld [vmem:[%s19721_s14 + $0xd18] sm:$0xff] }
 0x4e5   : > { %v1060_v11 = vld [vmem:[%s19721_s14 + $0xd38] sm:$0xff] }
 0x4e7   : > { %12258 = vmatpush1.bf16.msra.mxu0 %v16528_v60  ;;  %12832 = vmatpush1.bf16.msra.mxu1 %v16530_v21  ;;  %v1036_v60 = vld [vmem:[%s19721_s14 + $0xc78] sm:$0xff]  ;;  %v16568_v21 = vcombine.low %v1023_v26, %v1027_v2  ;;  %v1067_v26 = vld [vmem:[%s19721_s14 + $0xd70] sm:$0xff] }
 0x4e8   : > { %12259 = vmatprep.subr.bf16.mxu0 %v16537_v22  ;;  %12833 = vmatprep.subr.bf16.mxu1 %v16539_v25  ;;  %v16570_v22 = vcombine.low %v1024_v5, %v1028_v57  ;;  %v16577_v25 = vcombine.high %v1031_v18, %v1035_v35  ;;  %v16579_v28 = vcombine.high %v1032_v15, %v1036_v60  ;;  %v1064_v2 = vld [vmem:[%s19721_s14 + $0xd58] sm:$0xff] }
 0x4e9   : > { %v1068_v5 = vld [vmem:[%s19721_s14 + $0xd78] sm:$0xff]  ;;  %v16600_v57 = vcombine.low %v1055_v47, %v1059_v48 }
 0x4eb   : > { %12260 = vmatpush1.bf16.msra.mxu0 %v16536_v4  ;;  %12834 = vmatpush1.bf16.msra.mxu1 %v16538_v36  ;;  %v1044_v4 = vld [vmem:[%s19721_s14 + $0xcb8] sm:$0xff]  ;;  %v16576_v36 = vcombine.low %v1031_v18, %v1035_v35  ;;  %v1075_v18 = vld [vmem:[%s19721_s14 + $0xdb0] sm:$0xff] }
 0x4ec   : > { %12261 = vmatprep.subr.bf16.mxu0 %v16545_v63  ;;  %12835 = vmatprep.subr.bf16.mxu1 %v16547_v38  ;;  %v16578_v63 = vcombine.low %v1032_v15, %v1036_v60  ;;  %v16585_v38 = vcombine.high %v1039_v14, %v1043_v42  ;;  %v16587_v29 = vcombine.high %v1040_v37, %v1044_v4  ;;  %v1072_v35 = vld [vmem:[%s19721_s14 + $0xd98] sm:$0xff] }
 0x4ed   : > { %v1076_v15 = vld [vmem:[%s19721_s14 + $0xdb8] sm:$0xff] }
 0x4ef   : > { %12262 = vmatpush1.bf16.msra.mxu0 %v16544_v50  ;;  %12836 = vmatpush1.bf16.msra.mxu1 %v16546_v6  ;;  %v1052_v50 = vld [vmem:[%s19721_s14 + $0xcf8] sm:$0xff]  ;;  %v16586_v6 = vcombine.low %v1040_v37, %v1044_v4 }
 0x4f0   : > { %12263 = vmatprep.subr.bf16.mxu0 %v16553_v44  ;;  %12837 = vmatprep.subr.bf16.mxu1 %v16555_v46  ;;  %v16593_v44 = vcombine.high %v1047_v10, %v1051_v56  ;;  %v16595_v46 = vcombine.high %v1048_v52, %v1052_v50 }
 0x4f3   : > { %12264 = vmatpush1.bf16.msra.mxu0 %v16552_v24  ;;  %12838 = vmatpush1.bf16.msra.mxu1 %v16554_v58  ;;  %v16592_v24 = vcombine.low %v1047_v10, %v1051_v56  ;;  %v16601_v58 = vcombine.high %v1055_v47, %v1059_v48 }
 0x4f4   : > { %12265 = vmatprep.subr.bf16.mxu0 %v16561_v12  ;;  %12839 = vmatprep.subr.bf16.mxu1 %v16563_v62  ;;  %v16603_v12 = vcombine.high %v1056_v53, %v1060_v11  ;;  %v1063_v62 = vld [vmem:[%s19721_s14 + $0xd50] sm:$0xff] }
 0x4f5   : > { %v16608_v60 = vcombine.low %v1063_v62, %v1067_v26 }
 0x4f7   : > { %12266 = vmatpush1.bf16.msra.mxu0 %v16560_v7  ;;  %12840 = vmatpush1.bf16.msra.mxu1 %v16562_v8  ;;  %v16602_v7 = vcombine.low %v1056_v53, %v1060_v11  ;;  %v16609_v8 = vcombine.high %v1063_v62, %v1067_v26  ;;  %v1087_v53 = vld [vmem:[%s19721_s14 + $0xe10] sm:$0xff] }
 0x4f8   : > { %12276 = vmatprep.subr.bf16.mxu0 %v16569_v59  ;;  %12850 = vmatprep.subr.bf16.mxu1 %v16571_v9  ;;  %v16611_v59 = vcombine.high %v1064_v2, %v1068_v5  ;;  %v1071_v9 = vld [vmem:[%s19721_s14 + $0xd90] sm:$0xff] }
 0x4f9   : > { %v16616_v56 = vcombine.low %v1071_v9, %v1075_v18  ;;  %v1091_v11 = vld [vmem:[%s19721_s14 + $0xe30] sm:$0xff] }
 0x4fa   : > { %12268 = vmatmul.mubr.bf16.vlgmr.msra.gmra.mrb[4].mxu0 %v20008_v3  ;;  %12842 = vmatmul.mubr.bf16.vlgmr.msra.gmra.mrb[4].mxu1 %v20008_v3  ;;  %v16584_v3 = vcombine.low %v1039_v14, %v1043_v42  ;;  %v1079_v14 = vld [vmem:[%s19721_s14 + $0xdd0] sm:$0xff] }
 0x4fb   : > { %12277 = vmatpush1.bf16.msra.mxu0 %v16568_v21  ;;  %12851 = vmatpush1.bf16.msra.mxu1 %v16570_v22  ;;  %v16610_v21 = vcombine.low %v1064_v2, %v1068_v5  ;;  %v16617_v22 = vcombine.high %v1071_v9, %v1075_v18  ;;  %v1083_v42 = vld [vmem:[%s19721_s14 + $0xdf0] sm:$0xff]  ;;  %v16633_v5 = vcombine.high %v1087_v53, %v1091_v11  ;;  %v1096_v9 = vld [vmem:[%s19721_s14 + $0xe58] sm:$0xff] }
 0x4fc   : > { %12278 = vmatprep.subr.bf16.mxu0 %v16577_v25  ;;  %12852 = vmatprep.subr.bf16.mxu1 %v16579_v28  ;;  %v16619_v28 = vcombine.high %v1072_v35, %v1076_v15  ;;  %v16624_v62 = vcombine.low %v1079_v14, %v1083_v42  ;;  %v1100_v18 = vld [vmem:[%s19721_s14 + $0xe78] sm:$0xff] }
 0x4fd   : > { %12308 = vmatprep.mubr.bf16.mxu0 %v20014_v13  ;;  %12882 = vmatprep.mubr.bf16.mxu1 %v20014_v13  ;;  %v16594_v13 = vcombine.low %v1048_v52, %v1052_v50 }
 0x4ff   : > { %12279 = vmatpush1.bf16.msra.mxu0 %v16576_v36  ;;  %12853 = vmatpush1.bf16.msra.mxu1 %v16578_v63  ;;  %v1080_v36 = vld [vmem:[%s19721_s14 + $0xdd8] sm:$0xff] }
 0x500   : > { %12280 = vmatprep.subr.bf16.mxu0 %v16585_v38  ;;  %12854 = vmatprep.subr.bf16.mxu1 %v16587_v29  ;;  %v1084_v63 = vld [vmem:[%s19721_s14 + $0xdf8] sm:$0xff] }
 0x501   : > { %v16627_v48 = vcombine.high %v1080_v36, %v1084_v63  ;;  %v16626_v2 = vcombine.low %v1080_v36, %v1084_v63  ;;  %v1111_v63 = vld [vmem:[%s19721_s14 + $0xed0] sm:$0xff] }
 0x503   : > { %12281 = vmatpush1.bf16.msra.mxu0 %v16584_v3  ;;  %12855 = vmatpush1.bf16.msra.mxu1 %v16586_v6  ;;  %v16618_v6 = vcombine.low %v1072_v35, %v1076_v15  ;;  %v16632_v35 = vcombine.low %v1087_v53, %v1091_v11 }
 0x504   : > { %12282 = vmatprep.subr.bf16.mxu0 %v16593_v44  ;;  %12856 = vmatprep.subr.bf16.mxu1 %v16595_v46  ;;  %v16625_v44 = vcombine.high %v1079_v14, %v1083_v42  ;;  %v1108_v14 = vld [vmem:[%s19721_s14 + $0xeb8] sm:$0xff] }
 0x507   : > { %12283 = vmatpush1.bf16.msra.mxu0 %v16592_v24  ;;  %12857 = vmatpush1.bf16.msra.mxu1 %v16594_v13  ;;  %v1088_v13 = vld [vmem:[%s19721_s14 + $0xe18] sm:$0xff] }
 0x508   : > { %12284 = vmatprep.subr.bf16.mxu0 %v16601_v58  ;;  %12858 = vmatprep.subr.bf16.mxu1 %v16603_v12  ;;  %v1092_v58 = vld [vmem:[%s19721_s14 + $0xe38] sm:$0xff]  ;;  %v449_v12 = vld [vmem:[#allocation2] sm:$0xff] }
 0x509   : > { %v16634_v15 = vcombine.low %v1088_v13, %v1092_v58 }
 0x50b   : > { %12285 = vmatpush1.bf16.msra.mxu0 %v16600_v57  ;;  %12859 = vmatpush1.bf16.msra.mxu1 %v16602_v7  ;;  %v16635_v57 = vcombine.high %v1088_v13, %v1092_v58  ;;  %v1095_v7 = vld [vmem:[%s19721_s14 + $0xe50] sm:$0xff] }
 0x50c   : > { %12286 = vmatprep.subr.bf16.mxu0 %v16609_v8  ;;  %12860 = vmatprep.subr.bf16.mxu1 %v16611_v59  ;;  %v1099_v8 = vld [vmem:[%s19721_s14 + $0xe70] sm:$0xff] }
 0x50d   : > { %v11572_v25 = vpop.f32.mrb[0].mxu0  ;;  %v12146_v37 = vpop.f32.mrb[0].mxu1  ;;  %v16640_v42 = vcombine.low %v1095_v7, %v1099_v8  ;;  %v1127_v13 = vld [vmem:[%s19721_s14 + $0xf50] sm:$0xff] }
 0x50e   : > { %v11574_v4 = vpop.f32.mrb[1].mxu0  ;;  %v12148_v29 = vpop.f32.mrb[1].mxu1  ;;  %v1131_v58 = vld [vmem:[%s19721_s14 + $0xf70] sm:$0xff] }
 0x50f   : > { %v13309_v38 = vcombine.low %v11572_v25, %v11574_v4  ;;  %v11576_v10 = vpop.f32.mrb[2].mxu0  ;;  %12287 = vmatpush1.bf16.msra.mxu0 %v16608_v60  ;;  %v13310_v52 = vcombine.low %v12146_v37, %v12148_v29  ;;  %v12150_v50 = vpop.f32.mrb[2].mxu1  ;;  %12861 = vmatpush1.bf16.msra.mxu1 %v16610_v21  ;;  %v16641_v60 = vcombine.high %v1095_v7, %v1099_v8  ;;  %v1107_v25 = vld [vmem:[%s19721_s14 + $0xeb0] sm:$0xff]  ;;  %v1112_v29 = vld [vmem:[%s19721_s14 + $0xed8] sm:$0xff] }
 0x510   : > { %v11577_v3 = vpop.f32.mrb[3].mxu0  ;;  %12288 = vmatprep.subr.bf16.mxu0 %v16617_v22  ;;  %v12151_v47 = vpop.f32.mrb[3].mxu1  ;;  %12862 = vmatprep.subr.bf16.mxu1 %v16619_v28  ;;  %v16643_v21 = vcombine.high %v1096_v9, %v1100_v18  ;;  %v1103_v22 = vld [vmem:[%s19721_s14 + $0xe90] sm:$0xff]  ;;  %v1104_v28 = vld [vmem:[%s19721_s14 + $0xe98] sm:$0xff]  ;;  %v16642_v37 = vcombine.low %v1096_v9, %v1100_v18  ;;  %v16672_v18 = vcombine.low %v1127_v13, %v1131_v58 }
 0x511   : > { %v13317_v46 = vrot.slane %v13309_v38, %v19776_v54  ;;  %v13324_v24 = vrot.slane %v13310_v52, %v19776_v54  ;;  %v16649_v4 = vcombine.high %v1103_v22, %v1107_v25  ;;  %v16651_v36 = vcombine.high %v1104_v28, %v1108_v14  ;;  %v1115_v38 = vld [vmem:[%s19721_s14 + $0xef0] sm:$0xff]  ;;  %v1116_v10 = vld [vmem:[%s19721_s14 + $0xef8] sm:$0xff] }
 0x512   : > { %v16650_v52 = vcombine.low %v1104_v28, %v1108_v14  ;;  %v16657_v50 = vcombine.high %v1111_v63, %v1115_v38  ;;  %v16659_v3 = vcombine.high %v1112_v29, %v1116_v10  ;;  %v1124_v47 = vld [vmem:[%s19721_s14 + $0xf38] sm:$0xff]  ;;  %v16658_v53 = vcombine.low %v1112_v29, %v1116_v10  ;;  %v1135_v7 = vld [vmem:[%s19721_s14 + $0xf90] sm:$0xff] }
 0x513   : > { %12289 = vmatpush1.bf16.msra.mxu0 %v16616_v56  ;;  %v13325_v26 = vcombine.low %v13317_v46, %v13324_v24  ;;  %12863 = vmatpush1.bf16.msra.mxu1 %v16618_v6  ;;  %v16648_v56 = vcombine.low %v1103_v22, %v1107_v25  ;;  %v1119_v6 = vld [vmem:[%s19721_s14 + $0xf10] sm:$0xff]  ;;  %v1120_v46 = vld [vmem:[%s19721_s14 + $0xf18] sm:$0xff] }
 0x514   : > { %12290 = vmatprep.subr.bf16.mxu0 %v16625_v44  ;;  %12864 = vmatprep.subr.bf16.mxu1 %v16627_v48  ;;  %v1123_v44 = vld [vmem:[%s19721_s14 + $0xf30] sm:$0xff]  ;;  %v16656_v48 = vcombine.low %v1111_v63, %v1115_v38  ;;  %v16667_v24 = vcombine.high %v1120_v46, %v1124_v47  ;;  %v1140_v9 = vld [vmem:[%s19721_s14 + $0xfb8] sm:$0xff] }
 0x515   : > { %v13345_v59 = vadd.f32 %v13325_v26, %v449_v12  ;;  %v16665_v11 = vcombine.high %v1119_v6, %v1123_v44  ;;  %v1128_v12 = vld [vmem:[%s19721_s14 + $0xf58] sm:$0xff]  ;;  %v16664_v26 = vcombine.low %v1119_v6, %v1123_v44  ;;  %v1139_v8 = vld [vmem:[%s19721_s14 + $0xfb0] sm:$0xff] }
 0x516   : > { %v1147_v22 = vld [vmem:[%s19721_s14 + $0xff0] sm:$0xff]  ;;  %v1144_v25 = vld [vmem:[%s19721_s14 + $0xfd8] sm:$0xff]  ;;  %v16680_v14 = vcombine.low %v1135_v7, %v1139_v8 }
 0x517   : > { %12291 = vmatpush1.bf16.msra.mxu0 %v16624_v62  ;;  %13347 = vst [vmem:[#allocation2] sm:$0xff] %v13345_v59  ;;  %12865 = vmatpush1.bf16.msra.mxu1 %v16626_v2  ;;  %v1132_v62 = vld [vmem:[%s19721_s14 + $0xf78] sm:$0xff]  ;;  %v16666_v2 = vcombine.low %v1120_v46, %v1124_v47  ;;  %v1155_v63 = vld [vmem:[%s19721_s14 + $0x1030] sm:$0xff] }
 0x518   : > { %12292 = vmatprep.subr.bf16.mxu0 %v16633_v5  ;;  %12866 = vmatprep.subr.bf16.mxu1 %v16635_v57  ;;  %v16673_v5 = vcombine.high %v1127_v13, %v1131_v58  ;;  %v16675_v57 = vcombine.high %v1128_v12, %v1132_v62  ;;  %v1136_v59 = vld [vmem:[%s19721_s14 + $0xf98] sm:$0xff]  ;;  %v1163_v6 = vld [vmem:[%s19721_s14 + $0x1070] sm:$0xff] }
 0x519   : > { %v1148_v28 = vld [vmem:[%s19721_s14 + $0xff8] sm:$0xff]  ;;  %v1171_v13 = vld [vmem:[%s19721_s14 + $0x10b0] sm:$0xff] }
 0x51a   : > { %v1152_v38 = vld [vmem:[%s19721_s14 + $0x1018] sm:$0xff] }
 0x51b   : > { %12293 = vmatpush1.bf16.msra.mxu0 %v16632_v35  ;;  %12867 = vmatpush1.bf16.msra.mxu1 %v16634_v15  ;;  %v16674_v35 = vcombine.low %v1128_v12, %v1132_v62  ;;  %v16681_v15 = vcombine.high %v1135_v7, %v1139_v8  ;;  %v1156_v29 = vld [vmem:[%s19721_s14 + $0x1038] sm:$0xff]  ;;  %v1179_v7 = vld [vmem:[%s19721_s14 + $0x10f0] sm:$0xff] }
 0x51c   : > { %12294 = vmatprep.subr.bf16.mxu0 %v16641_v60  ;;  %12868 = vmatprep.subr.bf16.mxu1 %v16643_v21  ;;  %v16683_v60 = vcombine.high %v1136_v59, %v1140_v9  ;;  %v1143_v21 = vld [vmem:[%s19721_s14 + $0xfd0] sm:$0xff]  ;;  %v1160_v44 = vld [vmem:[%s19721_s14 + $0x1058] sm:$0xff] }
 0x51d   : > { %v16688_v10 = vcombine.low %v1143_v21, %v1147_v22  ;;  %v1164_v46 = vld [vmem:[%s19721_s14 + $0x1078] sm:$0xff] }
 0x51e   : > { %v1168_v58 = vld [vmem:[%s19721_s14 + $0x1098] sm:$0xff] }
 0x51f   : > { %12295 = vmatpush1.bf16.msra.mxu0 %v16640_v42  ;;  %12869 = vmatpush1.bf16.msra.mxu1 %v16642_v37  ;;  %v16682_v42 = vcombine.low %v1136_v59, %v1140_v9  ;;  %v16689_v37 = vcombine.high %v1143_v21, %v1147_v22  ;;  %v1172_v12 = vld [vmem:[%s19721_s14 + $0x10b8] sm:$0xff] }
 0x520   : > { %12296 = vmatprep.subr.bf16.mxu0 %v16649_v4  ;;  %12870 = vmatprep.subr.bf16.mxu1 %v16651_v36  ;;  %v16691_v4 = vcombine.high %v1144_v25, %v1148_v28  ;;  %v1151_v36 = vld [vmem:[%s19721_s14 + $0x1010] sm:$0xff]  ;;  %v1176_v8 = vld [vmem:[%s19721_s14 + $0x10d8] sm:$0xff]  ;;  %v16714_v9 = vcombine.low %v1168_v58, %v1172_v12 }
 0x521   : > { %v16696_v47 = vcombine.low %v1151_v36, %v1155_v63  ;;  %v1180_v59 = vld [vmem:[%s19721_s14 + $0x10f8] sm:$0xff] }
 0x522   : > { %v1184_v21 = vld [vmem:[%s19721_s14 + $0x1118] sm:$0xff] }
 0x523   : > { %12297 = vmatpush1.bf16.msra.mxu0 %v16648_v56  ;;  %12871 = vmatpush1.bf16.msra.mxu1 %v16650_v52  ;;  %v16690_v56 = vcombine.low %v1144_v25, %v1148_v28  ;;  %v16697_v52 = vcombine.high %v1151_v36, %v1155_v63  ;;  %v1188_v22 = vld [vmem:[%s19721_s14 + $0x1138] sm:$0xff] }
 0x524   : > { %12298 = vmatprep.subr.bf16.mxu0 %v16657_v50  ;;  %12872 = vmatprep.subr.bf16.mxu1 %v16659_v3  ;;  %v16699_v50 = vcombine.high %v1152_v38, %v1156_v29  ;;  %v1159_v3 = vld [vmem:[%s19721_s14 + $0x1050] sm:$0xff]  ;;  %v1196_v36 = vld [vmem:[%s19721_s14 + $0x1178] sm:$0xff] }
 0x525   : > { %v16704_v62 = vcombine.low %v1159_v3, %v1163_v6 }
 0x527   : > { %12299 = vmatpush1.bf16.msra.mxu0 %v16656_v48  ;;  %12873 = vmatpush1.bf16.msra.mxu1 %v16658_v53  ;;  %v16698_v48 = vcombine.low %v1152_v38, %v1156_v29  ;;  %v16705_v53 = vcombine.high %v1159_v3, %v1163_v6  ;;  %v16730_v38 = vcombine.low %v1184_v21, %v1188_v22  ;;  %v1204_v3 = vld [vmem:[%s19721_s14 + $0x11b8] sm:$0xff] }
 0x528   : > { %12300 = vmatprep.subr.bf16.mxu0 %v16665_v11  ;;  %12874 = vmatprep.subr.bf16.mxu1 %v16667_v24  ;;  %v16707_v11 = vcombine.high %v1160_v44, %v1164_v46  ;;  %v1167_v24 = vld [vmem:[%s19721_s14 + $0x1090] sm:$0xff] }
 0x52b   : > { %12301 = vmatpush1.bf16.msra.mxu0 %v16664_v26  ;;  %12875 = vmatpush1.bf16.msra.mxu1 %v16666_v2  ;;  %v16706_v26 = vcombine.low %v1160_v44, %v1164_v46  ;;  %v16713_v2 = vcombine.high %v1167_v24, %v1171_v13 }
 0x52c   : > { %12302 = vmatprep.subr.bf16.mxu0 %v16673_v5  ;;  %12876 = vmatprep.subr.bf16.mxu1 %v16675_v57  ;;  %v16715_v5 = vcombine.high %v1168_v58, %v1172_v12  ;;  %v1175_v57 = vld [vmem:[%s19721_s14 + $0x10d0] sm:$0xff] }
 0x52d   : > { %v16720_v25 = vcombine.low %v1175_v57, %v1179_v7 }
 0x52f   : > { %12303 = vmatpush1.bf16.msra.mxu0 %v16672_v18  ;;  %12877 = vmatpush1.bf16.msra.mxu1 %v16674_v35  ;;  %v16721_v18 = vcombine.high %v1175_v57, %v1179_v7  ;;  %v16723_v35 = vcombine.high %v1176_v8, %v1180_v59  ;;  %v1220_v57 = vld [vmem:[%s19721_s14 + $0x1238] sm:$0xff] }
 0x530   : > { %12304 = vmatprep.subr.bf16.mxu0 %v16681_v15  ;;  %12878 = vmatprep.subr.bf16.mxu1 %v16683_v60  ;;  %v1183_v15 = vld [vmem:[%s19721_s14 + $0x1110] sm:$0xff] }
 0x531   : > { %v1187_v60 = vld [vmem:[%s19721_s14 + $0x1130] sm:$0xff] }
 0x532   : > { %v16729_v28 = vcombine.high %v1183_v15, %v1187_v60  ;;  %v16728_v63 = vcombine.low %v1183_v15, %v1187_v60  ;;  %v1228_v15 = vld [vmem:[%s19721_s14 + $0x1278] sm:$0xff] }
 0x533   : > { %12305 = vmatpush1.bf16.msra.mxu0 %v16680_v14  ;;  %12879 = vmatpush1.bf16.msra.mxu1 %v16682_v42  ;;  %v16731_v14 = vcombine.high %v1184_v21, %v1188_v22  ;;  %v1191_v42 = vld [vmem:[%s19721_s14 + $0x1150] sm:$0xff] }
 0x534   : > { %12306 = vmatprep.subr.bf16.mxu0 %v16689_v37  ;;  %12880 = vmatprep.subr.bf16.mxu1 %v16691_v4  ;;  %v1195_v37 = vld [vmem:[%s19721_s14 + $0x1170] sm:$0xff]  ;;  %v1192_v4 = vld [vmem:[%s19721_s14 + $0x1158] sm:$0xff] }
 0x535   : > { %v16737_v29 = vcombine.high %v1191_v42, %v1195_v37  ;;  %v16736_v6 = vcombine.low %v1191_v42, %v1195_v37  ;;  %v16738_v44 = vcombine.low %v1192_v4, %v1196_v36  ;;  %v1236_v42 = vld [vmem:[%s19721_s14 + $0x12b8] sm:$0xff] }
 0x537   : > { %12307 = vmatpush1.bf16.msra.mxu0 %v16688_v10  ;;  %12881 = vmatpush1.bf16.msra.mxu1 %v16690_v56  ;;  %v16739_v10 = vcombine.high %v1192_v4, %v1196_v36  ;;  %v1199_v56 = vld [vmem:[%s19721_s14 + $0x1190] sm:$0xff] }
 0x538   : > { %12317 = vmatprep.subr.bf16.mxu0 %v16697_v52  ;;  %12891 = vmatprep.subr.bf16.mxu1 %v16699_v50  ;;  %v1203_v52 = vld [vmem:[%s19721_s14 + $0x11b0] sm:$0xff]  ;;  %v1200_v50 = vld [vmem:[%s19721_s14 + $0x1198] sm:$0xff] }
 0x539   : > { %v16745_v46 = vcombine.high %v1199_v56, %v1203_v52  ;;  %v16746_v58 = vcombine.low %v1200_v50, %v1204_v3 }
 0x53a   : > { %12309 = vmatmul.mubr.bf16.vlgmr.msra.gmra.mrb[4].mxu0 %v20091_v30  ;;  %12883 = vmatmul.mubr.bf16.vlgmr.msra.gmra.mrb[4].mxu1 %v20091_v30  ;;  %v16712_v30 = vcombine.low %v1167_v24, %v1171_v13  ;;  %v1212_v24 = vld [vmem:[%s19721_s14 + $0x11f8] sm:$0xff]  ;;  %v16744_v13 = vcombine.low %v1199_v56, %v1203_v52 }
 0x53b   : > { %12318 = vmatpush1.bf16.msra.mxu0 %v16696_v47  ;;  %12892 = vmatpush1.bf16.msra.mxu1 %v16698_v48  ;;  %v16747_v47 = vcombine.high %v1200_v50, %v1204_v3  ;;  %v1207_v48 = vld [vmem:[%s19721_s14 + $0x11d0] sm:$0xff]  ;;  %v1244_v56 = vld [vmem:[%s19721_s14 + $0x12f8] sm:$0xff] }
 0x53c   : > { %12319 = vmatprep.subr.bf16.mxu0 %v16705_v53  ;;  %12893 = vmatprep.subr.bf16.mxu1 %v16707_v11  ;;  %v1211_v53 = vld [vmem:[%s19721_s14 + $0x11f0] sm:$0xff]  ;;  %v1208_v11 = vld [vmem:[%s19721_s14 + $0x11d8] sm:$0xff] }
 0x53d   : > { %12349 = vmatprep.mubr.bf16.mxu0 %v20097_v40  ;;  %12923 = vmatprep.mubr.bf16.mxu1 %v20097_v40  ;;  %v16722_v40 = vcombine.low %v1176_v8, %v1180_v59  ;;  %v16753_v12 = vcombine.high %v1207_v48, %v1211_v53  ;;  %v16752_v7 = vcombine.low %v1207_v48, %v1211_v53  ;;  %v1252_v48 = vld [vmem:[%s19721_s14 + $0x1338] sm:$0xff] }
 0x53e   : > { %v16754_v8 = vcombine.low %v1208_v11, %v1212_v24 }
 0x53f   : > { %12320 = vmatpush1.bf16.msra.mxu0 %v16704_v62  ;;  %12894 = vmatpush1.bf16.msra.mxu1 %v16706_v26  ;;  %v16755_v62 = vcombine.high %v1208_v11, %v1212_v24  ;;  %v1215_v26 = vld [vmem:[%s19721_s14 + $0x1210] sm:$0xff] }
 0x540   : > { %12321 = vmatprep.subr.bf16.mxu0 %v16713_v2  ;;  %12895 = vmatprep.subr.bf16.mxu1 %v16715_v5  ;;  %v1219_v2 = vld [vmem:[%s19721_s14 + $0x1230] sm:$0xff]  ;;  %v1216_v5 = vld [vmem:[%s19721_s14 + $0x1218] sm:$0xff] }
 0x541   : > { %v16761_v59 = vcombine.high %v1215_v26, %v1219_v2  ;;  %v16760_v60 = vcombine.low %v1215_v26, %v1219_v2  ;;  %v16762_v21 = vcombine.low %v1216_v5, %v1220_v57  ;;  %v1260_v26 = vld [vmem:[%s19721_s14 + $0x1378] sm:$0xff] }
 0x543   : > { %12322 = vmatpush1.bf16.msra.mxu0 %v16712_v30  ;;  %12896 = vmatpush1.bf16.msra.mxu1 %v16714_v9  ;;  %v16763_v30 = vcombine.high %v1216_v5, %v1220_v57  ;;  %v1223_v9 = vld [vmem:[%s19721_s14 + $0x1250] sm:$0xff] }
 0x544   : > { %12323 = vmatprep.subr.bf16.mxu0 %v16721_v18  ;;  %12897 = vmatprep.subr.bf16.mxu1 %v16723_v35  ;;  %v1227_v18 = vld [vmem:[%s19721_s14 + $0x1270] sm:$0xff]  ;;  %v1224_v35 = vld [vmem:[%s19721_s14 + $0x1258] sm:$0xff] }
 0x545   : > { %v16769_v22 = vcombine.high %v1223_v9, %v1227_v18  ;;  %v16768_v37 = vcombine.low %v1223_v9, %v1227_v18  ;;  %v16770_v4 = vcombine.low %v1224_v35, %v1228_v15  ;;  %v1268_v9 = vld [vmem:[%s19721_s14 + $0x13b8] sm:$0xff] }
 0x547   : > { %12324 = vmatpush1.bf16.msra.mxu0 %v16720_v25  ;;  %12898 = vmatpush1.bf16.msra.mxu1 %v16722_v40  ;;  %v16771_v25 = vcombine.high %v1224_v35, %v1228_v15  ;;  %v1231_v40 = vld [vmem:[%s19721_s14 + $0x1290] sm:$0xff] }
 0x548   : > { %12325 = vmatprep.subr.bf16.mxu0 %v16729_v28  ;;  %12899 = vmatprep.subr.bf16.mxu1 %v16731_v14  ;;  %v1235_v28 = vld [vmem:[%s19721_s14 + $0x12b0] sm:$0xff]  ;;  %v1232_v14 = vld [vmem:[%s19721_s14 + $0x1298] sm:$0xff] }
 0x549   : > { %v16777_v36 = vcombine.high %v1231_v40, %v1235_v28  ;;  %v16776_v52 = vcombine.low %v1231_v40, %v1235_v28  ;;  %v16778_v50 = vcombine.low %v1232_v14, %v1236_v42  ;;  %v1276_v40 = vld [vmem:[%s19721_s14 + $0x13f8] sm:$0xff] }
 0x54b   : > { %12326 = vmatpush1.bf16.msra.mxu0 %v16728_v63  ;;  %12900 = vmatpush1.bf16.msra.mxu1 %v16730_v38  ;;  %v16779_v63 = vcombine.high %v1232_v14, %v1236_v42  ;;  %v1239_v38 = vld [vmem:[%s19721_s14 + $0x12d0] sm:$0xff] }
 0x54c   : > { %12327 = vmatprep.subr.bf16.mxu0 %v16737_v29  ;;  %12901 = vmatprep.subr.bf16.mxu1 %v16739_v10  ;;  %v1243_v29 = vld [vmem:[%s19721_s14 + $0x12f0] sm:$0xff]  ;;  %v1240_v10 = vld [vmem:[%s19721_s14 + $0x12d8] sm:$0xff] }
 0x54d   : > { %v16785_v3 = vcombine.high %v1239_v38, %v1243_v29  ;;  %v16784_v53 = vcombine.low %v1239_v38, %v1243_v29  ;;  %v16786_v11 = vcombine.low %v1240_v10, %v1244_v56  ;;  %v1284_v38 = vld [vmem:[%s19721_s14 + $0x1438] sm:$0xff] }
 0x54f   : > { %12328 = vmatpush1.bf16.msra.mxu0 %v16736_v6  ;;  %12902 = vmatpush1.bf16.msra.mxu1 %v16738_v44  ;;  %v16787_v6 = vcombine.high %v1240_v10, %v1244_v56  ;;  %v1247_v44 = vld [vmem:[%s19721_s14 + $0x1310] sm:$0xff] }
 0x550   : > { %12329 = vmatprep.subr.bf16.mxu0 %v16745_v46  ;;  %12903 = vmatprep.subr.bf16.mxu1 %v16747_v47  ;;  %v1251_v46 = vld [vmem:[%s19721_s14 + $0x1330] sm:$0xff]  ;;  %v1248_v47 = vld [vmem:[%s19721_s14 + $0x1318] sm:$0xff] }
 0x551   : > { %v16793_v24 = vcombine.high %v1247_v44, %v1251_v46  ;;  %v16792_v2 = vcombine.low %v1247_v44, %v1251_v46  ;;  %v16794_v5 = vcombine.low %v1248_v47, %v1252_v48  ;;  %v1292_v44 = vld [vmem:[%s19721_s14 + $0x1478] sm:$0xff] }
 0x553   : > { %12330 = vmatpush1.bf16.msra.mxu0 %v16744_v13  ;;  %12904 = vmatpush1.bf16.msra.mxu1 %v16746_v58  ;;  %v16795_v13 = vcombine.high %v1248_v47, %v1252_v48  ;;  %v1255_v58 = vld [vmem:[%s19721_s14 + $0x1350] sm:$0xff] }
 0x554   : > { %12331 = vmatprep.subr.bf16.mxu0 %v16753_v12  ;;  %12905 = vmatprep.subr.bf16.mxu1 %v16755_v62  ;;  %v1259_v12 = vld [vmem:[%s19721_s14 + $0x1370] sm:$0xff]  ;;  %v1256_v62 = vld [vmem:[%s19721_s14 + $0x1358] sm:$0xff] }
 0x555   : > { %v16801_v57 = vcombine.high %v1255_v58, %v1259_v12  ;;  %v16800_v18 = vcombine.low %v1255_v58, %v1259_v12  ;;  %v16802_v35 = vcombine.low %v1256_v62, %v1260_v26  ;;  %v1300_v58 = vld [vmem:[%s19721_s14 + $0x14b8] sm:$0xff] }
 0x557   : > { %12332 = vmatpush1.bf16.msra.mxu0 %v16752_v7  ;;  %12906 = vmatpush1.bf16.msra.mxu1 %v16754_v8  ;;  %v16803_v7 = vcombine.high %v1256_v62, %v1260_v26  ;;  %v1263_v8 = vld [vmem:[%s19721_s14 + $0x1390] sm:$0xff] }
 0x558   : > { %12333 = vmatprep.subr.bf16.mxu0 %v16761_v59  ;;  %12907 = vmatprep.subr.bf16.mxu1 %v16763_v30  ;;  %v1267_v59 = vld [vmem:[%s19721_s14 + $0x13b0] sm:$0xff]  ;;  %v1264_v30 = vld [vmem:[%s19721_s14 + $0x1398] sm:$0xff] }
 0x559   : > { %v16809_v15 = vcombine.high %v1263_v8, %v1267_v59  ;;  %v16808_v28 = vcombine.low %v1263_v8, %v1267_v59  ;;  %v16810_v14 = vcombine.low %v1264_v30, %v1268_v9  ;;  %v1308_v8 = vld [vmem:[%s19721_s14 + $0x14f8] sm:$0xff] }
 0x55b   : > { %12334 = vmatpush1.bf16.msra.mxu0 %v16760_v60  ;;  %12908 = vmatpush1.bf16.msra.mxu1 %v16762_v21  ;;  %v16811_v60 = vcombine.high %v1264_v30, %v1268_v9  ;;  %v1271_v21 = vld [vmem:[%s19721_s14 + $0x13d0] sm:$0xff] }
 0x55c   : > { %12335 = vmatprep.subr.bf16.mxu0 %v16769_v22  ;;  %12909 = vmatprep.subr.bf16.mxu1 %v16771_v25  ;;  %v1275_v22 = vld [vmem:[%s19721_s14 + $0x13f0] sm:$0xff]  ;;  %v1272_v25 = vld [vmem:[%s19721_s14 + $0x13d8] sm:$0xff] }
 0x55d   : > { %v16817_v42 = vcombine.high %v1271_v21, %v1275_v22  ;;  %v16816_v29 = vcombine.low %v1271_v21, %v1275_v22  ;;  %v16818_v10 = vcombine.low %v1272_v25, %v1276_v40 }
 0x55f   : > { %12336 = vmatpush1.bf16.msra.mxu0 %v16768_v37  ;;  %12910 = vmatpush1.bf16.msra.mxu1 %v16770_v4  ;;  %v16819_v37 = vcombine.high %v1272_v25, %v1276_v40  ;;  %v1279_v4 = vld [vmem:[%s19721_s14 + $0x1410] sm:$0xff] }
 0x560   : > { %12337 = vmatprep.subr.bf16.mxu0 %v16777_v36  ;;  %12911 = vmatprep.subr.bf16.mxu1 %v16779_v63  ;;  %v1283_v36 = vld [vmem:[%s19721_s14 + $0x1430] sm:$0xff]  ;;  %v1280_v63 = vld [vmem:[%s19721_s14 + $0x1418] sm:$0xff] }
 0x561   : > { %v16825_v56 = vcombine.high %v1279_v4, %v1283_v36  ;;  %v16824_v46 = vcombine.low %v1279_v4, %v1283_v36  ;;  %v16826_v47 = vcombine.low %v1280_v63, %v1284_v38  ;;  %v1319_v40 = vld [vmem:[%s19721_s14 + $0x1550] sm:$0xff] }
 0x563   : > { %12338 = vmatpush1.bf16.msra.mxu0 %v16776_v52  ;;  %12912 = vmatpush1.bf16.msra.mxu1 %v16778_v50  ;;  %v16827_v52 = vcombine.high %v1280_v63, %v1284_v38  ;;  %v1287_v50 = vld [vmem:[%s19721_s14 + $0x1450] sm:$0xff] }
 0x564   : > { %12339 = vmatprep.subr.bf16.mxu0 %v16785_v3  ;;  %12913 = vmatprep.subr.bf16.mxu1 %v16787_v6  ;;  %v1291_v3 = vld [vmem:[%s19721_s14 + $0x1470] sm:$0xff]  ;;  %v1288_v6 = vld [vmem:[%s19721_s14 + $0x1458] sm:$0xff] }
 0x565   : > { %v16833_v48 = vcombine.high %v1287_v50, %v1291_v3  ;;  %v16832_v12 = vcombine.low %v1287_v50, %v1291_v3  ;;  %v16834_v62 = vcombine.low %v1288_v6, %v1292_v44  ;;  %v1327_v38 = vld [vmem:[%s19721_s14 + $0x1590] sm:$0xff] }
 0x567   : > { %12340 = vmatpush1.bf16.msra.mxu0 %v16784_v53  ;;  %12914 = vmatpush1.bf16.msra.mxu1 %v16786_v11  ;;  %v16835_v53 = vcombine.high %v1288_v6, %v1292_v44  ;;  %v1295_v11 = vld [vmem:[%s19721_s14 + $0x1490] sm:$0xff] }
 0x568   : > { %12341 = vmatprep.subr.bf16.mxu0 %v16793_v24  ;;  %12915 = vmatprep.subr.bf16.mxu1 %v16795_v13  ;;  %v1299_v24 = vld [vmem:[%s19721_s14 + $0x14b0] sm:$0xff]  ;;  %v1296_v13 = vld [vmem:[%s19721_s14 + $0x1498] sm:$0xff] }
 0x569   : > { %v16841_v26 = vcombine.high %v1295_v11, %v1299_v24  ;;  %v16842_v59 = vcombine.low %v1296_v13, %v1300_v58  ;;  %v1335_v44 = vld [vmem:[%s19721_s14 + $0x15d0] sm:$0xff] }
 0x56b   : > { %12342 = vmatpush1.bf16.msra.mxu0 %v16792_v2  ;;  %12916 = vmatpush1.bf16.msra.mxu1 %v16794_v5  ;;  %v16843_v2 = vcombine.high %v1296_v13, %v1300_v58  ;;  %v1303_v5 = vld [vmem:[%s19721_s14 + $0x14d0] sm:$0xff] }
 0x56c   : > { %12343 = vmatprep.subr.bf16.mxu0 %v16801_v57  ;;  %12917 = vmatprep.subr.bf16.mxu1 %v16803_v7  ;;  %v1307_v57 = vld [vmem:[%s19721_s14 + $0x14f0] sm:$0xff]  ;;  %v1304_v7 = vld [vmem:[%s19721_s14 + $0x14d8] sm:$0xff] }
 0x56d   : > { %v16849_v30 = vcombine.high %v1303_v5, %v1307_v57  ;;  %v16851_v9 = vcombine.high %v1304_v7, %v1308_v8  ;;  %v16848_v21 = vcombine.low %v1303_v5, %v1307_v57  ;;  %v1343_v58 = vld [vmem:[%s19721_s14 + $0x1610] sm:$0xff] }
 0x56f   : > { %12344 = vmatpush1.bf16.msra.mxu0 %v16800_v18  ;;  %12918 = vmatpush1.bf16.msra.mxu1 %v16802_v35  ;;  %v1311_v18 = vld [vmem:[%s19721_s14 + $0x1510] sm:$0xff] }
 0x570   : > { %12345 = vmatprep.subr.bf16.mxu0 %v16809_v15  ;;  %12919 = vmatprep.subr.bf16.mxu1 %v16811_v60  ;;  %v1315_v35 = vld [vmem:[%s19721_s14 + $0x1530] sm:$0xff]  ;;  %v1312_v15 = vld [vmem:[%s19721_s14 + $0x1518] sm:$0xff] }
 0x571   : > { %v1316_v60 = vld [vmem:[%s19721_s14 + $0x1538] sm:$0xff]  ;;  %v16857_v22 = vcombine.high %v1311_v18, %v1315_v35 }
 0x572   : > { %v16859_v25 = vcombine.high %v1312_v15, %v1316_v60  ;;  %v16858_v4 = vcombine.low %v1312_v15, %v1316_v60  ;;  %v1359_v60 = vld [vmem:[%s19721_s14 + $0x1690] sm:$0xff] }
 0x573   : > { %12346 = vmatpush1.bf16.msra.mxu0 %v16808_v28  ;;  %12920 = vmatpush1.bf16.msra.mxu1 %v16810_v14  ;;  %v1323_v28 = vld [vmem:[%s19721_s14 + $0x1570] sm:$0xff]  ;;  %v1320_v14 = vld [vmem:[%s19721_s14 + $0x1558] sm:$0xff] }
 0x574   : > { %12347 = vmatprep.subr.bf16.mxu0 %v16817_v42  ;;  %12921 = vmatprep.subr.bf16.mxu1 %v16819_v37  ;;  %v1324_v42 = vld [vmem:[%s19721_s14 + $0x1578] sm:$0xff]  ;;  %v16856_v37 = vcombine.low %v1311_v18, %v1315_v35  ;;  %v16865_v36 = vcombine.high %v1319_v40, %v1323_v28 }
 0x575   : > { %v16867_v63 = vcombine.high %v1320_v14, %v1324_v42  ;;  %v16866_v50 = vcombine.low %v1320_v14, %v1324_v42  ;;  %v1367_v42 = vld [vmem:[%s19721_s14 + $0x16d0] sm:$0xff] }
 0x577   : > { %12348 = vmatpush1.bf16.msra.mxu0 %v16816_v29  ;;  %12922 = vmatpush1.bf16.msra.mxu1 %v16818_v10  ;;  %v1331_v29 = vld [vmem:[%s19721_s14 + $0x15b0] sm:$0xff]  ;;  %v1328_v10 = vld [vmem:[%s19721_s14 + $0x1598] sm:$0xff] }
 0x578   : > { %12358 = vmatprep.subr.bf16.mxu0 %v16825_v56  ;;  %12932 = vmatprep.subr.bf16.mxu1 %v16827_v52  ;;  %v1332_v56 = vld [vmem:[%s19721_s14 + $0x15b8] sm:$0xff]  ;;  %v16864_v52 = vcombine.low %v1319_v40, %v1323_v28  ;;  %v16873_v3 = vcombine.high %v1327_v38, %v1331_v29 }
 0x579   : > { %v16875_v6 = vcombine.high %v1328_v10, %v1332_v56 }
 0x57a   : > { %12350 = vmatmul.mubr.bf16.vlgmr.msra.gmra.mrb[4].mxu0 %v20172_v1  ;;  %12924 = vmatmul.mubr.bf16.vlgmr.msra.gmra.mrb[4].mxu1 %v20172_v1  ;;  %v16840_v1 = vcombine.low %v1295_v11, %v1299_v24  ;;  %v16874_v11 = vcombine.low %v1328_v10, %v1332_v56  ;;  %v1375_v56 = vld [vmem:[%s19721_s14 + $0x1710] sm:$0xff] }
 0x57b   : > { %12359 = vmatpush1.bf16.msra.mxu0 %v16824_v46  ;;  %12933 = vmatpush1.bf16.msra.mxu1 %v16826_v47  ;;  %v1339_v46 = vld [vmem:[%s19721_s14 + $0x15f0] sm:$0xff]  ;;  %v1336_v47 = vld [vmem:[%s19721_s14 + $0x15d8] sm:$0xff] }
 0x57c   : > { %12360 = vmatprep.subr.bf16.mxu0 %v16833_v48  ;;  %12934 = vmatprep.subr.bf16.mxu1 %v16835_v53  ;;  %v1340_v48 = vld [vmem:[%s19721_s14 + $0x15f8] sm:$0xff]  ;;  %v16872_v53 = vcombine.low %v1327_v38, %v1331_v29  ;;  %v16881_v24 = vcombine.high %v1335_v44, %v1339_v46 }
 0x57d   : > { %12390 = vmatprep.mubr.bf16.mxu0 %v20178_v32  ;;  %12964 = vmatprep.mubr.bf16.mxu1 %v20178_v32  ;;  %v16850_v32 = vcombine.low %v1304_v7, %v1308_v8  ;;  %v16883_v13 = vcombine.high %v1336_v47, %v1340_v48  ;;  %v16882_v5 = vcombine.low %v1336_v47, %v1340_v48  ;;  %v1351_v8 = vld [vmem:[%s19721_s14 + $0x1650] sm:$0xff] }
 0x57e   : > { %v1383_v48 = vld [vmem:[%s19721_s14 + $0x1750] sm:$0xff] }
 0x57f   : > { %12361 = vmatpush1.bf16.msra.mxu0 %v16832_v12  ;;  %12935 = vmatpush1.bf16.msra.mxu1 %v16834_v62  ;;  %v1347_v12 = vld [vmem:[%s19721_s14 + $0x1630] sm:$0xff]  ;;  %v1344_v62 = vld [vmem:[%s19721_s14 + $0x1618] sm:$0xff] }
 0x580   : > { %12362 = vmatprep.subr.bf16.mxu0 %v16841_v26  ;;  %12936 = vmatprep.subr.bf16.mxu1 %v16843_v2  ;;  %v1348_v26 = vld [vmem:[%s19721_s14 + $0x1638] sm:$0xff]  ;;  %v16880_v2 = vcombine.low %v1335_v44, %v1339_v46  ;;  %v16889_v57 = vcombine.high %v1343_v58, %v1347_v12 }
 0x581   : > { %v16891_v7 = vcombine.high %v1344_v62, %v1348_v26  ;;  %v16890_v18 = vcombine.low %v1344_v62, %v1348_v26  ;;  %v1391_v26 = vld [vmem:[%s19721_s14 + $0x1790] sm:$0xff] }
 0x583   : > { %12363 = vmatpush1.bf16.msra.mxu0 %v16840_v1  ;;  %12937 = vmatpush1.bf16.msra.mxu1 %v16842_v59  ;;  %v1355_v1 = vld [vmem:[%s19721_s14 + $0x1670] sm:$0xff]  ;;  %v1352_v59 = vld [vmem:[%s19721_s14 + $0x1658] sm:$0xff] }
 0x584   : > { %12364 = vmatprep.subr.bf16.mxu0 %v16849_v30  ;;  %12938 = vmatprep.subr.bf16.mxu1 %v16851_v9  ;;  %v1356_v30 = vld [vmem:[%s19721_s14 + $0x1678] sm:$0xff]  ;;  %v16888_v9 = vcombine.low %v1343_v58, %v1347_v12  ;;  %v16897_v35 = vcombine.high %v1351_v8, %v1355_v1 }
 0x585   : > { %v16899_v15 = vcombine.high %v1352_v59, %v1356_v30  ;;  %v16898_v40 = vcombine.low %v1352_v59, %v1356_v30  ;;  %v1399_v30 = vld [vmem:[%s19721_s14 + $0x17d0] sm:$0xff] }
 0x587   : > { %12365 = vmatpush1.bf16.msra.mxu0 %v16848_v21  ;;  %12939 = vmatpush1.bf16.msra.mxu1 %v16850_v32  ;;  %v1363_v21 = vld [vmem:[%s19721_s14 + $0x16b0] sm:$0xff]  ;;  %v1360_v32 = vld [vmem:[%s19721_s14 + $0x1698] sm:$0xff] }
 0x588   : > { %12366 = vmatprep.subr.bf16.mxu0 %v16857_v22  ;;  %12940 = vmatprep.subr.bf16.mxu1 %v16859_v25  ;;  %v1364_v22 = vld [vmem:[%s19721_s14 + $0x16b8] sm:$0xff]  ;;  %v16896_v25 = vcombine.low %v1351_v8, %v1355_v1  ;;  %v16905_v28 = vcombine.high %v1359_v60, %v1363_v21 }
 0x589   : > { %v16907_v14 = vcombine.high %v1360_v32, %v1364_v22  ;;  %v16906_v38 = vcombine.low %v1360_v32, %v1364_v22  ;;  %v1407_v22 = vld [vmem:[%s19721_s14 + $0x1810] sm:$0xff] }
 0x58b   : > { %12367 = vmatpush1.bf16.msra.mxu0 %v16856_v37  ;;  %12941 = vmatpush1.bf16.msra.mxu1 %v16858_v4  ;;  %v1371_v37 = vld [vmem:[%s19721_s14 + $0x16f0] sm:$0xff]  ;;  %v1368_v4 = vld [vmem:[%s19721_s14 + $0x16d8] sm:$0xff] }
 0x58c   : > { %12368 = vmatprep.subr.bf16.mxu0 %v16865_v36  ;;  %12942 = vmatprep.subr.bf16.mxu1 %v16867_v63  ;;  %v1372_v36 = vld [vmem:[%s19721_s14 + $0x16f8] sm:$0xff]  ;;  %v16904_v63 = vcombine.low %v1359_v60, %v1363_v21  ;;  %v16913_v29 = vcombine.high %v1367_v42, %v1371_v37 }
 0x58d   : > { %v16915_v10 = vcombine.high %v1368_v4, %v1372_v36  ;;  %v16914_v44 = vcombine.low %v1368_v4, %v1372_v36  ;;  %v1415_v36 = vld [vmem:[%s19721_s14 + $0x1850] sm:$0xff] }
 0x58f   : > { %12369 = vmatpush1.bf16.msra.mxu0 %v16864_v52  ;;  %12943 = vmatpush1.bf16.msra.mxu1 %v16866_v50  ;;  %v1379_v52 = vld [vmem:[%s19721_s14 + $0x1730] sm:$0xff]  ;;  %v1376_v50 = vld [vmem:[%s19721_s14 + $0x1718] sm:$0xff] }
 0x590   : > { %12370 = vmatprep.subr.bf16.mxu0 %v16873_v3  ;;  %12944 = vmatprep.subr.bf16.mxu1 %v16875_v6  ;;  %v1380_v3 = vld [vmem:[%s19721_s14 + $0x1738] sm:$0xff]  ;;  %v16912_v6 = vcombine.low %v1367_v42, %v1371_v37  ;;  %v16921_v46 = vcombine.high %v1375_v56, %v1379_v52 }
 0x591   : > { %v16923_v47 = vcombine.high %v1376_v50, %v1380_v3  ;;  %v16922_v58 = vcombine.low %v1376_v50, %v1380_v3  ;;  %v1423_v3 = vld [vmem:[%s19721_s14 + $0x1890] sm:$0xff] }
 0x593   : > { %12371 = vmatpush1.bf16.msra.mxu0 %v16872_v53  ;;  %12945 = vmatpush1.bf16.msra.mxu1 %v16874_v11  ;;  %v1387_v53 = vld [vmem:[%s19721_s14 + $0x1770] sm:$0xff]  ;;  %v1384_v11 = vld [vmem:[%s19721_s14 + $0x1758] sm:$0xff] }
 0x594   : > { %12372 = vmatprep.subr.bf16.mxu0 %v16881_v24  ;;  %12946 = vmatprep.subr.bf16.mxu1 %v16883_v13  ;;  %v1388_v24 = vld [vmem:[%s19721_s14 + $0x1778] sm:$0xff]  ;;  %v16920_v13 = vcombine.low %v1375_v56, %v1379_v52  ;;  %v16929_v12 = vcombine.high %v1383_v48, %v1387_v53 }
 0x595   : > { %v16931_v62 = vcombine.high %v1384_v11, %v1388_v24  ;;  %v16930_v8 = vcombine.low %v1384_v11, %v1388_v24  ;;  %v1431_v24 = vld [vmem:[%s19721_s14 + $0x18d0] sm:$0xff] }
 0x597   : > { %12373 = vmatpush1.bf16.msra.mxu0 %v16880_v2  ;;  %12947 = vmatpush1.bf16.msra.mxu1 %v16882_v5  ;;  %v1395_v2 = vld [vmem:[%s19721_s14 + $0x17b0] sm:$0xff]  ;;  %v1392_v5 = vld [vmem:[%s19721_s14 + $0x1798] sm:$0xff] }
 0x598   : > { %12374 = vmatprep.subr.bf16.mxu0 %v16889_v57  ;;  %12948 = vmatprep.subr.bf16.mxu1 %v16891_v7  ;;  %v1396_v57 = vld [vmem:[%s19721_s14 + $0x17b8] sm:$0xff]  ;;  %v16928_v7 = vcombine.low %v1383_v48, %v1387_v53  ;;  %v16937_v1 = vcombine.high %v1391_v26, %v1395_v2 }
 0x599   : > { %v16939_v59 = vcombine.high %v1392_v5, %v1396_v57  ;;  %v16938_v60 = vcombine.low %v1392_v5, %v1396_v57  ;;  %v1439_v5 = vld [vmem:[%s19721_s14 + $0x1910] sm:$0xff] }
 0x59a   : > { %v1443_v57 = vld [vmem:[%s19721_s14 + $0x1930] sm:$0xff] }
 0x59b   : > { %12375 = vmatpush1.bf16.msra.mxu0 %v16888_v9  ;;  %12949 = vmatpush1.bf16.msra.mxu1 %v16890_v18  ;;  %v1403_v9 = vld [vmem:[%s19721_s14 + $0x17f0] sm:$0xff]  ;;  %v1400_v18 = vld [vmem:[%s19721_s14 + $0x17d8] sm:$0xff] }
 0x59c   : > { %12376 = vmatprep.subr.bf16.mxu0 %v16897_v35  ;;  %12950 = vmatprep.subr.bf16.mxu1 %v16899_v15  ;;  %v1404_v35 = vld [vmem:[%s19721_s14 + $0x17f8] sm:$0xff]  ;;  %v16936_v15 = vcombine.low %v1391_v26, %v1395_v2  ;;  %v16945_v21 = vcombine.high %v1399_v30, %v1403_v9 }
 0x59d   : > { %v16947_v32 = vcombine.high %v1400_v18, %v1404_v35  ;;  %v16946_v42 = vcombine.low %v1400_v18, %v1404_v35  ;;  %v1451_v18 = vld [vmem:[%s19721_s14 + $0x1970] sm:$0xff]  ;;  %v1448_v35 = vld [vmem:[%s19721_s14 + $0x1958] sm:$0xff] }
 0x59f   : > { %12377 = vmatpush1.bf16.msra.mxu0 %v16896_v25  ;;  %12951 = vmatpush1.bf16.msra.mxu1 %v16898_v40  ;;  %v1411_v25 = vld [vmem:[%s19721_s14 + $0x1830] sm:$0xff]  ;;  %v1408_v40 = vld [vmem:[%s19721_s14 + $0x1818] sm:$0xff] }
 0x5a0   : > { %12378 = vmatprep.subr.bf16.mxu0 %v16905_v28  ;;  %12952 = vmatprep.subr.bf16.mxu1 %v16907_v14  ;;  %v1412_v28 = vld [vmem:[%s19721_s14 + $0x1838] sm:$0xff]  ;;  %v16944_v14 = vcombine.low %v1399_v30, %v1403_v9  ;;  %v16953_v37 = vcombine.high %v1407_v22, %v1411_v25  ;;  %v1447_v9 = vld [vmem:[%s19721_s14 + $0x1950] sm:$0xff] }
 0x5a1   : > { %v16955_v4 = vcombine.high %v1408_v40, %v1412_v28  ;;  %v16954_v56 = vcombine.low %v1408_v40, %v1412_v28  ;;  %v1459_v40 = vld [vmem:[%s19721_s14 + $0x19b0] sm:$0xff]  ;;  %v1456_v28 = vld [vmem:[%s19721_s14 + $0x1998] sm:$0xff] }
 0x5a3   : > { %12379 = vmatpush1.bf16.msra.mxu0 %v16904_v63  ;;  %12953 = vmatpush1.bf16.msra.mxu1 %v16906_v38  ;;  %v1419_v63 = vld [vmem:[%s19721_s14 + $0x1870] sm:$0xff]  ;;  %v1416_v38 = vld [vmem:[%s19721_s14 + $0x1858] sm:$0xff] }
 0x5a4   : > { %12380 = vmatprep.subr.bf16.mxu0 %v16913_v29  ;;  %12954 = vmatprep.subr.bf16.mxu1 %v16915_v10  ;;  %v1420_v29 = vld [vmem:[%s19721_s14 + $0x1878] sm:$0xff]  ;;  %v16952_v10 = vcombine.low %v1407_v22, %v1411_v25  ;;  %v16961_v52 = vcombine.high %v1415_v36, %v1419_v63  ;;  %v1455_v25 = vld [vmem:[%s19721_s14 + $0x1990] sm:$0xff] }
 0x5a5   : > { %v16963_v50 = vcombine.high %v1416_v38, %v1420_v29  ;;  %v16962_v48 = vcombine.low %v1416_v38, %v1420_v29  ;;  %v1467_v38 = vld [vmem:[%s19721_s14 + $0x19f0] sm:$0xff]  ;;  %v1464_v29 = vld [vmem:[%s19721_s14 + $0x19d8] sm:$0xff] }
 0x5a7   : > { %12381 = vmatpush1.bf16.msra.mxu0 %v16912_v6  ;;  %12955 = vmatpush1.bf16.msra.mxu1 %v16914_v44  ;;  %v1427_v6 = vld [vmem:[%s19721_s14 + $0x18b0] sm:$0xff]  ;;  %v1424_v44 = vld [vmem:[%s19721_s14 + $0x1898] sm:$0xff] }
 0x5a8   : > { %12382 = vmatprep.subr.bf16.mxu0 %v16921_v46  ;;  %12956 = vmatprep.subr.bf16.mxu1 %v16923_v47  ;;  %v1428_v46 = vld [vmem:[%s19721_s14 + $0x18b8] sm:$0xff]  ;;  %v16960_v47 = vcombine.low %v1415_v36, %v1419_v63  ;;  %v16969_v53 = vcombine.high %v1423_v3, %v1427_v6  ;;  %v1463_v63 = vld [vmem:[%s19721_s14 + $0x19d0] sm:$0xff] }
 0x5a9   : > { %v16971_v11 = vcombine.high %v1424_v44, %v1428_v46 }
 0x5ab   : > { %12383 = vmatpush1.bf16.msra.mxu0 %v16920_v13  ;;  %12957 = vmatpush1.bf16.msra.mxu1 %v16922_v58  ;;  %v1435_v13 = vld [vmem:[%s19721_s14 + $0x18f0] sm:$0xff]  ;;  %v1432_v58 = vld [vmem:[%s19721_s14 + $0x18d8] sm:$0xff] }
 0x5ac   : > { %12384 = vmatprep.subr.bf16.mxu0 %v16929_v12  ;;  %12958 = vmatprep.subr.bf16.mxu1 %v16931_v62  ;;  %v1436_v12 = vld [vmem:[%s19721_s14 + $0x18f8] sm:$0xff]  ;;  %v16970_v62 = vcombine.low %v1424_v44, %v1428_v46  ;;  %v16977_v26 = vcombine.high %v1431_v24, %v1435_v13  ;;  %v1475_v44 = vld [vmem:[%s19721_s14 + $0x1a30] sm:$0xff] }
 0x5ad   : > { %v16979_v2 = vcombine.high %v1432_v58, %v1436_v12  ;;  %v1472_v46 = vld [vmem:[%s19721_s14 + $0x1a18] sm:$0xff] }
 0x5af   : > { %12385 = vmatpush1.bf16.msra.mxu0 %v16928_v7  ;;  %12959 = vmatpush1.bf16.msra.mxu1 %v16930_v8  ;;  %v1440_v7 = vld [vmem:[%s19721_s14 + $0x1918] sm:$0xff] }
 0x5b0   : > { %12386 = vmatprep.subr.bf16.mxu0 %v16937_v1  ;;  %12960 = vmatprep.subr.bf16.mxu1 %v16939_v59  ;;  %v1444_v8 = vld [vmem:[%s19721_s14 + $0x1938] sm:$0xff]  ;;  %v16976_v1 = vcombine.low %v1431_v24, %v1435_v13  ;;  %v16985_v59 = vcombine.high %v1439_v5, %v1443_v57  ;;  %v1479_v13 = vld [vmem:[%s19721_s14 + $0x1a50] sm:$0xff] }
 0x5b1   : > { %v16987_v30 = vcombine.high %v1440_v7, %v1444_v8 }
 0x5b3   : > { %12387 = vmatpush1.bf16.msra.mxu0 %v16936_v15  ;;  %12961 = vmatpush1.bf16.msra.mxu1 %v16938_v60  ;;  %v1452_v15 = vld [vmem:[%s19721_s14 + $0x1978] sm:$0xff]  ;;  %v16984_v60 = vcombine.low %v1439_v5, %v1443_v57  ;;  %v1487_v57 = vld [vmem:[%s19721_s14 + $0x1a90] sm:$0xff] }
 0x5b4   : > { %12388 = vmatprep.subr.bf16.mxu0 %v16945_v21  ;;  %12962 = vmatprep.subr.bf16.mxu1 %v16947_v32  ;;  %v16986_v21 = vcombine.low %v1440_v7, %v1444_v8  ;;  %v16993_v32 = vcombine.high %v1447_v9, %v1451_v18  ;;  %v16995_v22 = vcombine.high %v1448_v35, %v1452_v15  ;;  %v1491_v7 = vld [vmem:[%s19721_s14 + $0x1ab0] sm:$0xff]  ;;  %v1488_v8 = vld [vmem:[%s19721_s14 + $0x1a98] sm:$0xff] }
 0x5b7   : > { %12389 = vmatpush1.bf16.msra.mxu0 %v16944_v14  ;;  %12963 = vmatpush1.bf16.msra.mxu1 %v16946_v42  ;;  %v1460_v14 = vld [vmem:[%s19721_s14 + $0x19b8] sm:$0xff]  ;;  %v16992_v42 = vcombine.low %v1447_v9, %v1451_v18  ;;  %v1495_v18 = vld [vmem:[%s19721_s14 + $0x1ad0] sm:$0xff] }
 0x5b8   : > { %12399 = vmatprep.subr.bf16.mxu0 %v16953_v37  ;;  %12973 = vmatprep.subr.bf16.mxu1 %v16955_v4  ;;  %v16994_v37 = vcombine.low %v1448_v35, %v1452_v15  ;;  %v17001_v4 = vcombine.high %v1455_v25, %v1459_v40  ;;  %v17003_v36 = vcombine.high %v1456_v28, %v1460_v14  ;;  %v1499_v35 = vld [vmem:[%s19721_s14 + $0x1af0] sm:$0xff]  ;;  %v1496_v15 = vld [vmem:[%s19721_s14 + $0x1ad8] sm:$0xff] }
 0x5ba   : > { %12391 = vmatmul.mubr.bf16.vlgmr.msra.gmra.mrb[4].mxu0 %v20255_v41  ;;  %12965 = vmatmul.mubr.bf16.vlgmr.msra.gmra.mrb[4].mxu1 %v20255_v41  ;;  %v16968_v41 = vcombine.low %v1423_v3, %v1427_v6  ;;  %v1471_v6 = vld [vmem:[%s19721_s14 + $0x1a10] sm:$0xff] }
 0x5bb   : > { %12400 = vmatpush1.bf16.msra.mxu0 %v16952_v10  ;;  %12974 = vmatpush1.bf16.msra.mxu1 %v16954_v56  ;;  %v1468_v10 = vld [vmem:[%s19721_s14 + $0x19f8] sm:$0xff]  ;;  %v17000_v56 = vcombine.low %v1455_v25, %v1459_v40  ;;  %v1503_v40 = vld [vmem:[%s19721_s14 + $0x1b10] sm:$0xff] }
 0x5bc   : > { %12401 = vmatprep.subr.bf16.mxu0 %v16961_v52  ;;  %12975 = vmatprep.subr.bf16.mxu1 %v16963_v50  ;;  %v17002_v52 = vcombine.low %v1456_v28, %v1460_v14  ;;  %v17009_v50 = vcombine.high %v1463_v63, %v1467_v38  ;;  %v17011_v3 = vcombine.high %v1464_v29, %v1468_v10  ;;  %v1507_v28 = vld [vmem:[%s19721_s14 + $0x1b30] sm:$0xff]  ;;  %v1504_v14 = vld [vmem:[%s19721_s14 + $0x1b18] sm:$0xff] }
 0x5bd   : > { %12431 = vmatprep.mubr.bf16.mxu0 %v20261_v17  ;;  %13005 = vmatprep.mubr.bf16.mxu1 %v20261_v17  ;;  %v16978_v17 = vcombine.low %v1432_v58, %v1436_v12  ;;  %v1483_v58 = vld [vmem:[%s19721_s14 + $0x1a70] sm:$0xff]  ;;  %v1480_v12 = vld [vmem:[%s19721_s14 + $0x1a58] sm:$0xff] }
 0x5bf   : > { %12402 = vmatpush1.bf16.msra.mxu0 %v16960_v47  ;;  %12976 = vmatpush1.bf16.msra.mxu1 %v16962_v48  ;;  %v1476_v47 = vld [vmem:[%s19721_s14 + $0x1a38] sm:$0xff]  ;;  %v17008_v48 = vcombine.low %v1463_v63, %v1467_v38  ;;  %v1511_v38 = vld [vmem:[%s19721_s14 + $0x1b50] sm:$0xff] }
 0x5c0   : > { %12403 = vmatprep.subr.bf16.mxu0 %v16969_v53  ;;  %12977 = vmatprep.subr.bf16.mxu1 %v16971_v11  ;;  %v17010_v53 = vcombine.low %v1464_v29, %v1468_v10  ;;  %v17017_v11 = vcombine.high %v1471_v6, %v1475_v44  ;;  %v17019_v24 = vcombine.high %v1472_v46, %v1476_v47  ;;  %v1515_v29 = vld [vmem:[%s19721_s14 + $0x1b70] sm:$0xff]  ;;  %v1512_v10 = vld [vmem:[%s19721_s14 + $0x1b58] sm:$0xff] }
 0x5c3   : > { %12404 = vmatpush1.bf16.msra.mxu0 %v16968_v41  ;;  %12978 = vmatpush1.bf16.msra.mxu1 %v16970_v62  ;;  %v1484_v41 = vld [vmem:[%s19721_s14 + $0x1a78] sm:$0xff]  ;;  %v17016_v62 = vcombine.low %v1471_v6, %v1475_v44  ;;  %v1519_v44 = vld [vmem:[%s19721_s14 + $0x1b90] sm:$0xff] }
 0x5c4   : > { %12405 = vmatprep.subr.bf16.mxu0 %v16977_v26  ;;  %12979 = vmatprep.subr.bf16.mxu1 %v16979_v2  ;;  %v17018_v26 = vcombine.low %v1472_v46, %v1476_v47  ;;  %v17025_v2 = vcombine.high %v1479_v13, %v1483_v58  ;;  %v17027_v5 = vcombine.high %v1480_v12, %v1484_v41  ;;  %v1523_v46 = vld [vmem:[%s19721_s14 + $0x1bb0] sm:$0xff]  ;;  %v1520_v47 = vld [vmem:[%s19721_s14 + $0x1b98] sm:$0xff] }
 0x5c7   : > { %12406 = vmatpush1.bf16.msra.mxu0 %v16976_v1  ;;  %12980 = vmatpush1.bf16.msra.mxu1 %v16978_v17  ;;  %v1492_v1 = vld [vmem:[%s19721_s14 + $0x1ab8] sm:$0xff]  ;;  %v17024_v17 = vcombine.low %v1479_v13, %v1483_v58  ;;  %v1527_v58 = vld [vmem:[%s19721_s14 + $0x1bd0] sm:$0xff] }
 0x5c8   : > { %12407 = vmatprep.subr.bf16.mxu0 %v16985_v59  ;;  %12981 = vmatprep.subr.bf16.mxu1 %v16987_v30  ;;  %v17026_v59 = vcombine.low %v1480_v12, %v1484_v41  ;;  %v17033_v30 = vcombine.high %v1487_v57, %v1491_v7  ;;  %v17035_v9 = vcombine.high %v1488_v8, %v1492_v1  ;;  %v1531_v12 = vld [vmem:[%s19721_s14 + $0x1bf0] sm:$0xff]  ;;  %v1528_v41 = vld [vmem:[%s19721_s14 + $0x1bd8] sm:$0xff] }
 0x5cb   : > { %12408 = vmatpush1.bf16.msra.mxu0 %v16984_v60  ;;  %12982 = vmatpush1.bf16.msra.mxu1 %v16986_v21  ;;  %v1500_v60 = vld [vmem:[%s19721_s14 + $0x1af8] sm:$0xff]  ;;  %v17032_v21 = vcombine.low %v1487_v57, %v1491_v7  ;;  %v1535_v7 = vld [vmem:[%s19721_s14 + $0x1c10] sm:$0xff] }
 0x5cc   : > { %12409 = vmatprep.subr.bf16.mxu0 %v16993_v32  ;;  %12983 = vmatprep.subr.bf16.mxu1 %v16995_v22  ;;  %v17034_v32 = vcombine.low %v1488_v8, %v1492_v1  ;;  %v17041_v22 = vcombine.high %v1495_v18, %v1499_v35  ;;  %v17043_v25 = vcombine.high %v1496_v15, %v1500_v60  ;;  %v1539_v8 = vld [vmem:[%s19721_s14 + $0x1c30] sm:$0xff]  ;;  %v1536_v1 = vld [vmem:[%s19721_s14 + $0x1c18] sm:$0xff] }
 0x5cf   : > { %12410 = vmatpush1.bf16.msra.mxu0 %v16992_v42  ;;  %12984 = vmatpush1.bf16.msra.mxu1 %v16994_v37  ;;  %v1508_v42 = vld [vmem:[%s19721_s14 + $0x1b38] sm:$0xff]  ;;  %v17040_v37 = vcombine.low %v1495_v18, %v1499_v35  ;;  %v1543_v35 = vld [vmem:[%s19721_s14 + $0x1c50] sm:$0xff] }
 0x5d0   : > { %12411 = vmatprep.subr.bf16.mxu0 %v17001_v4  ;;  %12985 = vmatprep.subr.bf16.mxu1 %v17003_v36  ;;  %v17042_v4 = vcombine.low %v1496_v15, %v1500_v60  ;;  %v17049_v36 = vcombine.high %v1503_v40, %v1507_v28  ;;  %v17051_v63 = vcombine.high %v1504_v14, %v1508_v42  ;;  %v1547_v15 = vld [vmem:[%s19721_s14 + $0x1c70] sm:$0xff]  ;;  %v1544_v60 = vld [vmem:[%s19721_s14 + $0x1c58] sm:$0xff] }
 0x5d3   : > { %12412 = vmatpush1.bf16.msra.mxu0 %v17000_v56  ;;  %12986 = vmatpush1.bf16.msra.mxu1 %v17002_v52  ;;  %v1516_v56 = vld [vmem:[%s19721_s14 + $0x1b78] sm:$0xff]  ;;  %v17048_v52 = vcombine.low %v1503_v40, %v1507_v28  ;;  %v1551_v28 = vld [vmem:[%s19721_s14 + $0x1c90] sm:$0xff] }
 0x5d4   : > { %12413 = vmatprep.subr.bf16.mxu0 %v17009_v50  ;;  %12987 = vmatprep.subr.bf16.mxu1 %v17011_v3  ;;  %v17050_v50 = vcombine.low %v1504_v14, %v1508_v42  ;;  %v17057_v3 = vcombine.high %v1511_v38, %v1515_v29  ;;  %v17059_v6 = vcombine.high %v1512_v10, %v1516_v56  ;;  %v1555_v14 = vld [vmem:[%s19721_s14 + $0x1cb0] sm:$0xff]  ;;  %v1552_v42 = vld [vmem:[%s19721_s14 + $0x1c98] sm:$0xff] }
 0x5d7   : > { %12414 = vmatpush1.bf16.msra.mxu0 %v17008_v48  ;;  %12988 = vmatpush1.bf16.msra.mxu1 %v17010_v53  ;;  %v1524_v48 = vld [vmem:[%s19721_s14 + $0x1bb8] sm:$0xff]  ;;  %v17056_v53 = vcombine.low %v1511_v38, %v1515_v29  ;;  %v1559_v29 = vld [vmem:[%s19721_s14 + $0x1cd0] sm:$0xff] }
 0x5d8   : > { %12415 = vmatprep.subr.bf16.mxu0 %v17017_v11  ;;  %12989 = vmatprep.subr.bf16.mxu1 %v17019_v24  ;;  %v17058_v11 = vcombine.low %v1512_v10, %v1516_v56  ;;  %v17065_v24 = vcombine.high %v1519_v44, %v1523_v46  ;;  %v17067_v13 = vcombine.high %v1520_v47, %v1524_v48  ;;  %v1563_v10 = vld [vmem:[%s19721_s14 + $0x1cf0] sm:$0xff]  ;;  %v1560_v56 = vld [vmem:[%s19721_s14 + $0x1cd8] sm:$0xff] }
 0x5db   : > { %12416 = vmatpush1.bf16.msra.mxu0 %v17016_v62  ;;  %12990 = vmatpush1.bf16.msra.mxu1 %v17018_v26  ;;  %v1532_v62 = vld [vmem:[%s19721_s14 + $0x1bf8] sm:$0xff]  ;;  %v17064_v26 = vcombine.low %v1519_v44, %v1523_v46  ;;  %v1567_v44 = vld [vmem:[%s19721_s14 + $0x1d10] sm:$0xff] }
 0x5dc   : > { %12417 = vmatprep.subr.bf16.mxu0 %v17025_v2  ;;  %12991 = vmatprep.subr.bf16.mxu1 %v17027_v5  ;;  %v17066_v2 = vcombine.low %v1520_v47, %v1524_v48  ;;  %v17073_v5 = vcombine.high %v1527_v58, %v1531_v12  ;;  %v17075_v57 = vcombine.high %v1528_v41, %v1532_v62  ;;  %v1571_v46 = vld [vmem:[%s19721_s14 + $0x1d30] sm:$0xff]  ;;  %v1568_v47 = vld [vmem:[%s19721_s14 + $0x1d18] sm:$0xff] }
 0x5dd   : > { %v1572_v48 = vld [vmem:[%s19721_s14 + $0x1d38] sm:$0xff] }
 0x5df   : > { %12418 = vmatpush1.bf16.msra.mxu0 %v17024_v17  ;;  %12992 = vmatpush1.bf16.msra.mxu1 %v17026_v59  ;;  %v1540_v17 = vld [vmem:[%s19721_s14 + $0x1c38] sm:$0xff]  ;;  %v17072_v59 = vcombine.low %v1527_v58, %v1531_v12  ;;  %v1579_v58 = vld [vmem:[%s19721_s14 + $0x1d70] sm:$0xff] }
 0x5e0   : > { %12419 = vmatprep.subr.bf16.mxu0 %v17033_v30  ;;  %12993 = vmatprep.subr.bf16.mxu1 %v17035_v9  ;;  %v17074_v30 = vcombine.low %v1528_v41, %v1532_v62  ;;  %v17081_v9 = vcombine.high %v1535_v7, %v1539_v8  ;;  %v17083_v18 = vcombine.high %v1536_v1, %v1540_v17  ;;  %v1576_v12 = vld [vmem:[%s19721_s14 + $0x1d58] sm:$0xff] }
 0x5e1   : > { %v1580_v41 = vld [vmem:[%s19721_s14 + $0x1d78] sm:$0xff]  ;;  %v17112_v62 = vcombine.low %v1567_v44, %v1571_v46 }
 0x5e3   : > { %12420 = vmatpush1.bf16.msra.mxu0 %v17032_v21  ;;  %12994 = vmatpush1.bf16.msra.mxu1 %v17034_v32  ;;  %v1548_v21 = vld [vmem:[%s19721_s14 + $0x1c78] sm:$0xff]  ;;  %v17080_v32 = vcombine.low %v1535_v7, %v1539_v8  ;;  %v1587_v7 = vld [vmem:[%s19721_s14 + $0x1db0] sm:$0xff] }
 0x5e4   : > { %12421 = vmatprep.subr.bf16.mxu0 %v17041_v22  ;;  %12995 = vmatprep.subr.bf16.mxu1 %v17043_v25  ;;  %v17082_v22 = vcombine.low %v1536_v1, %v1540_v17  ;;  %v17089_v25 = vcombine.high %v1543_v35, %v1547_v15  ;;  %v17091_v40 = vcombine.high %v1544_v60, %v1548_v21  ;;  %v1584_v8 = vld [vmem:[%s19721_s14 + $0x1d98] sm:$0xff] }
 0x5e5   : > { %v1588_v1 = vld [vmem:[%s19721_s14 + $0x1db8] sm:$0xff] }
 0x5e7   : > { %12422 = vmatpush1.bf16.msra.mxu0 %v17040_v37  ;;  %12996 = vmatpush1.bf16.msra.mxu1 %v17042_v4  ;;  %v1556_v37 = vld [vmem:[%s19721_s14 + $0x1cb8] sm:$0xff]  ;;  %v17088_v4 = vcombine.low %v1543_v35, %v1547_v15  ;;  %v1595_v35 = vld [vmem:[%s19721_s14 + $0x1df0] sm:$0xff] }
 0x5e8   : > { %12423 = vmatprep.subr.bf16.mxu0 %v17049_v36  ;;  %12997 = vmatprep.subr.bf16.mxu1 %v17051_v63  ;;  %v17090_v36 = vcombine.low %v1544_v60, %v1548_v21  ;;  %v17097_v63 = vcombine.high %v1551_v28, %v1555_v14  ;;  %v17099_v38 = vcombine.high %v1552_v42, %v1556_v37  ;;  %v1592_v15 = vld [vmem:[%s19721_s14 + $0x1dd8] sm:$0xff] }
 0x5e9   : > { %v1596_v60 = vld [vmem:[%s19721_s14 + $0x1df8] sm:$0xff] }
 0x5eb   : > { %12424 = vmatpush1.bf16.msra.mxu0 %v17048_v52  ;;  %12998 = vmatpush1.bf16.msra.mxu1 %v17050_v50  ;;  %v1564_v52 = vld [vmem:[%s19721_s14 + $0x1cf8] sm:$0xff]  ;;  %v17098_v50 = vcombine.low %v1552_v42, %v1556_v37 }
 0x5ec   : > { %12425 = vmatprep.subr.bf16.mxu0 %v17057_v3  ;;  %12999 = vmatprep.subr.bf16.mxu1 %v17059_v6  ;;  %v17105_v3 = vcombine.high %v1559_v29, %v1563_v10  ;;  %v17107_v6 = vcombine.high %v1560_v56, %v1564_v52  ;;  %v1604_v42 = vld [vmem:[%s19721_s14 + $0x1e38] sm:$0xff] }
 0x5ef   : > { %12426 = vmatpush1.bf16.msra.mxu0 %v17056_v53  ;;  %13000 = vmatpush1.bf16.msra.mxu1 %v17058_v11  ;;  %v17104_v53 = vcombine.low %v1559_v29, %v1563_v10  ;;  %v17113_v11 = vcombine.high %v1567_v44, %v1571_v46  ;;  %v1611_v29 = vld [vmem:[%s19721_s14 + $0x1e70] sm:$0xff]  ;;  %v1608_v10 = vld [vmem:[%s19721_s14 + $0x1e58] sm:$0xff] }
 0x5f0   : > { %12427 = vmatprep.subr.bf16.mxu0 %v17065_v24  ;;  %13001 = vmatprep.subr.bf16.mxu1 %v17067_v13  ;;  %v17115_v24 = vcombine.high %v1568_v47, %v1572_v48  ;;  %v1575_v13 = vld [vmem:[%s19721_s14 + $0x1d50] sm:$0xff]  ;;  %v1616_v46 = vld [vmem:[%s19721_s14 + $0x1e98] sm:$0xff] }
 0x5f1   : > { %v17120_v17 = vcombine.low %v1575_v13, %v1579_v58  ;;  %v1619_v44 = vld [vmem:[%s19721_s14 + $0x1eb0] sm:$0xff] }
 0x5f3   : > { %12428 = vmatpush1.bf16.msra.mxu0 %v17064_v26  ;;  %13002 = vmatpush1.bf16.msra.mxu1 %v17066_v2  ;;  %v17114_v26 = vcombine.low %v1568_v47, %v1572_v48  ;;  %v17121_v2 = vcombine.high %v1575_v13, %v1579_v58  ;;  %v1620_v47 = vld [vmem:[%s19721_s14 + $0x1eb8] sm:$0xff]  ;;  %v1627_v13 = vld [vmem:[%s19721_s14 + $0x1ef0] sm:$0xff] }
 0x5f4   : > { %12429 = vmatprep.subr.bf16.mxu0 %v17073_v5  ;;  %13003 = vmatprep.subr.bf16.mxu1 %v17075_v57  ;;  %v17123_v5 = vcombine.high %v1576_v12, %v1580_v41  ;;  %v1583_v57 = vld [vmem:[%s19721_s14 + $0x1d90] sm:$0xff]  ;;  %v1624_v58 = vld [vmem:[%s19721_s14 + $0x1ed8] sm:$0xff] }
 0x5f5   : > { %v17128_v21 = vcombine.low %v1583_v57, %v1587_v7 }
 0x5f7   : > { %12430 = vmatpush1.bf16.msra.mxu0 %v17072_v59  ;;  %13004 = vmatpush1.bf16.msra.mxu1 %v17074_v30  ;;  %v17122_v59 = vcombine.low %v1576_v12, %v1580_v41  ;;  %v17129_v30 = vcombine.high %v1583_v57, %v1587_v7  ;;  %v1628_v12 = vld [vmem:[%s19721_s14 + $0x1ef8] sm:$0xff]  ;;  %v1635_v57 = vld [vmem:[%s19721_s14 + $0x1f30] sm:$0xff] }
 0x5f8   : > { %12440 = vmatprep.subr.bf16.mxu0 %v17081_v9  ;;  %13014 = vmatprep.subr.bf16.mxu1 %v17083_v18  ;;  %v17131_v9 = vcombine.high %v1584_v8, %v1588_v1  ;;  %v1591_v18 = vld [vmem:[%s19721_s14 + $0x1dd0] sm:$0xff]  ;;  %v1632_v7 = vld [vmem:[%s19721_s14 + $0x1f18] sm:$0xff] }
 0x5f9   : > { %v17136_v37 = vcombine.low %v1591_v18, %v1595_v35 }
 0x5fa   : > { %12432 = vmatmul.mubr.bf16.vlgmr.msra.gmra.mrb[4].mxu0 %v20336_v27  ;;  %13006 = vmatmul.mubr.bf16.vlgmr.msra.gmra.mrb[4].mxu1 %v20336_v27  ;;  %v17096_v27 = vcombine.low %v1551_v28, %v1555_v14  ;;  %v1603_v28 = vld [vmem:[%s19721_s14 + $0x1e30] sm:$0xff]  ;;  %v1600_v14 = vld [vmem:[%s19721_s14 + $0x1e18] sm:$0xff] }
 0x5fb   : > { %12441 = vmatpush1.bf16.msra.mxu0 %v17080_v32  ;;  %13015 = vmatpush1.bf16.msra.mxu1 %v17082_v22  ;;  %v17130_v32 = vcombine.low %v1584_v8, %v1588_v1  ;;  %v17137_v22 = vcombine.high %v1591_v18, %v1595_v35  ;;  %v1636_v8 = vld [vmem:[%s19721_s14 + $0x1f38] sm:$0xff]  ;;  %v1643_v18 = vld [vmem:[%s19721_s14 + $0x1f70] sm:$0xff] }
 0x5fc   : > { %12442 = vmatprep.subr.bf16.mxu0 %v17089_v25  ;;  %13016 = vmatprep.subr.bf16.mxu1 %v17091_v40  ;;  %v17139_v25 = vcombine.high %v1592_v15, %v1596_v60  ;;  %v1599_v40 = vld [vmem:[%s19721_s14 + $0x1e10] sm:$0xff]  ;;  %v1640_v35 = vld [vmem:[%s19721_s14 + $0x1f58] sm:$0xff] }
 0x5fd   : > { %12472 = vmatprep.mubr.bf16.mxu0 %v20342_v39  ;;  %13046 = vmatprep.mubr.bf16.mxu1 %v20342_v39  ;;  %v17106_v39 = vcombine.low %v1560_v56, %v1564_v52  ;;  %v1612_v56 = vld [vmem:[%s19721_s14 + $0x1e78] sm:$0xff]  ;;  %v17144_v52 = vcombine.low %v1599_v40, %v1603_v28 }
 0x5ff   : > { %12443 = vmatpush1.bf16.msra.mxu0 %v17088_v4  ;;  %13017 = vmatpush1.bf16.msra.mxu1 %v17090_v36  ;;  %v17138_v4 = vcombine.low %v1592_v15, %v1596_v60  ;;  %v17145_v36 = vcombine.high %v1599_v40, %v1603_v28  ;;  %v1644_v15 = vld [vmem:[%s19721_s14 + $0x1f78] sm:$0xff]  ;;  %v1651_v40 = vld [vmem:[%s19721_s14 + $0x1fb0] sm:$0xff] }
 0x600   : > { %12444 = vmatprep.subr.bf16.mxu0 %v17097_v63  ;;  %13018 = vmatprep.subr.bf16.mxu1 %v17099_v38  ;;  %v17147_v63 = vcombine.high %v1600_v14, %v1604_v42  ;;  %v1607_v38 = vld [vmem:[%s19721_s14 + $0x1e50] sm:$0xff]  ;;  %v1648_v28 = vld [vmem:[%s19721_s14 + $0x1f98] sm:$0xff] }
 0x601   : > { %v17152_v48 = vcombine.low %v1607_v38, %v1611_v29 }
 0x603   : > { %12445 = vmatpush1.bf16.msra.mxu0 %v17096_v27  ;;  %13019 = vmatpush1.bf16.msra.mxu1 %v17098_v50  ;;  %v17146_v27 = vcombine.low %v1600_v14, %v1604_v42  ;;  %v17153_v50 = vcombine.high %v1607_v38, %v1611_v29  ;;  %v1652_v14 = vld [vmem:[%s19721_s14 + $0x1fb8] sm:$0xff]  ;;  %v1659_v38 = vld [vmem:[%s19721_s14 + $0x1ff0] sm:$0xff] }
 0x604   : > { %12446 = vmatprep.subr.bf16.mxu0 %v17105_v3  ;;  %13020 = vmatprep.subr.bf16.mxu1 %v17107_v6  ;;  %v17155_v3 = vcombine.high %v1608_v10, %v1612_v56  ;;  %v1615_v6 = vld [vmem:[%s19721_s14 + $0x1e90] sm:$0xff]  ;;  %v1656_v29 = vld [vmem:[%s19721_s14 + $0x1fd8] sm:$0xff] }
 0x605   : > { %v17160_v41 = vcombine.low %v1615_v6, %v1619_v44 }
 0x607   : > { %12447 = vmatpush1.bf16.msra.mxu0 %v17104_v53  ;;  %13021 = vmatpush1.bf16.msra.mxu1 %v17106_v39  ;;  %v17154_v53 = vcombine.low %v1608_v10, %v1612_v56  ;;  %v17161_v39 = vcombine.high %v1615_v6, %v1619_v44  ;;  %v1660_v10 = vld [vmem:[%s19721_s14 + $0x1ff8] sm:$0xff]  ;;  %v1667_v6 = vld [vmem:[%s19721_s14 + $0x2030] sm:$0xff] }
 0x608   : > { %12448 = vmatprep.subr.bf16.mxu0 %v17113_v11  ;;  %13022 = vmatprep.subr.bf16.mxu1 %v17115_v24  ;;  %v17163_v11 = vcombine.high %v1616_v46, %v1620_v47  ;;  %v1623_v24 = vld [vmem:[%s19721_s14 + $0x1ed0] sm:$0xff]  ;;  %v1664_v44 = vld [vmem:[%s19721_s14 + $0x2018] sm:$0xff] }
 0x609   : > { %v17168_v1 = vcombine.low %v1623_v24, %v1627_v13 }
 0x60b   : > { %12449 = vmatpush1.bf16.msra.mxu0 %v17112_v62  ;;  %13023 = vmatpush1.bf16.msra.mxu1 %v17114_v26  ;;  %v17162_v62 = vcombine.low %v1616_v46, %v1620_v47  ;;  %v17169_v26 = vcombine.high %v1623_v24, %v1627_v13  ;;  %v1668_v46 = vld [vmem:[%s19721_s14 + $0x2038] sm:$0xff]  ;;  %v1675_v24 = vld [vmem:[%s19721_s14 + $0x2070] sm:$0xff] }
 0x60c   : > { %12450 = vmatprep.subr.bf16.mxu0 %v17121_v2  ;;  %13024 = vmatprep.subr.bf16.mxu1 %v17123_v5  ;;  %v17171_v2 = vcombine.high %v1624_v58, %v1628_v12  ;;  %v1631_v5 = vld [vmem:[%s19721_s14 + $0x1f10] sm:$0xff]  ;;  %v1672_v13 = vld [vmem:[%s19721_s14 + $0x2058] sm:$0xff] }
 0x60d   : > { %v17176_v60 = vcombine.low %v1631_v5, %v1635_v57 }
 0x60f   : > { %12451 = vmatpush1.bf16.msra.mxu0 %v17120_v17  ;;  %13025 = vmatpush1.bf16.msra.mxu1 %v17122_v59  ;;  %v17170_v17 = vcombine.low %v1624_v58, %v1628_v12  ;;  %v17177_v59 = vcombine.high %v1631_v5, %v1635_v57  ;;  %v1676_v58 = vld [vmem:[%s19721_s14 + $0x2078] sm:$0xff]  ;;  %v1683_v5 = vld [vmem:[%s19721_s14 + $0x20b0] sm:$0xff] }
 0x610   : > { %12452 = vmatprep.subr.bf16.mxu0 %v17129_v30  ;;  %13026 = vmatprep.subr.bf16.mxu1 %v17131_v9  ;;  %v17179_v30 = vcombine.high %v1632_v7, %v1636_v8  ;;  %v1639_v9 = vld [vmem:[%s19721_s14 + $0x1f50] sm:$0xff]  ;;  %v1680_v57 = vld [vmem:[%s19721_s14 + $0x2098] sm:$0xff] }
 0x611   : > { %v17184_v42 = vcombine.low %v1639_v9, %v1643_v18 }
 0x613   : > { %12453 = vmatpush1.bf16.msra.mxu0 %v17128_v21  ;;  %13027 = vmatpush1.bf16.msra.mxu1 %v17130_v32  ;;  %v17178_v21 = vcombine.low %v1632_v7, %v1636_v8  ;;  %v17185_v32 = vcombine.high %v1639_v9, %v1643_v18  ;;  %v1684_v7 = vld [vmem:[%s19721_s14 + $0x20b8] sm:$0xff]  ;;  %v1691_v9 = vld [vmem:[%s19721_s14 + $0x20f0] sm:$0xff] }
 0x614   : > { %12454 = vmatprep.subr.bf16.mxu0 %v17137_v22  ;;  %13028 = vmatprep.subr.bf16.mxu1 %v17139_v25  ;;  %v17187_v22 = vcombine.high %v1640_v35, %v1644_v15  ;;  %v1647_v25 = vld [vmem:[%s19721_s14 + $0x1f90] sm:$0xff]  ;;  %v1688_v18 = vld [vmem:[%s19721_s14 + $0x20d8] sm:$0xff] }
 0x615   : > { %v17192_v56 = vcombine.low %v1647_v25, %v1651_v40 }
 0x617   : > { %12455 = vmatpush1.bf16.msra.mxu0 %v17136_v37  ;;  %13029 = vmatpush1.bf16.msra.mxu1 %v17138_v4  ;;  %v17186_v37 = vcombine.low %v1640_v35, %v1644_v15  ;;  %v17193_v4 = vcombine.high %v1647_v25, %v1651_v40  ;;  %v1692_v35 = vld [vmem:[%s19721_s14 + $0x20f8] sm:$0xff]  ;;  %v17226_v15 = vcombine.low %v1680_v57, %v1684_v7 }
 0x618   : > { %12456 = vmatprep.subr.bf16.mxu0 %v17145_v36  ;;  %13030 = vmatprep.subr.bf16.mxu1 %v17147_v63  ;;  %v17195_v36 = vcombine.high %v1648_v28, %v1652_v14  ;;  %v1655_v63 = vld [vmem:[%s19721_s14 + $0x1fd0] sm:$0xff]  ;;  %v1696_v25 = vld [vmem:[%s19721_s14 + $0x2118] sm:$0xff] }
 0x619   : > { %v17200_v47 = vcombine.low %v1655_v63, %v1659_v38  ;;  %v1700_v40 = vld [vmem:[%s19721_s14 + $0x2138] sm:$0xff] }
 0x61b   : > { %12457 = vmatpush1.bf16.msra.mxu0 %v17144_v52  ;;  %13031 = vmatpush1.bf16.msra.mxu1 %v17146_v27  ;;  %v17194_v52 = vcombine.low %v1648_v28, %v1652_v14  ;;  %v17201_v27 = vcombine.high %v1655_v63, %v1659_v38  ;;  %v1708_v63 = vld [vmem:[%s19721_s14 + $0x2178] sm:$0xff] }
 0x61c   : > { %12458 = vmatprep.subr.bf16.mxu0 %v17153_v50  ;;  %13032 = vmatprep.subr.bf16.mxu1 %v17155_v3  ;;  %v17203_v50 = vcombine.high %v1656_v29, %v1660_v10  ;;  %v1663_v3 = vld [vmem:[%s19721_s14 + $0x2010] sm:$0xff] }
 0x61d   : > { %v17208_v12 = vcombine.low %v1663_v3, %v1667_v6 }
 0x61f   : > { %12459 = vmatpush1.bf16.msra.mxu0 %v17152_v48  ;;  %13033 = vmatpush1.bf16.msra.mxu1 %v17154_v53  ;;  %v17202_v48 = vcombine.low %v1656_v29, %v1660_v10  ;;  %v17209_v53 = vcombine.high %v1663_v3, %v1667_v6  ;;  %v17242_v29 = vcombine.low %v1696_v25, %v1700_v40  ;;  %v1716_v3 = vld [vmem:[%s19721_s14 + $0x21b8] sm:$0xff] }
 0x620   : > { %12460 = vmatprep.subr.bf16.mxu0 %v17161_v39  ;;  %13034 = vmatprep.subr.bf16.mxu1 %v17163_v11  ;;  %v17211_v39 = vcombine.high %v1664_v44, %v1668_v46  ;;  %v1671_v11 = vld [vmem:[%s19721_s14 + $0x2050] sm:$0xff] }
 0x621   : > { %v17216_v8 = vcombine.low %v1671_v11, %v1675_v24 }
 0x623   : > { %12461 = vmatpush1.bf16.msra.mxu0 %v17160_v41  ;;  %13035 = vmatpush1.bf16.msra.mxu1 %v17162_v62  ;;  %v17210_v41 = vcombine.low %v1664_v44, %v1668_v46  ;;  %v17217_v62 = vcombine.high %v1671_v11, %v1675_v24  ;;  %v1724_v11 = vld [vmem:[%s19721_s14 + $0x21f8] sm:$0xff] }
 0x624   : > { %12462 = vmatprep.subr.bf16.mxu0 %v17169_v26  ;;  %13036 = vmatprep.subr.bf16.mxu1 %v17171_v2  ;;  %v17219_v26 = vcombine.high %v1672_v13, %v1676_v58  ;;  %v1679_v2 = vld [vmem:[%s19721_s14 + $0x2090] sm:$0xff] }
 0x627   : > { %12463 = vmatpush1.bf16.msra.mxu0 %v17168_v1  ;;  %13037 = vmatpush1.bf16.msra.mxu1 %v17170_v17  ;;  %v17218_v1 = vcombine.low %v1672_v13, %v1676_v58  ;;  %v17225_v17 = vcombine.high %v1679_v2, %v1683_v5 }
 0x628   : > { %12464 = vmatprep.subr.bf16.mxu0 %v17177_v59  ;;  %13038 = vmatprep.subr.bf16.mxu1 %v17179_v30  ;;  %v17227_v59 = vcombine.high %v1680_v57, %v1684_v7  ;;  %v1687_v30 = vld [vmem:[%s19721_s14 + $0x20d0] sm:$0xff] }
 0x629   : > { %v17232_v28 = vcombine.low %v1687_v30, %v1691_v9 }
 0x62b   : > { %12465 = vmatpush1.bf16.msra.mxu0 %v17176_v60  ;;  %13039 = vmatpush1.bf16.msra.mxu1 %v17178_v21  ;;  %v17233_v60 = vcombine.high %v1687_v30, %v1691_v9  ;;  %v17235_v21 = vcombine.high %v1688_v18, %v1692_v35  ;;  %v1740_v30 = vld [vmem:[%s19721_s14 + $0x2278] sm:$0xff] }
 0x62c   : > { %12466 = vmatprep.subr.bf16.mxu0 %v17185_v32  ;;  %13040 = vmatprep.subr.bf16.mxu1 %v17187_v22  ;;  %v1695_v32 = vld [vmem:[%s19721_s14 + $0x2110] sm:$0xff] }
 0x62d   : > { %v1699_v22 = vld [vmem:[%s19721_s14 + $0x2130] sm:$0xff] }
 0x62e   : > { %v17241_v14 = vcombine.high %v1695_v32, %v1699_v22  ;;  %v17240_v38 = vcombine.low %v1695_v32, %v1699_v22  ;;  %v1748_v32 = vld [vmem:[%s19721_s14 + $0x22b8] sm:$0xff] }
 0x62f   : > { %12467 = vmatpush1.bf16.msra.mxu0 %v17184_v42  ;;  %13041 = vmatpush1.bf16.msra.mxu1 %v17186_v37  ;;  %v17243_v42 = vcombine.high %v1696_v25, %v1700_v40  ;;  %v1703_v37 = vld [vmem:[%s19721_s14 + $0x2150] sm:$0xff] }
 0x630   : > { %12468 = vmatprep.subr.bf16.mxu0 %v17193_v4  ;;  %13042 = vmatprep.subr.bf16.mxu1 %v17195_v36  ;;  %v1707_v4 = vld [vmem:[%s19721_s14 + $0x2170] sm:$0xff]  ;;  %v1704_v36 = vld [vmem:[%s19721_s14 + $0x2158] sm:$0xff] }
 0x631   : > { %v17249_v10 = vcombine.high %v1703_v37, %v1707_v4  ;;  %v17248_v6 = vcombine.low %v1703_v37, %v1707_v4  ;;  %v17250_v44 = vcombine.low %v1704_v36, %v1708_v63  ;;  %v1756_v37 = vld [vmem:[%s19721_s14 + $0x22f8] sm:$0xff] }
 0x633   : > { %12469 = vmatpush1.bf16.msra.mxu0 %v17192_v56  ;;  %13043 = vmatpush1.bf16.msra.mxu1 %v17194_v52  ;;  %v17251_v56 = vcombine.high %v1704_v36, %v1708_v63  ;;  %v1711_v52 = vld [vmem:[%s19721_s14 + $0x2190] sm:$0xff] }
 0x634   : > { %12470 = vmatprep.subr.bf16.mxu0 %v17201_v27  ;;  %13044 = vmatprep.subr.bf16.mxu1 %v17203_v50  ;;  %v1715_v27 = vld [vmem:[%s19721_s14 + $0x21b0] sm:$0xff]  ;;  %v1712_v50 = vld [vmem:[%s19721_s14 + $0x2198] sm:$0xff] }
 0x635   : > { %v17257_v46 = vcombine.high %v1711_v52, %v1715_v27  ;;  %v17256_v24 = vcombine.low %v1711_v52, %v1715_v27  ;;  %v17258_v13 = vcombine.low %v1712_v50, %v1716_v3  ;;  %v1764_v52 = vld [vmem:[%s19721_s14 + $0x2338] sm:$0xff] }
 0x637   : > { %12471 = vmatpush1.bf16.msra.mxu0 %v17200_v47  ;;  %13045 = vmatpush1.bf16.msra.mxu1 %v17202_v48  ;;  %v17259_v47 = vcombine.high %v1712_v50, %v1716_v3  ;;  %v1719_v48 = vld [vmem:[%s19721_s14 + $0x21d0] sm:$0xff] }
 0x638   : > { %12481 = vmatprep.subr.bf16.mxu0 %v17209_v53  ;;  %13055 = vmatprep.subr.bf16.mxu1 %v17211_v39  ;;  %v1723_v53 = vld [vmem:[%s19721_s14 + $0x21f0] sm:$0xff]  ;;  %v1720_v39 = vld [vmem:[%s19721_s14 + $0x21d8] sm:$0xff] }
 0x639   : > { %v17265_v58 = vcombine.high %v1719_v48, %v1723_v53  ;;  %v17266_v57 = vcombine.low %v1720_v39, %v1724_v11 }
 0x63a   : > { %12473 = vmatmul.mubr.bf16.vlgmr.msra.gmra.mrb[4].mxu0 %v20419_v16  ;;  %13047 = vmatmul.mubr.bf16.vlgmr.msra.gmra.mrb[4].mxu1 %v20419_v16  ;;  %v17224_v16 = vcombine.low %v1679_v2, %v1683_v5  ;;  %v1732_v2 = vld [vmem:[%s19721_s14 + $0x2238] sm:$0xff]  ;;  %v17264_v5 = vcombine.low %v1719_v48, %v1723_v53 }
 0x63b   : > { %12482 = vmatpush1.bf16.msra.mxu0 %v17208_v12  ;;  %13056 = vmatpush1.bf16.msra.mxu1 %v17210_v41  ;;  %v17267_v12 = vcombine.high %v1720_v39, %v1724_v11  ;;  %v1727_v41 = vld [vmem:[%s19721_s14 + $0x2210] sm:$0xff]  ;;  %v1772_v48 = vld [vmem:[%s19721_s14 + $0x2378] sm:$0xff] }
 0x63c   : > { %12483 = vmatprep.subr.bf16.mxu0 %v17217_v62  ;;  %13057 = vmatprep.subr.bf16.mxu1 %v17219_v26  ;;  %v1731_v62 = vld [vmem:[%s19721_s14 + $0x2230] sm:$0xff]  ;;  %v1728_v26 = vld [vmem:[%s19721_s14 + $0x2218] sm:$0xff] }
 0x63d   : > { %12513 = vmatprep.mubr.bf16.mxu0 %v20425_v33  ;;  %13087 = vmatprep.mubr.bf16.mxu1 %v20425_v33  ;;  %v17234_v33 = vcombine.low %v1688_v18, %v1692_v35  ;;  %v17273_v7 = vcombine.high %v1727_v41, %v1731_v62  ;;  %v17272_v9 = vcombine.low %v1727_v41, %v1731_v62  ;;  %v1780_v41 = vld [vmem:[%s19721_s14 + $0x23b8] sm:$0xff] }
 0x63e   : > { %v17274_v18 = vcombine.low %v1728_v26, %v1732_v2 }
 0x63f   : > { %12484 = vmatpush1.bf16.msra.mxu0 %v17216_v8  ;;  %13058 = vmatpush1.bf16.msra.mxu1 %v17218_v1  ;;  %v17275_v8 = vcombine.high %v1728_v26, %v1732_v2  ;;  %v1735_v1 = vld [vmem:[%s19721_s14 + $0x2250] sm:$0xff] }
 0x640   : > { %12485 = vmatprep.subr.bf16.mxu0 %v17225_v17  ;;  %13059 = vmatprep.subr.bf16.mxu1 %v17227_v59  ;;  %v1739_v17 = vld [vmem:[%s19721_s14 + $0x2270] sm:$0xff]  ;;  %v1736_v59 = vld [vmem:[%s19721_s14 + $0x2258] sm:$0xff] }
 0x641   : > { %v17281_v35 = vcombine.high %v1735_v1, %v1739_v17  ;;  %v17280_v22 = vcombine.low %v1735_v1, %v1739_v17  ;;  %v17282_v25 = vcombine.low %v1736_v59, %v1740_v30  ;;  %v1788_v1 = vld [vmem:[%s19721_s14 + $0x23f8] sm:$0xff] }
 0x643   : > { %12486 = vmatpush1.bf16.msra.mxu0 %v17224_v16  ;;  %13060 = vmatpush1.bf16.msra.mxu1 %v17226_v15  ;;  %v17283_v16 = vcombine.high %v1736_v59, %v1740_v30  ;;  %v1743_v15 = vld [vmem:[%s19721_s14 + $0x2290] sm:$0xff] }
 0x644   : > { %12487 = vmatprep.subr.bf16.mxu0 %v17233_v60  ;;  %13061 = vmatprep.subr.bf16.mxu1 %v17235_v21  ;;  %v1747_v60 = vld [vmem:[%s19721_s14 + $0x22b0] sm:$0xff]  ;;  %v1744_v21 = vld [vmem:[%s19721_s14 + $0x2298] sm:$0xff] }
 0x645   : > { %v17289_v40 = vcombine.high %v1743_v15, %v1747_v60  ;;  %v17288_v4 = vcombine.low %v1743_v15, %v1747_v60  ;;  %v17290_v36 = vcombine.low %v1744_v21, %v1748_v32  ;;  %v1796_v15 = vld [vmem:[%s19721_s14 + $0x2438] sm:$0xff] }
 0x647   : > { %12488 = vmatpush1.bf16.msra.mxu0 %v17232_v28  ;;  %13062 = vmatpush1.bf16.msra.mxu1 %v17234_v33  ;;  %v17291_v28 = vcombine.high %v1744_v21, %v1748_v32  ;;  %v1751_v33 = vld [vmem:[%s19721_s14 + $0x22d0] sm:$0xff] }
 0x648   : > { %12489 = vmatprep.subr.bf16.mxu0 %v17241_v14  ;;  %13063 = vmatprep.subr.bf16.mxu1 %v17243_v42  ;;  %v1755_v14 = vld [vmem:[%s19721_s14 + $0x22f0] sm:$0xff]  ;;  %v1752_v42 = vld [vmem:[%s19721_s14 + $0x22d8] sm:$0xff] }
 0x649   : > { %v17297_v63 = vcombine.high %v1751_v33, %v1755_v14  ;;  %v17296_v27 = vcombine.low %v1751_v33, %v1755_v14  ;;  %v17298_v50 = vcombine.low %v1752_v42, %v1756_v37  ;;  %v1804_v33 = vld [vmem:[%s19721_s14 + $0x2478] sm:$0xff] }
 0x64b   : > { %12490 = vmatpush1.bf16.msra.mxu0 %v17240_v38  ;;  %13064 = vmatpush1.bf16.msra.mxu1 %v17242_v29  ;;  %v17299_v38 = vcombine.high %v1752_v42, %v1756_v37  ;;  %v1759_v29 = vld [vmem:[%s19721_s14 + $0x2310] sm:$0xff] }
 0x64c   : > { %12491 = vmatprep.subr.bf16.mxu0 %v17249_v10  ;;  %13065 = vmatprep.subr.bf16.mxu1 %v17251_v56  ;;  %v1763_v10 = vld [vmem:[%s19721_s14 + $0x2330] sm:$0xff]  ;;  %v1760_v56 = vld [vmem:[%s19721_s14 + $0x2318] sm:$0xff] }
 0x64d   : > { %v17305_v3 = vcombine.high %v1759_v29, %v1763_v10  ;;  %v17304_v53 = vcombine.low %v1759_v29, %v1763_v10  ;;  %v17306_v39 = vcombine.low %v1760_v56, %v1764_v52  ;;  %v1812_v29 = vld [vmem:[%s19721_s14 + $0x24b8] sm:$0xff] }
 0x64f   : > { %12492 = vmatpush1.bf16.msra.mxu0 %v17248_v6  ;;  %13066 = vmatpush1.bf16.msra.mxu1 %v17250_v44  ;;  %v17307_v6 = vcombine.high %v1760_v56, %v1764_v52  ;;  %v1767_v44 = vld [vmem:[%s19721_s14 + $0x2350] sm:$0xff] }
 0x650   : > { %12493 = vmatprep.subr.bf16.mxu0 %v17257_v46  ;;  %13067 = vmatprep.subr.bf16.mxu1 %v17259_v47  ;;  %v1771_v46 = vld [vmem:[%s19721_s14 + $0x2370] sm:$0xff]  ;;  %v1768_v47 = vld [vmem:[%s19721_s14 + $0x2358] sm:$0xff] }
 0x651   : > { %v17313_v11 = vcombine.high %v1767_v44, %v1771_v46  ;;  %v17312_v62 = vcombine.low %v1767_v44, %v1771_v46  ;;  %v17314_v26 = vcombine.low %v1768_v47, %v1772_v48  ;;  %v1820_v44 = vld [vmem:[%s19721_s14 + $0x24f8] sm:$0xff] }
 0x653   : > { %12494 = vmatpush1.bf16.msra.mxu0 %v17256_v24  ;;  %13068 = vmatpush1.bf16.msra.mxu1 %v17258_v13  ;;  %v17315_v24 = vcombine.high %v1768_v47, %v1772_v48  ;;  %v1775_v13 = vld [vmem:[%s19721_s14 + $0x2390] sm:$0xff] }
 0x654   : > { %12495 = vmatprep.subr.bf16.mxu0 %v17265_v58  ;;  %13069 = vmatprep.subr.bf16.mxu1 %v17267_v12  ;;  %v1779_v58 = vld [vmem:[%s19721_s14 + $0x23b0] sm:$0xff]  ;;  %v1776_v12 = vld [vmem:[%s19721_s14 + $0x2398] sm:$0xff] }
 0x655   : > { %v17321_v2 = vcombine.high %v1775_v13, %v1779_v58  ;;  %v17320_v17 = vcombine.low %v1775_v13, %v1779_v58  ;;  %v17322_v59 = vcombine.low %v1776_v12, %v1780_v41 }
 0x657   : > { %12496 = vmatpush1.bf16.msra.mxu0 %v17264_v5  ;;  %13070 = vmatpush1.bf16.msra.mxu1 %v17266_v57  ;;  %v17323_v5 = vcombine.high %v1776_v12, %v1780_v41  ;;  %v1783_v57 = vld [vmem:[%s19721_s14 + $0x23d0] sm:$0xff] }
 0x658   : > { %12497 = vmatprep.subr.bf16.mxu0 %v17273_v7  ;;  %13071 = vmatprep.subr.bf16.mxu1 %v17275_v8  ;;  %v1787_v7 = vld [vmem:[%s19721_s14 + $0x23f0] sm:$0xff]  ;;  %v1784_v8 = vld [vmem:[%s19721_s14 + $0x23d8] sm:$0xff] }
 0x659   : > { %v17329_v30 = vcombine.high %v1783_v57, %v1787_v7  ;;  %v17328_v60 = vcombine.low %v1783_v57, %v1787_v7  ;;  %v17330_v21 = vcombine.low %v1784_v8, %v1788_v1  ;;  %v1831_v41 = vld [vmem:[%s19721_s14 + $0x2550] sm:$0xff] }
 0x65b   : > { %12498 = vmatpush1.bf16.msra.mxu0 %v17272_v9  ;;  %13072 = vmatpush1.bf16.msra.mxu1 %v17274_v18  ;;  %v17331_v9 = vcombine.high %v1784_v8, %v1788_v1  ;;  %v1791_v18 = vld [vmem:[%s19721_s14 + $0x2410] sm:$0xff] }
 0x65c   : > { %12499 = vmatprep.subr.bf16.mxu0 %v17281_v35  ;;  %13073 = vmatprep.subr.bf16.mxu1 %v17283_v16  ;;  %v1795_v35 = vld [vmem:[%s19721_s14 + $0x2430] sm:$0xff]  ;;  %v1792_v16 = vld [vmem:[%s19721_s14 + $0x2418] sm:$0xff] }
 0x65d   : > { %v17337_v32 = vcombine.high %v1791_v18, %v1795_v35  ;;  %v17336_v14 = vcombine.low %v1791_v18, %v1795_v35  ;;  %v17338_v42 = vcombine.low %v1792_v16, %v1796_v15  ;;  %v1839_v1 = vld [vmem:[%s19721_s14 + $0x2590] sm:$0xff] }
 0x65f   : > { %12500 = vmatpush1.bf16.msra.mxu0 %v17280_v22  ;;  %13074 = vmatpush1.bf16.msra.mxu1 %v17282_v25  ;;  %v17339_v22 = vcombine.high %v1792_v16, %v1796_v15  ;;  %v1799_v25 = vld [vmem:[%s19721_s14 + $0x2450] sm:$0xff] }
 0x660   : > { %12501 = vmatprep.subr.bf16.mxu0 %v17289_v40  ;;  %13075 = vmatprep.subr.bf16.mxu1 %v17291_v28  ;;  %v1803_v40 = vld [vmem:[%s19721_s14 + $0x2470] sm:$0xff]  ;;  %v1800_v28 = vld [vmem:[%s19721_s14 + $0x2458] sm:$0xff] }
 0x661   : > { %v17345_v37 = vcombine.high %v1799_v25, %v1803_v40  ;;  %v17344_v10 = vcombine.low %v1799_v25, %v1803_v40  ;;  %v17346_v56 = vcombine.low %v1800_v28, %v1804_v33  ;;  %v1847_v15 = vld [vmem:[%s19721_s14 + $0x25d0] sm:$0xff] }
 0x663   : > { %12502 = vmatpush1.bf16.msra.mxu0 %v17288_v4  ;;  %13076 = vmatpush1.bf16.msra.mxu1 %v17290_v36  ;;  %v17347_v4 = vcombine.high %v1800_v28, %v1804_v33  ;;  %v1807_v36 = vld [vmem:[%s19721_s14 + $0x2490] sm:$0xff] }
 0x664   : > { %12503 = vmatprep.subr.bf16.mxu0 %v17297_v63  ;;  %13077 = vmatprep.subr.bf16.mxu1 %v17299_v38  ;;  %v1811_v63 = vld [vmem:[%s19721_s14 + $0x24b0] sm:$0xff]  ;;  %v1808_v38 = vld [vmem:[%s19721_s14 + $0x2498] sm:$0xff] }
 0x665   : > { %v17353_v52 = vcombine.high %v1807_v36, %v1811_v63  ;;  %v17354_v46 = vcombine.low %v1808_v38, %v1812_v29  ;;  %v1855_v33 = vld [vmem:[%s19721_s14 + $0x2610] sm:$0xff] }
 0x667   : > { %12504 = vmatpush1.bf16.msra.mxu0 %v17296_v27  ;;  %13078 = vmatpush1.bf16.msra.mxu1 %v17298_v50  ;;  %v17355_v27 = vcombine.high %v1808_v38, %v1812_v29  ;;  %v1815_v50 = vld [vmem:[%s19721_s14 + $0x24d0] sm:$0xff] }
 0x668   : > { %12505 = vmatprep.subr.bf16.mxu0 %v17305_v3  ;;  %13079 = vmatprep.subr.bf16.mxu1 %v17307_v6  ;;  %v1819_v3 = vld [vmem:[%s19721_s14 + $0x24f0] sm:$0xff]  ;;  %v1816_v6 = vld [vmem:[%s19721_s14 + $0x24d8] sm:$0xff] }
 0x669   : > { %v17361_v47 = vcombine.high %v1815_v50, %v1819_v3  ;;  %v17363_v48 = vcombine.high %v1816_v6, %v1820_v44  ;;  %v17360_v13 = vcombine.low %v1815_v50, %v1819_v3  ;;  %v1863_v29 = vld [vmem:[%s19721_s14 + $0x2650] sm:$0xff] }
 0x66b   : > { %12506 = vmatpush1.bf16.msra.mxu0 %v17304_v53  ;;  %13080 = vmatpush1.bf16.msra.mxu1 %v17306_v39  ;;  %v1823_v53 = vld [vmem:[%s19721_s14 + $0x2510] sm:$0xff] }
 0x66c   : > { %12507 = vmatprep.subr.bf16.mxu0 %v17313_v11  ;;  %13081 = vmatprep.subr.bf16.mxu1 %v17315_v24  ;;  %v1827_v39 = vld [vmem:[%s19721_s14 + $0x2530] sm:$0xff]  ;;  %v1824_v11 = vld [vmem:[%s19721_s14 + $0x2518] sm:$0xff] }
 0x66d   : > { %v1828_v24 = vld [vmem:[%s19721_s14 + $0x2538] sm:$0xff]  ;;  %v17369_v58 = vcombine.high %v1823_v53, %v1827_v39 }
 0x66e   : > { %v17371_v12 = vcombine.high %v1824_v11, %v1828_v24  ;;  %v17370_v57 = vcombine.low %v1824_v11, %v1828_v24  ;;  %v1879_v24 = vld [vmem:[%s19721_s14 + $0x26d0] sm:$0xff] }
 0x66f   : > { %12508 = vmatpush1.bf16.msra.mxu0 %v17312_v62  ;;  %13082 = vmatpush1.bf16.msra.mxu1 %v17314_v26  ;;  %v1835_v62 = vld [vmem:[%s19721_s14 + $0x2570] sm:$0xff]  ;;  %v1832_v26 = vld [vmem:[%s19721_s14 + $0x2558] sm:$0xff] }
 0x670   : > { %12509 = vmatprep.subr.bf16.mxu0 %v17321_v2  ;;  %13083 = vmatprep.subr.bf16.mxu1 %v17323_v5  ;;  %v1836_v2 = vld [vmem:[%s19721_s14 + $0x2578] sm:$0xff]  ;;  %v17368_v5 = vcombine.low %v1823_v53, %v1827_v39  ;;  %v17377_v7 = vcombine.high %v1831_v41, %v1835_v62 }
 0x671   : > { %v17379_v8 = vcombine.high %v1832_v26, %v1836_v2  ;;  %v17378_v18 = vcombine.low %v1832_v26, %v1836_v2  ;;  %v1887_v2 = vld [vmem:[%s19721_s14 + $0x2710] sm:$0xff] }
 0x673   : > { %12510 = vmatpush1.bf16.msra.mxu0 %v17320_v17  ;;  %13084 = vmatpush1.bf16.msra.mxu1 %v17322_v59  ;;  %v1843_v17 = vld [vmem:[%s19721_s14 + $0x25b0] sm:$0xff]  ;;  %v1840_v59 = vld [vmem:[%s19721_s14 + $0x2598] sm:$0xff] }
 0x674   : > { %12511 = vmatprep.subr.bf16.mxu0 %v17329_v30  ;;  %13085 = vmatprep.subr.bf16.mxu1 %v17331_v9  ;;  %v1844_v30 = vld [vmem:[%s19721_s14 + $0x25b8] sm:$0xff]  ;;  %v17376_v9 = vcombine.low %v1831_v41, %v1835_v62  ;;  %v17385_v35 = vcombine.high %v1839_v1, %v1843_v17 }
 0x675   : > { %v17387_v16 = vcombine.high %v1840_v59, %v1844_v30  ;;  %v17386_v25 = vcombine.low %v1840_v59, %v1844_v30  ;;  %v1895_v30 = vld [vmem:[%s19721_s14 + $0x2750] sm:$0xff] }
 0x677   : > { %12512 = vmatpush1.bf16.msra.mxu0 %v17328_v60  ;;  %13086 = vmatpush1.bf16.msra.mxu1 %v17330_v21  ;;  %v1851_v60 = vld [vmem:[%s19721_s14 + $0x25f0] sm:$0xff]  ;;  %v1848_v21 = vld [vmem:[%s19721_s14 + $0x25d8] sm:$0xff] }
 0x678   : > { %12522 = vmatprep.subr.bf16.mxu0 %v17337_v32  ;;  %13096 = vmatprep.subr.bf16.mxu1 %v17339_v22  ;;  %v1852_v32 = vld [vmem:[%s19721_s14 + $0x25f8] sm:$0xff]  ;;  %v17384_v22 = vcombine.low %v1839_v1, %v1843_v17  ;;  %v17393_v40 = vcombine.high %v1847_v15, %v1851_v60 }
 0x679   : > { %v17395_v28 = vcombine.high %v1848_v21, %v1852_v32 }
 0x67a   : > { %12514 = vmatmul.mubr.bf16.vlgmr.msra.gmra.mrb[4].mxu0 %v20500_v19  ;;  %13088 = vmatmul.mubr.bf16.vlgmr.msra.gmra.mrb[4].mxu1 %v20500_v19  ;;  %v17352_v19 = vcombine.low %v1807_v36, %v1811_v63  ;;  %v17394_v36 = vcombine.low %v1848_v21, %v1852_v32  ;;  %v1903_v32 = vld [vmem:[%s19721_s14 + $0x2790] sm:$0xff] }
 0x67b   : > { %12523 = vmatpush1.bf16.msra.mxu0 %v17336_v14  ;;  %13097 = vmatpush1.bf16.msra.mxu1 %v17338_v42  ;;  %v1859_v14 = vld [vmem:[%s19721_s14 + $0x2630] sm:$0xff]  ;;  %v1856_v42 = vld [vmem:[%s19721_s14 + $0x2618] sm:$0xff] }
 0x67c   : > { %12524 = vmatprep.subr.bf16.mxu0 %v17345_v37  ;;  %13098 = vmatprep.subr.bf16.mxu1 %v17347_v4  ;;  %v1860_v37 = vld [vmem:[%s19721_s14 + $0x2638] sm:$0xff]  ;;  %v17392_v4 = vcombine.low %v1847_v15, %v1851_v60  ;;  %v17401_v63 = vcombine.high %v1855_v33, %v1859_v14 }
 0x67d   : > { %12554 = vmatprep.mubr.bf16.mxu0 %v20506_v0  ;;  %13128 = vmatprep.mubr.bf16.mxu1 %v20506_v0  ;;  %v17362_v0 = vcombine.low %v1816_v6, %v1820_v44  ;;  %v17403_v38 = vcombine.high %v1856_v42, %v1860_v37  ;;  %v17402_v50 = vcombine.low %v1856_v42, %v1860_v37  ;;  %v1871_v44 = vld [vmem:[%s19721_s14 + $0x2690] sm:$0xff] }
 0x67e   : > { %v1911_v37 = vld [vmem:[%s19721_s14 + $0x27d0] sm:$0xff] }
 0x67f   : > { %12525 = vmatpush1.bf16.msra.mxu0 %v17344_v10  ;;  %13099 = vmatpush1.bf16.msra.mxu1 %v17346_v56  ;;  %v1867_v10 = vld [vmem:[%s19721_s14 + $0x2670] sm:$0xff]  ;;  %v1864_v56 = vld [vmem:[%s19721_s14 + $0x2658] sm:$0xff] }
 0x680   : > { %12526 = vmatprep.subr.bf16.mxu0 %v17353_v52  ;;  %13100 = vmatprep.subr.bf16.mxu1 %v17355_v27  ;;  %v1868_v52 = vld [vmem:[%s19721_s14 + $0x2678] sm:$0xff]  ;;  %v17400_v27 = vcombine.low %v1855_v33, %v1859_v14  ;;  %v17409_v3 = vcombine.high %v1863_v29, %v1867_v10 }
 0x681   : > { %v17411_v6 = vcombine.high %v1864_v56, %v1868_v52  ;;  %v17410_v53 = vcombine.low %v1864_v56, %v1868_v52  ;;  %v1919_v52 = vld [vmem:[%s19721_s14 + $0x2810] sm:$0xff] }
 0x683   : > { %12527 = vmatpush1.bf16.msra.mxu0 %v17352_v19  ;;  %13101 = vmatpush1.bf16.msra.mxu1 %v17354_v46  ;;  %v1875_v19 = vld [vmem:[%s19721_s14 + $0x26b0] sm:$0xff]  ;;  %v1872_v46 = vld [vmem:[%s19721_s14 + $0x2698] sm:$0xff] }
 0x684   : > { %12528 = vmatprep.subr.bf16.mxu0 %v17361_v47  ;;  %13102 = vmatprep.subr.bf16.mxu1 %v17363_v48  ;;  %v1876_v47 = vld [vmem:[%s19721_s14 + $0x26b8] sm:$0xff]  ;;  %v17408_v48 = vcombine.low %v1863_v29, %v1867_v10  ;;  %v17417_v39 = vcombine.high %v1871_v44, %v1875_v19 }
 0x685   : > { %v17419_v11 = vcombine.high %v1872_v46, %v1876_v47  ;;  %v17418_v41 = vcombine.low %v1872_v46, %v1876_v47  ;;  %v1927_v47 = vld [vmem:[%s19721_s14 + $0x2850] sm:$0xff] }
 0x687   : > { %12529 = vmatpush1.bf16.msra.mxu0 %v17360_v13  ;;  %13103 = vmatpush1.bf16.msra.mxu1 %v17362_v0  ;;  %v1883_v13 = vld [vmem:[%s19721_s14 + $0x26f0] sm:$0xff]  ;;  %v1880_v0 = vld [vmem:[%s19721_s14 + $0x26d8] sm:$0xff] }
 0x688   : > { %12530 = vmatprep.subr.bf16.mxu0 %v17369_v58  ;;  %13104 = vmatprep.subr.bf16.mxu1 %v17371_v12  ;;  %v1884_v58 = vld [vmem:[%s19721_s14 + $0x26f8] sm:$0xff]  ;;  %v17416_v12 = vcombine.low %v1871_v44, %v1875_v19  ;;  %v17425_v62 = vcombine.high %v1879_v24, %v1883_v13 }
 0x689   : > { %v17427_v26 = vcombine.high %v1880_v0, %v1884_v58  ;;  %v17426_v1 = vcombine.low %v1880_v0, %v1884_v58  ;;  %v1935_v58 = vld [vmem:[%s19721_s14 + $0x2890] sm:$0xff] }
 0x68b   : > { %12531 = vmatpush1.bf16.msra.mxu0 %v17368_v5  ;;  %13105 = vmatpush1.bf16.msra.mxu1 %v17370_v57  ;;  %v1891_v5 = vld [vmem:[%s19721_s14 + $0x2730] sm:$0xff]  ;;  %v1888_v57 = vld [vmem:[%s19721_s14 + $0x2718] sm:$0xff] }
 0x68c   : > { %12532 = vmatprep.subr.bf16.mxu0 %v17377_v7  ;;  %13106 = vmatprep.subr.bf16.mxu1 %v17379_v8  ;;  %v1892_v7 = vld [vmem:[%s19721_s14 + $0x2738] sm:$0xff]  ;;  %v17424_v8 = vcombine.low %v1879_v24, %v1883_v13  ;;  %v17433_v17 = vcombine.high %v1887_v2, %v1891_v5 }
 0x68d   : > { %v17435_v59 = vcombine.high %v1888_v57, %v1892_v7  ;;  %v17434_v15 = vcombine.low %v1888_v57, %v1892_v7  ;;  %v1943_v7 = vld [vmem:[%s19721_s14 + $0x28d0] sm:$0xff] }
 0x68f   : > { %12533 = vmatpush1.bf16.msra.mxu0 %v17376_v9  ;;  %13107 = vmatpush1.bf16.msra.mxu1 %v17378_v18  ;;  %v1899_v9 = vld [vmem:[%s19721_s14 + $0x2770] sm:$0xff]  ;;  %v1896_v18 = vld [vmem:[%s19721_s14 + $0x2758] sm:$0xff] }
 0x690   : > { %12534 = vmatprep.subr.bf16.mxu0 %v17385_v35  ;;  %13108 = vmatprep.subr.bf16.mxu1 %v17387_v16  ;;  %v1900_v35 = vld [vmem:[%s19721_s14 + $0x2778] sm:$0xff]  ;;  %v17432_v16 = vcombine.low %v1887_v2, %v1891_v5  ;;  %v17441_v60 = vcombine.high %v1895_v30, %v1899_v9 }
 0x691   : > { %v17443_v21 = vcombine.high %v1896_v18, %v1900_v35  ;;  %v17442_v33 = vcombine.low %v1896_v18, %v1900_v35  ;;  %v1951_v18 = vld [vmem:[%s19721_s14 + $0x2910] sm:$0xff] }
 0x692   : > { %v1955_v35 = vld [vmem:[%s19721_s14 + $0x2930] sm:$0xff] }
 0x693   : > { %12535 = vmatpush1.bf16.msra.mxu0 %v17384_v22  ;;  %13109 = vmatpush1.bf16.msra.mxu1 %v17386_v25  ;;  %v1907_v22 = vld [vmem:[%s19721_s14 + $0x27b0] sm:$0xff]  ;;  %v1904_v25 = vld [vmem:[%s19721_s14 + $0x2798] sm:$0xff] }
 0x694   : > { %12536 = vmatprep.subr.bf16.mxu0 %v17393_v40  ;;  %13110 = vmatprep.subr.bf16.mxu1 %v17395_v28  ;;  %v1908_v40 = vld [vmem:[%s19721_s14 + $0x27b8] sm:$0xff]  ;;  %v17440_v28 = vcombine.low %v1895_v30, %v1899_v9  ;;  %v17449_v14 = vcombine.high %v1903_v32, %v1907_v22 }
 0x695   : > { %v17451_v42 = vcombine.high %v1904_v25, %v1908_v40  ;;  %v17450_v29 = vcombine.low %v1904_v25, %v1908_v40  ;;  %v1963_v25 = vld [vmem:[%s19721_s14 + $0x2970] sm:$0xff]  ;;  %v1960_v40 = vld [vmem:[%s19721_s14 + $0x2958] sm:$0xff] }
 0x697   : > { %12537 = vmatpush1.bf16.msra.mxu0 %v17392_v4  ;;  %13111 = vmatpush1.bf16.msra.mxu1 %v17394_v36  ;;  %v1915_v4 = vld [vmem:[%s19721_s14 + $0x27f0] sm:$0xff]  ;;  %v1912_v36 = vld [vmem:[%s19721_s14 + $0x27d8] sm:$0xff] }
 0x698   : > { %12538 = vmatprep.subr.bf16.mxu0 %v17401_v63  ;;  %13112 = vmatprep.subr.bf16.mxu1 %v17403_v38  ;;  %v1916_v63 = vld [vmem:[%s19721_s14 + $0x27f8] sm:$0xff]  ;;  %v17448_v38 = vcombine.low %v1903_v32, %v1907_v22  ;;  %v17457_v10 = vcombine.high %v1911_v37, %v1915_v4  ;;  %v1959_v22 = vld [vmem:[%s19721_s14 + $0x2950] sm:$0xff] }
 0x699   : > { %v17459_v56 = vcombine.high %v1912_v36, %v1916_v63  ;;  %v17458_v44 = vcombine.low %v1912_v36, %v1916_v63  ;;  %v1971_v36 = vld [vmem:[%s19721_s14 + $0x29b0] sm:$0xff]  ;;  %v1968_v63 = vld [vmem:[%s19721_s14 + $0x2998] sm:$0xff] }
 0x69b   : > { %12539 = vmatpush1.bf16.msra.mxu0 %v17400_v27  ;;  %13113 = vmatpush1.bf16.msra.mxu1 %v17402_v50  ;;  %v1923_v27 = vld [vmem:[%s19721_s14 + $0x2830] sm:$0xff]  ;;  %v1920_v50 = vld [vmem:[%s19721_s14 + $0x2818] sm:$0xff] }
 0x69c   : > { %12540 = vmatprep.subr.bf16.mxu0 %v17409_v3  ;;  %13114 = vmatprep.subr.bf16.mxu1 %v17411_v6  ;;  %v1924_v3 = vld [vmem:[%s19721_s14 + $0x2838] sm:$0xff]  ;;  %v17456_v6 = vcombine.low %v1911_v37, %v1915_v4  ;;  %v17465_v19 = vcombine.high %v1919_v52, %v1923_v27  ;;  %v1967_v4 = vld [vmem:[%s19721_s14 + $0x2990] sm:$0xff] }
 0x69d   : > { %v17467_v46 = vcombine.high %v1920_v50, %v1924_v3  ;;  %v17466_v24 = vcombine.low %v1920_v50, %v1924_v3  ;;  %v1979_v50 = vld [vmem:[%s19721_s14 + $0x29f0] sm:$0xff]  ;;  %v1976_v3 = vld [vmem:[%s19721_s14 + $0x29d8] sm:$0xff] }
 0x69f   : > { %12541 = vmatpush1.bf16.msra.mxu0 %v17408_v48  ;;  %13115 = vmatpush1.bf16.msra.mxu1 %v17410_v53  ;;  %v1931_v48 = vld [vmem:[%s19721_s14 + $0x2870] sm:$0xff]  ;;  %v1928_v53 = vld [vmem:[%s19721_s14 + $0x2858] sm:$0xff] }
 0x6a0   : > { %12542 = vmatprep.subr.bf16.mxu0 %v17417_v39  ;;  %13116 = vmatprep.subr.bf16.mxu1 %v17419_v11  ;;  %v1932_v39 = vld [vmem:[%s19721_s14 + $0x2878] sm:$0xff]  ;;  %v17464_v11 = vcombine.low %v1919_v52, %v1923_v27  ;;  %v17473_v13 = vcombine.high %v1927_v47, %v1931_v48  ;;  %v1975_v27 = vld [vmem:[%s19721_s14 + $0x29d0] sm:$0xff] }
 0x6a1   : > { %v17475_v0 = vcombine.high %v1928_v53, %v1932_v39  ;;  %v17474_v2 = vcombine.low %v1928_v53, %v1932_v39  ;;  %v1987_v53 = vld [vmem:[%s19721_s14 + $0x2a30] sm:$0xff]  ;;  %v1984_v39 = vld [vmem:[%s19721_s14 + $0x2a18] sm:$0xff] }
 0x6a3   : > { %12543 = vmatpush1.bf16.msra.mxu0 %v17416_v12  ;;  %13117 = vmatpush1.bf16.msra.mxu1 %v17418_v41  ;;  %v1939_v12 = vld [vmem:[%s19721_s14 + $0x28b0] sm:$0xff]  ;;  %v1936_v41 = vld [vmem:[%s19721_s14 + $0x2898] sm:$0xff] }
 0x6a4   : > { %12544 = vmatprep.subr.bf16.mxu0 %v17425_v62  ;;  %13118 = vmatprep.subr.bf16.mxu1 %v17427_v26  ;;  %v1940_v62 = vld [vmem:[%s19721_s14 + $0x28b8] sm:$0xff]  ;;  %v17472_v26 = vcombine.low %v1927_v47, %v1931_v48  ;;  %v17481_v5 = vcombine.high %v1935_v58, %v1939_v12  ;;  %v1983_v48 = vld [vmem:[%s19721_s14 + $0x2a10] sm:$0xff] }
 0x6a5   : > { %v17483_v57 = vcombine.high %v1936_v41, %v1940_v62 }
 0x6a7   : > { %12545 = vmatpush1.bf16.msra.mxu0 %v17424_v8  ;;  %13119 = vmatpush1.bf16.msra.mxu1 %v17426_v1  ;;  %v1947_v8 = vld [vmem:[%s19721_s14 + $0x28f0] sm:$0xff]  ;;  %v1944_v1 = vld [vmem:[%s19721_s14 + $0x28d8] sm:$0xff] }
 0x6a8   : > { %12546 = vmatprep.subr.bf16.mxu0 %v17433_v17  ;;  %13120 = vmatprep.subr.bf16.mxu1 %v17435_v59  ;;  %v1948_v17 = vld [vmem:[%s19721_s14 + $0x28f8] sm:$0xff]  ;;  %v17482_v59 = vcombine.low %v1936_v41, %v1940_v62  ;;  %v17489_v30 = vcombine.high %v1943_v7, %v1947_v8  ;;  %v1995_v41 = vld [vmem:[%s19721_s14 + $0x2a70] sm:$0xff] }
 0x6a9   : > { %v17491_v9 = vcombine.high %v1944_v1, %v1948_v17  ;;  %v1992_v62 = vld [vmem:[%s19721_s14 + $0x2a58] sm:$0xff] }
 0x6ab   : > { %12547 = vmatpush1.bf16.msra.mxu0 %v17432_v16  ;;  %13121 = vmatpush1.bf16.msra.mxu1 %v17434_v15  ;;  %v1952_v16 = vld [vmem:[%s19721_s14 + $0x2918] sm:$0xff] }
 0x6ac   : > { %12548 = vmatprep.subr.bf16.mxu0 %v17441_v60  ;;  %13122 = vmatprep.subr.bf16.mxu1 %v17443_v21  ;;  %v1956_v15 = vld [vmem:[%s19721_s14 + $0x2938] sm:$0xff]  ;;  %v17488_v60 = vcombine.low %v1943_v7, %v1947_v8  ;;  %v17497_v21 = vcombine.high %v1951_v18, %v1955_v35  ;;  %v1999_v8 = vld [vmem:[%s19721_s14 + $0x2a90] sm:$0xff] }
 0x6ad   : > { %v17499_v32 = vcombine.high %v1952_v16, %v1956_v15 }
 0x6af   : > { %12549 = vmatpush1.bf16.msra.mxu0 %v17440_v28  ;;  %13123 = vmatpush1.bf16.msra.mxu1 %v17442_v33  ;;  %v1964_v28 = vld [vmem:[%s19721_s14 + $0x2978] sm:$0xff]  ;;  %v17496_v33 = vcombine.low %v1951_v18, %v1955_v35  ;;  %v2007_v35 = vld [vmem:[%s19721_s14 + $0x2ad0] sm:$0xff] }
 0x6b0   : > { %12550 = vmatprep.subr.bf16.mxu0 %v17449_v14  ;;  %13124 = vmatprep.subr.bf16.mxu1 %v17451_v42  ;;  %v17498_v14 = vcombine.low %v1952_v16, %v1956_v15  ;;  %v17505_v42 = vcombine.high %v1959_v22, %v1963_v25  ;;  %v17507_v37 = vcombine.high %v1960_v40, %v1964_v28  ;;  %v2011_v16 = vld [vmem:[%s19721_s14 + $0x2af0] sm:$0xff]  ;;  %v2008_v15 = vld [vmem:[%s19721_s14 + $0x2ad8] sm:$0xff] }
 0x6b3   : > { %12551 = vmatpush1.bf16.msra.mxu0 %v17448_v38  ;;  %13125 = vmatpush1.bf16.msra.mxu1 %v17450_v29  ;;  %v1972_v38 = vld [vmem:[%s19721_s14 + $0x29b8] sm:$0xff]  ;;  %v17504_v29 = vcombine.low %v1959_v22, %v1963_v25  ;;  %v2015_v25 = vld [vmem:[%s19721_s14 + $0x2b10] sm:$0xff] }
 0x6b4   : > { %12552 = vmatprep.subr.bf16.mxu0 %v17457_v10  ;;  %13126 = vmatprep.subr.bf16.mxu1 %v17459_v56  ;;  %v17506_v10 = vcombine.low %v1960_v40, %v1964_v28  ;;  %v17513_v56 = vcombine.high %v1967_v4, %v1971_v36  ;;  %v17515_v52 = vcombine.high %v1968_v63, %v1972_v38  ;;  %v2019_v40 = vld [vmem:[%s19721_s14 + $0x2b30] sm:$0xff]  ;;  %v2016_v28 = vld [vmem:[%s19721_s14 + $0x2b18] sm:$0xff] }
 0x6b7   : > { %12553 = vmatpush1.bf16.msra.mxu0 %v17456_v6  ;;  %13127 = vmatpush1.bf16.msra.mxu1 %v17458_v44  ;;  %v1980_v6 = vld [vmem:[%s19721_s14 + $0x29f8] sm:$0xff]  ;;  %v17512_v44 = vcombine.low %v1967_v4, %v1971_v36  ;;  %v2023_v36 = vld [vmem:[%s19721_s14 + $0x2b50] sm:$0xff] }
 0x6b8   : > { %12563 = vmatprep.subr.bf16.mxu0 %v17465_v19  ;;  %13137 = vmatprep.subr.bf16.mxu1 %v17467_v46  ;;  %v17514_v19 = vcombine.low %v1968_v63, %v1972_v38  ;;  %v17521_v46 = vcombine.high %v1975_v27, %v1979_v50  ;;  %v17523_v47 = vcombine.high %v1976_v3, %v1980_v6  ;;  %v2027_v63 = vld [vmem:[%s19721_s14 + $0x2b70] sm:$0xff]  ;;  %v2024_v38 = vld [vmem:[%s19721_s14 + $0x2b58] sm:$0xff] }
 0x6ba   : > { %12555 = vmatmul.mubr.bf16.vlgmr.msra.gmra.mrb[4].mxu0 %v20583_v31  ;;  %13129 = vmatmul.mubr.bf16.vlgmr.msra.gmra.mrb[4].mxu1 %v20583_v31  ;;  %v17480_v31 = vcombine.low %v1935_v58, %v1939_v12  ;;  %v1991_v12 = vld [vmem:[%s19721_s14 + $0x2a50] sm:$0xff] }
 0x6bb   : > { %12564 = vmatpush1.bf16.msra.mxu0 %v17464_v11  ;;  %13138 = vmatpush1.bf16.msra.mxu1 %v17466_v24  ;;  %v1988_v11 = vld [vmem:[%s19721_s14 + $0x2a38] sm:$0xff]  ;;  %v17520_v24 = vcombine.low %v1975_v27, %v1979_v50  ;;  %v2031_v50 = vld [vmem:[%s19721_s14 + $0x2b90] sm:$0xff] }
 0x6bc   : > { %12565 = vmatprep.subr.bf16.mxu0 %v17473_v13  ;;  %13139 = vmatprep.subr.bf16.mxu1 %v17475_v0  ;;  %v17522_v13 = vcombine.low %v1976_v3, %v1980_v6  ;;  %v17529_v0 = vcombine.high %v1983_v48, %v1987_v53  ;;  %v17531_v58 = vcombine.high %v1984_v39, %v1988_v11  ;;  %v2035_v3 = vld [vmem:[%s19721_s14 + $0x2bb0] sm:$0xff]  ;;  %v2032_v6 = vld [vmem:[%s19721_s14 + $0x2b98] sm:$0xff] }
 0x6bd   : > { %12595 = vmatprep.mubr.bf16.mxu0 %v20589_v43  ;;  %13169 = vmatprep.mubr.bf16.mxu1 %v20589_v43  ;;  %v17490_v43 = vcombine.low %v1944_v1, %v1948_v17  ;;  %v2003_v1 = vld [vmem:[%s19721_s14 + $0x2ab0] sm:$0xff]  ;;  %v2000_v17 = vld [vmem:[%s19721_s14 + $0x2a98] sm:$0xff] }
 0x6bf   : > { %12566 = vmatpush1.bf16.msra.mxu0 %v17472_v26  ;;  %13140 = vmatpush1.bf16.msra.mxu1 %v17474_v2  ;;  %v1996_v26 = vld [vmem:[%s19721_s14 + $0x2a78] sm:$0xff]  ;;  %v17528_v2 = vcombine.low %v1983_v48, %v1987_v53  ;;  %v2039_v53 = vld [vmem:[%s19721_s14 + $0x2bd0] sm:$0xff] }
 0x6c0   : > { %12567 = vmatprep.subr.bf16.mxu0 %v17481_v5  ;;  %13141 = vmatprep.subr.bf16.mxu1 %v17483_v57  ;;  %v17530_v5 = vcombine.low %v1984_v39, %v1988_v11  ;;  %v17537_v57 = vcombine.high %v1991_v12, %v1995_v41  ;;  %v17539_v7 = vcombine.high %v1992_v62, %v1996_v26  ;;  %v2043_v39 = vld [vmem:[%s19721_s14 + $0x2bf0] sm:$0xff]  ;;  %v2040_v11 = vld [vmem:[%s19721_s14 + $0x2bd8] sm:$0xff] }
 0x6c3   : > { %12568 = vmatpush1.bf16.msra.mxu0 %v17480_v31  ;;  %13142 = vmatpush1.bf16.msra.mxu1 %v17482_v59  ;;  %v2004_v31 = vld [vmem:[%s19721_s14 + $0x2ab8] sm:$0xff]  ;;  %v17536_v59 = vcombine.low %v1991_v12, %v1995_v41  ;;  %v2047_v41 = vld [vmem:[%s19721_s14 + $0x2c10] sm:$0xff] }
 0x6c4   : > { %12569 = vmatprep.subr.bf16.mxu0 %v17489_v30  ;;  %13143 = vmatprep.subr.bf16.mxu1 %v17491_v9  ;;  %v17538_v30 = vcombine.low %v1992_v62, %v1996_v26  ;;  %v17545_v9 = vcombine.high %v1999_v8, %v2003_v1  ;;  %v17547_v18 = vcombine.high %v2000_v17, %v2004_v31  ;;  %v2051_v62 = vld [vmem:[%s19721_s14 + $0x2c30] sm:$0xff]  ;;  %v2048_v26 = vld [vmem:[%s19721_s14 + $0x2c18] sm:$0xff] }
 0x6c7   : > { %12570 = vmatpush1.bf16.msra.mxu0 %v17488_v60  ;;  %13144 = vmatpush1.bf16.msra.mxu1 %v17490_v43  ;;  %v2012_v60 = vld [vmem:[%s19721_s14 + $0x2af8] sm:$0xff]  ;;  %v17544_v43 = vcombine.low %v1999_v8, %v2003_v1  ;;  %v2055_v1 = vld [vmem:[%s19721_s14 + $0x2c50] sm:$0xff] }
 0x6c8   : > { %12571 = vmatprep.subr.bf16.mxu0 %v17497_v21  ;;  %13145 = vmatprep.subr.bf16.mxu1 %v17499_v32  ;;  %v17546_v21 = vcombine.low %v2000_v17, %v2004_v31  ;;  %v17553_v32 = vcombine.high %v2007_v35, %v2011_v16  ;;  %v17555_v22 = vcombine.high %v2008_v15, %v2012_v60  ;;  %v2059_v17 = vld [vmem:[%s19721_s14 + $0x2c70] sm:$0xff]  ;;  %v2056_v31 = vld [vmem:[%s19721_s14 + $0x2c58] sm:$0xff] }
 0x6cb   : > { %12572 = vmatpush1.bf16.msra.mxu0 %v17496_v33  ;;  %13146 = vmatpush1.bf16.msra.mxu1 %v17498_v14  ;;  %v2020_v33 = vld [vmem:[%s19721_s14 + $0x2b38] sm:$0xff]  ;;  %v17552_v14 = vcombine.low %v2007_v35, %v2011_v16  ;;  %v2063_v16 = vld [vmem:[%s19721_s14 + $0x2c90] sm:$0xff] }
 0x6cc   : > { %12573 = vmatprep.subr.bf16.mxu0 %v17505_v42  ;;  %13147 = vmatprep.subr.bf16.mxu1 %v17507_v37  ;;  %v17554_v42 = vcombine.low %v2008_v15, %v2012_v60  ;;  %v17561_v37 = vcombine.high %v2015_v25, %v2019_v40  ;;  %v17563_v4 = vcombine.high %v2016_v28, %v2020_v33  ;;  %v2067_v15 = vld [vmem:[%s19721_s14 + $0x2cb0] sm:$0xff]  ;;  %v2064_v60 = vld [vmem:[%s19721_s14 + $0x2c98] sm:$0xff] }
 0x6cf   : > { %12574 = vmatpush1.bf16.msra.mxu0 %v17504_v29  ;;  %13148 = vmatpush1.bf16.msra.mxu1 %v17506_v10  ;;  %v2028_v29 = vld [vmem:[%s19721_s14 + $0x2b78] sm:$0xff]  ;;  %v17560_v10 = vcombine.low %v2015_v25, %v2019_v40  ;;  %v2071_v40 = vld [vmem:[%s19721_s14 + $0x2cd0] sm:$0xff] }
 0x6d0   : > { %12575 = vmatprep.subr.bf16.mxu0 %v17513_v56  ;;  %13149 = vmatprep.subr.bf16.mxu1 %v17515_v52  ;;  %v17562_v56 = vcombine.low %v2016_v28, %v2020_v33  ;;  %v17569_v52 = vcombine.high %v2023_v36, %v2027_v63  ;;  %v17571_v27 = vcombine.high %v2024_v38, %v2028_v29  ;;  %v2075_v28 = vld [vmem:[%s19721_s14 + $0x2cf0] sm:$0xff]  ;;  %v2072_v33 = vld [vmem:[%s19721_s14 + $0x2cd8] sm:$0xff] }
 0x6d3   : > { %12576 = vmatpush1.bf16.msra.mxu0 %v17512_v44  ;;  %13150 = vmatpush1.bf16.msra.mxu1 %v17514_v19  ;;  %v2036_v44 = vld [vmem:[%s19721_s14 + $0x2bb8] sm:$0xff]  ;;  %v17568_v19 = vcombine.low %v2023_v36, %v2027_v63  ;;  %v2079_v36 = vld [vmem:[%s19721_s14 + $0x2d10] sm:$0xff] }
 0x6d4   : > { %12577 = vmatprep.subr.bf16.mxu0 %v17521_v46  ;;  %13151 = vmatprep.subr.bf16.mxu1 %v17523_v47  ;;  %v17570_v46 = vcombine.low %v2024_v38, %v2028_v29  ;;  %v17577_v47 = vcombine.high %v2031_v50, %v2035_v3  ;;  %v17579_v48 = vcombine.high %v2032_v6, %v2036_v44  ;;  %v2083_v63 = vld [vmem:[%s19721_s14 + $0x2d30] sm:$0xff]  ;;  %v2080_v38 = vld [vmem:[%s19721_s14 + $0x2d18] sm:$0xff] }
 0x6d5   : > { %v2084_v29 = vld [vmem:[%s19721_s14 + $0x2d38] sm:$0xff] }
 0x6d7   : > { %12578 = vmatpush1.bf16.msra.mxu0 %v17520_v24  ;;  %13152 = vmatpush1.bf16.msra.mxu1 %v17522_v13  ;;  %v2044_v24 = vld [vmem:[%s19721_s14 + $0x2bf8] sm:$0xff]  ;;  %v17576_v13 = vcombine.low %v2031_v50, %v2035_v3  ;;  %v2091_v50 = vld [vmem:[%s19721_s14 + $0x2d70] sm:$0xff] }
 0x6d8   : > { %12579 = vmatprep.subr.bf16.mxu0 %v17529_v0  ;;  %13153 = vmatprep.subr.bf16.mxu1 %v17531_v58  ;;  %v17578_v0 = vcombine.low %v2032_v6, %v2036_v44  ;;  %v17585_v58 = vcombine.high %v2039_v53, %v2043_v39  ;;  %v17587_v12 = vcombine.high %v2040_v11, %v2044_v24  ;;  %v2088_v3 = vld [vmem:[%s19721_s14 + $0x2d58] sm:$0xff] }
 0x6d9   : > { %v2092_v6 = vld [vmem:[%s19721_s14 + $0x2d78] sm:$0xff]  ;;  %v17624_v44 = vcombine.low %v2079_v36, %v2083_v63 }
 0x6db   : > { %12580 = vmatpush1.bf16.msra.mxu0 %v17528_v2  ;;  %13154 = vmatpush1.bf16.msra.mxu1 %v17530_v5  ;;  %v2052_v2 = vld [vmem:[%s19721_s14 + $0x2c38] sm:$0xff]  ;;  %v17584_v5 = vcombine.low %v2039_v53, %v2043_v39  ;;  %v2099_v53 = vld [vmem:[%s19721_s14 + $0x2db0] sm:$0xff] }
 0x6dc   : > { %12581 = vmatprep.subr.bf16.mxu0 %v17537_v57  ;;  %13155 = vmatprep.subr.bf16.mxu1 %v17539_v7  ;;  %v17586_v57 = vcombine.low %v2040_v11, %v2044_v24  ;;  %v17593_v7 = vcombine.high %v2047_v41, %v2051_v62  ;;  %v17595_v8 = vcombine.high %v2048_v26, %v2052_v2  ;;  %v2096_v39 = vld [vmem:[%s19721_s14 + $0x2d98] sm:$0xff] }
 0x6dd   : > { %v2100_v11 = vld [vmem:[%s19721_s14 + $0x2db8] sm:$0xff] }
 0x6df   : > { %12582 = vmatpush1.bf16.msra.mxu0 %v17536_v59  ;;  %13156 = vmatpush1.bf16.msra.mxu1 %v17538_v30  ;;  %v2060_v59 = vld [vmem:[%s19721_s14 + $0x2c78] sm:$0xff]  ;;  %v17592_v30 = vcombine.low %v2047_v41, %v2051_v62  ;;  %v2107_v41 = vld [vmem:[%s19721_s14 + $0x2df0] sm:$0xff] }
 0x6e0   : > { %12583 = vmatprep.subr.bf16.mxu0 %v17545_v9  ;;  %13157 = vmatprep.subr.bf16.mxu1 %v17547_v18  ;;  %v17594_v9 = vcombine.low %v2048_v26, %v2052_v2  ;;  %v17601_v18 = vcombine.high %v2055_v1, %v2059_v17  ;;  %v17603_v35 = vcombine.high %v2056_v31, %v2060_v59  ;;  %v2104_v62 = vld [vmem:[%s19721_s14 + $0x2dd8] sm:$0xff] }
 0x6e1   : > { %v2108_v26 = vld [vmem:[%s19721_s14 + $0x2df8] sm:$0xff] }
 0x6e3   : > { %12584 = vmatpush1.bf16.msra.mxu0 %v17544_v43  ;;  %13158 = vmatpush1.bf16.msra.mxu1 %v17546_v21  ;;  %v2068_v43 = vld [vmem:[%s19721_s14 + $0x2cb8] sm:$0xff]  ;;  %v17600_v21 = vcombine.low %v2055_v1, %v2059_v17  ;;  %v2115_v1 = vld [vmem:[%s19721_s14 + $0x2e30] sm:$0xff] }
 0x6e4   : > { %12585 = vmatprep.subr.bf16.mxu0 %v17553_v32  ;;  %13159 = vmatprep.subr.bf16.mxu1 %v17555_v22  ;;  %v17602_v32 = vcombine.low %v2056_v31, %v2060_v59  ;;  %v17609_v22 = vcombine.high %v2063_v16, %v2067_v15  ;;  %v17611_v25 = vcombine.high %v2064_v60, %v2068_v43  ;;  %v2112_v17 = vld [vmem:[%s19721_s14 + $0x2e18] sm:$0xff] }
 0x6e5   : > { %v2116_v31 = vld [vmem:[%s19721_s14 + $0x2e38] sm:$0xff] }
 0x6e7   : > { %12586 = vmatpush1.bf16.msra.mxu0 %v17552_v14  ;;  %13160 = vmatpush1.bf16.msra.mxu1 %v17554_v42  ;;  %v2076_v14 = vld [vmem:[%s19721_s14 + $0x2cf8] sm:$0xff]  ;;  %v17610_v42 = vcombine.low %v2064_v60, %v2068_v43 }
 0x6e8   : > { %12587 = vmatprep.subr.bf16.mxu0 %v17561_v37  ;;  %13161 = vmatprep.subr.bf16.mxu1 %v17563_v4  ;;  %v17617_v37 = vcombine.high %v2071_v40, %v2075_v28  ;;  %v17619_v4 = vcombine.high %v2072_v33, %v2076_v14  ;;  %v2124_v60 = vld [vmem:[%s19721_s14 + $0x2e78] sm:$0xff] }
 0x6eb   : > { %12588 = vmatpush1.bf16.msra.mxu0 %v17560_v10  ;;  %13162 = vmatpush1.bf16.msra.mxu1 %v17562_v56  ;;  %v17616_v10 = vcombine.low %v2071_v40, %v2075_v28  ;;  %v17625_v56 = vcombine.high %v2079_v36, %v2083_v63  ;;  %v2131_v40 = vld [vmem:[%s19721_s14 + $0x2eb0] sm:$0xff]  ;;  %v2128_v28 = vld [vmem:[%s19721_s14 + $0x2e98] sm:$0xff] }
 0x6ec   : > { %12589 = vmatprep.subr.bf16.mxu0 %v17569_v52  ;;  %13163 = vmatprep.subr.bf16.mxu1 %v17571_v27  ;;  %v17627_v52 = vcombine.high %v2080_v38, %v2084_v29  ;;  %v2087_v27 = vld [vmem:[%s19721_s14 + $0x2d50] sm:$0xff]  ;;  %v2136_v63 = vld [vmem:[%s19721_s14 + $0x2ed8] sm:$0xff] }
 0x6ed   : > { %v17632_v24 = vcombine.low %v2087_v27, %v2091_v50  ;;  %v2139_v36 = vld [vmem:[%s19721_s14 + $0x2ef0] sm:$0xff] }
 0x6ef   : > { %12590 = vmatpush1.bf16.msra.mxu0 %v17568_v19  ;;  %13164 = vmatpush1.bf16.msra.mxu1 %v17570_v46  ;;  %v17626_v19 = vcombine.low %v2080_v38, %v2084_v29  ;;  %v17633_v46 = vcombine.high %v2087_v27, %v2091_v50  ;;  %v2140_v38 = vld [vmem:[%s19721_s14 + $0x2ef8] sm:$0xff]  ;;  %v2147_v27 = vld [vmem:[%s19721_s14 + $0x2f30] sm:$0xff] }
 0x6f0   : > { %12591 = vmatprep.subr.bf16.mxu0 %v17577_v47  ;;  %13165 = vmatprep.subr.bf16.mxu1 %v17579_v48  ;;  %v17635_v47 = vcombine.high %v2088_v3, %v2092_v6  ;;  %v2095_v48 = vld [vmem:[%s19721_s14 + $0x2d90] sm:$0xff]  ;;  %v2144_v50 = vld [vmem:[%s19721_s14 + $0x2f18] sm:$0xff] }
 0x6f1   : > { %v17640_v2 = vcombine.low %v2095_v48, %v2099_v53 }
 0x6f3   : > { %12592 = vmatpush1.bf16.msra.mxu0 %v17576_v13  ;;  %13166 = vmatpush1.bf16.msra.mxu1 %v17578_v0  ;;  %v17634_v13 = vcombine.low %v2088_v3, %v2092_v6  ;;  %v17641_v0 = vcombine.high %v2095_v48, %v2099_v53  ;;  %v2148_v3 = vld [vmem:[%s19721_s14 + $0x2f38] sm:$0xff]  ;;  %v2155_v48 = vld [vmem:[%s19721_s14 + $0x2f70] sm:$0xff] }
 0x6f4   : > { %12593 = vmatprep.subr.bf16.mxu0 %v17585_v58  ;;  %13167 = vmatprep.subr.bf16.mxu1 %v17587_v12  ;;  %v17643_v58 = vcombine.high %v2096_v39, %v2100_v11  ;;  %v2103_v12 = vld [vmem:[%s19721_s14 + $0x2dd0] sm:$0xff]  ;;  %v2152_v53 = vld [vmem:[%s19721_s14 + $0x2f58] sm:$0xff] }
 0x6f5   : > { %v17648_v59 = vcombine.low %v2103_v12, %v2107_v41 }
 0x6f7   : > { %12594 = vmatpush1.bf16.msra.mxu0 %v17584_v5  ;;  %13168 = vmatpush1.bf16.msra.mxu1 %v17586_v57  ;;  %v17642_v5 = vcombine.low %v2096_v39, %v2100_v11  ;;  %v17649_v57 = vcombine.high %v2103_v12, %v2107_v41  ;;  %v2156_v39 = vld [vmem:[%s19721_s14 + $0x2f78] sm:$0xff]  ;;  %v2163_v12 = vld [vmem:[%s19721_s14 + $0x2fb0] sm:$0xff] }
 0x6f8   : > { %12604 = vmatprep.subr.bf16.mxu0 %v17593_v7  ;;  %13178 = vmatprep.subr.bf16.mxu1 %v17595_v8  ;;  %v17651_v7 = vcombine.high %v2104_v62, %v2108_v26  ;;  %v2111_v8 = vld [vmem:[%s19721_s14 + $0x2e10] sm:$0xff]  ;;  %v2160_v41 = vld [vmem:[%s19721_s14 + $0x2f98] sm:$0xff] }
 0x6f9   : > { %v17656_v43 = vcombine.low %v2111_v8, %v2115_v1 }
 0x6fa   : > { %12596 = vmatmul.mubr.bf16.vlgmr.msra.gmra.mrb[4].mxu0 %v20664_v49  ;;  %13170 = vmatmul.mubr.bf16.vlgmr.msra.gmra.mrb[4].mxu1 %v20664_v49  ;;  %v17608_v49 = vcombine.low %v2063_v16, %v2067_v15  ;;  %v2123_v16 = vld [vmem:[%s19721_s14 + $0x2e70] sm:$0xff]  ;;  %v2120_v15 = vld [vmem:[%s19721_s14 + $0x2e58] sm:$0xff] }
 0x6fb   : > { %12605 = vmatpush1.bf16.msra.mxu0 %v17592_v30  ;;  %13179 = vmatpush1.bf16.msra.mxu1 %v17594_v9  ;;  %v17650_v30 = vcombine.low %v2104_v62, %v2108_v26  ;;  %v17657_v9 = vcombine.high %v2111_v8, %v2115_v1  ;;  %v2164_v62 = vld [vmem:[%s19721_s14 + $0x2fb8] sm:$0xff]  ;;  %v2171_v8 = vld [vmem:[%s19721_s14 + $0x2ff0] sm:$0xff] }
 0x6fc   : > { %12606 = vmatprep.subr.bf16.mxu0 %v17601_v18  ;;  %13180 = vmatprep.subr.bf16.mxu1 %v17603_v35  ;;  %v17659_v18 = vcombine.high %v2112_v17, %v2116_v31  ;;  %v2119_v35 = vld [vmem:[%s19721_s14 + $0x2e50] sm:$0xff]  ;;  %v2168_v1 = vld [vmem:[%s19721_s14 + $0x2fd8] sm:$0xff] }
 0x6fd   : > { %12636 = vmatprep.mubr.bf16.mxu0 %v20670_v61  ;;  %13210 = vmatprep.mubr.bf16.mxu1 %v20670_v61  ;;  %v17618_v61 = vcombine.low %v2072_v33, %v2076_v14  ;;  %v2132_v33 = vld [vmem:[%s19721_s14 + $0x2eb8] sm:$0xff]  ;;  %v17664_v14 = vcombine.low %v2119_v35, %v2123_v16 }
 0x6ff   : > { %12607 = vmatpush1.bf16.msra.mxu0 %v17600_v21  ;;  %13181 = vmatpush1.bf16.msra.mxu1 %v17602_v32  ;;  %v17658_v21 = vcombine.low %v2112_v17, %v2116_v31  ;;  %v17665_v32 = vcombine.high %v2119_v35, %v2123_v16  ;;  %v2172_v17 = vld [vmem:[%s19721_s14 + $0x2ff8] sm:$0xff]  ;;  %v2179_v35 = vld [vmem:[%s19721_s14 + $0x3030] sm:$0xff] }
 0x700   : > { %12608 = vmatprep.subr.bf16.mxu0 %v17609_v22  ;;  %13182 = vmatprep.subr.bf16.mxu1 %v17611_v25  ;;  %v17667_v22 = vcombine.high %v2120_v15, %v2124_v60  ;;  %v2127_v25 = vld [vmem:[%s19721_s14 + $0x2e90] sm:$0xff]  ;;  %v2176_v16 = vld [vmem:[%s19721_s14 + $0x3018] sm:$0xff] }
 0x701   : > { %v17672_v29 = vcombine.low %v2127_v25, %v2131_v40 }
 0x703   : > { %12609 = vmatpush1.bf16.msra.mxu0 %v17608_v49  ;;  %13183 = vmatpush1.bf16.msra.mxu1 %v17610_v42  ;;  %v17666_v49 = vcombine.low %v2120_v15, %v2124_v60  ;;  %v17673_v42 = vcombine.high %v2127_v25, %v2131_v40  ;;  %v2180_v15 = vld [vmem:[%s19721_s14 + $0x3038] sm:$0xff]  ;;  %v2187_v25 = vld [vmem:[%s19721_s14 + $0x3070] sm:$0xff] }
 0x704   : > { %12610 = vmatprep.subr.bf16.mxu0 %v17617_v37  ;;  %13184 = vmatprep.subr.bf16.mxu1 %v17619_v4  ;;  %v17675_v37 = vcombine.high %v2128_v28, %v2132_v33  ;;  %v2135_v4 = vld [vmem:[%s19721_s14 + $0x2ed0] sm:$0xff]  ;;  %v2184_v40 = vld [vmem:[%s19721_s14 + $0x3058] sm:$0xff] }
 0x705   : > { %v17680_v6 = vcombine.low %v2135_v4, %v2139_v36 }
 0x707   : > { %12611 = vmatpush1.bf16.msra.mxu0 %v17616_v10  ;;  %13185 = vmatpush1.bf16.msra.mxu1 %v17618_v61  ;;  %v17674_v10 = vcombine.low %v2128_v28, %v2132_v33  ;;  %v17681_v61 = vcombine.high %v2135_v4, %v2139_v36  ;;  %v2188_v28 = vld [vmem:[%s19721_s14 + $0x3078] sm:$0xff]  ;;  %v2195_v4 = vld [vmem:[%s19721_s14 + $0x30b0] sm:$0xff] }
 0x708   : > { %12612 = vmatprep.subr.bf16.mxu0 %v17625_v56  ;;  %13186 = vmatprep.subr.bf16.mxu1 %v17627_v52  ;;  %v17683_v56 = vcombine.high %v2136_v63, %v2140_v38  ;;  %v2143_v52 = vld [vmem:[%s19721_s14 + $0x2f10] sm:$0xff]  ;;  %v2192_v36 = vld [vmem:[%s19721_s14 + $0x3098] sm:$0xff] }
 0x709   : > { %v17688_v11 = vcombine.low %v2143_v52, %v2147_v27 }
 0x70b   : > { %12613 = vmatpush1.bf16.msra.mxu0 %v17624_v44  ;;  %13187 = vmatpush1.bf16.msra.mxu1 %v17626_v19  ;;  %v17682_v44 = vcombine.low %v2136_v63, %v2140_v38  ;;  %v17689_v19 = vcombine.high %v2143_v52, %v2147_v27  ;;  %v2196_v63 = vld [vmem:[%s19721_s14 + $0x30b8] sm:$0xff]  ;;  %v2203_v52 = vld [vmem:[%s19721_s14 + $0x30f0] sm:$0xff] }
 0x70c   : > { %12614 = vmatprep.subr.bf16.mxu0 %v17633_v46  ;;  %13188 = vmatprep.subr.bf16.mxu1 %v17635_v47  ;;  %v17691_v46 = vcombine.high %v2144_v50, %v2148_v3  ;;  %v2151_v47 = vld [vmem:[%s19721_s14 + $0x2f50] sm:$0xff]  ;;  %v2200_v27 = vld [vmem:[%s19721_s14 + $0x30d8] sm:$0xff] }
 0x70d   : > { %v17696_v26 = vcombine.low %v2151_v47, %v2155_v48 }
 0x70f   : > { %12615 = vmatpush1.bf16.msra.mxu0 %v17632_v24  ;;  %13189 = vmatpush1.bf16.msra.mxu1 %v17634_v13  ;;  %v17690_v24 = vcombine.low %v2144_v50, %v2148_v3  ;;  %v17697_v13 = vcombine.high %v2151_v47, %v2155_v48  ;;  %v2204_v50 = vld [vmem:[%s19721_s14 + $0x30f8] sm:$0xff]  ;;  %v17738_v3 = vcombine.low %v2192_v36, %v2196_v63 }
 0x710   : > { %12616 = vmatprep.subr.bf16.mxu0 %v17641_v0  ;;  %13190 = vmatprep.subr.bf16.mxu1 %v17643_v58  ;;  %v17699_v0 = vcombine.high %v2152_v53, %v2156_v39  ;;  %v2159_v58 = vld [vmem:[%s19721_s14 + $0x2f90] sm:$0xff]  ;;  %v2208_v47 = vld [vmem:[%s19721_s14 + $0x3118] sm:$0xff] }
 0x711   : > { %v17704_v31 = vcombine.low %v2159_v58, %v2163_v12  ;;  %v2212_v48 = vld [vmem:[%s19721_s14 + $0x3138] sm:$0xff] }
 0x713   : > { %12617 = vmatpush1.bf16.msra.mxu0 %v17640_v2  ;;  %13191 = vmatpush1.bf16.msra.mxu1 %v17642_v5  ;;  %v17698_v2 = vcombine.low %v2152_v53, %v2156_v39  ;;  %v17705_v5 = vcombine.high %v2159_v58, %v2163_v12  ;;  %v2220_v58 = vld [vmem:[%s19721_s14 + $0x3178] sm:$0xff] }
 0x714   : > { %12618 = vmatprep.subr.bf16.mxu0 %v17649_v57  ;;  %13192 = vmatprep.subr.bf16.mxu1 %v17651_v7  ;;  %v17707_v57 = vcombine.high %v2160_v41, %v2164_v62  ;;  %v2167_v7 = vld [vmem:[%s19721_s14 + $0x2fd0] sm:$0xff] }
 0x715   : > { %v17712_v60 = vcombine.low %v2167_v7, %v2171_v8 }
 0x717   : > { %12619 = vmatpush1.bf16.msra.mxu0 %v17648_v59  ;;  %13193 = vmatpush1.bf16.msra.mxu1 %v17650_v30  ;;  %v17706_v59 = vcombine.low %v2160_v41, %v2164_v62  ;;  %v17713_v30 = vcombine.high %v2167_v7, %v2171_v8  ;;  %v17754_v41 = vcombine.low %v2208_v47, %v2212_v48  ;;  %v2228_v7 = vld [vmem:[%s19721_s14 + $0x31b8] sm:$0xff] }
 0x718   : > { %12620 = vmatprep.subr.bf16.mxu0 %v17657_v9  ;;  %13194 = vmatprep.subr.bf16.mxu1 %v17659_v18  ;;  %v17715_v9 = vcombine.high %v2168_v1, %v2172_v17  ;;  %v2175_v18 = vld [vmem:[%s19721_s14 + $0x3010] sm:$0xff] }
 0x719   : > { %v17720_v33 = vcombine.low %v2175_v18, %v2179_v35 }
 0x71b   : > { %12621 = vmatpush1.bf16.msra.mxu0 %v17656_v43  ;;  %13195 = vmatpush1.bf16.msra.mxu1 %v17658_v21  ;;  %v17714_v43 = vcombine.low %v2168_v1, %v2172_v17  ;;  %v17721_v21 = vcombine.high %v2175_v18, %v2179_v35  ;;  %v2236_v18 = vld [vmem:[%s19721_s14 + $0x31f8] sm:$0xff] }
 0x71c   : > { %12622 = vmatprep.subr.bf16.mxu0 %v17665_v32  ;;  %13196 = vmatprep.subr.bf16.mxu1 %v17667_v22  ;;  %v17723_v32 = vcombine.high %v2176_v16, %v2180_v15  ;;  %v2183_v22 = vld [vmem:[%s19721_s14 + $0x3050] sm:$0xff] }
 0x71d   : > { %v17728_v38 = vcombine.low %v2183_v22, %v2187_v25 }
 0x71f   : > { %12623 = vmatpush1.bf16.msra.mxu0 %v17664_v14  ;;  %13197 = vmatpush1.bf16.msra.mxu1 %v17666_v49  ;;  %v17722_v14 = vcombine.low %v2176_v16, %v2180_v15  ;;  %v17729_v49 = vcombine.high %v2183_v22, %v2187_v25  ;;  %v2244_v22 = vld [vmem:[%s19721_s14 + $0x3238] sm:$0xff] }
 0x720   : > { %12624 = vmatprep.subr.bf16.mxu0 %v17673_v42  ;;  %13198 = vmatprep.subr.bf16.mxu1 %v17675_v37  ;;  %v17731_v42 = vcombine.high %v2184_v40, %v2188_v28  ;;  %v2191_v37 = vld [vmem:[%s19721_s14 + $0x3090] sm:$0xff] }
 0x723   : > { %12625 = vmatpush1.bf16.msra.mxu0 %v17672_v29  ;;  %13199 = vmatpush1.bf16.msra.mxu1 %v17674_v10  ;;  %v17730_v29 = vcombine.low %v2184_v40, %v2188_v28  ;;  %v17737_v10 = vcombine.high %v2191_v37, %v2195_v4 }
 0x724   : > { %12626 = vmatprep.subr.bf16.mxu0 %v17681_v61  ;;  %13200 = vmatprep.subr.bf16.mxu1 %v17683_v56  ;;  %v17739_v61 = vcombine.high %v2192_v36, %v2196_v63  ;;  %v2199_v56 = vld [vmem:[%s19721_s14 + $0x30d0] sm:$0xff] }
 0x725   : > { %v17744_v53 = vcombine.low %v2199_v56, %v2203_v52 }
 0x727   : > { %12627 = vmatpush1.bf16.msra.mxu0 %v17680_v6  ;;  %13201 = vmatpush1.bf16.msra.mxu1 %v17682_v44  ;;  %v17745_v6 = vcombine.high %v2199_v56, %v2203_v52  ;;  %v17747_v44 = vcombine.high %v2200_v27, %v2204_v50  ;;  %v2260_v56 = vld [vmem:[%s19721_s14 + $0x32b8] sm:$0xff] }
 0x728   : > { %12628 = vmatprep.subr.bf16.mxu0 %v17689_v19  ;;  %13202 = vmatprep.subr.bf16.mxu1 %v17691_v46  ;;  %v2207_v19 = vld [vmem:[%s19721_s14 + $0x3110] sm:$0xff] }
 0x729   : > { %v2211_v46 = vld [vmem:[%s19721_s14 + $0x3130] sm:$0xff] }
 0x72a   : > { %v17753_v39 = vcombine.high %v2207_v19, %v2211_v46  ;;  %v17752_v12 = vcombine.low %v2207_v19, %v2211_v46  ;;  %v2268_v19 = vld [vmem:[%s19721_s14 + $0x32f8] sm:$0xff] }
 0x72b   : > { %12629 = vmatpush1.bf16.msra.mxu0 %v17688_v11  ;;  %13203 = vmatpush1.bf16.msra.mxu1 %v17690_v24  ;;  %v17755_v11 = vcombine.high %v2208_v47, %v2212_v48  ;;  %v2215_v24 = vld [vmem:[%s19721_s14 + $0x3150] sm:$0xff] }
 0x72c   : > { %12630 = vmatprep.subr.bf16.mxu0 %v17697_v13  ;;  %13204 = vmatprep.subr.bf16.mxu1 %v17699_v0  ;;  %v2219_v13 = vld [vmem:[%s19721_s14 + $0x3170] sm:$0xff]  ;;  %v2216_v0 = vld [vmem:[%s19721_s14 + $0x3158] sm:$0xff] }
 0x72d   : > { %v17761_v62 = vcombine.high %v2215_v24, %v2219_v13  ;;  %v17760_v8 = vcombine.low %v2215_v24, %v2219_v13  ;;  %v17762_v1 = vcombine.low %v2216_v0, %v2220_v58  ;;  %v2276_v24 = vld [vmem:[%s19721_s14 + $0x3338] sm:$0xff] }
 0x72f   : > { %12631 = vmatpush1.bf16.msra.mxu0 %v17696_v26  ;;  %13205 = vmatpush1.bf16.msra.mxu1 %v17698_v2  ;;  %v17763_v26 = vcombine.high %v2216_v0, %v2220_v58  ;;  %v2223_v2 = vld [vmem:[%s19721_s14 + $0x3190] sm:$0xff] }
 0x730   : > { %12632 = vmatprep.subr.bf16.mxu0 %v17705_v5  ;;  %13206 = vmatprep.subr.bf16.mxu1 %v17707_v57  ;;  %v2227_v5 = vld [vmem:[%s19721_s14 + $0x31b0] sm:$0xff]  ;;  %v2224_v57 = vld [vmem:[%s19721_s14 + $0x3198] sm:$0xff] }
 0x731   : > { %v17769_v17 = vcombine.high %v2223_v2, %v2227_v5  ;;  %v17768_v35 = vcombine.low %v2223_v2, %v2227_v5  ;;  %v17770_v16 = vcombine.low %v2224_v57, %v2228_v7  ;;  %v2284_v2 = vld [vmem:[%s19721_s14 + $0x3378] sm:$0xff] }
 0x733   : > { %12633 = vmatpush1.bf16.msra.mxu0 %v17704_v31  ;;  %13207 = vmatpush1.bf16.msra.mxu1 %v17706_v59  ;;  %v17771_v31 = vcombine.high %v2224_v57, %v2228_v7  ;;  %v2231_v59 = vld [vmem:[%s19721_s14 + $0x31d0] sm:$0xff] }
 0x734   : > { %12634 = vmatprep.subr.bf16.mxu0 %v17713_v30  ;;  %13208 = vmatprep.subr.bf16.mxu1 %v17715_v9  ;;  %v2235_v30 = vld [vmem:[%s19721_s14 + $0x31f0] sm:$0xff]  ;;  %v2232_v9 = vld [vmem:[%s19721_s14 + $0x31d8] sm:$0xff] }
 0x735   : > { %v17777_v15 = vcombine.high %v2231_v59, %v2235_v30  ;;  %v17776_v25 = vcombine.low %v2231_v59, %v2235_v30  ;;  %v17778_v40 = vcombine.low %v2232_v9, %v2236_v18  ;;  %v2292_v59 = vld [vmem:[%s19721_s14 + $0x33b8] sm:$0xff] }
 0x737   : > { %12635 = vmatpush1.bf16.msra.mxu0 %v17712_v60  ;;  %13209 = vmatpush1.bf16.msra.mxu1 %v17714_v43  ;;  %v17779_v60 = vcombine.high %v2232_v9, %v2236_v18  ;;  %v2239_v43 = vld [vmem:[%s19721_s14 + $0x3210] sm:$0xff] }
 0x738   : > { %12645 = vmatprep.subr.bf16.mxu0 %v17721_v21  ;;  %13219 = vmatprep.subr.bf16.mxu1 %v17723_v32  ;;  %v2243_v21 = vld [vmem:[%s19721_s14 + $0x3230] sm:$0xff]  ;;  %v2240_v32 = vld [vmem:[%s19721_s14 + $0x3218] sm:$0xff] }
 0x739   : > { %v17785_v28 = vcombine.high %v2239_v43, %v2243_v21  ;;  %v17786_v36 = vcombine.low %v2240_v32, %v2244_v22 }
 0x73a   : > { %12637 = vmatmul.mubr.bf16.vlgmr.msra.gmra.mrb[4].mxu0 %v20747_v20  ;;  %13211 = vmatmul.mubr.bf16.vlgmr.msra.gmra.mrb[4].mxu1 %v20747_v20  ;;  %v17736_v20 = vcombine.low %v2191_v37, %v2195_v4  ;;  %v2252_v37 = vld [vmem:[%s19721_s14 + $0x3278] sm:$0xff]  ;;  %v17784_v4 = vcombine.low %v2239_v43, %v2243_v21 }
 0x73b   : > { %12646 = vmatpush1.bf16.msra.mxu0 %v17720_v33  ;;  %13220 = vmatpush1.bf16.msra.mxu1 %v17722_v14  ;;  %v17787_v33 = vcombine.high %v2240_v32, %v2244_v22  ;;  %v2247_v14 = vld [vmem:[%s19721_s14 + $0x3250] sm:$0xff]  ;;  %v2300_v43 = vld [vmem:[%s19721_s14 + $0x33f8] sm:$0xff] }
 0x73c   : > { %12647 = vmatprep.subr.bf16.mxu0 %v17729_v49  ;;  %13221 = vmatprep.subr.bf16.mxu1 %v17731_v42  ;;  %v2251_v49 = vld [vmem:[%s19721_s14 + $0x3270] sm:$0xff]  ;;  %v2248_v42 = vld [vmem:[%s19721_s14 + $0x3258] sm:$0xff] }
 0x73d   : > { %12677 = vmatprep.mubr.bf16.mxu0 %v20753_v34  ;;  %13251 = vmatprep.mubr.bf16.mxu1 %v20753_v34  ;;  %v17746_v34 = vcombine.low %v2200_v27, %v2204_v50  ;;  %v17793_v63 = vcombine.high %v2247_v14, %v2251_v49  ;;  %v17792_v52 = vcombine.low %v2247_v14, %v2251_v49  ;;  %v2308_v14 = vld [vmem:[%s19721_s14 + $0x3438] sm:$0xff] }
 0x73e   : > { %v17794_v27 = vcombine.low %v2248_v42, %v2252_v37 }
 0x73f   : > { %12648 = vmatpush1.bf16.msra.mxu0 %v17728_v38  ;;  %13222 = vmatpush1.bf16.msra.mxu1 %v17730_v29  ;;  %v17795_v38 = vcombine.high %v2248_v42, %v2252_v37  ;;  %v2255_v29 = vld [vmem:[%s19721_s14 + $0x3290] sm:$0xff] }
 0x740   : > { %12649 = vmatprep.subr.bf16.mxu0 %v17737_v10  ;;  %13223 = vmatprep.subr.bf16.mxu1 %v17739_v61  ;;  %v2259_v10 = vld [vmem:[%s19721_s14 + $0x32b0] sm:$0xff]  ;;  %v2256_v61 = vld [vmem:[%s19721_s14 + $0x3298] sm:$0xff] }
 0x741   : > { %v17801_v50 = vcombine.high %v2255_v29, %v2259_v10  ;;  %v17800_v46 = vcombine.low %v2255_v29, %v2259_v10  ;;  %v17802_v47 = vcombine.low %v2256_v61, %v2260_v56  ;;  %v2316_v29 = vld [vmem:[%s19721_s14 + $0x3478] sm:$0xff] }
 0x743   : > { %12650 = vmatpush1.bf16.msra.mxu0 %v17736_v20  ;;  %13224 = vmatpush1.bf16.msra.mxu1 %v17738_v3  ;;  %v17803_v20 = vcombine.high %v2256_v61, %v2260_v56  ;;  %v2263_v3 = vld [vmem:[%s19721_s14 + $0x32d0] sm:$0xff] }
 0x744   : > { %12651 = vmatprep.subr.bf16.mxu0 %v17745_v6  ;;  %13225 = vmatprep.subr.bf16.mxu1 %v17747_v44  ;;  %v2267_v6 = vld [vmem:[%s19721_s14 + $0x32f0] sm:$0xff]  ;;  %v2264_v44 = vld [vmem:[%s19721_s14 + $0x32d8] sm:$0xff] }
 0x745   : > { %v17809_v48 = vcombine.high %v2263_v3, %v2267_v6  ;;  %v17808_v13 = vcombine.low %v2263_v3, %v2267_v6  ;;  %v17810_v0 = vcombine.low %v2264_v44, %v2268_v19  ;;  %v2324_v3 = vld [vmem:[%s19721_s14 + $0x34b8] sm:$0xff] }
 0x747   : > { %12652 = vmatpush1.bf16.msra.mxu0 %v17744_v53  ;;  %13226 = vmatpush1.bf16.msra.mxu1 %v17746_v34  ;;  %v17811_v53 = vcombine.high %v2264_v44, %v2268_v19  ;;  %v2271_v34 = vld [vmem:[%s19721_s14 + $0x3310] sm:$0xff] }
 0x748   : > { %12653 = vmatprep.subr.bf16.mxu0 %v17753_v39  ;;  %13227 = vmatprep.subr.bf16.mxu1 %v17755_v11  ;;  %v2275_v39 = vld [vmem:[%s19721_s14 + $0x3330] sm:$0xff]  ;;  %v2272_v11 = vld [vmem:[%s19721_s14 + $0x3318] sm:$0xff] }
 0x749   : > { %v17817_v58 = vcombine.high %v2271_v34, %v2275_v39  ;;  %v17816_v5 = vcombine.low %v2271_v34, %v2275_v39  ;;  %v17818_v57 = vcombine.low %v2272_v11, %v2276_v24  ;;  %v2332_v34 = vld [vmem:[%s19721_s14 + $0x34f8] sm:$0xff] }
 0x74b   : > { %12654 = vmatpush1.bf16.msra.mxu0 %v17752_v12  ;;  %13228 = vmatpush1.bf16.msra.mxu1 %v17754_v41  ;;  %v17819_v12 = vcombine.high %v2272_v11, %v2276_v24  ;;  %v2279_v41 = vld [vmem:[%s19721_s14 + $0x3350] sm:$0xff] }
 0x74c   : > { %12655 = vmatprep.subr.bf16.mxu0 %v17761_v62  ;;  %13229 = vmatprep.subr.bf16.mxu1 %v17763_v26  ;;  %v2283_v62 = vld [vmem:[%s19721_s14 + $0x3370] sm:$0xff]  ;;  %v2280_v26 = vld [vmem:[%s19721_s14 + $0x3358] sm:$0xff] }
 0x74d   : > { %v17825_v7 = vcombine.high %v2279_v41, %v2283_v62  ;;  %v17824_v30 = vcombine.low %v2279_v41, %v2283_v62  ;;  %v17826_v9 = vcombine.low %v2280_v26, %v2284_v2 }
 0x74f   : > { %12656 = vmatpush1.bf16.msra.mxu0 %v17760_v8  ;;  %13230 = vmatpush1.bf16.msra.mxu1 %v17762_v1  ;;  %v17827_v8 = vcombine.high %v2280_v26, %v2284_v2  ;;  %v2287_v1 = vld [vmem:[%s19721_s14 + $0x3390] sm:$0xff] }
 0x750   : > { %12657 = vmatprep.subr.bf16.mxu0 %v17769_v17  ;;  %13231 = vmatprep.subr.bf16.mxu1 %v17771_v31  ;;  %v2291_v17 = vld [vmem:[%s19721_s14 + $0x33b0] sm:$0xff]  ;;  %v2288_v31 = vld [vmem:[%s19721_s14 + $0x3398] sm:$0xff] }
 0x751   : > { %v17833_v18 = vcombine.high %v2287_v1, %v2291_v17  ;;  %v17832_v21 = vcombine.low %v2287_v1, %v2291_v17  ;;  %v17834_v32 = vcombine.low %v2288_v31, %v2292_v59  ;;  %v2343_v2 = vld [vmem:[%s19721_s14 + $0x3550] sm:$0xff] }
 0x753   : > { %12658 = vmatpush1.bf16.msra.mxu0 %v17768_v35  ;;  %13232 = vmatpush1.bf16.msra.mxu1 %v17770_v16  ;;  %v17835_v35 = vcombine.high %v2288_v31, %v2292_v59  ;;  %v2295_v16 = vld [vmem:[%s19721_s14 + $0x33d0] sm:$0xff] }
 0x754   : > { %12659 = vmatprep.subr.bf16.mxu0 %v17777_v15  ;;  %13233 = vmatprep.subr.bf16.mxu1 %v17779_v60  ;;  %v2299_v15 = vld [vmem:[%s19721_s14 + $0x33f0] sm:$0xff]  ;;  %v2296_v60 = vld [vmem:[%s19721_s14 + $0x33d8] sm:$0xff] }
 0x755   : > { %v17841_v22 = vcombine.high %v2295_v16, %v2299_v15  ;;  %v17840_v49 = vcombine.low %v2295_v16, %v2299_v15  ;;  %v17842_v42 = vcombine.low %v2296_v60, %v2300_v43  ;;  %v2351_v59 = vld [vmem:[%s19721_s14 + $0x3590] sm:$0xff] }
 0x757   : > { %12660 = vmatpush1.bf16.msra.mxu0 %v17776_v25  ;;  %13234 = vmatpush1.bf16.msra.mxu1 %v17778_v40  ;;  %v17843_v25 = vcombine.high %v2296_v60, %v2300_v43  ;;  %v2303_v40 = vld [vmem:[%s19721_s14 + $0x3410] sm:$0xff] }
 0x758   : > { %12661 = vmatprep.subr.bf16.mxu0 %v17785_v28  ;;  %13235 = vmatprep.subr.bf16.mxu1 %v17787_v33  ;;  %v2307_v28 = vld [vmem:[%s19721_s14 + $0x3430] sm:$0xff]  ;;  %v2304_v33 = vld [vmem:[%s19721_s14 + $0x3418] sm:$0xff] }
 0x759   : > { %v17849_v37 = vcombine.high %v2303_v40, %v2307_v28  ;;  %v17848_v10 = vcombine.low %v2303_v40, %v2307_v28  ;;  %v17850_v61 = vcombine.low %v2304_v33, %v2308_v14  ;;  %v2359_v43 = vld [vmem:[%s19721_s14 + $0x35d0] sm:$0xff] }
 0x75b   : > { %12662 = vmatpush1.bf16.msra.mxu0 %v17784_v4  ;;  %13236 = vmatpush1.bf16.msra.mxu1 %v17786_v36  ;;  %v17851_v4 = vcombine.high %v2304_v33, %v2308_v14  ;;  %v2311_v36 = vld [vmem:[%s19721_s14 + $0x3450] sm:$0xff] }
 0x75c   : > { %12663 = vmatprep.subr.bf16.mxu0 %v17793_v63  ;;  %13237 = vmatprep.subr.bf16.mxu1 %v17795_v38  ;;  %v2315_v63 = vld [vmem:[%s19721_s14 + $0x3470] sm:$0xff]  ;;  %v2312_v38 = vld [vmem:[%s19721_s14 + $0x3458] sm:$0xff] }
 0x75d   : > { %v17857_v56 = vcombine.high %v2311_v36, %v2315_v63  ;;  %v17856_v6 = vcombine.low %v2311_v36, %v2315_v63  ;;  %v17858_v44 = vcombine.low %v2312_v38, %v2316_v29 }
 0x75f   : > { %12664 = vmatpush1.bf16.msra.mxu0 %v17792_v52  ;;  %13238 = vmatpush1.bf16.msra.mxu1 %v17794_v27  ;;  %v17859_v52 = vcombine.high %v2312_v38, %v2316_v29  ;;  %v2319_v27 = vld [vmem:[%s19721_s14 + $0x3490] sm:$0xff] }
 0x760   : > { %12665 = vmatprep.subr.bf16.mxu0 %v17801_v50  ;;  %13239 = vmatprep.subr.bf16.mxu1 %v17803_v20  ;;  %v2323_v50 = vld [vmem:[%s19721_s14 + $0x34b0] sm:$0xff]  ;;  %v2320_v20 = vld [vmem:[%s19721_s14 + $0x3498] sm:$0xff] }
 0x761   : > { %v17865_v19 = vcombine.high %v2319_v27, %v2323_v50  ;;  %v17866_v39 = vcombine.low %v2320_v20, %v2324_v3 }
 0x763   : > { %12666 = vmatpush1.bf16.msra.mxu0 %v17800_v46  ;;  %13240 = vmatpush1.bf16.msra.mxu1 %v17802_v47  ;;  %v17867_v46 = vcombine.high %v2320_v20, %v2324_v3  ;;  %v2327_v47 = vld [vmem:[%s19721_s14 + $0x34d0] sm:$0xff] }
 0x764   : > { %12667 = vmatprep.subr.bf16.mxu0 %v17809_v48  ;;  %13241 = vmatprep.subr.bf16.mxu1 %v17811_v53  ;;  %v2331_v48 = vld [vmem:[%s19721_s14 + $0x34f0] sm:$0xff]  ;;  %v2328_v53 = vld [vmem:[%s19721_s14 + $0x34d8] sm:$0xff] }
 0x765   : > { %v17873_v11 = vcombine.high %v2327_v47, %v2331_v48  ;;  %v17875_v24 = vcombine.high %v2328_v53, %v2332_v34  ;;  %v17872_v41 = vcombine.low %v2327_v47, %v2331_v48  ;;  %v18648_v47 = vld [vmem:[#allocation8 + $0x224] ss:$16 sps:$4 sm:$0xff] (!%p17908_p9)   ;;  %v18650_v48 = vld [vmem:[#allocation8 + $0x20] ss:$16 sps:$4 sm:$0xff] (!%p17908_p9)  }
 0x767   : > { %12668 = vmatpush1.bf16.msra.mxu0 %v17808_v13  ;;  %13242 = vmatpush1.bf16.msra.mxu1 %v17810_v0  ;;  %v2335_v13 = vld [vmem:[%s19721_s14 + $0x3510] sm:$0xff] }
 0x768   : > { %12669 = vmatprep.subr.bf16.mxu0 %v17817_v58  ;;  %13243 = vmatprep.subr.bf16.mxu1 %v17819_v12  ;;  %v2339_v0 = vld [vmem:[%s19721_s14 + $0x3530] sm:$0xff]  ;;  %v2336_v58 = vld [vmem:[%s19721_s14 + $0x3518] sm:$0xff] }
 0x769   : > { %v2340_v12 = vld [vmem:[%s19721_s14 + $0x3538] sm:$0xff]  ;;  %v17881_v62 = vcombine.high %v2335_v13, %v2339_v0 }
 0x76a   : > { %v17883_v26 = vcombine.high %v2336_v58, %v2340_v12  ;;  %v17882_v1 = vcombine.low %v2336_v58, %v2340_v12  ;;  %v18663_v58 = vld [vmem:[#allocation8 + $0x260] ss:$16 sps:$4 sm:$0xff] (!%p17908_p9)   ;;  %v18664_v12 = vld [vmem:[#allocation8 + $0x84] ss:$16 sps:$4 sm:$0xff] (!%p17908_p9)  }
 0x76b   : > { %12670 = vmatpush1.bf16.msra.mxu0 %v17816_v5  ;;  %13244 = vmatpush1.bf16.msra.mxu1 %v17818_v57  ;;  %v2347_v5 = vld [vmem:[%s19721_s14 + $0x3570] sm:$0xff]  ;;  %v2344_v57 = vld [vmem:[%s19721_s14 + $0x3558] sm:$0xff] }
 0x76c   : > { %12671 = vmatprep.subr.bf16.mxu0 %v17825_v7  ;;  %13245 = vmatprep.subr.bf16.mxu1 %v17827_v8  ;;  %v2348_v7 = vld [vmem:[%s19721_s14 + $0x3578] sm:$0xff]  ;;  %v17880_v8 = vcombine.low %v2335_v13, %v2339_v0  ;;  %v17889_v17 = vcombine.high %v2343_v2, %v2347_v5 }
 0x76d   : > { %v17891_v31 = vcombine.high %v2344_v57, %v2348_v7  ;;  %v17890_v16 = vcombine.low %v2344_v57, %v2348_v7  ;;  %v18660_v13 = vld [vmem:[#allocation8 + $0x264] ss:$16 sps:$4 sm:$0xff] (!%p17908_p9)   ;;  %v18662_v0 = vld [vmem:[#allocation8 + $0x60] ss:$16 sps:$4 sm:$0xff] (!%p17908_p9)  }
 0x76e   : > { %v18675_v57 = vld [vmem:[#allocation8 + $0x2a0] ss:$16 sps:$4 sm:$0xff] (!%p17908_p9)   ;;  %v18676_v7 = vld [vmem:[#allocation8 + $0xc4] ss:$16 sps:$4 sm:$0xff] (!%p17908_p9)  }
 0x76f   : > { %12672 = vmatpush1.bf16.msra.mxu0 %v17824_v30  ;;  %13246 = vmatpush1.bf16.msra.mxu1 %v17826_v9  ;;  %v2355_v30 = vld [vmem:[%s19721_s14 + $0x35b0] sm:$0xff]  ;;  %v2352_v9 = vld [vmem:[%s19721_s14 + $0x3598] sm:$0xff] }
 0x770   : > { %12673 = vmatprep.subr.bf16.mxu0 %v17833_v18  ;;  %13247 = vmatprep.subr.bf16.mxu1 %v17835_v35  ;;  %v2356_v18 = vld [vmem:[%s19721_s14 + $0x35b8] sm:$0xff]  ;;  %v17888_v35 = vcombine.low %v2343_v2, %v2347_v5  ;;  %v17897_v15 = vcombine.high %v2351_v59, %v2355_v30 }
 0x771   : > { %v17899_v60 = vcombine.high %v2352_v9, %v2356_v18  ;;  %v17898_v40 = vcombine.low %v2352_v9, %v2356_v18  ;;  %v18672_v2 = vld [vmem:[#allocation8 + $0x2a4] ss:$16 sps:$4 sm:$0xff] (!%p17908_p9)   ;;  %v18674_v5 = vld [vmem:[#allocation8 + $0xa0] ss:$16 sps:$4 sm:$0xff] (!%p17908_p9)  }
 0x772   : > { %v18687_v9 = vld [vmem:[#allocation8 + $0x2e0] ss:$16 sps:$4 sm:$0xff] (!%p17908_p9)   ;;  %v18688_v18 = vld [vmem:[#allocation8 + $0x104] ss:$16 sps:$4 sm:$0xff] (!%p17908_p9)  }
 0x773   : > { %12674 = vmatpush1.bf16.msra.mxu0 %v17832_v21  ;;  %13248 = vmatpush1.bf16.msra.mxu1 %v17834_v32  ;;  %v2363_v21 = vld [vmem:[%s19721_s14 + $0x35f0] sm:$0xff]  ;;  %v2360_v32 = vld [vmem:[%s19721_s14 + $0x35d8] sm:$0xff] }
 0x774   : > { %12675 = vmatprep.subr.bf16.mxu0 %v17841_v22  ;;  %13249 = vmatprep.subr.bf16.mxu1 %v17843_v25  ;;  %v2364_v22 = vld [vmem:[%s19721_s14 + $0x35f8] sm:$0xff]  ;;  %v17896_v25 = vcombine.low %v2351_v59, %v2355_v30  ;;  %v17905_v28 = vcombine.high %v2359_v43, %v2363_v21  ;;  %v17904_v14 = vcombine.low %v2359_v43, %v2363_v21 }
 0x775   : > { %v17907_v33 = vcombine.high %v2360_v32, %v2364_v22  ;;  %v18684_v59 = vld [vmem:[#allocation8 + $0x2e4] ss:$16 sps:$4 sm:$0xff] (!%p17908_p9)   ;;  %v18686_v30 = vld [vmem:[#allocation8 + $0xe0] ss:$16 sps:$4 sm:$0xff] (!%p17908_p9)  }
 0x776   : > { %v18696_v43 = vld [vmem:[#allocation8 + $0x324] ss:$16 sps:$4 sm:$0xff] (!%p17908_p9)   ;;  %v18698_v21 = vld [vmem:[#allocation8 + $0x120] ss:$16 sps:$4 sm:$0xff] (!%p17908_p9)  }
 0x777   : > { %12676 = vmatpush1.bf16.msra.mxu0 %v17840_v49  ;;  %13250 = vmatpush1.bf16.msra.mxu1 %v17842_v42  ;;  %v17906_v49 = vcombine.low %v2360_v32, %v2364_v22  ;;  %v18699_v32 = vld [vmem:[#allocation8 + $0x320] ss:$16 sps:$4 sm:$0xff] (!%p17908_p9)   ;;  %v18700_v22 = vld [vmem:[#allocation8 + $0x144] ss:$16 sps:$4 sm:$0xff] (!%p17908_p9)  }
 0x778   : > { %12686 = vmatprep.subr.bf16.mxu0 %v17849_v37  ;;  %13260 = vmatprep.subr.bf16.mxu1 %v17851_v4 }
 0x77a   : > { %12678 = vmatmul.mubr.bf16.vlgmr.msra.gmra.mrb[4].mxu0 %v20821_v55  ;;  %13252 = vmatmul.mubr.bf16.vlgmr.msra.gmra.mrb[4].mxu1 %v20821_v55  ;;  %v17864_v55 = vcombine.low %v2319_v27, %v2323_v50  ;;  %v450_v50 = vld [vmem:[#allocation2 + $0x8] sm:$0xff] }
 0x77b   : > { %12687 = vmatpush1.bf16.msra.mxu0 %v17848_v10  ;;  %13261 = vmatpush1.bf16.msra.mxu1 %v17850_v61 }
 0x77c   : > { %12688 = vmatprep.subr.bf16.mxu0 %v17857_v56  ;;  %13262 = vmatprep.subr.bf16.mxu1 %v17859_v52 }
 0x77d   : > { %12718 = vmatprep.mubr.bf16.mxu0 %v19427_v23  ;;  %13292 = vmatprep.mubr.bf16.mxu1 %v19427_v23  ;;  %v17874_v23 = vcombine.low %v2328_v53, %v2332_v34  ;;  %v18651_v53 = vld [vmem:[#allocation8 + $0x220] ss:$16 sps:$4 sm:$0xff] (!%p17908_p9)   ;;  %v18652_v34 = vld [vmem:[#allocation8 + $0x44] ss:$16 sps:$4 sm:$0xff] (!%p17908_p9)  }
 0x77f   : > { %12689 = vmatpush1.bf16.msra.mxu0 %v17856_v6  ;;  %13263 = vmatpush1.bf16.msra.mxu1 %v17858_v44  ;;  %v18642_v6 = vld [vmem:[#allocation8 + $0x204] ss:$16 sps:$4 sm:$0xff] (!%p17908_p9)   ;;  %v18644_v44 = vld [vmem:[#allocation8] ss:$16 sps:$4 sm:$0xff] (!%p17908_p9)  }
 0x780   : > { %12690 = vmatprep.subr.bf16.mxu0 %v17865_v19  ;;  %13264 = vmatprep.subr.bf16.mxu1 %v17867_v46  ;;  %v18645_v19 = vld [vmem:[#allocation8 + $0x200] ss:$16 sps:$4 sm:$0xff] (!%p17908_p9)   ;;  %v18646_v46 = vld [vmem:[#allocation8 + $0x24] ss:$16 sps:$4 sm:$0xff] (!%p17908_p9)  }
 0x783   : > { %12691 = vmatpush1.bf16.msra.mxu0 %v17864_v55  ;;  %13265 = vmatpush1.bf16.msra.mxu1 %v17866_v39  ;;  %v18654_v55 = vld [vmem:[#allocation8 + $0x244] ss:$16 sps:$4 sm:$0xff] (!%p17908_p9)   ;;  %v18656_v39 = vld [vmem:[#allocation8 + $0x40] ss:$16 sps:$4 sm:$0xff] (!%p17908_p9)  }
 0x784   : > { %12692 = vmatprep.subr.bf16.mxu0 %v17873_v11  ;;  %13266 = vmatprep.subr.bf16.mxu1 %v17875_v24  ;;  %v18657_v11 = vld [vmem:[#allocation8 + $0x240] ss:$16 sps:$4 sm:$0xff] (!%p17908_p9)   ;;  %v18658_v24 = vld [vmem:[#allocation8 + $0x64] ss:$16 sps:$4 sm:$0xff] (!%p17908_p9)  }
 0x787   : > { %12693 = vmatpush1.bf16.msra.mxu0 %v17872_v41  ;;  %13267 = vmatpush1.bf16.msra.mxu1 %v17874_v23  ;;  %v18666_v41 = vld [vmem:[#allocation8 + $0x284] ss:$16 sps:$4 sm:$0xff] (!%p17908_p9)   ;;  %v18668_v23 = vld [vmem:[#allocation8 + $0x80] ss:$16 sps:$4 sm:$0xff] (!%p17908_p9)  }
 0x788   : > { %12694 = vmatprep.subr.bf16.mxu0 %v17881_v62  ;;  %13268 = vmatprep.subr.bf16.mxu1 %v17883_v26  ;;  %v18669_v62 = vld [vmem:[#allocation8 + $0x280] ss:$16 sps:$4 sm:$0xff] (!%p17908_p9)   ;;  %v18670_v26 = vld [vmem:[#allocation8 + $0xa4] ss:$16 sps:$4 sm:$0xff] (!%p17908_p9)  }
 0x78b   : > { %12695 = vmatpush1.bf16.msra.mxu0 %v17880_v8  ;;  %13269 = vmatpush1.bf16.msra.mxu1 %v17882_v1  ;;  %v18678_v8 = vld [vmem:[#allocation8 + $0x2c4] ss:$16 sps:$4 sm:$0xff] (!%p17908_p9)   ;;  %v18680_v1 = vld [vmem:[#allocation8 + $0xc0] ss:$16 sps:$4 sm:$0xff] (!%p17908_p9)  }
 0x78c   : > { %12696 = vmatprep.subr.bf16.mxu0 %v17889_v17  ;;  %13270 = vmatprep.subr.bf16.mxu1 %v17891_v31  ;;  %v18681_v17 = vld [vmem:[#allocation8 + $0x2c0] ss:$16 sps:$4 sm:$0xff] (!%p17908_p9)   ;;  %v18682_v31 = vld [vmem:[#allocation8 + $0xe4] ss:$16 sps:$4 sm:$0xff] (!%p17908_p9)  }
 0x78f   : > { %12697 = vmatpush1.bf16.msra.mxu0 %v17888_v35  ;;  %13271 = vmatpush1.bf16.msra.mxu1 %v17890_v16  ;;  %v18690_v35 = vld [vmem:[#allocation8 + $0x304] ss:$16 sps:$4 sm:$0xff] (!%p17908_p9)   ;;  %v18692_v16 = vld [vmem:[#allocation8 + $0x100] ss:$16 sps:$4 sm:$0xff] (!%p17908_p9)  }
 0x790   : > { %12698 = vmatprep.subr.bf16.mxu0 %v17897_v15  ;;  %13272 = vmatprep.subr.bf16.mxu1 %v17899_v60  ;;  %v18693_v15 = vld [vmem:[#allocation8 + $0x300] ss:$16 sps:$4 sm:$0xff] (!%p17908_p9)   ;;  %v18694_v60 = vld [vmem:[#allocation8 + $0x124] ss:$16 sps:$4 sm:$0xff] (!%p17908_p9)  }
 0x793   : > { %12699 = vmatpush1.bf16.msra.mxu0 %v17896_v25  ;;  %13273 = vmatpush1.bf16.msra.mxu1 %v17898_v40  ;;  %v18702_v25 = vld [vmem:[#allocation8 + $0x344] ss:$16 sps:$4 sm:$0xff] (!%p17908_p9)   ;;  %v18704_v40 = vld [vmem:[#allocation8 + $0x140] ss:$16 sps:$4 sm:$0xff] (!%p17908_p9)  }
 0x794   : > { %12700 = vmatprep.subr.bf16.mxu0 %v17905_v28  ;;  %13274 = vmatprep.subr.bf16.mxu1 %v17907_v33  ;;  %v18705_v28 = vld [vmem:[#allocation8 + $0x340] ss:$16 sps:$4 sm:$0xff] (!%p17908_p9)   ;;  %v21786_v33 = vsub.s32 (!%p17908_p9), 0, %v19769_v45 }
 0x797   : > { %12701 = vmatpush1.bf16.msra.mxu0 %v17904_v14  ;;  %13275 = vmatpush1.bf16.msra.mxu1 %v17906_v49  ;;  %v18706_v14 = vld [vmem:[#allocation8 + $0x164] ss:$16 sps:$4 sm:$0xff] (!%p17908_p9)   ;;  %v21789_v49 = vsub.s32 (!%p17908_p9), 1, %v19769_v45 }
 0x798   : > { %15080 = vmatprep.subr.bf16.mxu0 (!%p17908_p9), %v18642_v6 }
 0x79a   : > { %12719 = vmatmul.mubr.bf16.vlgmr.msra.gmra.mrb[4].mxu0 %v20862_v51  ;;  %13293 = vmatmul.mubr.bf16.vlgmr.msra.gmra.mrb[4].mxu1 %v20862_v51  ;;  %v18640_v51 = vld [vmem:[#allocation8 + $0x4] ss:$16 sps:$4 sm:$0xff] (!%p17908_p9)  }
 0x79b   : > { %15039 = vmatprep.subr.bf16.mxu1 (!%p17908_p9), %v18640_v51  ;;  %15081 = vmatpush1.bf16.msra.mxu0 (!%p17908_p9), %v18645_v19  ;;  %v18717_v51 = vld [vmem:[#allocation8 + $0x380] ss:$16 sps:$4 sm:$0xff] (!%p17908_p9)   ;;  %v18720_v19 = vld [vmem:[#allocation8 + $0x3a4] ss:$16 sps:$4 sm:$0xff] (!%p17908_p9)  }
 0x79c   : > { %15040 = vmatpush1.bf16.msra.mxu1 (!%p17908_p9), %v18644_v44  ;;  %15082 = vmatprep.subr.bf16.mxu0 (!%p17908_p9), %v18648_v47  ;;  %v18718_v44 = vld [vmem:[#allocation8 + $0x1a4] ss:$16 sps:$4 sm:$0xff] (!%p17908_p9)   ;;  %v13353_v47 = vld [vmem:[#allocation2] sm:$0xff] (!%p17908_p9) }
 0x79d   : > { %15041 = vmatprep.subr.bf16.mxu1 (!%p17908_p9), %v18646_v46 }
 0x79f   : > { %15083 = vmatpush1.bf16.msra.mxu0 (!%p17908_p9), %v18651_v53  ;;  %v18722_v53 = vld [vmem:[#allocation8 + $0x1a0] ss:$16 sps:$4 sm:$0xff] (!%p17908_p9)  }
 0x7a0   : > { %15042 = vmatpush1.bf16.msra.mxu1 (!%p17908_p9), %v18650_v48  ;;  %15084 = vmatprep.subr.bf16.mxu0 (!%p17908_p9), %v18654_v55  ;;  %v18724_v55 = vld [vmem:[#allocation8 + $0x1c4] ss:$16 sps:$4 sm:$0xff] (!%p17908_p9)  }
 0x7a1   : > { %15043 = vmatprep.subr.bf16.mxu1 (!%p17908_p9), %v18652_v34  ;;  %v18723_v34 = vld [vmem:[#allocation8 + $0x3a0] ss:$16 sps:$4 sm:$0xff] (!%p17908_p9)  }
 0x7a3   : > { %15085 = vmatpush1.bf16.msra.mxu0 (!%p17908_p9), %v18657_v11 }
 0x7a4   : > { %15044 = vmatpush1.bf16.msra.mxu1 (!%p17908_p9), %v18656_v39  ;;  %15086 = vmatprep.subr.bf16.mxu0 (!%p17908_p9), %v18660_v13  ;;  %v18726_v39 = vld [vmem:[#allocation8 + $0x3c4] ss:$16 sps:$4 sm:$0xff] (!%p17908_p9)   ;;  %v18728_v13 = vld [vmem:[#allocation8 + $0x1c0] ss:$16 sps:$4 sm:$0xff] (!%p17908_p9)  }
 0x7a5   : > { %15045 = vmatprep.subr.bf16.mxu1 (!%p17908_p9), %v18658_v24 }
 0x7a7   : > { %15087 = vmatpush1.bf16.msra.mxu0 (!%p17908_p9), %v18663_v58  ;;  %v18730_v58 = vld [vmem:[#allocation8 + $0x1e4] ss:$16 sps:$4 sm:$0xff] (!%p17908_p9)  }
 0x7a8   : > { %15046 = vmatpush1.bf16.msra.mxu1 (!%p17908_p9), %v18662_v0  ;;  %15088 = vmatprep.subr.bf16.mxu0 (!%p17908_p9), %v18666_v41  ;;  %v18729_v0 = vld [vmem:[#allocation8 + $0x3c0] ss:$16 sps:$4 sm:$0xff] (!%p17908_p9)  }
 0x7a9   : > { %15047 = vmatprep.subr.bf16.mxu1 (!%p17908_p9), %v18664_v12  ;;  %v18732_v12 = vld [vmem:[#allocation8 + $0x3e4] ss:$16 sps:$4 sm:$0xff] (!%p17908_p9)  }
 0x7ab   : > { %15089 = vmatpush1.bf16.msra.mxu0 (!%p17908_p9), %v18669_v62 }
 0x7ac   : > { %15048 = vmatpush1.bf16.msra.mxu1 (!%p17908_p9), %v18668_v23  ;;  %15090 = vmatprep.subr.bf16.mxu0 (!%p17908_p9), %v18672_v2  ;;  %v18734_v2 = vld [vmem:[#allocation8 + $0x1e0] ss:$16 sps:$4 sm:$0xff] (!%p17908_p9)  }
 0x7ad   : > { %15049 = vmatprep.subr.bf16.mxu1 (!%p17908_p9), %v18670_v26 }
 0x7af   : > { %15091 = vmatpush1.bf16.msra.mxu0 (!%p17908_p9), %v18675_v57 }
 0x7b0   : > { %15050 = vmatpush1.bf16.msra.mxu1 (!%p17908_p9), %v18674_v5  ;;  %15092 = vmatprep.subr.bf16.mxu0 (!%p17908_p9), %v18678_v8  ;;  %v18735_v5 = vld [vmem:[#allocation8 + $0x3e0] ss:$16 sps:$4 sm:$0xff] (!%p17908_p9)   ;;  %v18738_v8 = vld [vmem:[#allocation8 + $0x404] ss:$16 sps:$4 sm:$0xff] (!%p17908_p9)  }
 0x7b1   : > { %15051 = vmatprep.subr.bf16.mxu1 (!%p17908_p9), %v18676_v7 }
 0x7b3   : > { %15093 = vmatpush1.bf16.msra.mxu0 (!%p17908_p9), %v18681_v17 }
 0x7b4   : > { %15052 = vmatpush1.bf16.msra.mxu1 (!%p17908_p9), %v18680_v1  ;;  %15094 = vmatprep.subr.bf16.mxu0 (!%p17908_p9), %v18684_v59  ;;  %v18741_v1 = vld [vmem:[#allocation8 + $0xc] ss:$16 sps:$4 sm:$0xff] (!%p17908_p9)  }
 0x7b5   : > { %15053 = vmatprep.subr.bf16.mxu1 (!%p17908_p9), %v18682_v31 }
 0x7b7   : > { %15095 = vmatpush1.bf16.msra.mxu0 (!%p17908_p9), %v18687_v9  ;;  %v18739_v9 = vld [vmem:[#allocation8 + $0x8] ss:$16 sps:$4 sm:$0xff] (!%p17908_p9)  }
 0x7b8   : > { %15054 = vmatpush1.bf16.msra.mxu1 (!%p17908_p9), %v18686_v30  ;;  %15096 = vmatprep.subr.bf16.mxu0 (!%p17908_p9), %v18690_v35  ;;  %v18736_v30 = vld [vmem:[#allocation8 + $0x400] ss:$16 sps:$4 sm:$0xff] (!%p17908_p9)   ;;  %v18747_v35 = vld [vmem:[#allocation8 + $0x2c] ss:$16 sps:$4 sm:$0xff] (!%p17908_p9)  }
 0x7b9   : > { %15055 = vmatprep.subr.bf16.mxu1 (!%p17908_p9), %v18688_v18  ;;  %v18744_v18 = vld [vmem:[#allocation8 + $0x424] ss:$16 sps:$4 sm:$0xff] (!%p17908_p9)  }
 0x7bb   : > { %15097 = vmatpush1.bf16.msra.mxu0 (!%p17908_p9), %v18693_v15  ;;  %v13379_v15 = vsub.s32 (!%p17908_p9), 5, %v19769_v45 }
 0x7bc   : > { %15056 = vmatpush1.bf16.msra.mxu1 (!%p17908_p9), %v18692_v16  ;;  %15098 = vmatprep.subr.bf16.mxu0 (!%p17908_p9), %v18696_v43  ;;  %v13375_v16 = vsub.s32 (!%p17908_p9), 4, %v19769_v45  ;;  %v13387_v43 = vsub.s32 (!%p17908_p9), 7, %v19769_v45 }
 0x7bd   : > { %15057 = vmatprep.subr.bf16.mxu1 (!%p17908_p9), %v18694_v60  ;;  %v13383_v60 = vsub.s32 (!%p17908_p9), 6, %v19769_v45 }
 0x7bf   : > { %15099 = vmatpush1.bf16.msra.mxu0 (!%p17908_p9), %v18699_v32  ;;  %v18745_v32 = vld [vmem:[#allocation8 + $0x28] ss:$16 sps:$4 sm:$0xff] (!%p17908_p9)  }
 0x7c0   : > { %15058 = vmatpush1.bf16.msra.mxu1 (!%p17908_p9), %v18698_v21  ;;  %15100 = vmatprep.subr.bf16.mxu0 (!%p17908_p9), %v18702_v25  ;;  %v18742_v21 = vld [vmem:[#allocation8 + $0x420] ss:$16 sps:$4 sm:$0xff] (!%p17908_p9)   ;;  %v18753_v25 = vld [vmem:[#allocation8 + $0x4c] ss:$16 sps:$4 sm:$0xff] (!%p17908_p9)  }
 0x7c1   : > { %15059 = vmatprep.subr.bf16.mxu1 (!%p17908_p9), %v18700_v22  ;;  %v18750_v22 = vld [vmem:[#allocation8 + $0x444] ss:$16 sps:$4 sm:$0xff] (!%p17908_p9)  }
 0x7c3   : > { %15101 = vmatpush1.bf16.msra.mxu0 (!%p17908_p9), %v18705_v28 }
 0x7c4   : > { %15060 = vmatpush1.bf16.msra.mxu1 (!%p17908_p9), %v18704_v40 }
 0x7c5   : > { %15061 = vmatprep.subr.bf16.mxu1 (!%p17908_p9), %v18706_v14 }
 0x86d   : > { %v12720_v42 = vpop.f32.mrb[4].mxu0  ;;  %v13294_v37 = vpop.f32.mrb[4].mxu1 }
 0x86e   : > { %v12722_v4 = vpop.f32.mrb[5].mxu0  ;;  %v13296_v63 = vpop.f32.mrb[5].mxu1 }
 0x86f   : > { %v13326_v36 = vcombine.low %v12720_v42, %v12722_v4  ;;  %v12724_v38 = vpop.f32.mrb[6].mxu0  ;;  %v13327_v29 = vcombine.low %v13294_v37, %v13296_v63  ;;  %v13298_v10 = vpop.f32.mrb[6].mxu1  ;;  %v13367_v42 = vsub.s32 (!%p17908_p9), 2, %v19769_v45  ;;  %v18708_v37 = vld [vmem:[#allocation8 + $0x364] ss:$16 sps:$4 sm:$0xff] (!%p17908_p9)   ;;  %v13371_v4 = vsub.s32 (!%p17908_p9), 3, %v19769_v45 }
 0x870   : > { %v12725_v61 = vpop.f32.mrb[7].mxu0  ;;  %v13299_v52 = vpop.f32.mrb[7].mxu1  ;;  %v18710_v63 = vld [vmem:[#allocation8 + $0x160] ss:$16 sps:$4 sm:$0xff] (!%p17908_p9)   ;;  %15102 = vmatprep.subr.bf16.mxu0 (!%p17908_p9), %v18708_v37  ;;  %v19133_v45 = vld [vmem:[%s21971_s7 + $0x30] sm:$0xff] (!%p17908_p9)  }
 0x871   : > { %v13334_v56 = vrot.slane %v13326_v36, %v19776_v54  ;;  %v13341_v27 = vrot.slane %v13327_v29, %v19776_v54  ;;  %13352 = sbr.rel (%p17908_p9) target bundleno = 3097 (0xc19), region = 92  ;;  %v21793_v36 = vld [vmem:[#allocation6] sm:$0xff] (!%p17908_p9)  ;;  %v18711_v38 = vld [vmem:[#allocation8 + $0x360] ss:$16 sps:$4 sm:$0xff] (!%p17908_p9)   ;;  %v18714_v52 = vld [vmem:[#allocation8 + $0x384] ss:$16 sps:$4 sm:$0xff] (!%p17908_p9)   ;;  %15062 = vmatpush1.bf16.msra.mxu1 (!%p17908_p9), %v18710_v63 }
 0x872   : > { %v13360_v29 = vrot.slane (!%p17908_p9), %v21793_v36, %v21786_v33  ;;  %v13364_v10 = vrot.slane (!%p17908_p9), %v21793_v36, %v21789_v49  ;;  %v13368_v61 = vrot.slane (!%p17908_p9), %v21793_v36, %v13367_v42  ;;  %15103 = vmatpush1.bf16.msra.mxu0 (!%p17908_p9), %v18711_v38  ;;  %v13376_v40 = vrot.slane (!%p17908_p9), %v21793_v36, %v13375_v16  ;;  %v18748_v63 = vld [vmem:[#allocation8 + $0x440] ss:$16 sps:$4 sm:$0xff] (!%p17908_p9)   ;;  %v18751_v38 = vld [vmem:[#allocation8 + $0x48] ss:$16 sps:$4 sm:$0xff] (!%p17908_p9)  }
 0x873   : > { %v13342_v20 = vcombine.low %v13334_v56, %v13341_v27  ;;  %v18712_v56 = vld [vmem:[#allocation8 + $0x184] ss:$16 sps:$4 sm:$0xff] (!%p17908_p9)   ;;  %v13372_v27 = vrot.slane (!%p17908_p9), %v21793_v36, %v13371_v4  ;;  %15104 = vmatprep.subr.bf16.mxu0 (!%p17908_p9), %v18714_v52  ;;  %v13380_v28 = vrot.slane (!%p17908_p9), %v21793_v36, %v13379_v15  ;;  %v13384_v14 = vrot.slane (!%p17908_p9), %v21793_v36, %v13383_v60  ;;  %v18754_v52 = vld [vmem:[#allocation8 + $0x460] ss:$16 sps:$4 sm:$0xff] (!%p17908_p9)   ;;  %v18799_v15 = vld [vmem:[#allocation8 + $0x148] ss:$16 sps:$4 sm:$0xff] (!%p17908_p9)  }
 0x874   : > { %15063 = vmatprep.subr.bf16.mxu1 (!%p17908_p9), %v18712_v56  ;;  %v13388_v37 = vrot.slane (!%p17908_p9), %v21793_v36, %v13387_v43  ;;  %v18796_v16 = vld [vmem:[#allocation8 + $0x540] ss:$16 sps:$4 sm:$0xff] (!%p17908_p9)   ;;  %v18804_v60 = vld [vmem:[#allocation8 + $0x564] ss:$16 sps:$4 sm:$0xff] (!%p17908_p9)   ;;  %v18807_v43 = vld [vmem:[#allocation8 + $0x16c] ss:$16 sps:$4 sm:$0xff] (!%p17908_p9)  }
 0x875   : > { %v13346_v3 = vadd.f32 %v13342_v20, %v450_v50  ;;  %v13389_v50 = vcombine.low (!%p17908_p9), %v13360_v29, %v13364_v10  ;;  %v13390_v20 = vcombine.low (!%p17908_p9), %v13368_v61, %v13372_v27  ;;  %v18756_v29 = vld [vmem:[#allocation8 + $0x464] ss:$16 sps:$4 sm:$0xff] (!%p17908_p9)   ;;  %v18759_v10 = vld [vmem:[#allocation8 + $0x6c] ss:$16 sps:$4 sm:$0xff] (!%p17908_p9)   ;;  %v13406_v61 = vcombine.low (!%p17908_p9), %v13376_v40, %v13380_v28  ;;  %v18757_v27 = vld [vmem:[#allocation8 + $0x68] ss:$16 sps:$4 sm:$0xff] (!%p17908_p9)  }
 0x876   : > { %15105 = vmatpush1.bf16.msra.mxu0 (!%p17908_p9), %v18717_v51  ;;  %v13407_v56 = vcombine.low (!%p17908_p9), %v13384_v14, %v13388_v37  ;;  %v18760_v51 = vld [vmem:[#allocation8 + $0x480] ss:$16 sps:$4 sm:$0xff] (!%p17908_p9)   ;;  %v18811_v28 = vld [vmem:[#allocation8 + $0x188] ss:$16 sps:$4 sm:$0xff] (!%p17908_p9)   ;;  %v18816_v14 = vld [vmem:[#allocation8 + $0x5a4] ss:$16 sps:$4 sm:$0xff] (!%p17908_p9)  }
 0x877   : > { %13348 = vst [vmem:[#allocation2 + $0x8] sm:$0xff] %v13346_v3  ;;  %v18716_v3 = vld [vmem:[#allocation8 + $0x180] ss:$16 sps:$4 sm:$0xff] (!%p17908_p9)   ;;  %v13397_v6 = vrot.slane (!%p17908_p9), %v13389_v50, %v19776_v54  ;;  %v13404_v46 = vrot.slane (!%p17908_p9), %v13390_v20, %v19776_v54  ;;  %15106 = vmatprep.subr.bf16.mxu0 (!%p17908_p9), %v18720_v19  ;;  %v18762_v50 = vld [vmem:[#allocation8 + $0x484] ss:$16 sps:$4 sm:$0xff] (!%p17908_p9)   ;;  %v13414_v36 = vrot.slane (!%p17908_p9), %v13406_v61, %v19776_v54 }
 0x878   : > { %15064 = vmatpush1.bf16.msra.mxu1 %v18716_v3  ;;  %v18765_v20 = vld [vmem:[#allocation8 + $0x8c] ss:$16 sps:$4 sm:$0xff]   ;;  %v13421_v3 = vrot.slane %v13407_v56, %v19776_v54  ;;  %v18808_v40 = vld [vmem:[#allocation8 + $0x580] ss:$16 sps:$4 sm:$0xff]  }
 0x879   : > { %v13405_v48 = vcombine.low %v13397_v6, %v13404_v46  ;;  %15065 = vmatprep.subr.bf16.mxu1 %v18718_v44  ;;  %v18763_v6 = vld [vmem:[#allocation8 + $0x88] ss:$16 sps:$4 sm:$0xff]   ;;  %v18768_v44 = vld [vmem:[#allocation8 + $0x4a4] ss:$16 sps:$4 sm:$0xff]   ;;  %v18771_v19 = vld [vmem:[#allocation8 + $0xac] ss:$16 sps:$4 sm:$0xff]  }
 0x87a   : > { %15107 = vmatpush1.bf16.msra.mxu0 %v18723_v34  ;;  %v13422_v46 = vcombine.low %v13414_v36, %v13421_v3  ;;  %v18777_v34 = vld [vmem:[#allocation8 + $0xcc] ss:$16 sps:$4 sm:$0xff]   ;;  %v18820_v56 = vld [vmem:[#allocation8 + $0x5c0] ss:$16 sps:$4 sm:$0xff]   ;;  %v18829_v3 = vld [vmem:[#allocation8 + $0x1e8] ss:$16 sps:$4 sm:$0xff]  }
 0x87b   : > { %v13425_v11 = vadd.f32 %v13405_v48, %v13353_v47  ;;  %15108 = vmatprep.subr.bf16.mxu0 %v18726_v39  ;;  %v18766_v47 = vld [vmem:[#allocation8 + $0x4a0] ss:$16 sps:$4 sm:$0xff]   ;;  %v18769_v48 = vld [vmem:[#allocation8 + $0xa8] ss:$16 sps:$4 sm:$0xff]   ;;  %v18819_v37 = vld [vmem:[#allocation8 + $0x1ac] ss:$16 sps:$4 sm:$0xff]  }
 0x87c   : > { %15066 = vmatpush1.bf16.msra.mxu1 %v18722_v53  ;;  %v18774_v53 = vld [vmem:[#allocation8 + $0x4c4] ss:$16 sps:$4 sm:$0xff]   ;;  %v18772_v39 = vld [vmem:[#allocation8 + $0x4c0] ss:$16 sps:$4 sm:$0xff]  }
 0x87d   : > { %v13427_v24 = vmax.f32 %v13425_v11, 0.0  ;;  %15067 = vmatprep.subr.bf16.mxu1 %v18724_v55  ;;  %v18826_v36 = vld [vmem:[#allocation8 + $0x5e0] ss:$16 sps:$4 sm:$0xff]  }
 0x87e   : > { %15109 = vmatpush1.bf16.msra.mxu0 %v18729_v0  ;;  %v13354_v55 = vld [vmem:[#allocation2 + $0x8] sm:$0xff]  ;;  %v18783_v0 = vld [vmem:[#allocation8 + $0xec] ss:$16 sps:$4 sm:$0xff]  }
 0x87f   : > { %v13438_v41 = vrot.slane %v13427_v24, %v19776_v54  ;;  %v13431_v23 = vcombine.high %v13427_v24, %v13427_v24  ;;  %15110 = vmatprep.subr.bf16.mxu0 %v18732_v12  ;;  %v13426_v11 = vadd.f32 %v13422_v46, %v13354_v55  ;;  %v18775_v24 = vld [vmem:[#allocation8 + $0xc8] ss:$16 sps:$4 sm:$0xff]   ;;  %v18778_v12 = vld [vmem:[#allocation8 + $0x4e0] ss:$16 sps:$4 sm:$0xff]  }
 0x880   : > { %15068 = vmatpush1.bf16.msra.mxu1 %v18728_v13  ;;  %v18780_v13 = vld [vmem:[#allocation8 + $0x4e4] ss:$16 sps:$4 sm:$0xff]   ;;  %v18841_v55 = vld [vmem:[#allocation8 + $0x228] ss:$16 sps:$4 sm:$0xff]  }
 0x881   : > { %v13446_v62 = vcombine.high %v13438_v41, %v13438_v41  ;;  %v13445_v26 = vrot.slane %v13431_v23, %v19776_v54  ;;  %15069 = vmatprep.subr.bf16.mxu1 %v18730_v58  ;;  %v21809_v17 = vpack.c.bf16 %v13438_v41, %v13438_v41  ;;  %v21828_v58 = vmax.f32 %v13426_v11, 0.0  ;;  %v18781_v23 = vld [vmem:[#allocation8 + $0xe8] ss:$16 sps:$4 sm:$0xff]   ;;  %v18849_v11 = vld [vmem:[#allocation8 + $0x24c] ss:$16 sps:$4 sm:$0xff]  }
 0x882   : > { %15111 = vmatpush1.bf16.msra.mxu0 %v18735_v5  ;;  %v18784_v5 = vld [vmem:[#allocation8 + $0x500] ss:$16 sps:$4 sm:$0xff]  }
 0x883   : > { %v13474_v57 = vpack.c.bf16 %v13446_v62, %v13446_v62  ;;  %v13447_v7 = vcombine.high %v13445_v26, %v13445_v26  ;;  %v21813_v59 = vpack.c.bf16 %v13445_v26, %v13445_v26  ;;  %15121 = vmatprep.subr.bf16.mxu0 %v18738_v8  ;;  %v21832_v41 = vrot.slane %v21828_v58, %v19776_v54  ;;  %v18786_v62 = vld [vmem:[#allocation8 + $0x504] ss:$16 sps:$4 sm:$0xff]   ;;  %v18789_v26 = vld [vmem:[#allocation8 + $0x10c] ss:$16 sps:$4 sm:$0xff]  }
 0x884   : > { %15070 = vmatpush1.bf16.msra.mxu1 %v18734_v2  ;;  %v18792_v8 = vld [vmem:[#allocation8 + $0x524] ss:$16 sps:$4 sm:$0xff]   ;;  %v13448_v61 = vcombine.high %v21828_v58, %v21828_v58  ;;  %v18850_v58 = vld [vmem:[#allocation8 + $0x660] ss:$16 sps:$4 sm:$0xff]  }
 0x885   : > { %15071 = vmatprep.mubr.bf16.mxu1 %v13474_v57  ;;  %v21811_v31 = vpack.c.bf16 %v13447_v7, %v13447_v7  ;;  %15203 = vmatprep.subr.bf16.mxu1 %v18741_v1  ;;  %v13463_v2 = vcombine.high %v21832_v41, %v21832_v41  ;;  %v18787_v7 = vld [vmem:[#allocation8 + $0x108] ss:$16 sps:$4 sm:$0xff]   ;;  %v18795_v1 = vld [vmem:[#allocation8 + $0x12c] ss:$16 sps:$4 sm:$0xff]   ;;  %v21848_v46 = vpack.c.bf16 %v21832_v41, %v21832_v41  ;;  %v18858_v41 = vld [vmem:[#allocation8 + $0x684] ss:$16 sps:$4 sm:$0xff]  }
 0x887   : > { %15112 = vmatprep.mubr.bf16.mxu0 %v21811_v31  ;;  %15072 = vmatmul.mubr.bf16.vlgmr.msra.gmra.mrb[0].mxu1 %v21809_v17 }
 0x888   : > { %15113 = vmatmul.mubr.bf16.vlgmr.msra.gmra.mrb[0].mxu0 %v21813_v59  ;;  %15204 = vmatpush1.bf16.msra.mxu1 %v18739_v9  ;;  %v18793_v9 = vld [vmem:[#allocation8 + $0x128] ss:$16 sps:$4 sm:$0xff]  }
 0x889   : > { %15122 = vmatpush1.bf16.msra.mxu0 %v18736_v30  ;;  %15205 = vmatprep.subr.bf16.mxu1 %v18747_v35  ;;  %v18790_v30 = vld [vmem:[#allocation8 + $0x520] ss:$16 sps:$4 sm:$0xff]   ;;  %v18801_v35 = vld [vmem:[#allocation8 + $0x14c] ss:$16 sps:$4 sm:$0xff]  }
 0x88a   : > { %15123 = vmatprep.subr.bf16.mxu0 %v18744_v18  ;;  %15235 = vmatprep.mubr.bf16.mxu1 %v13474_v57  ;;  %v21836_v57 = vpack.c.bf16 %v13463_v2, %v13463_v2  ;;  %v18798_v18 = vld [vmem:[#allocation8 + $0x544] ss:$16 sps:$4 sm:$0xff]   ;;  %v18867_v2 = vld [vmem:[#allocation8 + $0x2ac] ss:$16 sps:$4 sm:$0xff]  }
 0x88c   : > { %15206 = vmatpush1.bf16.msra.mxu1 %v18745_v32  ;;  %15153 = vmatprep.mubr.bf16.mxu0 %v21836_v57  ;;  %v18805_v32 = vld [vmem:[#allocation8 + $0x168] ss:$16 sps:$4 sm:$0xff]  }
 0x88d   : > { %15124 = vmatpush1.bf16.msra.mxu0 %v18742_v21  ;;  %15207 = vmatprep.subr.bf16.mxu1 %v18753_v25  ;;  %v18802_v21 = vld [vmem:[#allocation8 + $0x560] ss:$16 sps:$4 sm:$0xff]   ;;  %v18813_v25 = vld [vmem:[#allocation8 + $0x18c] ss:$16 sps:$4 sm:$0xff]  }
 0x88e   : > { %15125 = vmatprep.subr.bf16.mxu0 %v18750_v22  ;;  %v18810_v22 = vld [vmem:[#allocation8 + $0x584] ss:$16 sps:$4 sm:$0xff]  }
 0x890   : > { %15208 = vmatpush1.bf16.msra.mxu1 %v18751_v38  ;;  %v18817_v38 = vld [vmem:[#allocation8 + $0x1a8] ss:$16 sps:$4 sm:$0xff]  }
 0x891   : > { %15126 = vmatpush1.bf16.msra.mxu0 %v18748_v63  ;;  %15209 = vmatprep.subr.bf16.mxu1 %v18759_v10  ;;  %v18814_v63 = vld [vmem:[#allocation8 + $0x5a0] ss:$16 sps:$4 sm:$0xff]   ;;  %v18825_v10 = vld [vmem:[#allocation8 + $0x1cc] ss:$16 sps:$4 sm:$0xff]  }
 0x892   : > { %15127 = vmatprep.subr.bf16.mxu0 %v18756_v29  ;;  %v18822_v29 = vld [vmem:[#allocation8 + $0x5c4] ss:$16 sps:$4 sm:$0xff]  }
 0x894   : > { %15210 = vmatpush1.bf16.msra.mxu1 %v18757_v27  ;;  %v18828_v27 = vld [vmem:[#allocation8 + $0x5e4] ss:$16 sps:$4 sm:$0xff]  }
 0x895   : > { %15128 = vmatpush1.bf16.msra.mxu0 %v18754_v52  ;;  %15211 = vmatprep.subr.bf16.mxu1 %v18765_v20  ;;  %v18823_v52 = vld [vmem:[#allocation8 + $0x1c8] ss:$16 sps:$4 sm:$0xff]   ;;  %v21842_v20 = vrot.slane %v13448_v61, %v19776_v54  ;;  %v18898_v61 = vld [vmem:[#allocation8 + $0x760] ss:$16 sps:$4 sm:$0xff]  }
 0x896   : > { %15129 = vmatprep.subr.bf16.mxu0 %v18762_v50  ;;  %v18831_v50 = vld [vmem:[#allocation8 + $0x1ec] ss:$16 sps:$4 sm:$0xff]   ;;  %v18835_v54 = vld [vmem:[#allocation8 + $0x208] ss:$16 sps:$4 sm:$0xff]  }
 0x898   : > { %15212 = vmatpush1.bf16.msra.mxu1 %v18763_v6  ;;  %v18837_v6 = vld [vmem:[#allocation8 + $0x20c] ss:$16 sps:$4 sm:$0xff]  }
 0x899   : > { %15130 = vmatpush1.bf16.msra.mxu0 %v18760_v51  ;;  %15213 = vmatprep.subr.bf16.mxu1 %v18771_v19  ;;  %v18834_v51 = vld [vmem:[#allocation8 + $0x604] ss:$16 sps:$4 sm:$0xff]   ;;  %v18832_v19 = vld [vmem:[#allocation8 + $0x600] ss:$16 sps:$4 sm:$0xff]  }
 0x89a   : > { %15131 = vmatprep.subr.bf16.mxu0 %v18768_v44  ;;  %v13464_v44 = vcombine.high %v21842_v20, %v21842_v20 }
 0x89c   : > { %15214 = vmatpush1.bf16.msra.mxu1 %v18769_v48  ;;  %v18843_v48 = vld [vmem:[#allocation8 + $0x22c] ss:$16 sps:$4 sm:$0xff]  }
 0x89d   : > { %15132 = vmatpush1.bf16.msra.mxu0 %v18766_v47  ;;  %15215 = vmatprep.subr.bf16.mxu1 %v18777_v34  ;;  %v18840_v47 = vld [vmem:[#allocation8 + $0x624] ss:$16 sps:$4 sm:$0xff]   ;;  %v18838_v34 = vld [vmem:[#allocation8 + $0x620] ss:$16 sps:$4 sm:$0xff]  }
 0x89e   : > { %15133 = vmatprep.subr.bf16.mxu0 %v18774_v53  ;;  %v21850_v53 = vpack.c.bf16 %v13464_v44, %v13464_v44  ;;  %v18913_v44 = vld [vmem:[#allocation8 + $0x3a8] ss:$16 sps:$4 sm:$0xff]  }
 0x8a0   : > { %15216 = vmatpush1.bf16.msra.mxu1 %v18775_v24  ;;  %v18844_v24 = vld [vmem:[#allocation8 + $0x640] ss:$16 sps:$4 sm:$0xff]  }
 0x8a1   : > { %15134 = vmatpush1.bf16.msra.mxu0 %v18772_v39  ;;  %15217 = vmatprep.subr.bf16.mxu1 %v18783_v0  ;;  %v18846_v39 = vld [vmem:[#allocation8 + $0x644] ss:$16 sps:$4 sm:$0xff]  }
 0x8a2   : > { %15135 = vmatprep.subr.bf16.mxu0 %v18780_v13  ;;  %v18847_v13 = vld [vmem:[#allocation8 + $0x248] ss:$16 sps:$4 sm:$0xff]   ;;  %v18852_v0 = vld [vmem:[#allocation8 + $0x664] ss:$16 sps:$4 sm:$0xff]  }
 0x8a4   : > { %15218 = vmatpush1.bf16.msra.mxu1 %v18781_v23  ;;  %v18861_v23 = vld [vmem:[#allocation8 + $0x28c] ss:$16 sps:$4 sm:$0xff]  }
 0x8a5   : > { %15136 = vmatpush1.bf16.msra.mxu0 %v18778_v12  ;;  %15219 = vmatprep.subr.bf16.mxu1 %v18789_v26  ;;  %v18853_v12 = vld [vmem:[#allocation8 + $0x268] ss:$16 sps:$4 sm:$0xff]   ;;  %v18864_v26 = vld [vmem:[#allocation8 + $0x6a4] ss:$16 sps:$4 sm:$0xff]  }
 0x8a6   : > { %15137 = vmatprep.subr.bf16.mxu0 %v18786_v62  ;;  %v18856_v62 = vld [vmem:[#allocation8 + $0x680] ss:$16 sps:$4 sm:$0xff]  }
 0x8a8   : > { %15220 = vmatpush1.bf16.msra.mxu1 %v18787_v7  ;;  %v18865_v7 = vld [vmem:[#allocation8 + $0x2a8] ss:$16 sps:$4 sm:$0xff]  }
 0x8a9   : > { %15138 = vmatpush1.bf16.msra.mxu0 %v18784_v5  ;;  %15221 = vmatprep.subr.bf16.mxu1 %v18795_v1  ;;  %v18862_v5 = vld [vmem:[#allocation8 + $0x6a0] ss:$16 sps:$4 sm:$0xff]   ;;  %v18873_v1 = vld [vmem:[#allocation8 + $0x2cc] ss:$16 sps:$4 sm:$0xff]  }
 0x8aa   : > { %15139 = vmatprep.subr.bf16.mxu0 %v18792_v8  ;;  %v18870_v8 = vld [vmem:[#allocation8 + $0x6c4] ss:$16 sps:$4 sm:$0xff]  }
 0x8ac   : > { %15222 = vmatpush1.bf16.msra.mxu1 %v18793_v9  ;;  %v18871_v9 = vld [vmem:[#allocation8 + $0x2c8] ss:$16 sps:$4 sm:$0xff]  }
 0x8ad   : > { %15140 = vmatpush1.bf16.msra.mxu0 %v18790_v30  ;;  %15223 = vmatprep.subr.bf16.mxu1 %v18801_v35  ;;  %v18868_v30 = vld [vmem:[#allocation8 + $0x6c0] ss:$16 sps:$4 sm:$0xff]   ;;  %v18879_v35 = vld [vmem:[#allocation8 + $0x2ec] ss:$16 sps:$4 sm:$0xff]  }
 0x8ae   : > { %15141 = vmatprep.subr.bf16.mxu0 %v18798_v18  ;;  %v18876_v18 = vld [vmem:[#allocation8 + $0x6e4] ss:$16 sps:$4 sm:$0xff]  }
 0x8b0   : > { %15224 = vmatpush1.bf16.msra.mxu1 %v18799_v15  ;;  %v18877_v15 = vld [vmem:[#allocation8 + $0x2e8] ss:$16 sps:$4 sm:$0xff]  }
 0x8b1   : > { %15142 = vmatpush1.bf16.msra.mxu0 %v18796_v16  ;;  %15225 = vmatprep.subr.bf16.mxu1 %v18807_v43  ;;  %v18874_v16 = vld [vmem:[#allocation8 + $0x6e0] ss:$16 sps:$4 sm:$0xff]   ;;  %v18885_v43 = vld [vmem:[#allocation8 + $0x30c] ss:$16 sps:$4 sm:$0xff]  }
 0x8b2   : > { %15143 = vmatprep.subr.bf16.mxu0 %v18804_v60  ;;  %v18882_v60 = vld [vmem:[#allocation8 + $0x704] ss:$16 sps:$4 sm:$0xff]  }
 0x8b4   : > { %15226 = vmatpush1.bf16.msra.mxu1 %v18805_v32  ;;  %v18883_v32 = vld [vmem:[#allocation8 + $0x308] ss:$16 sps:$4 sm:$0xff]  }
 0x8b5   : > { %15144 = vmatpush1.bf16.msra.mxu0 %v18802_v21  ;;  %15227 = vmatprep.subr.bf16.mxu1 %v18813_v25  ;;  %v18880_v21 = vld [vmem:[#allocation8 + $0x700] ss:$16 sps:$4 sm:$0xff]   ;;  %v18891_v25 = vld [vmem:[#allocation8 + $0x32c] ss:$16 sps:$4 sm:$0xff]  }
 0x8b6   : > { %15145 = vmatprep.subr.bf16.mxu0 %v18810_v22  ;;  %v18888_v22 = vld [vmem:[#allocation8 + $0x724] ss:$16 sps:$4 sm:$0xff]  }
 0x8b8   : > { %15228 = vmatpush1.bf16.msra.mxu1 %v18811_v28  ;;  %v18889_v28 = vld [vmem:[#allocation8 + $0x328] ss:$16 sps:$4 sm:$0xff]  }
 0x8b9   : > { %15146 = vmatpush1.bf16.msra.mxu0 %v18808_v40  ;;  %15229 = vmatprep.subr.bf16.mxu1 %v18819_v37  ;;  %v18886_v40 = vld [vmem:[#allocation8 + $0x720] ss:$16 sps:$4 sm:$0xff]   ;;  %v18897_v37 = vld [vmem:[#allocation8 + $0x34c] ss:$16 sps:$4 sm:$0xff]  }
 0x8ba   : > { %15147 = vmatprep.subr.bf16.mxu0 %v18816_v14  ;;  %v18894_v14 = vld [vmem:[#allocation8 + $0x744] ss:$16 sps:$4 sm:$0xff]  }
 0x8bc   : > { %15230 = vmatpush1.bf16.msra.mxu1 %v18817_v38  ;;  %v18895_v38 = vld [vmem:[#allocation8 + $0x348] ss:$16 sps:$4 sm:$0xff]  }
 0x8bd   : > { %15148 = vmatpush1.bf16.msra.mxu0 %v18814_v63  ;;  %15231 = vmatprep.subr.bf16.mxu1 %v18825_v10  ;;  %v18892_v63 = vld [vmem:[#allocation8 + $0x740] ss:$16 sps:$4 sm:$0xff]   ;;  %v18903_v10 = vld [vmem:[#allocation8 + $0x36c] ss:$16 sps:$4 sm:$0xff]  }
 0x8be   : > { %15149 = vmatprep.subr.bf16.mxu0 %v18822_v29  ;;  %v18900_v29 = vld [vmem:[#allocation8 + $0x764] ss:$16 sps:$4 sm:$0xff]  }
 0x8c0   : > { %15232 = vmatpush1.bf16.msra.mxu1 %v18823_v52  ;;  %v18906_v52 = vld [vmem:[#allocation8 + $0x784] ss:$16 sps:$4 sm:$0xff]  }
 0x8c1   : > { %15150 = vmatpush1.bf16.msra.mxu0 %v18820_v56  ;;  %15233 = vmatprep.subr.bf16.mxu1 %v18831_v50  ;;  %v18901_v56 = vld [vmem:[#allocation8 + $0x368] ss:$16 sps:$4 sm:$0xff]   ;;  %v18904_v50 = vld [vmem:[#allocation8 + $0x780] ss:$16 sps:$4 sm:$0xff]  }
 0x8c2   : > { %15151 = vmatprep.subr.bf16.mxu0 %v18828_v27  ;;  %v18909_v27 = vld [vmem:[#allocation8 + $0x38c] ss:$16 sps:$4 sm:$0xff]  }
 0x8c4   : > { %15234 = vmatpush1.bf16.msra.mxu1 %v18829_v3  ;;  %v18912_v3 = vld [vmem:[#allocation8 + $0x7a4] ss:$16 sps:$4 sm:$0xff]  }
 0x8c5   : > { %15152 = vmatpush1.bf16.msra.mxu0 %v18826_v36  ;;  %15244 = vmatprep.subr.bf16.mxu1 %v18837_v6  ;;  %v18907_v36 = vld [vmem:[#allocation8 + $0x388] ss:$16 sps:$4 sm:$0xff]   ;;  %v18910_v6 = vld [vmem:[#allocation8 + $0x7a0] ss:$16 sps:$4 sm:$0xff]  }
 0x8c6   : > { %15162 = vmatprep.subr.bf16.mxu0 %v18834_v51  ;;  %v18915_v51 = vld [vmem:[#allocation8 + $0x3ac] ss:$16 sps:$4 sm:$0xff]  }
 0x8c7   : > { %15236 = vmatmul.mubr.bf16.vlgmr.msra.gmra.mrb[4].mxu1 %v21809_v17  ;;  %v18855_v17 = vld [vmem:[#allocation8 + $0x26c] ss:$16 sps:$4 sm:$0xff]  }
 0x8c8   : > { %15154 = vmatmul.mubr.bf16.vlgmr.msra.gmra.mrb[0].mxu0 %v21848_v46  ;;  %15245 = vmatpush1.bf16.msra.mxu1 %v18835_v54  ;;  %v18921_v54 = vld [vmem:[#allocation8 + $0x3cc] ss:$16 sps:$4 sm:$0xff]  }
 0x8c9   : > { %15163 = vmatpush1.bf16.msra.mxu0 %v18832_v19  ;;  %15246 = vmatprep.subr.bf16.mxu1 %v18843_v48  ;;  %v18918_v19 = vld [vmem:[#allocation8 + $0x7c4] ss:$16 sps:$4 sm:$0xff]   ;;  %v18919_v48 = vld [vmem:[#allocation8 + $0x3c8] ss:$16 sps:$4 sm:$0xff]  }
 0x8ca   : > { %15164 = vmatprep.subr.bf16.mxu0 %v18840_v47  ;;  %15194 = vmatprep.mubr.bf16.mxu0 %v21850_v53  ;;  %v18916_v47 = vld [vmem:[#allocation8 + $0x7c0] ss:$16 sps:$4 sm:$0xff]  }
 0x8cb   : > { %15276 = vmatprep.mubr.bf16.mxu1 %v21811_v31  ;;  %v18859_v31 = vld [vmem:[#allocation8 + $0x288] ss:$16 sps:$4 sm:$0xff]  }
 0x8cc   : > { %15247 = vmatpush1.bf16.msra.mxu1 %v18841_v55  ;;  %v18927_v55 = vld [vmem:[#allocation8 + $0x3ec] ss:$16 sps:$4 sm:$0xff]  }
 0x8cd   : > { %15165 = vmatpush1.bf16.msra.mxu0 %v18838_v34  ;;  %15248 = vmatprep.subr.bf16.mxu1 %v18849_v11  ;;  %v18924_v34 = vld [vmem:[#allocation8 + $0x7e4] ss:$16 sps:$4 sm:$0xff]   ;;  %v18925_v11 = vld [vmem:[#allocation8 + $0x3e8] ss:$16 sps:$4 sm:$0xff]  }
 0x8ce   : > { %15166 = vmatprep.subr.bf16.mxu0 %v18846_v39  ;;  %v18922_v39 = vld [vmem:[#allocation8 + $0x7e0] ss:$16 sps:$4 sm:$0xff]  }
 0x8d0   : > { %15249 = vmatpush1.bf16.msra.mxu1 %v18847_v13  ;;  %v18928_v13 = vld [vmem:[#allocation8 + $0x408] ss:$16 sps:$4 sm:$0xff]  }
 0x8d1   : > { %15167 = vmatpush1.bf16.msra.mxu0 %v18844_v24  ;;  %15250 = vmatprep.subr.bf16.mxu1 %v18855_v17  ;;  %v18930_v24 = vld [vmem:[#allocation8 + $0x40c] ss:$16 sps:$4 sm:$0xff]  }
 0x8d2   : > { %15168 = vmatprep.subr.bf16.mxu0 %v18852_v0  ;;  %v21858_v0 = vpack.c.bf16 %v21842_v20, %v21842_v20  ;;  %v18933_v17 = vld [vmem:[#allocation8 + $0x42c] ss:$16 sps:$4 sm:$0xff]  }
 0x8d3   : > { %v19027_v20 = vld [vmem:[#allocation11 + $0x10] ss:$8 sps:$4 sm:$0xff]  }
 0x8d4   : > { %15251 = vmatpush1.bf16.msra.mxu1 %v18853_v12  ;;  %v19026_v12 = vld [vmem:[#allocation11 + $0x4] ss:$8 sps:$4 sm:$0xff]  }
 0x8d5   : > { %15169 = vmatpush1.bf16.msra.mxu0 %v18850_v58  ;;  %15252 = vmatprep.subr.bf16.mxu1 %v18861_v23  ;;  %v19024_v58 = vld [vmem:[#allocation11] ss:$8 sps:$4 sm:$0xff]   ;;  %v19029_v23 = vld [vmem:[#allocation11 + $0x14] ss:$8 sps:$4 sm:$0xff]  }
 0x8d6   : > { %15170 = vmatprep.subr.bf16.mxu0 %v18858_v41  ;;  %v18931_v41 = vld [vmem:[#allocation8 + $0x428] ss:$16 sps:$4 sm:$0xff]  }
 0x8d8   : > { %15253 = vmatpush1.bf16.msra.mxu1 %v18859_v31  ;;  %v19032_v31 = vld [vmem:[#allocation11 + $0x24] ss:$8 sps:$4 sm:$0xff]  }
 0x8d9   : > { %15171 = vmatpush1.bf16.msra.mxu0 %v18856_v62  ;;  %15254 = vmatprep.subr.bf16.mxu1 %v18867_v2  ;;  %v18936_v62 = vld [vmem:[#allocation8 + $0x44c] ss:$16 sps:$4 sm:$0xff]  }
 0x8da   : > { %15172 = vmatprep.subr.bf16.mxu0 %v18864_v26  ;;  %v18934_v26 = vld [vmem:[#allocation8 + $0x448] ss:$16 sps:$4 sm:$0xff]   ;;  %v18939_v2 = vld [vmem:[#allocation8 + $0x46c] ss:$16 sps:$4 sm:$0xff]  }
 0x8dc   : > { %15255 = vmatpush1.bf16.msra.mxu1 %v18865_v7  ;;  %v18942_v7 = vld [vmem:[#allocation8 + $0x48c] ss:$16 sps:$4 sm:$0xff]  }
 0x8dd   : > { %15173 = vmatpush1.bf16.msra.mxu0 %v18862_v5  ;;  %15256 = vmatprep.subr.bf16.mxu1 %v18873_v1  ;;  %v18937_v5 = vld [vmem:[#allocation8 + $0x468] ss:$16 sps:$4 sm:$0xff]  }
 0x8de   : > { %15174 = vmatprep.subr.bf16.mxu0 %v18870_v8  ;;  %v19035_v8 = vld [vmem:[#allocation11 + $0x34] ss:$8 sps:$4 sm:$0xff]   ;;  %v19038_v1 = vld [vmem:[#allocation11 + $0x44] ss:$8 sps:$4 sm:$0xff]  }
 0x8e0   : > { %15257 = vmatpush1.bf16.msra.mxu1 %v18871_v9  ;;  %v18945_v9 = vld [vmem:[#allocation8 + $0x4ac] ss:$16 sps:$4 sm:$0xff]  }
 0x8e1   : > { %15175 = vmatpush1.bf16.msra.mxu0 %v18868_v30  ;;  %15258 = vmatprep.subr.bf16.mxu1 %v18879_v35  ;;  %v18940_v30 = vld [vmem:[#allocation8 + $0x488] ss:$16 sps:$4 sm:$0xff]  }
 0x8e2   : > { %15176 = vmatprep.subr.bf16.mxu0 %v18876_v18  ;;  %v19036_v18 = vld [vmem:[#allocation11 + $0x40] ss:$8 sps:$4 sm:$0xff]   ;;  %v19041_v35 = vld [vmem:[#allocation11 + $0x54] ss:$8 sps:$4 sm:$0xff]  }
 0x8e4   : > { %15259 = vmatpush1.bf16.msra.mxu1 %v18877_v15  ;;  %v18948_v15 = vld [vmem:[#allocation8 + $0x4cc] ss:$16 sps:$4 sm:$0xff]  }
 0x8e5   : > { %15177 = vmatpush1.bf16.msra.mxu0 %v18874_v16  ;;  %15260 = vmatprep.subr.bf16.mxu1 %v18885_v43  ;;  %v18943_v16 = vld [vmem:[#allocation8 + $0x4a8] ss:$16 sps:$4 sm:$0xff]  }
 0x8e6   : > { %15178 = vmatprep.subr.bf16.mxu0 %v18882_v60  ;;  %v19039_v60 = vld [vmem:[#allocation11 + $0x50] ss:$8 sps:$4 sm:$0xff]   ;;  %v19044_v43 = vld [vmem:[#allocation11 + $0x64] ss:$8 sps:$4 sm:$0xff]  }
 0x8e8   : > { %15261 = vmatpush1.bf16.msra.mxu1 %v18883_v32  ;;  %v18951_v32 = vld [vmem:[#allocation8 + $0x4ec] ss:$16 sps:$4 sm:$0xff]  }
 0x8e9   : > { %15179 = vmatpush1.bf16.msra.mxu0 %v18880_v21  ;;  %15262 = vmatprep.subr.bf16.mxu1 %v18891_v25  ;;  %v18946_v21 = vld [vmem:[#allocation8 + $0x4c8] ss:$16 sps:$4 sm:$0xff]  }
 0x8ea   : > { %15180 = vmatprep.subr.bf16.mxu0 %v18888_v22  ;;  %v19042_v22 = vld [vmem:[#allocation11 + $0x60] ss:$8 sps:$4 sm:$0xff]   ;;  %v19047_v25 = vld [vmem:[#allocation11 + $0x74] ss:$8 sps:$4 sm:$0xff]  }
 0x8ec   : > { %15263 = vmatpush1.bf16.msra.mxu1 %v18889_v28  ;;  %v18954_v28 = vld [vmem:[#allocation8 + $0x50c] ss:$16 sps:$4 sm:$0xff]  }
 0x8ed   : > { %15181 = vmatpush1.bf16.msra.mxu0 %v18886_v40  ;;  %15264 = vmatprep.subr.bf16.mxu1 %v18897_v37  ;;  %v18949_v40 = vld [vmem:[#allocation8 + $0x4e8] ss:$16 sps:$4 sm:$0xff]  }
 0x8ee   : > { %15182 = vmatprep.subr.bf16.mxu0 %v18894_v14  ;;  %v19045_v14 = vld [vmem:[#allocation11 + $0x70] ss:$8 sps:$4 sm:$0xff]   ;;  %v19050_v37 = vld [vmem:[#allocation11 + $0x84] ss:$8 sps:$4 sm:$0xff]  }
 0x8f0   : > { %15265 = vmatpush1.bf16.msra.mxu1 %v18895_v38  ;;  %v18957_v38 = vld [vmem:[#allocation8 + $0x52c] ss:$16 sps:$4 sm:$0xff]  }
 0x8f1   : > { %15183 = vmatpush1.bf16.msra.mxu0 %v18892_v63  ;;  %15266 = vmatprep.subr.bf16.mxu1 %v18903_v10  ;;  %v18952_v63 = vld [vmem:[#allocation8 + $0x508] ss:$16 sps:$4 sm:$0xff]  }
 0x8f2   : > { %15184 = vmatprep.subr.bf16.mxu0 %v18900_v29  ;;  %v19048_v29 = vld [vmem:[#allocation11 + $0x80] ss:$8 sps:$4 sm:$0xff]   ;;  %v19053_v10 = vld [vmem:[#allocation11 + $0x94] ss:$8 sps:$4 sm:$0xff]  }
 0x8f4   : > { %15267 = vmatpush1.bf16.msra.mxu1 %v18901_v56  ;;  %v18960_v56 = vld [vmem:[#allocation8 + $0x54c] ss:$16 sps:$4 sm:$0xff]  }
 0x8f5   : > { %15185 = vmatpush1.bf16.msra.mxu0 %v18898_v61  ;;  %15268 = vmatprep.subr.bf16.mxu1 %v18909_v27  ;;  %v18955_v61 = vld [vmem:[#allocation8 + $0x528] ss:$16 sps:$4 sm:$0xff]  }
 0x8f6   : > { %15186 = vmatprep.subr.bf16.mxu0 %v18906_v52  ;;  %v19051_v52 = vld [vmem:[#allocation11 + $0x90] ss:$8 sps:$4 sm:$0xff]   ;;  %v19056_v27 = vld [vmem:[#allocation11 + $0xa4] ss:$8 sps:$4 sm:$0xff]  }
 0x8f8   : > { %15269 = vmatpush1.bf16.msra.mxu1 %v18907_v36  ;;  %v18963_v36 = vld [vmem:[#allocation8 + $0x56c] ss:$16 sps:$4 sm:$0xff]  }
 0x8f9   : > { %15187 = vmatpush1.bf16.msra.mxu0 %v18904_v50  ;;  %15270 = vmatprep.subr.bf16.mxu1 %v18915_v51  ;;  %v18958_v50 = vld [vmem:[#allocation8 + $0x548] ss:$16 sps:$4 sm:$0xff]  }
 0x8fa   : > { %15188 = vmatprep.subr.bf16.mxu0 %v18912_v3  ;;  %v19054_v3 = vld [vmem:[#allocation11 + $0xa0] ss:$8 sps:$4 sm:$0xff]   ;;  %v19059_v51 = vld [vmem:[#allocation11 + $0xb4] ss:$8 sps:$4 sm:$0xff]  }
 0x8fc   : > { %15271 = vmatpush1.bf16.msra.mxu1 %v18913_v44  ;;  %v18966_v44 = vld [vmem:[#allocation8 + $0x58c] ss:$16 sps:$4 sm:$0xff]  }
 0x8fd   : > { %15189 = vmatpush1.bf16.msra.mxu0 %v18910_v6  ;;  %15272 = vmatprep.subr.bf16.mxu1 %v18921_v54  ;;  %v18961_v6 = vld [vmem:[#allocation8 + $0x568] ss:$16 sps:$4 sm:$0xff]  }
 0x8fe   : > { %15190 = vmatprep.subr.bf16.mxu0 %v18918_v19  ;;  %v19057_v19 = vld [vmem:[#allocation11 + $0xb0] ss:$8 sps:$4 sm:$0xff]   ;;  %v19062_v54 = vld [vmem:[#allocation11 + $0xc4] ss:$8 sps:$4 sm:$0xff]  }
 0x900   : > { %15273 = vmatpush1.bf16.msra.mxu1 %v18919_v48  ;;  %v18969_v48 = vld [vmem:[#allocation8 + $0x5ac] ss:$16 sps:$4 sm:$0xff]  }
 0x901   : > { %15191 = vmatpush1.bf16.msra.mxu0 %v18916_v47  ;;  %15274 = vmatprep.subr.bf16.mxu1 %v18927_v55  ;;  %v18964_v47 = vld [vmem:[#allocation8 + $0x588] ss:$16 sps:$4 sm:$0xff]  }
 0x902   : > { %15192 = vmatprep.subr.bf16.mxu0 %v18924_v34  ;;  %v19060_v34 = vld [vmem:[#allocation11 + $0xc0] ss:$8 sps:$4 sm:$0xff]   ;;  %v19065_v55 = vld [vmem:[#allocation11 + $0xd4] ss:$8 sps:$4 sm:$0xff]  }
 0x904   : > { %15275 = vmatpush1.bf16.msra.mxu1 %v18925_v11  ;;  %v18972_v11 = vld [vmem:[#allocation8 + $0x5cc] ss:$16 sps:$4 sm:$0xff]  }
 0x905   : > { %15193 = vmatpush1.bf16.msra.mxu0 %v18922_v39  ;;  %15285 = vmatprep.subr.bf16.mxu1 %v18930_v24  ;;  %v18967_v39 = vld [vmem:[#allocation8 + $0x5a8] ss:$16 sps:$4 sm:$0xff]   ;;  %v19063_v24 = vld [vmem:[#allocation11 + $0xd0] ss:$8 sps:$4 sm:$0xff]  }
 0x906   : > { %15771 = vmatprep.subr.bf16.mxu0 %v19026_v12  ;;  %v18978_v12 = vld [vmem:[#allocation8 + $0x60c] ss:$16 sps:$4 sm:$0xff]  }
 0x907   : > { %15277 = vmatmul.mubr.bf16.vlgmr.msra.gmra.mrb[4].mxu1 %v21813_v59  ;;  %v19030_v59 = vld [vmem:[#allocation11 + $0x20] ss:$8 sps:$4 sm:$0xff]  }
 0x908   : > { %15195 = vmatmul.mubr.bf16.vlgmr.msra.gmra.mrb[0].mxu0 %v21858_v0  ;;  %15286 = vmatpush1.bf16.msra.mxu1 %v18928_v13  ;;  %v18970_v13 = vld [vmem:[#allocation8 + $0x5c8] ss:$16 sps:$4 sm:$0xff]  }
 0x909   : > { %15317 = vmatprep.mubr.bf16.mxu1 %v21836_v57  ;;  %15287 = vmatprep.subr.bf16.mxu1 %v18933_v17  ;;  %v19033_v57 = vld [vmem:[#allocation11 + $0x30] ss:$8 sps:$4 sm:$0xff]  }
 0x90a   : > { %15772 = vmatpush1.bf16.msra.mxu0 %v19024_v58  ;;  %v18975_v17 = vld [vmem:[#allocation8 + $0x5ec] ss:$16 sps:$4 sm:$0xff]   ;;  %v18973_v58 = vld [vmem:[#allocation8 + $0x5e8] ss:$16 sps:$4 sm:$0xff]  }
 0x90b   : > { %15773 = vmatprep.subr.bf16.mxu0 %v19029_v23  ;;  %v18981_v23 = vld [vmem:[#allocation8 + $0x62c] ss:$16 sps:$4 sm:$0xff]  }
 0x90c   : > { %15288 = vmatpush1.bf16.msra.mxu1 %v18931_v41  ;;  %v18976_v41 = vld [vmem:[#allocation8 + $0x608] ss:$16 sps:$4 sm:$0xff]  }
 0x90d   : > { %15289 = vmatprep.subr.bf16.mxu1 %v18936_v62  ;;  %v18979_v62 = vld [vmem:[#allocation8 + $0x628] ss:$16 sps:$4 sm:$0xff]  }
 0x90e   : > { %15774 = vmatpush1.bf16.msra.mxu0 %v19027_v20  ;;  %v18984_v20 = vld [vmem:[#allocation8 + $0x64c] ss:$16 sps:$4 sm:$0xff]  }
 0x90f   : > { %15775 = vmatprep.subr.bf16.mxu0 %v19032_v31  ;;  %v18982_v31 = vld [vmem:[#allocation8 + $0x648] ss:$16 sps:$4 sm:$0xff]  }
 0x910   : > { %15290 = vmatpush1.bf16.msra.mxu1 %v18934_v26  ;;  %v18987_v26 = vld [vmem:[#allocation8 + $0x66c] ss:$16 sps:$4 sm:$0xff]  }
 0x911   : > { %15291 = vmatprep.subr.bf16.mxu1 %v18939_v2  ;;  %v18985_v2 = vld [vmem:[#allocation8 + $0x668] ss:$16 sps:$4 sm:$0xff]  }
 0x912   : > { %15776 = vmatpush1.bf16.msra.mxu0 %v19030_v59  ;;  %v18990_v59 = vld [vmem:[#allocation8 + $0x68c] ss:$16 sps:$4 sm:$0xff]  }
 0x913   : > { %15777 = vmatprep.subr.bf16.mxu0 %v19035_v8  ;;  %v18996_v8 = vld [vmem:[#allocation8 + $0x6cc] ss:$16 sps:$4 sm:$0xff]  }
 0x914   : > { %15292 = vmatpush1.bf16.msra.mxu1 %v18937_v5  ;;  %v18988_v5 = vld [vmem:[#allocation8 + $0x688] ss:$16 sps:$4 sm:$0xff]  }
 0x915   : > { %15293 = vmatprep.subr.bf16.mxu1 %v18942_v7  ;;  %v18993_v7 = vld [vmem:[#allocation8 + $0x6ac] ss:$16 sps:$4 sm:$0xff]  }
 0x916   : > { %15778 = vmatpush1.bf16.msra.mxu0 %v19033_v57  ;;  %v19068_v57 = vld [vmem:[#allocation11 + $0xe4] ss:$8 sps:$4 sm:$0xff]  }
 0x917   : > { %15779 = vmatprep.subr.bf16.mxu0 %v19038_v1  ;;  %v19066_v1 = vld [vmem:[#allocation11 + $0xe0] ss:$8 sps:$4 sm:$0xff]  }
 0x918   : > { %15294 = vmatpush1.bf16.msra.mxu1 %v18940_v30 }
 0x919   : > { %15295 = vmatprep.subr.bf16.mxu1 %v18945_v9 }
 0x91a   : > { %15780 = vmatpush1.bf16.msra.mxu0 %v19036_v18  ;;  %v18994_v18 = vld [vmem:[#allocation8 + $0x6c8] ss:$16 sps:$4 sm:$0xff]  }
 0x91b   : > { %15781 = vmatprep.subr.bf16.mxu0 %v19041_v35 }
 0x91c   : > { %15296 = vmatpush1.bf16.msra.mxu1 %v18943_v16  ;;  %v18999_v16 = vld [vmem:[#allocation8 + $0x6ec] ss:$16 sps:$4 sm:$0xff]  }
 0x91d   : > { %15297 = vmatprep.subr.bf16.mxu1 %v18948_v15  ;;  %v19071_v15 = vld [vmem:[#allocation11 + $0xf4] ss:$8 sps:$4 sm:$0xff]  }
 0x91e   : > { %15782 = vmatpush1.bf16.msra.mxu0 %v19039_v60  ;;  %v19069_v60 = vld [vmem:[#allocation11 + $0xf0] ss:$8 sps:$4 sm:$0xff]  }
 0x91f   : > { %15783 = vmatprep.subr.bf16.mxu0 %v19044_v43  ;;  %v18997_v43 = vld [vmem:[#allocation8 + $0x6e8] ss:$16 sps:$4 sm:$0xff]  }
 0x920   : > { %15298 = vmatpush1.bf16.msra.mxu1 %v18946_v21  ;;  %v19002_v21 = vld [vmem:[#allocation8 + $0x70c] ss:$16 sps:$4 sm:$0xff]  }
 0x921   : > { %15299 = vmatprep.subr.bf16.mxu1 %v18951_v32  ;;  %v19074_v32 = vld [vmem:[#allocation11 + $0x104] ss:$8 sps:$4 sm:$0xff]  }
 0x922   : > { %15784 = vmatpush1.bf16.msra.mxu0 %v19042_v22  ;;  %v19000_v22 = vld [vmem:[#allocation8 + $0x708] ss:$16 sps:$4 sm:$0xff]  }
 0x923   : > { %15785 = vmatprep.subr.bf16.mxu0 %v19047_v25  ;;  %v19005_v25 = vld [vmem:[#allocation8 + $0x72c] ss:$16 sps:$4 sm:$0xff]  }
 0x924   : > { %15300 = vmatpush1.bf16.msra.mxu1 %v18949_v40  ;;  %v19003_v40 = vld [vmem:[#allocation8 + $0x728] ss:$16 sps:$4 sm:$0xff]  }
 0x925   : > { %15301 = vmatprep.subr.bf16.mxu1 %v18954_v28  ;;  %v19008_v28 = vld [vmem:[#allocation8 + $0x74c] ss:$16 sps:$4 sm:$0xff]  }
 0x926   : > { %15786 = vmatpush1.bf16.msra.mxu0 %v19045_v14  ;;  %v19006_v14 = vld [vmem:[#allocation8 + $0x748] ss:$16 sps:$4 sm:$0xff]  }
 0x927   : > { %15787 = vmatprep.subr.bf16.mxu0 %v19050_v37  ;;  %v19011_v37 = vld [vmem:[#allocation8 + $0x76c] ss:$16 sps:$4 sm:$0xff]  }
 0x928   : > { %15302 = vmatpush1.bf16.msra.mxu1 %v18952_v63  ;;  %v19009_v63 = vld [vmem:[#allocation8 + $0x768] ss:$16 sps:$4 sm:$0xff]  }
 0x929   : > { %15303 = vmatprep.subr.bf16.mxu1 %v18957_v38  ;;  %v19014_v38 = vld [vmem:[#allocation8 + $0x78c] ss:$16 sps:$4 sm:$0xff]  }
 0x92a   : > { %15788 = vmatpush1.bf16.msra.mxu0 %v19048_v29  ;;  %v19012_v29 = vld [vmem:[#allocation8 + $0x788] ss:$16 sps:$4 sm:$0xff]  }
 0x92b   : > { %15789 = vmatprep.subr.bf16.mxu0 %v19053_v10  ;;  %v19017_v10 = vld [vmem:[#allocation8 + $0x7ac] ss:$16 sps:$4 sm:$0xff]  }
 0x92c   : > { %15304 = vmatpush1.bf16.msra.mxu1 %v18955_v61  ;;  %v19015_v61 = vld [vmem:[#allocation8 + $0x7a8] ss:$16 sps:$4 sm:$0xff]  }
 0x92d   : > { %15305 = vmatprep.subr.bf16.mxu1 %v18960_v56  ;;  %v19020_v56 = vld [vmem:[#allocation8 + $0x7cc] ss:$16 sps:$4 sm:$0xff]  }
 0x92e   : > { %15790 = vmatpush1.bf16.msra.mxu0 %v19051_v52  ;;  %v19018_v52 = vld [vmem:[#allocation8 + $0x7c8] ss:$16 sps:$4 sm:$0xff]  }
 0x92f   : > { %15791 = vmatprep.subr.bf16.mxu0 %v19056_v27  ;;  %v19023_v27 = vld [vmem:[#allocation8 + $0x7ec] ss:$16 sps:$4 sm:$0xff]  }
 0x930   : > { %15306 = vmatpush1.bf16.msra.mxu1 %v18958_v50  ;;  %v19021_v50 = vld [vmem:[#allocation8 + $0x7e8] ss:$16 sps:$4 sm:$0xff]  }
 0x931   : > { %15307 = vmatprep.subr.bf16.mxu1 %v18963_v36  ;;  %v21866_v36 = vld [vmem:[#allocation9] sm:$0xf] }
 0x932   : > { %15792 = vmatpush1.bf16.msra.mxu0 %v19054_v3  ;;  %v13742_v3 = vrot.slane %v21866_v36, %v21786_v33 }
 0x933   : > { %15793 = vmatprep.subr.bf16.mxu0 %v19059_v51  ;;  %v13746_v51 = vrot.slane %v21866_v36, %v21789_v49 }
 0x934   : > { %15308 = vmatpush1.bf16.msra.mxu1 %v18961_v6 }
 0x935   : > { %15309 = vmatprep.subr.bf16.mxu1 %v18966_v44 }
 0x936   : > { %15794 = vmatpush1.bf16.msra.mxu0 %v19057_v19 }
 0x937   : > { %15795 = vmatprep.subr.bf16.mxu0 %v19062_v54 }
 0x938   : > { %15310 = vmatpush1.bf16.msra.mxu1 %v18964_v47 }
 0x939   : > { %15311 = vmatprep.subr.bf16.mxu1 %v18969_v48 }
 0x93a   : > { %15796 = vmatpush1.bf16.msra.mxu0 %v19060_v34 }
 0x93b   : > { %15797 = vmatprep.subr.bf16.mxu0 %v19065_v55 }
 0x93c   : > { %15312 = vmatpush1.bf16.msra.mxu1 %v18967_v39 }
 0x93d   : > { %15313 = vmatprep.subr.bf16.mxu1 %v18972_v11 }
 0x93e   : > { %15798 = vmatpush1.bf16.msra.mxu0 %v19063_v24 }
 0x93f   : > { %15799 = vmatprep.subr.bf16.mxu0 %v19068_v57  ;;  %v19128_v57 = vld [vmem:[%s21971_s7 + $0x60] sm:$0xff]  }
 0x940   : > { %15314 = vmatpush1.bf16.msra.mxu1 %v18970_v13 }
 0x941   : > { %15315 = vmatprep.subr.bf16.mxu1 %v18975_v17  ;;  %v19077_v17 = vld [vmem:[#allocation11 + $0x114] ss:$8 sps:$4 sm:$0xff]  }
 0x942   : > { %15800 = vmatpush1.bf16.msra.mxu0 %v19066_v1  ;;  %v19089_v1 = vld [vmem:[#allocation11 + $0x154] ss:$8 sps:$4 sm:$0xff]  }
 0x943   : > { %15801 = vmatprep.subr.bf16.mxu0 %v19071_v15  ;;  %v19090_v15 = vld [vmem:[#allocation11 + $0x160] ss:$8 sps:$4 sm:$0xff]  }
 0x944   : > { %15316 = vmatpush1.bf16.msra.mxu1 %v18973_v58  ;;  %v19120_v58 = vld [vmem:[%s21971_s7 + $0x40] sm:$0xff]  }
 0x945   : > { %15326 = vmatprep.subr.bf16.mxu1 %v18978_v12  ;;  %v19121_v12 = vld [vmem:[%s21971_s7] sm:$0xff]  }
 0x946   : > { %15802 = vmatpush1.bf16.msra.mxu0 %v19069_v60  ;;  %v19095_v60 = vld [vmem:[#allocation11 + $0x174] ss:$8 sps:$4 sm:$0xff]  }
 0x947   : > { %15318 = vmatmul.mubr.bf16.vlgmr.msra.gmra.mrb[4].mxu1 %v21848_v46  ;;  %v18991_v46 = vld [vmem:[#allocation8 + $0x6a8] ss:$16 sps:$4 sm:$0xff]   ;;  %15812 = vmatprep.subr.bf16.mxu0 %v19074_v32  ;;  %v19096_v32 = vld [vmem:[#allocation11 + $0x180] ss:$8 sps:$4 sm:$0xff]  }
 0x948   : > { %15327 = vmatpush1.bf16.msra.mxu1 %v18976_v41  ;;  %15358 = vmatprep.mubr.bf16.mxu1 %v21850_v53  ;;  %v19122_v41 = vld [vmem:[%s21971_s7 + $0x48] sm:$0xff]  }
 0x949   : > { %15328 = vmatprep.subr.bf16.mxu1 %v18981_v23  ;;  %v19075_v23 = vld [vmem:[#allocation11 + $0x110] ss:$8 sps:$4 sm:$0xff]  }
 0x94c   : > { %15329 = vmatpush1.bf16.msra.mxu1 %v18979_v62  ;;  %v19080_v62 = vld [vmem:[#allocation11 + $0x124] ss:$8 sps:$4 sm:$0xff]  }
 0x94d   : > { %15330 = vmatprep.subr.bf16.mxu1 %v18984_v20  ;;  %v19123_v20 = vld [vmem:[%s21971_s7 + $0x8] sm:$0xff]  }
 0x950   : > { %15331 = vmatpush1.bf16.msra.mxu1 %v18982_v31  ;;  %v19124_v31 = vld [vmem:[%s21971_s7 + $0x50] sm:$0xff]  }
 0x951   : > { %15332 = vmatprep.subr.bf16.mxu1 %v18987_v26  ;;  %v19078_v26 = vld [vmem:[#allocation11 + $0x120] ss:$8 sps:$4 sm:$0xff]  }
 0x954   : > { %15333 = vmatpush1.bf16.msra.mxu1 %v18985_v2  ;;  %v19083_v2 = vld [vmem:[#allocation11 + $0x134] ss:$8 sps:$4 sm:$0xff]  }
 0x955   : > { %15334 = vmatprep.subr.bf16.mxu1 %v18990_v59  ;;  %v19125_v59 = vld [vmem:[%s21971_s7 + $0x10] sm:$0xff]  }
 0x958   : > { %15335 = vmatpush1.bf16.msra.mxu1 %v18988_v5  ;;  %v19126_v5 = vld [vmem:[%s21971_s7 + $0x58] sm:$0xff]  }
 0x959   : > { %15336 = vmatprep.subr.bf16.mxu1 %v18993_v7  ;;  %v19081_v7 = vld [vmem:[#allocation11 + $0x130] ss:$8 sps:$4 sm:$0xff]  }
 0x95a   : > { %v15073_v53 = vpop.f32.mrb[0].mxu1 }
 0x95b   : > { %v15075_v30 = vpop.f32.mrb[1].mxu1  ;;  %v15074_v6 = vadd.f32 %v15073_v53, %v13742_v3  ;;  %v19084_v53 = vld [vmem:[#allocation11 + $0x140] ss:$8 sps:$4 sm:$0xff]   ;;  %v13754_v3 = vrot.slane %v21866_v36, %v13371_v4 }
 0x95c   : > { %v15077_v9 = vpop.f32.mrb[2].mxu1  ;;  %15337 = vmatpush1.bf16.msra.mxu1 %v18991_v46  ;;  %v15076_v44 = vadd.f32 %v15075_v30, %v13746_v51  ;;  %v19086_v46 = vld [vmem:[#allocation11 + $0x144] ss:$8 sps:$4 sm:$0xff]   ;;  %v19134_v4 = vld [vmem:[%s21971_s7 + $0x78] sm:$0xff]  }
 0x95d   : > { %v15078_v35 = vpop.f32.mrb[3].mxu1  ;;  %15338 = vmatprep.subr.bf16.mxu1 %v18996_v8  ;;  %v19127_v8 = vld [vmem:[%s21971_s7 + $0x18] sm:$0xff]   ;;  %v19129_v30 = vld [vmem:[%s21971_s7 + $0x20] sm:$0xff]   ;;  %v19130_v9 = vld [vmem:[%s21971_s7 + $0x68] sm:$0xff]  }
 0x95e   : > { %v19092_v35 = vld [vmem:[#allocation11 + $0x164] ss:$8 sps:$4 sm:$0xff]  }
 0x960   : > { %15339 = vmatpush1.bf16.msra.mxu1 %v18994_v18  ;;  %v19087_v18 = vld [vmem:[#allocation11 + $0x150] ss:$8 sps:$4 sm:$0xff]  }
 0x961   : > { %15340 = vmatprep.subr.bf16.mxu1 %v18999_v16  ;;  %v19131_v16 = vld [vmem:[%s21971_s7 + $0x28] sm:$0xff]  }
 0x964   : > { %15341 = vmatpush1.bf16.msra.mxu1 %v18997_v43  ;;  %v19093_v43 = vld [vmem:[#allocation11 + $0x170] ss:$8 sps:$4 sm:$0xff]  }
 0x965   : > { %15342 = vmatprep.subr.bf16.mxu1 %v19002_v21  ;;  %v19098_v21 = vld [vmem:[#allocation11 + $0x184] ss:$8 sps:$4 sm:$0xff]  }
 0x968   : > { %15343 = vmatpush1.bf16.msra.mxu1 %v19000_v22  ;;  %v19101_v22 = vld [vmem:[#allocation11 + $0x194] ss:$8 sps:$4 sm:$0xff]  }
 0x969   : > { %15344 = vmatprep.subr.bf16.mxu1 %v19005_v25  ;;  %v19099_v25 = vld [vmem:[#allocation11 + $0x190] ss:$8 sps:$4 sm:$0xff]  }
 0x96c   : > { %15345 = vmatpush1.bf16.msra.mxu1 %v19003_v40  ;;  %v19104_v40 = vld [vmem:[#allocation11 + $0x1a4] ss:$8 sps:$4 sm:$0xff]  }
 0x96d   : > { %15346 = vmatprep.subr.bf16.mxu1 %v19008_v28  ;;  %v19102_v28 = vld [vmem:[#allocation11 + $0x1a0] ss:$8 sps:$4 sm:$0xff]  }
 0x970   : > { %15347 = vmatpush1.bf16.msra.mxu1 %v19006_v14  ;;  %v19107_v14 = vld [vmem:[#allocation11 + $0x1b4] ss:$8 sps:$4 sm:$0xff]  }
 0x971   : > { %15348 = vmatprep.subr.bf16.mxu1 %v19011_v37  ;;  %v19105_v37 = vld [vmem:[#allocation11 + $0x1b0] ss:$8 sps:$4 sm:$0xff]  }
 0x974   : > { %15349 = vmatpush1.bf16.msra.mxu1 %v19009_v63  ;;  %v19110_v63 = vld [vmem:[#allocation11 + $0x1c4] ss:$8 sps:$4 sm:$0xff]  }
 0x975   : > { %15350 = vmatprep.subr.bf16.mxu1 %v19014_v38  ;;  %v19108_v38 = vld [vmem:[#allocation11 + $0x1c0] ss:$8 sps:$4 sm:$0xff]  }
 0x978   : > { %15351 = vmatpush1.bf16.msra.mxu1 %v19012_v29  ;;  %v19113_v29 = vld [vmem:[#allocation11 + $0x1d4] ss:$8 sps:$4 sm:$0xff]  }
 0x979   : > { %15352 = vmatprep.subr.bf16.mxu1 %v19017_v10  ;;  %v19111_v10 = vld [vmem:[#allocation11 + $0x1d0] ss:$8 sps:$4 sm:$0xff]  }
 0x97c   : > { %15353 = vmatpush1.bf16.msra.mxu1 %v19015_v61  ;;  %v19116_v61 = vld [vmem:[#allocation11 + $0x1e4] ss:$8 sps:$4 sm:$0xff]  }
 0x97d   : > { %15354 = vmatprep.subr.bf16.mxu1 %v19020_v56  ;;  %v19114_v56 = vld [vmem:[#allocation11 + $0x1e0] ss:$8 sps:$4 sm:$0xff]  }
 0x980   : > { %15355 = vmatpush1.bf16.msra.mxu1 %v19018_v52  ;;  %v19119_v52 = vld [vmem:[#allocation11 + $0x1f4] ss:$8 sps:$4 sm:$0xff]  }
 0x981   : > { %15356 = vmatprep.subr.bf16.mxu1 %v19023_v27  ;;  %v19117_v27 = vld [vmem:[#allocation11 + $0x1f0] ss:$8 sps:$4 sm:$0xff]  }
 0x984   : > { %15357 = vmatpush1.bf16.msra.mxu1 %v19021_v50  ;;  %v13750_v50 = vrot.slane %v21866_v36, %v13367_v42  ;;  %v19132_v42 = vld [vmem:[%s21971_s7 + $0x70] sm:$0xff]   ;;  %v19135_v36 = vld [vmem:[%s21971_s7 + $0x38] sm:$0xff]  }
 0x985   : > { %18253 = vmatprep.subr.bf16.mxu1 %v19120_v58 }
 0x987   : > { %15359 = vmatmul.mubr.bf16.vlgmr.msra.gmra.mrb[4].mxu1 %v21858_v0  ;;  %v19072_v0 = vld [vmem:[#allocation11 + $0x100] ss:$8 sps:$4 sm:$0xff]  }
 0x988   : > { %18254 = vmatpush3.bf16.msra.mxu1 %v19121_v12 }
 0x989   : > { %18255 = vmatprep.subr.bf16.mxu1 %v19122_v41 }
 0x98c   : > { %18256 = vmatpush3.bf16.msra.mxu1 %v19123_v20 }
 0x98d   : > { %18257 = vmatprep.subr.bf16.mxu1 %v19124_v31 }
 0x990   : > { %18258 = vmatpush3.bf16.msra.mxu1 %v19125_v59  ;;  %v18229_v59 = vld [vmem:[#allocation14] ss:$0 sm:$0xff] }
 0x991   : > { %18259 = vmatprep.subr.bf16.mxu1 %v19126_v5 }
 0x994   : > { %18260 = vmatpush3.bf16.msra.mxu1 %v19127_v8 }
 0x995   : > { %18261 = vmatprep.subr.bf16.mxu1 %v19128_v57 }
 0x998   : > { %18262 = vmatpush3.bf16.msra.mxu1 %v19129_v30 }
 0x999   : > { %18263 = vmatprep.subr.bf16.mxu1 %v19130_v9 }
 0x99c   : > { %18264 = vmatpush3.bf16.msra.mxu1 %v19131_v16 }
 0x99d   : > { %18265 = vmatprep.subr.bf16.mxu1 %v19132_v42 }
 0x9a0   : > { %18266 = vmatpush3.bf16.msra.mxu1 %v19133_v45 }
 0x9a1   : > { %18267 = vmatprep.subr.bf16.mxu1 %v19134_v4 }
 0x9a4   : > { %18268 = vmatpush3.bf16.msra.mxu1 %v19135_v36 }
 0x9db   : > { %v15196_v19 = vpop.f32.mrb[0].mxu0 }
 0x9dc   : > { %v18484_v54 = vadd.f32 %v15196_v19, %v15074_v6  ;;  %v15198_v47 = vpop.f32.mrb[1].mxu0 }
 0x9dd   : > { %v18486_v48 = vadd.f32 %v15198_v47, %v15076_v44  ;;  %v15200_v34 = vpop.f32.mrb[2].mxu0 }
 0x9de   : > { %v15367_v55 = vmax.f32 %v18484_v54, 0.0  ;;  %v15201_v39 = vpop.f32.mrb[3].mxu0 }
 0x9df   : > { %v15368_v11 = vmax.f32 %v18486_v48, 0.0 }
 0x9e0   : > { %v15371_v13 = vpack.c.bf16 %v15367_v55, %v15367_v55 }
 0x9e1   : > { %v15372_v24 = vpack.c.bf16 %v15368_v11, %v15368_v11  ;;  %v15439_v11 = vld [vmem:[#allocation12] sm:$0x3] }
 0x9e3   : > { %15803 = vmatprep.mubr.bf16.mxu0 %v15372_v24  ;;  %v15444_v24 = vrot.slane %v15439_v11, %v21786_v33 }
 0x9e4   : > { %15804 = vmatmul.mubr.bf16.vlgmr.msra.gmra.mrb[4].mxu0 %v15371_v13 }
 0x9e5   : > { %15813 = vmatpush1.bf16.msra.mxu0 %v19072_v0  ;;  %v15448_v0 = vrot.slane %v15439_v11, %v21789_v49 }
 0x9e6   : > { %15814 = vmatprep.subr.bf16.mxu0 %v19077_v17 }
 0x9e9   : > { %15815 = vmatpush1.bf16.msra.mxu0 %v19075_v23 }
 0x9ea   : > { %15816 = vmatprep.subr.bf16.mxu0 %v19080_v62 }
 0x9ed   : > { %15817 = vmatpush1.bf16.msra.mxu0 %v19078_v26 }
 0x9ee   : > { %15818 = vmatprep.subr.bf16.mxu0 %v19083_v2 }
 0x9f1   : > { %15819 = vmatpush1.bf16.msra.mxu0 %v19081_v7 }
 0x9f2   : > { %15820 = vmatprep.subr.bf16.mxu0 %v19086_v46 }
 0x9f5   : > { %15821 = vmatpush1.bf16.msra.mxu0 %v19084_v53 }
 0x9f6   : > { %15822 = vmatprep.subr.bf16.mxu0 %v19089_v1 }
 0x9f9   : > { %15823 = vmatpush1.bf16.msra.mxu0 %v19087_v18 }
 0x9fa   : > { %15824 = vmatprep.subr.bf16.mxu0 %v19092_v35 }
 0x9fd   : > { %15825 = vmatpush1.bf16.msra.mxu0 %v19090_v15 }
 0x9fe   : > { %15826 = vmatprep.subr.bf16.mxu0 %v19095_v60 }
 0xa01   : > { %15827 = vmatpush1.bf16.msra.mxu0 %v19093_v43 }
 0xa02   : > { %15828 = vmatprep.subr.bf16.mxu0 %v19098_v21 }
 0xa05   : > { %15829 = vmatpush1.bf16.msra.mxu0 %v19096_v32 }
 0xa06   : > { %15830 = vmatprep.subr.bf16.mxu0 %v19101_v22 }
 0xa09   : > { %15831 = vmatpush1.bf16.msra.mxu0 %v19099_v25 }
 0xa0a   : > { %15832 = vmatprep.subr.bf16.mxu0 %v19104_v40 }
 0xa0d   : > { %15833 = vmatpush1.bf16.msra.mxu0 %v19102_v28 }
 0xa0e   : > { %15834 = vmatprep.subr.bf16.mxu0 %v19107_v14 }
 0xa11   : > { %15835 = vmatpush1.bf16.msra.mxu0 %v19105_v37 }
 0xa12   : > { %15836 = vmatprep.subr.bf16.mxu0 %v19110_v63 }
 0xa15   : > { %15837 = vmatpush1.bf16.msra.mxu0 %v19108_v38 }
 0xa16   : > { %15838 = vmatprep.subr.bf16.mxu0 %v19113_v29 }
 0xa19   : > { %15839 = vmatpush1.bf16.msra.mxu0 %v19111_v10 }
 0xa1a   : > { %15840 = vmatprep.subr.bf16.mxu0 %v19116_v61 }
 0xa1d   : > { %15841 = vmatpush1.bf16.msra.mxu0 %v19114_v56 }
 0xa1e   : > { %15842 = vmatprep.subr.bf16.mxu0 %v19119_v52 }
 0xa21   : > { %15843 = vmatpush1.bf16.msra.mxu0 %v19117_v27 }
 0xa5a   : > { %v15360_v51 = vpop.f32.mrb[4].mxu1 }
 0xa5b   : > { %v18487_v6 = vadd.f32 %v15360_v51, %v13750_v50  ;;  %v15362_v44 = vpop.f32.mrb[5].mxu1 }
 0xa5c   : > { %v18488_v19 = vadd.f32 %v15362_v44, %v13754_v3  ;;  %v15364_v54 = vpop.f32.mrb[6].mxu1 }
 0xa5d   : > { %v15369_v47 = vmax.f32 %v18487_v6, 0.0  ;;  %v15365_v48 = vpop.f32.mrb[7].mxu1 }
 0xa5e   : > { %v15370_v34 = vmax.f32 %v18488_v19, 0.0 }
 0xa5f   : > { %v15373_v39 = vpack.c.bf16 %v15369_v47, %v15369_v47 }
 0xa60   : > { %v15374_v55 = vpack.c.bf16 %v15370_v34, %v15370_v34 }
 0xa62   : > { %15844 = vmatprep.mubr.bf16.mxu0 %v15374_v55 }
 0xa63   : > { %15845 = vmatmul.mubr.bf16.vlgmr.msra.gmra.mrb[4].mxu0 %v15373_v39 }
 0xb36   : > { %v15846_v13 = vpop.f32.mrb[4].mxu0 }
 0xb37   : > { %v18489_v17 = vadd.f32 %v15846_v13, %v15444_v24  ;;  %v15848_v58 = vpop.f32.mrb[5].mxu0 }
 0xb38   : > { %v18490_v12 = vadd.f32 %v15848_v58, %v15448_v0  ;;  %v15850_v41 = vpop.f32.mrb[6].mxu0 }
 0xb39   : > { %v15853_v23 = vmax.f32 %v18489_v17, 0.0  ;;  %v15851_v62 = vpop.f32.mrb[7].mxu0 }
 0xb3a   : > { %v15854_v20 = vmax.f32 %v18490_v12, 0.0 }
 0xb3b   : > { %v15855_v26 = vpack.c.bf16 %v15853_v23, %v15853_v23 }
 0xb3c   : > { %v15856_v31 = vpack.c.bf16 %v15854_v20, %v15854_v20 }
 0xb3e   : > { %16024 = vmatprep.mubr.bf16.mxu1 %v15856_v31 }
 0xb3f   : > { %16025 = vmatmul.mubr.bf16.vlgmr.msra.gmra.mrb[8].mxu1 %v15855_v26 }
 0xc12   : > { %v18269_v2 = vpop.f32.mrb[8].mxu1 }
 0xc13   : > { %v18270_v5 = vpop.f32.mrb[9].mxu1 }
 0xc14   : > { %v18271_v7 = vadd.f32 %v18270_v5, %v18269_v2  ;;  %v18272_v46 = vpop.f32.mrb[10].mxu1 }
 0xc15   : > { %v18273_v33 = vpop.f32.mrb[11].mxu1 }
 0xc16   : > { %v16027_v49 = vadd.f32 %v18271_v7, %v18229_v59 }
 0xc18   : > { %16033 = vst.msk [vmem:[#allocation15] sm:$0x3] %vm16032_vm0, %v16027_v49 }
 0xc19 PF: > { %p18583_p3 = scmp.eq.s32.totalorder %s19500_s15, 7  ;;  %s19428_s30 = smov [#allocation15]  }
 0xc1a   : > { %s16041_s25 = sshll.u32 %s19428_s30, 4  ;;  %s16042_s25 = int_to_ptr.vmem [resolvable:$true] %s16041_s25 }
 0xc1b   : > { %s19334_s12 = scalar_lea.vmem %s16042_s25, 32  ;;  %p19341_p10 = scmp.lt.s32.totalorder %s16042_s25, %s16042_s25 }
 0xc1c   : > { %p19335_p12 = scmp.ne.s32.totalorder %s16042_s25, %s19334_s12  ;;  %p19342_p11 = scmp.lt.s32.totalorder %s19334_s12, %s19334_s12 }
 0xc1e   : > { %p19336_p8 = pnand %p19335_p12, %p18583_p3  ;;  %p19343_p6 = por %p19342_p11, %p19341_p10 }
 0xc20   : > { %p19337_p1 = pneg %p19336_p8 }
 0xc22   : > { %p19344_p4 = pnand %p19343_p6, %p19337_p1 }
 0xc24   : > { %19347 = shalt.err (!%p19344_p4)
}
 0xc25   : > { %s19348_s28 = scalar_lea.hbm %s21973_s9, 32 }
 0xc26   : > { %p19349_p13 = scmp.ne.s32.totalorder %s21973_s9, %s19348_s28  ;;  %p19354_p7 = scmp.lt.u32.totalorder %s19348_s28, %s21973_s9 }
 0xc28   : > { %p19350_p0 = pnand %p19349_p13, %p18583_p3 }
 0xc2a   : > { %p19351_p2 = pneg %p19350_p0 }
 0xc2c   : > { %p19356_p5 = pnand %p19354_p7, %p19351_p2 }
 0xc2e   : > { %19359 = shalt.err (!%p19356_p5)
}
 0xc2f   : > { %18544 = dma.vmem_to_hbm [thread:$0]  (%p18583_p3), %s16042_s25, 32, %s21973_s9, [#allocation5]  }
 0xc30   : > { %19393 = dma.done.wait (%p18583_p3), [#allocation5], 32  }
 0xc31   : > { %19395 = vsyncadd (%p18583_p3), [#allocation5], 4294967264 }
 0xc32 PF: > { %p23_p9 = scmp.ge.s32.totalorder %s19657_s29, 10   ;;  %s21992_s30 = smov %s19402_s10 }
 0xc33   : > { %s21993_s10 = smov %s19406_s11  ;;  %s21994_s11 = smov %s19669_s22 }
 0xc34   : > { %s21995_s12 = smov %s19657_s29  ;;  %25 = sbr.rel (!%p23_p9) target bundleno = 9 (0x9), region = 128 }
 0xc3b   :  { %16054 = vsyncpa [#allocation4], 1 }
 0xc3c   :  { %16056 = vsyncpa [#allocation4 + $0x1], 1 }
 0xc3d   :  { %16057 = vsyncpa [#allocation7], 1 }
 0xc3e   :  { %16058 = vsyncpa [#allocation10], 1 }
 0xc3f   :  { %16059 = vsyncpa [#allocation13], 1 }
 0xc40   :  { %16060 = vsyncpa [#allocation5], 1 }
 0xc41   :  { %16062 = vsyncpa [#allocation5 + $0x1], 1 }

</bundles_post_ra>
